<compile_context>
chip_gen: v6e
topology: v6e:2x2x1
jax: 0.10.0
libtpu: 0.0.40
codegen_flags: <defaults>
</compile_context>

<pallas_src>
import math

import jax
import jax.numpy as jnp
from jax.experimental import pallas as pl
from jax.experimental.pallas import tpu as pltpu

_EPS = 1e-5                                   # torch GroupNorm default eps
_SQRT_2_OVER_PI = math.sqrt(2.0 / math.pi)
# Full f32 MXU precision for the fused 1x1 residual projection; identity skips
# bypass the MXU entirely (see kernel 2 epilogue).
_RES_PRECISION = jax.lax.Precision.HIGHEST


def _vmem_limit_bytes():
    # 128 MiB parts (v5e/v6e) get a large scoped-VMEM budget so bigger blocks /
    # strips fit; v7x only has 64 MiB per core so keep headroom there.
    try:
        kind = jax.devices()[0].device_kind.lower()
    except Exception:
        kind = ""
    if "v7" in kind or "7x" in kind:
        return 48 * 1024 * 1024
    return 96 * 1024 * 1024


# ----------------------------------------------------------------------------
# in-kernel math helpers
# ----------------------------------------------------------------------------
def _gelu(x):
    # tanh-approximation GELU (EUP tanh); differs from torch.nn.GELU() (exact
    # erf) by < ~1e-3 per element.
    return 0.5 * x * (1.0 + jnp.tanh(_SQRT_2_OVER_PI * (x + 0.044715 * (x * x * x))))


def _group_norm1(x, gamma, beta):
    # GroupNorm(num_groups=1): single-pass moments over the whole (C, H*W) slab
    # (f32 accumulation), per-channel affine broadcast over lanes.
    m = jnp.mean(x)
    v = jnp.maximum(jnp.mean(x * x) - m * m, 0.0)
    return (x - m) * jax.lax.rsqrt(v + _EPS) * gamma + beta


def _tap_masks(rowcol, H, W, r):
    """(2r+1)^2 hoisted validity masks, one (1, H*W) bool per tap.

    rowcol: (2, H*W) int32 with row indices in row 0 and column indices in row 1
    (precomputed host-side to avoid in-kernel vector integer div/rem).
    Tap order is t = (dy+r)*(2r+1) + (dx+r), matching the weight layouts.
    """
    row = rowcol[0:1, :]
    col = rowcol[1:2, :]
    vh = [jnp.logical_and(row + dy >= 0, row + dy < H) for dy in range(-r, r + 1)]
    vw = [jnp.logical_and(col + dx >= 0, col + dx < W) for dx in range(-r, r + 1)]
    return [jnp.logical_and(vh[dy + r], vw[dx + r])
            for dy in range(-r, r + 1) for dx in range(-r, r + 1)]


# ----------------------------------------------------------------------------
# kernel 1: fused depthwise 7x7 conv (both streams) + conditioning add
# ----------------------------------------------------------------------------
def _make_dw_kernel(H, W, C, has_cond):
    N = H * W
    R = 3

    def dw_conv(x, w_ref, b, masks):
        # x: (C, N) f32; w_ref: (49, C, 1) ref; b: (C, 1).  Returns (C, N) f32.
        acc = jnp.zeros((C, N), jnp.float32)
        t = 0
        for dy in range(-R, R + 1):
            for dx in range(-R, R + 1):
                off = dy * W + dx
                if dy == 0 and dx == 0:
                    xt = x
                else:
                    sh = (-off) % N
                    xt = x if sh == 0 else pltpu.roll(x, shift=sh, axis=1)
                    xt = jnp.where(masks[t], xt, 0.0)
                acc = acc + xt * w_ref[t]
                t += 1
        return acc + b

    def kernel(*refs):
        if has_cond:
            (x_ref, l_ref, rc_ref, dsw_ref, dsb_ref, ldsw_ref, ldsb_ref,
             cond_ref, o_ref) = refs
        else:
            (x_ref, l_ref, rc_ref, dsw_ref, dsb_ref, ldsw_ref, ldsb_ref,
             o_ref) = refs

        masks = _tap_masks(rc_ref[...], H, W, R)   # hoisted, shared by both streams

        lat = dw_conv(l_ref[0], ldsw_ref, ldsb_ref[...], masks)
        h = dw_conv(x_ref[0], dsw_ref, dsb_ref[...], masks)
        if has_cond:
            # Matches PyTorch: `h + latent_h + cond` only when the time-MLP exists
            # AND time_emb was passed.
            h = h + lat + cond_ref[0]

        o_ref[0, 0] = h.astype(o_ref.dtype)      # stream 0: h
        o_ref[1, 0] = lat.astype(o_ref.dtype)    # stream 1: latent_h
    return kernel


def fused_dwconv_cond(x, latents, rowcol, ds_w, ds_b, lds_w, lds_b, cond, *, H, W):
    """x, latents: (B, C, H*W) f32 -> (2, B, C, H*W) bf16 (stream-major)."""
    B, C, N = x.shape
    has_cond = cond is not None
    kernel = _make_dw_kernel(H, W, C, has_cond)

    in_specs = [
        pl.BlockSpec((1, C, N), lambda b: (b, 0, 0)),
        pl.BlockSpec((1, C, N), lambda b: (b, 0, 0)),
        pl.BlockSpec((2, N), lambda b: (0, 0)),
        pl.BlockSpec((49, C, 1), lambda b: (0, 0, 0)),
        pl.BlockSpec((C, 1), lambda b: (0, 0)),
        pl.BlockSpec((49, C, 1), lambda b: (0, 0, 0)),
        pl.BlockSpec((C, 1), lambda b: (0, 0)),
    ]
    args = [x, latents, rowcol, ds_w, ds_b, lds_w, lds_b]
    if has_cond:
        in_specs.append(pl.BlockSpec((1, C, 1), lambda b: (b, 0, 0)))
        args.append(cond)

    return pl.pallas_call(
        kernel,
        out_shape=jax.ShapeDtypeStruct((2, B, C, N), jnp.bfloat16),
        grid=(B,),
        in_specs=in_specs,
        out_specs=pl.BlockSpec((2, 1, C, N), lambda b: (0, b, 0, 0)),
        compiler_params=pltpu.CompilerParams(
            dimension_semantics=("parallel",),
            vmem_limit_bytes=_vmem_limit_bytes()),
    )(*args)


# ----------------------------------------------------------------------------
# kernel 2: fused "net" (GN -> 3x3 -> GELU -> GN -> 3x3) + fused residual
# ----------------------------------------------------------------------------
def _make_net_kernel(H, W, Cin, Chid, Cout, apply_norm, proj_res):
    N = H * W

    def conv3x3(x, w_ref, b, cout, masks):
        # 3x3 conv, padding=1, as 9 accumulated (cout,cin)@(cin,N) MXU matmuls.
        # x: (cin, N) f32; w_ref block: (1, 9, cout, cin) bf16; b: (cout, 1) f32.
        acc = jnp.zeros((cout, N), jnp.float32)
        t = 0
        for dy in (-1, 0, 1):
            for dx in (-1, 0, 1):
                off = dy * W + dx
                if dy == 0 and dx == 0:
                    xt = x
                else:
                    sh = (-off) % N
                    xt = x if sh == 0 else pltpu.roll(x, shift=sh, axis=1)
                    xt = jnp.where(masks[t], xt, 0.0)
                acc = acc + jnp.dot(w_ref[0, t], xt.astype(jnp.bfloat16),
                                    preferred_element_type=jnp.float32)
                t += 1
        return acc + b

    def kernel(*refs):
        if proj_res:
            (hl_ref, x_ref, rc_ref, g1_ref, bg1_ref, w1_ref, b1_ref,
             g2_ref, bg2_ref, w2_ref, b2_ref, rw_ref, rb_ref, o_ref) = refs
        else:
            (hl_ref, x_ref, rc_ref, g1_ref, bg1_ref, w1_ref, b1_ref,
             g2_ref, bg2_ref, w2_ref, b2_ref, o_ref) = refs

        masks3 = _tap_masks(rc_ref[...], H, W, 1)    # hoisted, shared by both convs

        hin = hl_ref[0, 0].astype(jnp.float32)                 # (Cin, N)
        if apply_norm:
            hin = _group_norm1(hin, g1_ref[0], bg1_ref[0])

        a = conv3x3(hin, w1_ref, b1_ref[0], Chid, masks3)      # (Chid, N)
        a = _group_norm1(_gelu(a), g2_ref[0], bg2_ref[0])
        out = conv3x3(a, w2_ref, b2_ref[0], Cout, masks3)      # (Cout, N)
        o_ref[0, 0] = out

        # Fused residual: h stream only (the latent stream's all-zeros residual
        # matmul of the previous version is dead work and skipped entirely).
        @pl.when(pl.program_id(0) == 0)
        def _():
            xres = x_ref[0]                                    # (Cin, N) f32
            if proj_res:
                res = jnp.dot(rw_ref[...], xres,
                              preferred_element_type=jnp.float32,
                              precision=_RES_PRECISION) + rb_ref[...]
            else:
                res = xres                                     # exact identity skip
            o_ref[0, 0] = o_ref[0, 0] + res
    return kernel


def fused_net_res(hl, x, rowcol, p, *, H, W, norm, proj_res):
    """hl: (2, B, Cin, H*W) bf16 (stream-major); x: (B, Cin, H*W) f32 residual.
    Returns (2, B, Cout, H*W) f32: stream 0 = net(h)+res(x), stream 1 = latent."""
    _, B, Cin, N = hl.shape
    Chid = p["b1"].shape[1]
    Cout = p["b2"].shape[1]
    kernel = _make_net_kernel(H, W, Cin, Chid, Cout, norm, proj_res)

    in_specs = [
        pl.BlockSpec((1, 1, Cin, N), lambda s, b: (s, b, 0, 0)),
        # residual x: only read by the h stream; collapse to block 0 for the
        # latent stream so the already-fetched block is reused, not re-DMA'd.
        pl.BlockSpec((1, Cin, N), lambda s, b: (b * (1 - s), 0, 0)),
        pl.BlockSpec((2, N), lambda s, b: (0, 0)),
        pl.BlockSpec((1, Cin, 1), lambda s, b: (s, 0, 0)),
        pl.BlockSpec((1, Cin, 1), lambda s, b: (s, 0, 0)),
        pl.BlockSpec((1, 9, Chid, Cin), lambda s, b: (s, 0, 0, 0)),
        pl.BlockSpec((1, Chid, 1), lambda s, b: (s, 0, 0)),
        pl.BlockSpec((1, Chid, 1), lambda s, b: (s, 0, 0)),
        pl.BlockSpec((1, Chid, 1), lambda s, b: (s, 0, 0)),
        pl.BlockSpec((1, 9, Cout, Chid), lambda s, b: (s, 0, 0, 0)),
        pl.BlockSpec((1, Cout, 1), lambda s, b: (s, 0, 0)),
    ]
    args = [hl, x, rowcol, p["g1"], p["bg1"], p["w1"], p["b1"],
            p["g2"], p["bg2"], p["w2"], p["b2"]]
    if proj_res:
        in_specs += [pl.BlockSpec((Cout, Cin), lambda s, b: (0, 0)),
                     pl.BlockSpec((Cout, 1), lambda s, b: (0, 0))]
        args += [p["rw"], p["rb"]]

    return pl.pallas_call(
        kernel,
        out_shape=jax.ShapeDtypeStruct((2, B, Cout, N), jnp.float32),
        grid=(2, B),            # stream outer -> per-stream weights stay resident
        in_specs=in_specs,
        out_specs=pl.BlockSpec((1, 1, Cout, N), lambda s, b: (s, b, 0, 0)),
        compiler_params=pltpu.CompilerParams(
            dimension_semantics=("parallel", "parallel"),
            vmem_limit_bytes=_vmem_limit_bytes()),
    )(*args)


# ----------------------------------------------------------------------------
# module wrapper (deterministic synthetic parameters)
# ----------------------------------------------------------------------------
class LatentConvNextBlockPallas:
    def __init__(self, key, dim, dim_out, *, time_emb_dim=None, mult=2, norm=True):
        self.dim, self.dim_out, self.norm = dim, dim_out, norm
        self.proj_res = dim != dim_out
        hid = dim_out * mult
        ks = iter(jax.random.split(key, 32))

        def nrm(shape, scale=0.1):
            return scale * jax.random.normal(next(ks), shape, jnp.float32)

        self.has_mlp = time_emb_dim is not None
        if self.has_mlp:
            self.mlp_w = nrm((time_emb_dim, dim))   # Linear weight, transposed
            self.mlp_b = nrm((1, dim))

        # depthwise 7x7 weights, channel-major: (49, C, 1) with tap t = ky*7+kx.
        self.ds_w, self.ds_b = nrm((49, dim, 1)), nrm((dim, 1))
        self.lds_w, self.lds_b = nrm((49, dim, 1)), nrm((dim, 1))

        # net / latent_net stacked along a stream axis (0 = net, 1 = latent_net).
        # 3x3 weights are stored per-tap transposed, (stream, tap, Cout, Cin), in
        # bf16 for the MXU (f32 accumulation happens inside the kernel).
        def conv_w(cin, cout):
            return nrm((9, cout, cin))

        self.net_params = dict(
            g1=jnp.ones((2, dim, 1), jnp.float32),
            bg1=jnp.zeros((2, dim, 1), jnp.float32),
            w1=jnp.stack([conv_w(dim, hid), conv_w(dim, hid)], 0).astype(jnp.bfloat16),
            b1=jnp.stack([nrm((hid, 1)), nrm((hid, 1))], 0),
            g2=jnp.ones((2, hid, 1), jnp.float32),
            bg2=jnp.zeros((2, hid, 1), jnp.float32),
            w2=jnp.stack([conv_w(hid, dim_out), conv_w(hid, dim_out)], 0).astype(jnp.bfloat16),
            b2=jnp.stack([nrm((dim_out, 1)), nrm((dim_out, 1))], 0),
        )
        if self.proj_res:
            # 1x1 projection for the skip path (f32, full-precision MXU matmul);
            # when dim == dim_out the kernel adds x directly (exact identity).
            self.net_params["rw"] = nrm((dim_out, dim))
            self.net_params["rb"] = nrm((dim_out, 1))

    def __call__(self, x, latents, time_emb=None):
        # x, latents: NCHW.  Channel-major kernels only need free reshapes here.
        B, C, H, W = x.shape
        N = H * W
        x_cm = x.reshape(B, C, N).astype(jnp.float32)
        l_cm = latents.reshape(B, C, N).astype(jnp.float32)

        ii = jnp.arange(N, dtype=jnp.int32)
        rowcol = jnp.stack([ii // W, ii % W], axis=0)          # (2, N), host-side

        cond = None
        if self.has_mlp and time_emb is not None:
            # Same gating as PyTorch.  Tiny (B,T)@(T,C) matmul stays in XLA with
            # the exact erf GELU of torch.nn.GELU().
            cond = (jax.nn.gelu(time_emb.astype(jnp.float32), approximate=False)
                    @ self.mlp_w + self.mlp_b).reshape(B, self.dim, 1)

        # kernel 1: both depthwise convs + conditioning add (bf16 intermediate)
        hl = fused_dwconv_cond(x_cm, l_cm, rowcol, self.ds_w, self.ds_b,
                               self.lds_w, self.lds_b, cond, H=H, W=W)

        # kernel 2: both ConvNeXt nets + fused residual
        outs = fused_net_res(hl, x_cm, rowcol, self.net_params, H=H, W=W,
                             norm=self.norm, proj_res=self.proj_res)

        out = outs[0].reshape(B, self.dim_out, H, W)           # contiguous views
        latent_out = outs[1].reshape(B, self.dim_out, H, W)
        return out, latent_out


# ----------------------------------------------------------------------------
if __name__ == "__main__":
    B, dim, dim_out, H, W = 2, 4, 8, 16, 16
    time_emb_dim = 8

    root = jax.random.PRNGKey(0)
    kparam, kx, kl, kt = jax.random.split(root, 4)

    block = LatentConvNextBlockPallas(kparam, dim, dim_out,
                                      time_emb_dim=time_emb_dim, mult=2, norm=True)

    x = jax.random.normal(kx, (B, dim, H, W), jnp.float32)        # NCHW
    latents = jax.random.normal(kl, (B, dim, H, W), jnp.float32)  # NCHW
    time_emb = jax.random.normal(kt, (B, time_emb_dim), jnp.float32)

    out, latent_out = block(x, latents, time_emb)
    jax.block_until_ready((out, latent_out))

    assert out.shape == (B, dim_out, H, W)
    assert latent_out.shape == (B, dim_out, H, W)
    assert bool(jnp.all(jnp.isfinite(out))) and bool(jnp.all(jnp.isfinite(latent_out)))
    print("KERNEL_OK")
</pallas_src>

<mosaic_0001>
module attributes {stable_mosaic.version = 11 : i64} {
  func.func @kernel(%arg0: i32, %arg1: memref<1x4x256xf32, #tpu.memory_space<vmem>>, %arg2: memref<1x4x256xf32, #tpu.memory_space<vmem>>, %arg3: memref<2x256xi32, #tpu.memory_space<vmem>>, %arg4: memref<49x4x1xf32, #tpu.memory_space<vmem>>, %arg5: memref<4x1xf32, #tpu.memory_space<vmem>>, %arg6: memref<49x4x1xf32, #tpu.memory_space<vmem>>, %arg7: memref<4x1xf32, #tpu.memory_space<vmem>>, %arg8: memref<1x4x1xf32, #tpu.memory_space<vmem>>, %arg9: memref<2x1x4x256xbf16, #tpu.memory_space<vmem>>) attributes {dimension_semantics = [#tpu.dimension_semantics<parallel>], iteration_bounds = array<i64: 2>, scalar_prefetch = 0 : i64, scratch_operands = 0 : i64, tpu.core_type = #tpu.core_type<tc>, window_params = [{transform_indices = @transform_0, window_bounds = array<i64: 1, 4, 256>}, {transform_indices = @transform_1, window_bounds = array<i64: 1, 4, 256>}, {pipeline_mode = #tpu.pipeline_mode<synchronous>, transform_indices = @transform_2, window_bounds = array<i64: 2, 256>}, {pipeline_mode = #tpu.pipeline_mode<synchronous>, transform_indices = @transform_3, window_bounds = array<i64: 49, 4, 1>}, {pipeline_mode = #tpu.pipeline_mode<synchronous>, transform_indices = @transform_4, window_bounds = array<i64: 4, 1>}, {pipeline_mode = #tpu.pipeline_mode<synchronous>, transform_indices = @transform_5, window_bounds = array<i64: 49, 4, 1>}, {pipeline_mode = #tpu.pipeline_mode<synchronous>, transform_indices = @transform_6, window_bounds = array<i64: 4, 1>}, {transform_indices = @transform_7, window_bounds = array<i64: 1, 4, 1>}, {transform_indices = @transform_8, window_bounds = array<i64: 2, 1, 4, 256>}]} {
    %c0 = arith.constant 0 : index
    %c0_0 = arith.constant 0 : index
    %0 = vector.load %arg3[%c0, %c0_0] : memref<2x256xi32, #tpu.memory_space<vmem>>, vector<2x256xi32>
    %1 = vector.extract_strided_slice %0 {offsets = [0, 0], sizes = [1, 256], strides = [1, 1]} : vector<2x256xi32> to vector<1x256xi32>
    %2 = vector.extract_strided_slice %0 {offsets = [1, 0], sizes = [1, 256], strides = [1, 1]} : vector<2x256xi32> to vector<1x256xi32>
    %c-3_i32 = arith.constant -3 : i32
    %3 = vector.broadcast %c-3_i32 : i32 to vector<1x256xi32>
    %4 = arith.addi %1, %3 : vector<1x256xi32>
    %c0_i32 = arith.constant 0 : i32
    %5 = vector.broadcast %c0_i32 : i32 to vector<1x256xi32>
    %6 = arith.cmpi sge, %4, %5 : vector<1x256xi32>
    %c-3_i32_1 = arith.constant -3 : i32
    %7 = vector.broadcast %c-3_i32_1 : i32 to vector<1x256xi32>
    %8 = arith.addi %1, %7 : vector<1x256xi32>
    %c16_i32 = arith.constant 16 : i32
    %9 = vector.broadcast %c16_i32 : i32 to vector<1x256xi32>
    %10 = arith.cmpi slt, %8, %9 : vector<1x256xi32>
    %11 = arith.andi %6, %10 : vector<1x256xi1>
    %c-2_i32 = arith.constant -2 : i32
    %12 = vector.broadcast %c-2_i32 : i32 to vector<1x256xi32>
    %13 = arith.addi %1, %12 : vector<1x256xi32>
    %c0_i32_2 = arith.constant 0 : i32
    %14 = vector.broadcast %c0_i32_2 : i32 to vector<1x256xi32>
    %15 = arith.cmpi sge, %13, %14 : vector<1x256xi32>
    %c-2_i32_3 = arith.constant -2 : i32
    %16 = vector.broadcast %c-2_i32_3 : i32 to vector<1x256xi32>
    %17 = arith.addi %1, %16 : vector<1x256xi32>
    %c16_i32_4 = arith.constant 16 : i32
    %18 = vector.broadcast %c16_i32_4 : i32 to vector<1x256xi32>
    %19 = arith.cmpi slt, %17, %18 : vector<1x256xi32>
    %20 = arith.andi %15, %19 : vector<1x256xi1>
    %c-1_i32 = arith.constant -1 : i32
    %21 = vector.broadcast %c-1_i32 : i32 to vector<1x256xi32>
    %22 = arith.addi %1, %21 : vector<1x256xi32>
    %c0_i32_5 = arith.constant 0 : i32
    %23 = vector.broadcast %c0_i32_5 : i32 to vector<1x256xi32>
    %24 = arith.cmpi sge, %22, %23 : vector<1x256xi32>
    %c-1_i32_6 = arith.constant -1 : i32
    %25 = vector.broadcast %c-1_i32_6 : i32 to vector<1x256xi32>
    %26 = arith.addi %1, %25 : vector<1x256xi32>
    %c16_i32_7 = arith.constant 16 : i32
    %27 = vector.broadcast %c16_i32_7 : i32 to vector<1x256xi32>
    %28 = arith.cmpi slt, %26, %27 : vector<1x256xi32>
    %29 = arith.andi %24, %28 : vector<1x256xi1>
    %c0_i32_8 = arith.constant 0 : i32
    %30 = vector.broadcast %c0_i32_8 : i32 to vector<1x256xi32>
    %31 = arith.addi %1, %30 : vector<1x256xi32>
    %c0_i32_9 = arith.constant 0 : i32
    %32 = vector.broadcast %c0_i32_9 : i32 to vector<1x256xi32>
    %33 = arith.cmpi sge, %31, %32 : vector<1x256xi32>
    %c0_i32_10 = arith.constant 0 : i32
    %34 = vector.broadcast %c0_i32_10 : i32 to vector<1x256xi32>
    %35 = arith.addi %1, %34 : vector<1x256xi32>
    %c16_i32_11 = arith.constant 16 : i32
    %36 = vector.broadcast %c16_i32_11 : i32 to vector<1x256xi32>
    %37 = arith.cmpi slt, %35, %36 : vector<1x256xi32>
    %38 = arith.andi %33, %37 : vector<1x256xi1>
    %c1_i32 = arith.constant 1 : i32
    %39 = vector.broadcast %c1_i32 : i32 to vector<1x256xi32>
    %40 = arith.addi %1, %39 : vector<1x256xi32>
    %c0_i32_12 = arith.constant 0 : i32
    %41 = vector.broadcast %c0_i32_12 : i32 to vector<1x256xi32>
    %42 = arith.cmpi sge, %40, %41 : vector<1x256xi32>
    %c1_i32_13 = arith.constant 1 : i32
    %43 = vector.broadcast %c1_i32_13 : i32 to vector<1x256xi32>
    %44 = arith.addi %1, %43 : vector<1x256xi32>
    %c16_i32_14 = arith.constant 16 : i32
    %45 = vector.broadcast %c16_i32_14 : i32 to vector<1x256xi32>
    %46 = arith.cmpi slt, %44, %45 : vector<1x256xi32>
    %47 = arith.andi %42, %46 : vector<1x256xi1>
    %c2_i32 = arith.constant 2 : i32
    %48 = vector.broadcast %c2_i32 : i32 to vector<1x256xi32>
    %49 = arith.addi %1, %48 : vector<1x256xi32>
    %c0_i32_15 = arith.constant 0 : i32
    %50 = vector.broadcast %c0_i32_15 : i32 to vector<1x256xi32>
    %51 = arith.cmpi sge, %49, %50 : vector<1x256xi32>
    %c2_i32_16 = arith.constant 2 : i32
    %52 = vector.broadcast %c2_i32_16 : i32 to vector<1x256xi32>
    %53 = arith.addi %1, %52 : vector<1x256xi32>
    %c16_i32_17 = arith.constant 16 : i32
    %54 = vector.broadcast %c16_i32_17 : i32 to vector<1x256xi32>
    %55 = arith.cmpi slt, %53, %54 : vector<1x256xi32>
    %56 = arith.andi %51, %55 : vector<1x256xi1>
    %c3_i32 = arith.constant 3 : i32
    %57 = vector.broadcast %c3_i32 : i32 to vector<1x256xi32>
    %58 = arith.addi %1, %57 : vector<1x256xi32>
    %c0_i32_18 = arith.constant 0 : i32
    %59 = vector.broadcast %c0_i32_18 : i32 to vector<1x256xi32>
    %60 = arith.cmpi sge, %58, %59 : vector<1x256xi32>
    %c3_i32_19 = arith.constant 3 : i32
    %61 = vector.broadcast %c3_i32_19 : i32 to vector<1x256xi32>
    %62 = arith.addi %1, %61 : vector<1x256xi32>
    %c16_i32_20 = arith.constant 16 : i32
    %63 = vector.broadcast %c16_i32_20 : i32 to vector<1x256xi32>
    %64 = arith.cmpi slt, %62, %63 : vector<1x256xi32>
    %65 = arith.andi %60, %64 : vector<1x256xi1>
    %c-3_i32_21 = arith.constant -3 : i32
    %66 = vector.broadcast %c-3_i32_21 : i32 to vector<1x256xi32>
    %67 = arith.addi %2, %66 : vector<1x256xi32>
    %c0_i32_22 = arith.constant 0 : i32
    %68 = vector.broadcast %c0_i32_22 : i32 to vector<1x256xi32>
    %69 = arith.cmpi sge, %67, %68 : vector<1x256xi32>
    %c-3_i32_23 = arith.constant -3 : i32
    %70 = vector.broadcast %c-3_i32_23 : i32 to vector<1x256xi32>
    %71 = arith.addi %2, %70 : vector<1x256xi32>
    %c16_i32_24 = arith.constant 16 : i32
    %72 = vector.broadcast %c16_i32_24 : i32 to vector<1x256xi32>
    %73 = arith.cmpi slt, %71, %72 : vector<1x256xi32>
    %74 = arith.andi %69, %73 : vector<1x256xi1>
    %c-2_i32_25 = arith.constant -2 : i32
    %75 = vector.broadcast %c-2_i32_25 : i32 to vector<1x256xi32>
    %76 = arith.addi %2, %75 : vector<1x256xi32>
    %c0_i32_26 = arith.constant 0 : i32
    %77 = vector.broadcast %c0_i32_26 : i32 to vector<1x256xi32>
    %78 = arith.cmpi sge, %76, %77 : vector<1x256xi32>
    %c-2_i32_27 = arith.constant -2 : i32
    %79 = vector.broadcast %c-2_i32_27 : i32 to vector<1x256xi32>
    %80 = arith.addi %2, %79 : vector<1x256xi32>
    %c16_i32_28 = arith.constant 16 : i32
    %81 = vector.broadcast %c16_i32_28 : i32 to vector<1x256xi32>
    %82 = arith.cmpi slt, %80, %81 : vector<1x256xi32>
    %83 = arith.andi %78, %82 : vector<1x256xi1>
    %c-1_i32_29 = arith.constant -1 : i32
    %84 = vector.broadcast %c-1_i32_29 : i32 to vector<1x256xi32>
    %85 = arith.addi %2, %84 : vector<1x256xi32>
    %c0_i32_30 = arith.constant 0 : i32
    %86 = vector.broadcast %c0_i32_30 : i32 to vector<1x256xi32>
    %87 = arith.cmpi sge, %85, %86 : vector<1x256xi32>
    %c-1_i32_31 = arith.constant -1 : i32
    %88 = vector.broadcast %c-1_i32_31 : i32 to vector<1x256xi32>
    %89 = arith.addi %2, %88 : vector<1x256xi32>
    %c16_i32_32 = arith.constant 16 : i32
    %90 = vector.broadcast %c16_i32_32 : i32 to vector<1x256xi32>
    %91 = arith.cmpi slt, %89, %90 : vector<1x256xi32>
    %92 = arith.andi %87, %91 : vector<1x256xi1>
    %c0_i32_33 = arith.constant 0 : i32
    %93 = vector.broadcast %c0_i32_33 : i32 to vector<1x256xi32>
    %94 = arith.addi %2, %93 : vector<1x256xi32>
    %c0_i32_34 = arith.constant 0 : i32
    %95 = vector.broadcast %c0_i32_34 : i32 to vector<1x256xi32>
    %96 = arith.cmpi sge, %94, %95 : vector<1x256xi32>
    %c0_i32_35 = arith.constant 0 : i32
    %97 = vector.broadcast %c0_i32_35 : i32 to vector<1x256xi32>
    %98 = arith.addi %2, %97 : vector<1x256xi32>
    %c16_i32_36 = arith.constant 16 : i32
    %99 = vector.broadcast %c16_i32_36 : i32 to vector<1x256xi32>
    %100 = arith.cmpi slt, %98, %99 : vector<1x256xi32>
    %101 = arith.andi %96, %100 : vector<1x256xi1>
    %c1_i32_37 = arith.constant 1 : i32
    %102 = vector.broadcast %c1_i32_37 : i32 to vector<1x256xi32>
    %103 = arith.addi %2, %102 : vector<1x256xi32>
    %c0_i32_38 = arith.constant 0 : i32
    %104 = vector.broadcast %c0_i32_38 : i32 to vector<1x256xi32>
    %105 = arith.cmpi sge, %103, %104 : vector<1x256xi32>
    %c1_i32_39 = arith.constant 1 : i32
    %106 = vector.broadcast %c1_i32_39 : i32 to vector<1x256xi32>
    %107 = arith.addi %2, %106 : vector<1x256xi32>
    %c16_i32_40 = arith.constant 16 : i32
    %108 = vector.broadcast %c16_i32_40 : i32 to vector<1x256xi32>
    %109 = arith.cmpi slt, %107, %108 : vector<1x256xi32>
    %110 = arith.andi %105, %109 : vector<1x256xi1>
    %c2_i32_41 = arith.constant 2 : i32
    %111 = vector.broadcast %c2_i32_41 : i32 to vector<1x256xi32>
    %112 = arith.addi %2, %111 : vector<1x256xi32>
    %c0_i32_42 = arith.constant 0 : i32
    %113 = vector.broadcast %c0_i32_42 : i32 to vector<1x256xi32>
    %114 = arith.cmpi sge, %112, %113 : vector<1x256xi32>
    %c2_i32_43 = arith.constant 2 : i32
    %115 = vector.broadcast %c2_i32_43 : i32 to vector<1x256xi32>
    %116 = arith.addi %2, %115 : vector<1x256xi32>
    %c16_i32_44 = arith.constant 16 : i32
    %117 = vector.broadcast %c16_i32_44 : i32 to vector<1x256xi32>
    %118 = arith.cmpi slt, %116, %117 : vector<1x256xi32>
    %119 = arith.andi %114, %118 : vector<1x256xi1>
    %c3_i32_45 = arith.constant 3 : i32
    %120 = vector.broadcast %c3_i32_45 : i32 to vector<1x256xi32>
    %121 = arith.addi %2, %120 : vector<1x256xi32>
    %c0_i32_46 = arith.constant 0 : i32
    %122 = vector.broadcast %c0_i32_46 : i32 to vector<1x256xi32>
    %123 = arith.cmpi sge, %121, %122 : vector<1x256xi32>
    %c3_i32_47 = arith.constant 3 : i32
    %124 = vector.broadcast %c3_i32_47 : i32 to vector<1x256xi32>
    %125 = arith.addi %2, %124 : vector<1x256xi32>
    %c16_i32_48 = arith.constant 16 : i32
    %126 = vector.broadcast %c16_i32_48 : i32 to vector<1x256xi32>
    %127 = arith.cmpi slt, %125, %126 : vector<1x256xi32>
    %128 = arith.andi %123, %127 : vector<1x256xi1>
    %129 = arith.andi %11, %74 : vector<1x256xi1>
    %130 = arith.andi %11, %83 : vector<1x256xi1>
    %131 = arith.andi %11, %92 : vector<1x256xi1>
    %132 = arith.andi %11, %101 : vector<1x256xi1>
    %133 = arith.andi %11, %110 : vector<1x256xi1>
    %134 = arith.andi %11, %119 : vector<1x256xi1>
    %135 = arith.andi %11, %128 : vector<1x256xi1>
    %136 = arith.andi %20, %74 : vector<1x256xi1>
    %137 = arith.andi %20, %83 : vector<1x256xi1>
    %138 = arith.andi %20, %92 : vector<1x256xi1>
    %139 = arith.andi %20, %101 : vector<1x256xi1>
    %140 = arith.andi %20, %110 : vector<1x256xi1>
    %141 = arith.andi %20, %119 : vector<1x256xi1>
    %142 = arith.andi %20, %128 : vector<1x256xi1>
    %143 = arith.andi %29, %74 : vector<1x256xi1>
    %144 = arith.andi %29, %83 : vector<1x256xi1>
    %145 = arith.andi %29, %92 : vector<1x256xi1>
    %146 = arith.andi %29, %101 : vector<1x256xi1>
    %147 = arith.andi %29, %110 : vector<1x256xi1>
    %148 = arith.andi %29, %119 : vector<1x256xi1>
    %149 = arith.andi %29, %128 : vector<1x256xi1>
    %150 = arith.andi %38, %74 : vector<1x256xi1>
    %151 = arith.andi %38, %83 : vector<1x256xi1>
    %152 = arith.andi %38, %92 : vector<1x256xi1>
    %153 = arith.andi %38, %110 : vector<1x256xi1>
    %154 = arith.andi %38, %119 : vector<1x256xi1>
    %155 = arith.andi %38, %128 : vector<1x256xi1>
    %156 = arith.andi %47, %74 : vector<1x256xi1>
    %157 = arith.andi %47, %83 : vector<1x256xi1>
    %158 = arith.andi %47, %92 : vector<1x256xi1>
    %159 = arith.andi %47, %101 : vector<1x256xi1>
    %160 = arith.andi %47, %110 : vector<1x256xi1>
    %161 = arith.andi %47, %119 : vector<1x256xi1>
    %162 = arith.andi %47, %128 : vector<1x256xi1>
    %163 = arith.andi %56, %74 : vector<1x256xi1>
    %164 = arith.andi %56, %83 : vector<1x256xi1>
    %165 = arith.andi %56, %92 : vector<1x256xi1>
    %166 = arith.andi %56, %101 : vector<1x256xi1>
    %167 = arith.andi %56, %110 : vector<1x256xi1>
    %168 = arith.andi %56, %119 : vector<1x256xi1>
    %169 = arith.andi %56, %128 : vector<1x256xi1>
    %170 = arith.andi %65, %74 : vector<1x256xi1>
    %171 = arith.andi %65, %83 : vector<1x256xi1>
    %172 = arith.andi %65, %92 : vector<1x256xi1>
    %173 = arith.andi %65, %101 : vector<1x256xi1>
    %174 = arith.andi %65, %110 : vector<1x256xi1>
    %175 = arith.andi %65, %119 : vector<1x256xi1>
    %176 = arith.andi %65, %128 : vector<1x256xi1>
    %c0_49 = arith.constant 0 : index
    %c0_50 = arith.constant 0 : index
    %c0_51 = arith.constant 0 : index
    %177 = vector.load %arg2[%c0_49, %c0_50, %c0_51] : memref<1x4x256xf32, #tpu.memory_space<vmem>>, vector<1x4x256xf32>
    %178 = vector.shape_cast %177 : vector<1x4x256xf32> to vector<4x256xf32>
    %c0_52 = arith.constant 0 : index
    %c0_53 = arith.constant 0 : index
    %179 = vector.load %arg7[%c0_52, %c0_53] : memref<4x1xf32, #tpu.memory_space<vmem>>, vector<4x1xf32>
    %cst = arith.constant 0.000000e+00 : f32
    %180 = vector.broadcast %cst : f32 to vector<4x256xf32>
    %c51_i32 = arith.constant 51 : i32
    %181 = tpu.dynamic_rotate %178 by %c51_i32 dim 1 : vector<4x256xf32>, i32 -> vector<4x256xf32>
    %cst_54 = arith.constant 0.000000e+00 : f32
    %182 = vector.shape_cast %129 : vector<1x256xi1> to vector<1x256xi1>
    %183 = vector.broadcast %182 : vector<1x256xi1> to vector<4x256xi1>
    %184 = vector.broadcast %cst_54 : f32 to vector<4x256xf32>
    %185 = arith.select %183, %181, %184 : vector<4x256xi1>, vector<4x256xf32>
    %c0_55 = arith.constant 0 : index
    %c0_56 = arith.constant 0 : index
    %c0_57 = arith.constant 0 : index
    %186 = vector.load %arg6[%c0_55, %c0_56, %c0_57] : memref<49x4x1xf32, #tpu.memory_space<vmem>>, vector<1x4x1xf32>
    %187 = vector.shape_cast %186 : vector<1x4x1xf32> to vector<4x1xf32>
    %188 = vector.broadcast %187 : vector<4x1xf32> to vector<4x256xf32>
    %189 = arith.mulf %185, %188 : vector<4x256xf32>
    %190 = arith.addf %180, %189 : vector<4x256xf32>
    %c50_i32 = arith.constant 50 : i32
    %191 = tpu.dynamic_rotate %178 by %c50_i32 dim 1 : vector<4x256xf32>, i32 -> vector<4x256xf32>
    %cst_58 = arith.constant 0.000000e+00 : f32
    %192 = vector.shape_cast %130 : vector<1x256xi1> to vector<1x256xi1>
    %193 = vector.broadcast %192 : vector<1x256xi1> to vector<4x256xi1>
    %194 = vector.broadcast %cst_58 : f32 to vector<4x256xf32>
    %195 = arith.select %193, %191, %194 : vector<4x256xi1>, vector<4x256xf32>
    %c1 = arith.constant 1 : index
    %c0_59 = arith.constant 0 : index
    %c0_60 = arith.constant 0 : index
    %196 = vector.load %arg6[%c1, %c0_59, %c0_60] : memref<49x4x1xf32, #tpu.memory_space<vmem>>, vector<1x4x1xf32>
    %197 = vector.shape_cast %196 : vector<1x4x1xf32> to vector<4x1xf32>
    %198 = vector.broadcast %197 : vector<4x1xf32> to vector<4x256xf32>
    %199 = arith.mulf %195, %198 : vector<4x256xf32>
    %200 = arith.addf %190, %199 : vector<4x256xf32>
    %c49_i32 = arith.constant 49 : i32
    %201 = tpu.dynamic_rotate %178 by %c49_i32 dim 1 : vector<4x256xf32>, i32 -> vector<4x256xf32>
    %cst_61 = arith.constant 0.000000e+00 : f32
    %202 = vector.shape_cast %131 : vector<1x256xi1> to vector<1x256xi1>
    %203 = vector.broadcast %202 : vector<1x256xi1> to vector<4x256xi1>
    %204 = vector.broadcast %cst_61 : f32 to vector<4x256xf32>
    %205 = arith.select %203, %201, %204 : vector<4x256xi1>, vector<4x256xf32>
    %c2 = arith.constant 2 : index
    %c0_62 = arith.constant 0 : index
    %c0_63 = arith.constant 0 : index
    %206 = vector.load %arg6[%c2, %c0_62, %c0_63] : memref<49x4x1xf32, #tpu.memory_space<vmem>>, vector<1x4x1xf32>
    %207 = vector.shape_cast %206 : vector<1x4x1xf32> to vector<4x1xf32>
    %208 = vector.broadcast %207 : vector<4x1xf32> to vector<4x256xf32>
    %209 = arith.mulf %205, %208 : vector<4x256xf32>
    %210 = arith.addf %200, %209 : vector<4x256xf32>
    %c48_i32 = arith.constant 48 : i32
    %211 = tpu.dynamic_rotate %178 by %c48_i32 dim 1 : vector<4x256xf32>, i32 -> vector<4x256xf32>
    %cst_64 = arith.constant 0.000000e+00 : f32
    %212 = vector.shape_cast %132 : vector<1x256xi1> to vector<1x256xi1>
    %213 = vector.broadcast %212 : vector<1x256xi1> to vector<4x256xi1>
    %214 = vector.broadcast %cst_64 : f32 to vector<4x256xf32>
    %215 = arith.select %213, %211, %214 : vector<4x256xi1>, vector<4x256xf32>
    %c3 = arith.constant 3 : index
    %c0_65 = arith.constant 0 : index
    %c0_66 = arith.constant 0 : index
    %216 = vector.load %arg6[%c3, %c0_65, %c0_66] : memref<49x4x1xf32, #tpu.memory_space<vmem>>, vector<1x4x1xf32>
    %217 = vector.shape_cast %216 : vector<1x4x1xf32> to vector<4x1xf32>
    %218 = vector.broadcast %217 : vector<4x1xf32> to vector<4x256xf32>
    %219 = arith.mulf %215, %218 : vector<4x256xf32>
    %220 = arith.addf %210, %219 : vector<4x256xf32>
    %c47_i32 = arith.constant 47 : i32
    %221 = tpu.dynamic_rotate %178 by %c47_i32 dim 1 : vector<4x256xf32>, i32 -> vector<4x256xf32>
    %cst_67 = arith.constant 0.000000e+00 : f32
    %222 = vector.shape_cast %133 : vector<1x256xi1> to vector<1x256xi1>
    %223 = vector.broadcast %222 : vector<1x256xi1> to vector<4x256xi1>
    %224 = vector.broadcast %cst_67 : f32 to vector<4x256xf32>
    %225 = arith.select %223, %221, %224 : vector<4x256xi1>, vector<4x256xf32>
    %c4 = arith.constant 4 : index
    %c0_68 = arith.constant 0 : index
    %c0_69 = arith.constant 0 : index
    %226 = vector.load %arg6[%c4, %c0_68, %c0_69] : memref<49x4x1xf32, #tpu.memory_space<vmem>>, vector<1x4x1xf32>
    %227 = vector.shape_cast %226 : vector<1x4x1xf32> to vector<4x1xf32>
    %228 = vector.broadcast %227 : vector<4x1xf32> to vector<4x256xf32>
    %229 = arith.mulf %225, %228 : vector<4x256xf32>
    %230 = arith.addf %220, %229 : vector<4x256xf32>
    %c46_i32 = arith.constant 46 : i32
    %231 = tpu.dynamic_rotate %178 by %c46_i32 dim 1 : vector<4x256xf32>, i32 -> vector<4x256xf32>
    %cst_70 = arith.constant 0.000000e+00 : f32
    %232 = vector.shape_cast %134 : vector<1x256xi1> to vector<1x256xi1>
    %233 = vector.broadcast %232 : vector<1x256xi1> to vector<4x256xi1>
    %234 = vector.broadcast %cst_70 : f32 to vector<4x256xf32>
    %235 = arith.select %233, %231, %234 : vector<4x256xi1>, vector<4x256xf32>
    %c5 = arith.constant 5 : index
    %c0_71 = arith.constant 0 : index
    %c0_72 = arith.constant 0 : index
    %236 = vector.load %arg6[%c5, %c0_71, %c0_72] : memref<49x4x1xf32, #tpu.memory_space<vmem>>, vector<1x4x1xf32>
    %237 = vector.shape_cast %236 : vector<1x4x1xf32> to vector<4x1xf32>
    %238 = vector.broadcast %237 : vector<4x1xf32> to vector<4x256xf32>
    %239 = arith.mulf %235, %238 : vector<4x256xf32>
    %240 = arith.addf %230, %239 : vector<4x256xf32>
    %c45_i32 = arith.constant 45 : i32
    %241 = tpu.dynamic_rotate %178 by %c45_i32 dim 1 : vector<4x256xf32>, i32 -> vector<4x256xf32>
    %cst_73 = arith.constant 0.000000e+00 : f32
    %242 = vector.shape_cast %135 : vector<1x256xi1> to vector<1x256xi1>
    %243 = vector.broadcast %242 : vector<1x256xi1> to vector<4x256xi1>
    %244 = vector.broadcast %cst_73 : f32 to vector<4x256xf32>
    %245 = arith.select %243, %241, %244 : vector<4x256xi1>, vector<4x256xf32>
    %c6 = arith.constant 6 : index
    %c0_74 = arith.constant 0 : index
    %c0_75 = arith.constant 0 : index
    %246 = vector.load %arg6[%c6, %c0_74, %c0_75] : memref<49x4x1xf32, #tpu.memory_space<vmem>>, vector<1x4x1xf32>
    %247 = vector.shape_cast %246 : vector<1x4x1xf32> to vector<4x1xf32>
    %248 = vector.broadcast %247 : vector<4x1xf32> to vector<4x256xf32>
    %249 = arith.mulf %245, %248 : vector<4x256xf32>
    %250 = arith.addf %240, %249 : vector<4x256xf32>
    %c35_i32 = arith.constant 35 : i32
    %251 = tpu.dynamic_rotate %178 by %c35_i32 dim 1 : vector<4x256xf32>, i32 -> vector<4x256xf32>
    %cst_76 = arith.constant 0.000000e+00 : f32
    %252 = vector.shape_cast %136 : vector<1x256xi1> to vector<1x256xi1>
    %253 = vector.broadcast %252 : vector<1x256xi1> to vector<4x256xi1>
    %254 = vector.broadcast %cst_76 : f32 to vector<4x256xf32>
    %255 = arith.select %253, %251, %254 : vector<4x256xi1>, vector<4x256xf32>
    %c7 = arith.constant 7 : index
    %c0_77 = arith.constant 0 : index
    %c0_78 = arith.constant 0 : index
    %256 = vector.load %arg6[%c7, %c0_77, %c0_78] : memref<49x4x1xf32, #tpu.memory_space<vmem>>, vector<1x4x1xf32>
    %257 = vector.shape_cast %256 : vector<1x4x1xf32> to vector<4x1xf32>
    %258 = vector.broadcast %257 : vector<4x1xf32> to vector<4x256xf32>
    %259 = arith.mulf %255, %258 : vector<4x256xf32>
    %260 = arith.addf %250, %259 : vector<4x256xf32>
    %c34_i32 = arith.constant 34 : i32
    %261 = tpu.dynamic_rotate %178 by %c34_i32 dim 1 : vector<4x256xf32>, i32 -> vector<4x256xf32>
    %cst_79 = arith.constant 0.000000e+00 : f32
    %262 = vector.shape_cast %137 : vector<1x256xi1> to vector<1x256xi1>
    %263 = vector.broadcast %262 : vector<1x256xi1> to vector<4x256xi1>
    %264 = vector.broadcast %cst_79 : f32 to vector<4x256xf32>
    %265 = arith.select %263, %261, %264 : vector<4x256xi1>, vector<4x256xf32>
    %c8 = arith.constant 8 : index
    %c0_80 = arith.constant 0 : index
    %c0_81 = arith.constant 0 : index
    %266 = vector.load %arg6[%c8, %c0_80, %c0_81] : memref<49x4x1xf32, #tpu.memory_space<vmem>>, vector<1x4x1xf32>
    %267 = vector.shape_cast %266 : vector<1x4x1xf32> to vector<4x1xf32>
    %268 = vector.broadcast %267 : vector<4x1xf32> to vector<4x256xf32>
    %269 = arith.mulf %265, %268 : vector<4x256xf32>
    %270 = arith.addf %260, %269 : vector<4x256xf32>
    %c33_i32 = arith.constant 33 : i32
    %271 = tpu.dynamic_rotate %178 by %c33_i32 dim 1 : vector<4x256xf32>, i32 -> vector<4x256xf32>
    %cst_82 = arith.constant 0.000000e+00 : f32
    %272 = vector.shape_cast %138 : vector<1x256xi1> to vector<1x256xi1>
    %273 = vector.broadcast %272 : vector<1x256xi1> to vector<4x256xi1>
    %274 = vector.broadcast %cst_82 : f32 to vector<4x256xf32>
    %275 = arith.select %273, %271, %274 : vector<4x256xi1>, vector<4x256xf32>
    %c9 = arith.constant 9 : index
    %c0_83 = arith.constant 0 : index
    %c0_84 = arith.constant 0 : index
    %276 = vector.load %arg6[%c9, %c0_83, %c0_84] : memref<49x4x1xf32, #tpu.memory_space<vmem>>, vector<1x4x1xf32>
    %277 = vector.shape_cast %276 : vector<1x4x1xf32> to vector<4x1xf32>
    %278 = vector.broadcast %277 : vector<4x1xf32> to vector<4x256xf32>
    %279 = arith.mulf %275, %278 : vector<4x256xf32>
    %280 = arith.addf %270, %279 : vector<4x256xf32>
    %c32_i32 = arith.constant 32 : i32
    %281 = tpu.dynamic_rotate %178 by %c32_i32 dim 1 : vector<4x256xf32>, i32 -> vector<4x256xf32>
    %cst_85 = arith.constant 0.000000e+00 : f32
    %282 = vector.shape_cast %139 : vector<1x256xi1> to vector<1x256xi1>
    %283 = vector.broadcast %282 : vector<1x256xi1> to vector<4x256xi1>
    %284 = vector.broadcast %cst_85 : f32 to vector<4x256xf32>
    %285 = arith.select %283, %281, %284 : vector<4x256xi1>, vector<4x256xf32>
    %c10 = arith.constant 10 : index
    %c0_86 = arith.constant 0 : index
    %c0_87 = arith.constant 0 : index
    %286 = vector.load %arg6[%c10, %c0_86, %c0_87] : memref<49x4x1xf32, #tpu.memory_space<vmem>>, vector<1x4x1xf32>
    %287 = vector.shape_cast %286 : vector<1x4x1xf32> to vector<4x1xf32>
    %288 = vector.broadcast %287 : vector<4x1xf32> to vector<4x256xf32>
    %289 = arith.mulf %285, %288 : vector<4x256xf32>
    %290 = arith.addf %280, %289 : vector<4x256xf32>
    %c31_i32 = arith.constant 31 : i32
    %291 = tpu.dynamic_rotate %178 by %c31_i32 dim 1 : vector<4x256xf32>, i32 -> vector<4x256xf32>
    %cst_88 = arith.constant 0.000000e+00 : f32
    %292 = vector.shape_cast %140 : vector<1x256xi1> to vector<1x256xi1>
    %293 = vector.broadcast %292 : vector<1x256xi1> to vector<4x256xi1>
    %294 = vector.broadcast %cst_88 : f32 to vector<4x256xf32>
    %295 = arith.select %293, %291, %294 : vector<4x256xi1>, vector<4x256xf32>
    %c11 = arith.constant 11 : index
    %c0_89 = arith.constant 0 : index
    %c0_90 = arith.constant 0 : index
    %296 = vector.load %arg6[%c11, %c0_89, %c0_90] : memref<49x4x1xf32, #tpu.memory_space<vmem>>, vector<1x4x1xf32>
    %297 = vector.shape_cast %296 : vector<1x4x1xf32> to vector<4x1xf32>
    %298 = vector.broadcast %297 : vector<4x1xf32> to vector<4x256xf32>
    %299 = arith.mulf %295, %298 : vector<4x256xf32>
    %300 = arith.addf %290, %299 : vector<4x256xf32>
    %c30_i32 = arith.constant 30 : i32
    %301 = tpu.dynamic_rotate %178 by %c30_i32 dim 1 : vector<4x256xf32>, i32 -> vector<4x256xf32>
    %cst_91 = arith.constant 0.000000e+00 : f32
    %302 = vector.shape_cast %141 : vector<1x256xi1> to vector<1x256xi1>
    %303 = vector.broadcast %302 : vector<1x256xi1> to vector<4x256xi1>
    %304 = vector.broadcast %cst_91 : f32 to vector<4x256xf32>
    %305 = arith.select %303, %301, %304 : vector<4x256xi1>, vector<4x256xf32>
    %c12 = arith.constant 12 : index
    %c0_92 = arith.constant 0 : index
    %c0_93 = arith.constant 0 : index
    %306 = vector.load %arg6[%c12, %c0_92, %c0_93] : memref<49x4x1xf32, #tpu.memory_space<vmem>>, vector<1x4x1xf32>
    %307 = vector.shape_cast %306 : vector<1x4x1xf32> to vector<4x1xf32>
    %308 = vector.broadcast %307 : vector<4x1xf32> to vector<4x256xf32>
    %309 = arith.mulf %305, %308 : vector<4x256xf32>
    %310 = arith.addf %300, %309 : vector<4x256xf32>
    %c29_i32 = arith.constant 29 : i32
    %311 = tpu.dynamic_rotate %178 by %c29_i32 dim 1 : vector<4x256xf32>, i32 -> vector<4x256xf32>
    %cst_94 = arith.constant 0.000000e+00 : f32
    %312 = vector.shape_cast %142 : vector<1x256xi1> to vector<1x256xi1>
    %313 = vector.broadcast %312 : vector<1x256xi1> to vector<4x256xi1>
    %314 = vector.broadcast %cst_94 : f32 to vector<4x256xf32>
    %315 = arith.select %313, %311, %314 : vector<4x256xi1>, vector<4x256xf32>
    %c13 = arith.constant 13 : index
    %c0_95 = arith.constant 0 : index
    %c0_96 = arith.constant 0 : index
    %316 = vector.load %arg6[%c13, %c0_95, %c0_96] : memref<49x4x1xf32, #tpu.memory_space<vmem>>, vector<1x4x1xf32>
    %317 = vector.shape_cast %316 : vector<1x4x1xf32> to vector<4x1xf32>
    %318 = vector.broadcast %317 : vector<4x1xf32> to vector<4x256xf32>
    %319 = arith.mulf %315, %318 : vector<4x256xf32>
    %320 = arith.addf %310, %319 : vector<4x256xf32>
    %c19_i32 = arith.constant 19 : i32
    %321 = tpu.dynamic_rotate %178 by %c19_i32 dim 1 : vector<4x256xf32>, i32 -> vector<4x256xf32>
    %cst_97 = arith.constant 0.000000e+00 : f32
    %322 = vector.shape_cast %143 : vector<1x256xi1> to vector<1x256xi1>
    %323 = vector.broadcast %322 : vector<1x256xi1> to vector<4x256xi1>
    %324 = vector.broadcast %cst_97 : f32 to vector<4x256xf32>
    %325 = arith.select %323, %321, %324 : vector<4x256xi1>, vector<4x256xf32>
    %c14 = arith.constant 14 : index
    %c0_98 = arith.constant 0 : index
    %c0_99 = arith.constant 0 : index
    %326 = vector.load %arg6[%c14, %c0_98, %c0_99] : memref<49x4x1xf32, #tpu.memory_space<vmem>>, vector<1x4x1xf32>
    %327 = vector.shape_cast %326 : vector<1x4x1xf32> to vector<4x1xf32>
    %328 = vector.broadcast %327 : vector<4x1xf32> to vector<4x256xf32>
    %329 = arith.mulf %325, %328 : vector<4x256xf32>
    %330 = arith.addf %320, %329 : vector<4x256xf32>
    %c18_i32 = arith.constant 18 : i32
    %331 = tpu.dynamic_rotate %178 by %c18_i32 dim 1 : vector<4x256xf32>, i32 -> vector<4x256xf32>
    %cst_100 = arith.constant 0.000000e+00 : f32
    %332 = vector.shape_cast %144 : vector<1x256xi1> to vector<1x256xi1>
    %333 = vector.broadcast %332 : vector<1x256xi1> to vector<4x256xi1>
    %334 = vector.broadcast %cst_100 : f32 to vector<4x256xf32>
    %335 = arith.select %333, %331, %334 : vector<4x256xi1>, vector<4x256xf32>
    %c15 = arith.constant 15 : index
    %c0_101 = arith.constant 0 : index
    %c0_102 = arith.constant 0 : index
    %336 = vector.load %arg6[%c15, %c0_101, %c0_102] : memref<49x4x1xf32, #tpu.memory_space<vmem>>, vector<1x4x1xf32>
    %337 = vector.shape_cast %336 : vector<1x4x1xf32> to vector<4x1xf32>
    %338 = vector.broadcast %337 : vector<4x1xf32> to vector<4x256xf32>
    %339 = arith.mulf %335, %338 : vector<4x256xf32>
    %340 = arith.addf %330, %339 : vector<4x256xf32>
    %c17_i32 = arith.constant 17 : i32
    %341 = tpu.dynamic_rotate %178 by %c17_i32 dim 1 : vector<4x256xf32>, i32 -> vector<4x256xf32>
    %cst_103 = arith.constant 0.000000e+00 : f32
    %342 = vector.shape_cast %145 : vector<1x256xi1> to vector<1x256xi1>
    %343 = vector.broadcast %342 : vector<1x256xi1> to vector<4x256xi1>
    %344 = vector.broadcast %cst_103 : f32 to vector<4x256xf32>
    %345 = arith.select %343, %341, %344 : vector<4x256xi1>, vector<4x256xf32>
    %c16 = arith.constant 16 : index
    %c0_104 = arith.constant 0 : index
    %c0_105 = arith.constant 0 : index
    %346 = vector.load %arg6[%c16, %c0_104, %c0_105] : memref<49x4x1xf32, #tpu.memory_space<vmem>>, vector<1x4x1xf32>
    %347 = vector.shape_cast %346 : vector<1x4x1xf32> to vector<4x1xf32>
    %348 = vector.broadcast %347 : vector<4x1xf32> to vector<4x256xf32>
    %349 = arith.mulf %345, %348 : vector<4x256xf32>
    %350 = arith.addf %340, %349 : vector<4x256xf32>
    %c16_i32_106 = arith.constant 16 : i32
    %351 = tpu.dynamic_rotate %178 by %c16_i32_106 dim 1 : vector<4x256xf32>, i32 -> vector<4x256xf32>
    %cst_107 = arith.constant 0.000000e+00 : f32
    %352 = vector.shape_cast %146 : vector<1x256xi1> to vector<1x256xi1>
    %353 = vector.broadcast %352 : vector<1x256xi1> to vector<4x256xi1>
    %354 = vector.broadcast %cst_107 : f32 to vector<4x256xf32>
    %355 = arith.select %353, %351, %354 : vector<4x256xi1>, vector<4x256xf32>
    %c17 = arith.constant 17 : index
    %c0_108 = arith.constant 0 : index
    %c0_109 = arith.constant 0 : index
    %356 = vector.load %arg6[%c17, %c0_108, %c0_109] : memref<49x4x1xf32, #tpu.memory_space<vmem>>, vector<1x4x1xf32>
    %357 = vector.shape_cast %356 : vector<1x4x1xf32> to vector<4x1xf32>
    %358 = vector.broadcast %357 : vector<4x1xf32> to vector<4x256xf32>
    %359 = arith.mulf %355, %358 : vector<4x256xf32>
    %360 = arith.addf %350, %359 : vector<4x256xf32>
    %c15_i32 = arith.constant 15 : i32
    %361 = tpu.dynamic_rotate %178 by %c15_i32 dim 1 : vector<4x256xf32>, i32 -> vector<4x256xf32>
    %cst_110 = arith.constant 0.000000e+00 : f32
    %362 = vector.shape_cast %147 : vector<1x256xi1> to vector<1x256xi1>
    %363 = vector.broadcast %362 : vector<1x256xi1> to vector<4x256xi1>
    %364 = vector.broadcast %cst_110 : f32 to vector<4x256xf32>
    %365 = arith.select %363, %361, %364 : vector<4x256xi1>, vector<4x256xf32>
    %c18 = arith.constant 18 : index
    %c0_111 = arith.constant 0 : index
    %c0_112 = arith.constant 0 : index
    %366 = vector.load %arg6[%c18, %c0_111, %c0_112] : memref<49x4x1xf32, #tpu.memory_space<vmem>>, vector<1x4x1xf32>
    %367 = vector.shape_cast %366 : vector<1x4x1xf32> to vector<4x1xf32>
    %368 = vector.broadcast %367 : vector<4x1xf32> to vector<4x256xf32>
    %369 = arith.mulf %365, %368 : vector<4x256xf32>
    %370 = arith.addf %360, %369 : vector<4x256xf32>
    %c14_i32 = arith.constant 14 : i32
    %371 = tpu.dynamic_rotate %178 by %c14_i32 dim 1 : vector<4x256xf32>, i32 -> vector<4x256xf32>
    %cst_113 = arith.constant 0.000000e+00 : f32
    %372 = vector.shape_cast %148 : vector<1x256xi1> to vector<1x256xi1>
    %373 = vector.broadcast %372 : vector<1x256xi1> to vector<4x256xi1>
    %374 = vector.broadcast %cst_113 : f32 to vector<4x256xf32>
    %375 = arith.select %373, %371, %374 : vector<4x256xi1>, vector<4x256xf32>
    %c19 = arith.constant 19 : index
    %c0_114 = arith.constant 0 : index
    %c0_115 = arith.constant 0 : index
    %376 = vector.load %arg6[%c19, %c0_114, %c0_115] : memref<49x4x1xf32, #tpu.memory_space<vmem>>, vector<1x4x1xf32>
    %377 = vector.shape_cast %376 : vector<1x4x1xf32> to vector<4x1xf32>
    %378 = vector.broadcast %377 : vector<4x1xf32> to vector<4x256xf32>
    %379 = arith.mulf %375, %378 : vector<4x256xf32>
    %380 = arith.addf %370, %379 : vector<4x256xf32>
    %c13_i32 = arith.constant 13 : i32
    %381 = tpu.dynamic_rotate %178 by %c13_i32 dim 1 : vector<4x256xf32>, i32 -> vector<4x256xf32>
    %cst_116 = arith.constant 0.000000e+00 : f32
    %382 = vector.shape_cast %149 : vector<1x256xi1> to vector<1x256xi1>
    %383 = vector.broadcast %382 : vector<1x256xi1> to vector<4x256xi1>
    %384 = vector.broadcast %cst_116 : f32 to vector<4x256xf32>
    %385 = arith.select %383, %381, %384 : vector<4x256xi1>, vector<4x256xf32>
    %c20 = arith.constant 20 : index
    %c0_117 = arith.constant 0 : index
    %c0_118 = arith.constant 0 : index
    %386 = vector.load %arg6[%c20, %c0_117, %c0_118] : memref<49x4x1xf32, #tpu.memory_space<vmem>>, vector<1x4x1xf32>
    %387 = vector.shape_cast %386 : vector<1x4x1xf32> to vector<4x1xf32>
    %388 = vector.broadcast %387 : vector<4x1xf32> to vector<4x256xf32>
    %389 = arith.mulf %385, %388 : vector<4x256xf32>
    %390 = arith.addf %380, %389 : vector<4x256xf32>
    %c3_i32_119 = arith.constant 3 : i32
    %391 = tpu.dynamic_rotate %178 by %c3_i32_119 dim 1 : vector<4x256xf32>, i32 -> vector<4x256xf32>
    %cst_120 = arith.constant 0.000000e+00 : f32
    %392 = vector.shape_cast %150 : vector<1x256xi1> to vector<1x256xi1>
    %393 = vector.broadcast %392 : vector<1x256xi1> to vector<4x256xi1>
    %394 = vector.broadcast %cst_120 : f32 to vector<4x256xf32>
    %395 = arith.select %393, %391, %394 : vector<4x256xi1>, vector<4x256xf32>
    %c21 = arith.constant 21 : index
    %c0_121 = arith.constant 0 : index
    %c0_122 = arith.constant 0 : index
    %396 = vector.load %arg6[%c21, %c0_121, %c0_122] : memref<49x4x1xf32, #tpu.memory_space<vmem>>, vector<1x4x1xf32>
    %397 = vector.shape_cast %396 : vector<1x4x1xf32> to vector<4x1xf32>
    %398 = vector.broadcast %397 : vector<4x1xf32> to vector<4x256xf32>
    %399 = arith.mulf %395, %398 : vector<4x256xf32>
    %400 = arith.addf %390, %399 : vector<4x256xf32>
    %c2_i32_123 = arith.constant 2 : i32
    %401 = tpu.dynamic_rotate %178 by %c2_i32_123 dim 1 : vector<4x256xf32>, i32 -> vector<4x256xf32>
    %cst_124 = arith.constant 0.000000e+00 : f32
    %402 = vector.shape_cast %151 : vector<1x256xi1> to vector<1x256xi1>
    %403 = vector.broadcast %402 : vector<1x256xi1> to vector<4x256xi1>
    %404 = vector.broadcast %cst_124 : f32 to vector<4x256xf32>
    %405 = arith.select %403, %401, %404 : vector<4x256xi1>, vector<4x256xf32>
    %c22 = arith.constant 22 : index
    %c0_125 = arith.constant 0 : index
    %c0_126 = arith.constant 0 : index
    %406 = vector.load %arg6[%c22, %c0_125, %c0_126] : memref<49x4x1xf32, #tpu.memory_space<vmem>>, vector<1x4x1xf32>
    %407 = vector.shape_cast %406 : vector<1x4x1xf32> to vector<4x1xf32>
    %408 = vector.broadcast %407 : vector<4x1xf32> to vector<4x256xf32>
    %409 = arith.mulf %405, %408 : vector<4x256xf32>
    %410 = arith.addf %400, %409 : vector<4x256xf32>
    %c1_i32_127 = arith.constant 1 : i32
    %411 = tpu.dynamic_rotate %178 by %c1_i32_127 dim 1 : vector<4x256xf32>, i32 -> vector<4x256xf32>
    %cst_128 = arith.constant 0.000000e+00 : f32
    %412 = vector.shape_cast %152 : vector<1x256xi1> to vector<1x256xi1>
    %413 = vector.broadcast %412 : vector<1x256xi1> to vector<4x256xi1>
    %414 = vector.broadcast %cst_128 : f32 to vector<4x256xf32>
    %415 = arith.select %413, %411, %414 : vector<4x256xi1>, vector<4x256xf32>
    %c23 = arith.constant 23 : index
    %c0_129 = arith.constant 0 : index
    %c0_130 = arith.constant 0 : index
    %416 = vector.load %arg6[%c23, %c0_129, %c0_130] : memref<49x4x1xf32, #tpu.memory_space<vmem>>, vector<1x4x1xf32>
    %417 = vector.shape_cast %416 : vector<1x4x1xf32> to vector<4x1xf32>
    %418 = vector.broadcast %417 : vector<4x1xf32> to vector<4x256xf32>
    %419 = arith.mulf %415, %418 : vector<4x256xf32>
    %420 = arith.addf %410, %419 : vector<4x256xf32>
    %c24 = arith.constant 24 : index
    %c0_131 = arith.constant 0 : index
    %c0_132 = arith.constant 0 : index
    %421 = vector.load %arg6[%c24, %c0_131, %c0_132] : memref<49x4x1xf32, #tpu.memory_space<vmem>>, vector<1x4x1xf32>
    %422 = vector.shape_cast %421 : vector<1x4x1xf32> to vector<4x1xf32>
    %423 = vector.broadcast %422 : vector<4x1xf32> to vector<4x256xf32>
    %424 = arith.mulf %178, %423 : vector<4x256xf32>
    %425 = arith.addf %420, %424 : vector<4x256xf32>
    %c255_i32 = arith.constant 255 : i32
    %426 = tpu.dynamic_rotate %178 by %c255_i32 dim 1 : vector<4x256xf32>, i32 -> vector<4x256xf32>
    %cst_133 = arith.constant 0.000000e+00 : f32
    %427 = vector.shape_cast %153 : vector<1x256xi1> to vector<1x256xi1>
    %428 = vector.broadcast %427 : vector<1x256xi1> to vector<4x256xi1>
    %429 = vector.broadcast %cst_133 : f32 to vector<4x256xf32>
    %430 = arith.select %428, %426, %429 : vector<4x256xi1>, vector<4x256xf32>
    %c25 = arith.constant 25 : index
    %c0_134 = arith.constant 0 : index
    %c0_135 = arith.constant 0 : index
    %431 = vector.load %arg6[%c25, %c0_134, %c0_135] : memref<49x4x1xf32, #tpu.memory_space<vmem>>, vector<1x4x1xf32>
    %432 = vector.shape_cast %431 : vector<1x4x1xf32> to vector<4x1xf32>
    %433 = vector.broadcast %432 : vector<4x1xf32> to vector<4x256xf32>
    %434 = arith.mulf %430, %433 : vector<4x256xf32>
    %435 = arith.addf %425, %434 : vector<4x256xf32>
    %c254_i32 = arith.constant 254 : i32
    %436 = tpu.dynamic_rotate %178 by %c254_i32 dim 1 : vector<4x256xf32>, i32 -> vector<4x256xf32>
    %cst_136 = arith.constant 0.000000e+00 : f32
    %437 = vector.shape_cast %154 : vector<1x256xi1> to vector<1x256xi1>
    %438 = vector.broadcast %437 : vector<1x256xi1> to vector<4x256xi1>
    %439 = vector.broadcast %cst_136 : f32 to vector<4x256xf32>
    %440 = arith.select %438, %436, %439 : vector<4x256xi1>, vector<4x256xf32>
    %c26 = arith.constant 26 : index
    %c0_137 = arith.constant 0 : index
    %c0_138 = arith.constant 0 : index
    %441 = vector.load %arg6[%c26, %c0_137, %c0_138] : memref<49x4x1xf32, #tpu.memory_space<vmem>>, vector<1x4x1xf32>
    %442 = vector.shape_cast %441 : vector<1x4x1xf32> to vector<4x1xf32>
    %443 = vector.broadcast %442 : vector<4x1xf32> to vector<4x256xf32>
    %444 = arith.mulf %440, %443 : vector<4x256xf32>
    %445 = arith.addf %435, %444 : vector<4x256xf32>
    %c253_i32 = arith.constant 253 : i32
    %446 = tpu.dynamic_rotate %178 by %c253_i32 dim 1 : vector<4x256xf32>, i32 -> vector<4x256xf32>
    %cst_139 = arith.constant 0.000000e+00 : f32
    %447 = vector.shape_cast %155 : vector<1x256xi1> to vector<1x256xi1>
    %448 = vector.broadcast %447 : vector<1x256xi1> to vector<4x256xi1>
    %449 = vector.broadcast %cst_139 : f32 to vector<4x256xf32>
    %450 = arith.select %448, %446, %449 : vector<4x256xi1>, vector<4x256xf32>
    %c27 = arith.constant 27 : index
    %c0_140 = arith.constant 0 : index
    %c0_141 = arith.constant 0 : index
    %451 = vector.load %arg6[%c27, %c0_140, %c0_141] : memref<49x4x1xf32, #tpu.memory_space<vmem>>, vector<1x4x1xf32>
    %452 = vector.shape_cast %451 : vector<1x4x1xf32> to vector<4x1xf32>
    %453 = vector.broadcast %452 : vector<4x1xf32> to vector<4x256xf32>
    %454 = arith.mulf %450, %453 : vector<4x256xf32>
    %455 = arith.addf %445, %454 : vector<4x256xf32>
    %c243_i32 = arith.constant 243 : i32
    %456 = tpu.dynamic_rotate %178 by %c243_i32 dim 1 : vector<4x256xf32>, i32 -> vector<4x256xf32>
    %cst_142 = arith.constant 0.000000e+00 : f32
    %457 = vector.shape_cast %156 : vector<1x256xi1> to vector<1x256xi1>
    %458 = vector.broadcast %457 : vector<1x256xi1> to vector<4x256xi1>
    %459 = vector.broadcast %cst_142 : f32 to vector<4x256xf32>
    %460 = arith.select %458, %456, %459 : vector<4x256xi1>, vector<4x256xf32>
    %c28 = arith.constant 28 : index
    %c0_143 = arith.constant 0 : index
    %c0_144 = arith.constant 0 : index
    %461 = vector.load %arg6[%c28, %c0_143, %c0_144] : memref<49x4x1xf32, #tpu.memory_space<vmem>>, vector<1x4x1xf32>
    %462 = vector.shape_cast %461 : vector<1x4x1xf32> to vector<4x1xf32>
    %463 = vector.broadcast %462 : vector<4x1xf32> to vector<4x256xf32>
    %464 = arith.mulf %460, %463 : vector<4x256xf32>
    %465 = arith.addf %455, %464 : vector<4x256xf32>
    %c242_i32 = arith.constant 242 : i32
    %466 = tpu.dynamic_rotate %178 by %c242_i32 dim 1 : vector<4x256xf32>, i32 -> vector<4x256xf32>
    %cst_145 = arith.constant 0.000000e+00 : f32
    %467 = vector.shape_cast %157 : vector<1x256xi1> to vector<1x256xi1>
    %468 = vector.broadcast %467 : vector<1x256xi1> to vector<4x256xi1>
    %469 = vector.broadcast %cst_145 : f32 to vector<4x256xf32>
    %470 = arith.select %468, %466, %469 : vector<4x256xi1>, vector<4x256xf32>
    %c29 = arith.constant 29 : index
    %c0_146 = arith.constant 0 : index
    %c0_147 = arith.constant 0 : index
    %471 = vector.load %arg6[%c29, %c0_146, %c0_147] : memref<49x4x1xf32, #tpu.memory_space<vmem>>, vector<1x4x1xf32>
    %472 = vector.shape_cast %471 : vector<1x4x1xf32> to vector<4x1xf32>
    %473 = vector.broadcast %472 : vector<4x1xf32> to vector<4x256xf32>
    %474 = arith.mulf %470, %473 : vector<4x256xf32>
    %475 = arith.addf %465, %474 : vector<4x256xf32>
    %c241_i32 = arith.constant 241 : i32
    %476 = tpu.dynamic_rotate %178 by %c241_i32 dim 1 : vector<4x256xf32>, i32 -> vector<4x256xf32>
    %cst_148 = arith.constant 0.000000e+00 : f32
    %477 = vector.shape_cast %158 : vector<1x256xi1> to vector<1x256xi1>
    %478 = vector.broadcast %477 : vector<1x256xi1> to vector<4x256xi1>
    %479 = vector.broadcast %cst_148 : f32 to vector<4x256xf32>
    %480 = arith.select %478, %476, %479 : vector<4x256xi1>, vector<4x256xf32>
    %c30 = arith.constant 30 : index
    %c0_149 = arith.constant 0 : index
    %c0_150 = arith.constant 0 : index
    %481 = vector.load %arg6[%c30, %c0_149, %c0_150] : memref<49x4x1xf32, #tpu.memory_space<vmem>>, vector<1x4x1xf32>
    %482 = vector.shape_cast %481 : vector<1x4x1xf32> to vector<4x1xf32>
    %483 = vector.broadcast %482 : vector<4x1xf32> to vector<4x256xf32>
    %484 = arith.mulf %480, %483 : vector<4x256xf32>
    %485 = arith.addf %475, %484 : vector<4x256xf32>
    %c240_i32 = arith.constant 240 : i32
    %486 = tpu.dynamic_rotate %178 by %c240_i32 dim 1 : vector<4x256xf32>, i32 -> vector<4x256xf32>
    %cst_151 = arith.constant 0.000000e+00 : f32
    %487 = vector.shape_cast %159 : vector<1x256xi1> to vector<1x256xi1>
    %488 = vector.broadcast %487 : vector<1x256xi1> to vector<4x256xi1>
    %489 = vector.broadcast %cst_151 : f32 to vector<4x256xf32>
    %490 = arith.select %488, %486, %489 : vector<4x256xi1>, vector<4x256xf32>
    %c31 = arith.constant 31 : index
    %c0_152 = arith.constant 0 : index
    %c0_153 = arith.constant 0 : index
    %491 = vector.load %arg6[%c31, %c0_152, %c0_153] : memref<49x4x1xf32, #tpu.memory_space<vmem>>, vector<1x4x1xf32>
    %492 = vector.shape_cast %491 : vector<1x4x1xf32> to vector<4x1xf32>
    %493 = vector.broadcast %492 : vector<4x1xf32> to vector<4x256xf32>
    %494 = arith.mulf %490, %493 : vector<4x256xf32>
    %495 = arith.addf %485, %494 : vector<4x256xf32>
    %c239_i32 = arith.constant 239 : i32
    %496 = tpu.dynamic_rotate %178 by %c239_i32 dim 1 : vector<4x256xf32>, i32 -> vector<4x256xf32>
    %cst_154 = arith.constant 0.000000e+00 : f32
    %497 = vector.shape_cast %160 : vector<1x256xi1> to vector<1x256xi1>
    %498 = vector.broadcast %497 : vector<1x256xi1> to vector<4x256xi1>
    %499 = vector.broadcast %cst_154 : f32 to vector<4x256xf32>
    %500 = arith.select %498, %496, %499 : vector<4x256xi1>, vector<4x256xf32>
    %c32 = arith.constant 32 : index
    %c0_155 = arith.constant 0 : index
    %c0_156 = arith.constant 0 : index
    %501 = vector.load %arg6[%c32, %c0_155, %c0_156] : memref<49x4x1xf32, #tpu.memory_space<vmem>>, vector<1x4x1xf32>
    %502 = vector.shape_cast %501 : vector<1x4x1xf32> to vector<4x1xf32>
    %503 = vector.broadcast %502 : vector<4x1xf32> to vector<4x256xf32>
    %504 = arith.mulf %500, %503 : vector<4x256xf32>
    %505 = arith.addf %495, %504 : vector<4x256xf32>
    %c238_i32 = arith.constant 238 : i32
    %506 = tpu.dynamic_rotate %178 by %c238_i32 dim 1 : vector<4x256xf32>, i32 -> vector<4x256xf32>
    %cst_157 = arith.constant 0.000000e+00 : f32
    %507 = vector.shape_cast %161 : vector<1x256xi1> to vector<1x256xi1>
    %508 = vector.broadcast %507 : vector<1x256xi1> to vector<4x256xi1>
    %509 = vector.broadcast %cst_157 : f32 to vector<4x256xf32>
    %510 = arith.select %508, %506, %509 : vector<4x256xi1>, vector<4x256xf32>
    %c33 = arith.constant 33 : index
    %c0_158 = arith.constant 0 : index
    %c0_159 = arith.constant 0 : index
    %511 = vector.load %arg6[%c33, %c0_158, %c0_159] : memref<49x4x1xf32, #tpu.memory_space<vmem>>, vector<1x4x1xf32>
    %512 = vector.shape_cast %511 : vector<1x4x1xf32> to vector<4x1xf32>
    %513 = vector.broadcast %512 : vector<4x1xf32> to vector<4x256xf32>
    %514 = arith.mulf %510, %513 : vector<4x256xf32>
    %515 = arith.addf %505, %514 : vector<4x256xf32>
    %c237_i32 = arith.constant 237 : i32
    %516 = tpu.dynamic_rotate %178 by %c237_i32 dim 1 : vector<4x256xf32>, i32 -> vector<4x256xf32>
    %cst_160 = arith.constant 0.000000e+00 : f32
    %517 = vector.shape_cast %162 : vector<1x256xi1> to vector<1x256xi1>
    %518 = vector.broadcast %517 : vector<1x256xi1> to vector<4x256xi1>
    %519 = vector.broadcast %cst_160 : f32 to vector<4x256xf32>
    %520 = arith.select %518, %516, %519 : vector<4x256xi1>, vector<4x256xf32>
    %c34 = arith.constant 34 : index
    %c0_161 = arith.constant 0 : index
    %c0_162 = arith.constant 0 : index
    %521 = vector.load %arg6[%c34, %c0_161, %c0_162] : memref<49x4x1xf32, #tpu.memory_space<vmem>>, vector<1x4x1xf32>
    %522 = vector.shape_cast %521 : vector<1x4x1xf32> to vector<4x1xf32>
    %523 = vector.broadcast %522 : vector<4x1xf32> to vector<4x256xf32>
    %524 = arith.mulf %520, %523 : vector<4x256xf32>
    %525 = arith.addf %515, %524 : vector<4x256xf32>
    %c227_i32 = arith.constant 227 : i32
    %526 = tpu.dynamic_rotate %178 by %c227_i32 dim 1 : vector<4x256xf32>, i32 -> vector<4x256xf32>
    %cst_163 = arith.constant 0.000000e+00 : f32
    %527 = vector.shape_cast %163 : vector<1x256xi1> to vector<1x256xi1>
    %528 = vector.broadcast %527 : vector<1x256xi1> to vector<4x256xi1>
    %529 = vector.broadcast %cst_163 : f32 to vector<4x256xf32>
    %530 = arith.select %528, %526, %529 : vector<4x256xi1>, vector<4x256xf32>
    %c35 = arith.constant 35 : index
    %c0_164 = arith.constant 0 : index
    %c0_165 = arith.constant 0 : index
    %531 = vector.load %arg6[%c35, %c0_164, %c0_165] : memref<49x4x1xf32, #tpu.memory_space<vmem>>, vector<1x4x1xf32>
    %532 = vector.shape_cast %531 : vector<1x4x1xf32> to vector<4x1xf32>
    %533 = vector.broadcast %532 : vector<4x1xf32> to vector<4x256xf32>
    %534 = arith.mulf %530, %533 : vector<4x256xf32>
    %535 = arith.addf %525, %534 : vector<4x256xf32>
    %c226_i32 = arith.constant 226 : i32
    %536 = tpu.dynamic_rotate %178 by %c226_i32 dim 1 : vector<4x256xf32>, i32 -> vector<4x256xf32>
    %cst_166 = arith.constant 0.000000e+00 : f32
    %537 = vector.shape_cast %164 : vector<1x256xi1> to vector<1x256xi1>
    %538 = vector.broadcast %537 : vector<1x256xi1> to vector<4x256xi1>
    %539 = vector.broadcast %cst_166 : f32 to vector<4x256xf32>
    %540 = arith.select %538, %536, %539 : vector<4x256xi1>, vector<4x256xf32>
    %c36 = arith.constant 36 : index
    %c0_167 = arith.constant 0 : index
    %c0_168 = arith.constant 0 : index
    %541 = vector.load %arg6[%c36, %c0_167, %c0_168] : memref<49x4x1xf32, #tpu.memory_space<vmem>>, vector<1x4x1xf32>
    %542 = vector.shape_cast %541 : vector<1x4x1xf32> to vector<4x1xf32>
    %543 = vector.broadcast %542 : vector<4x1xf32> to vector<4x256xf32>
    %544 = arith.mulf %540, %543 : vector<4x256xf32>
    %545 = arith.addf %535, %544 : vector<4x256xf32>
    %c225_i32 = arith.constant 225 : i32
    %546 = tpu.dynamic_rotate %178 by %c225_i32 dim 1 : vector<4x256xf32>, i32 -> vector<4x256xf32>
    %cst_169 = arith.constant 0.000000e+00 : f32
    %547 = vector.shape_cast %165 : vector<1x256xi1> to vector<1x256xi1>
    %548 = vector.broadcast %547 : vector<1x256xi1> to vector<4x256xi1>
    %549 = vector.broadcast %cst_169 : f32 to vector<4x256xf32>
    %550 = arith.select %548, %546, %549 : vector<4x256xi1>, vector<4x256xf32>
    %c37 = arith.constant 37 : index
    %c0_170 = arith.constant 0 : index
    %c0_171 = arith.constant 0 : index
    %551 = vector.load %arg6[%c37, %c0_170, %c0_171] : memref<49x4x1xf32, #tpu.memory_space<vmem>>, vector<1x4x1xf32>
    %552 = vector.shape_cast %551 : vector<1x4x1xf32> to vector<4x1xf32>
    %553 = vector.broadcast %552 : vector<4x1xf32> to vector<4x256xf32>
    %554 = arith.mulf %550, %553 : vector<4x256xf32>
    %555 = arith.addf %545, %554 : vector<4x256xf32>
    %c224_i32 = arith.constant 224 : i32
    %556 = tpu.dynamic_rotate %178 by %c224_i32 dim 1 : vector<4x256xf32>, i32 -> vector<4x256xf32>
    %cst_172 = arith.constant 0.000000e+00 : f32
    %557 = vector.shape_cast %166 : vector<1x256xi1> to vector<1x256xi1>
    %558 = vector.broadcast %557 : vector<1x256xi1> to vector<4x256xi1>
    %559 = vector.broadcast %cst_172 : f32 to vector<4x256xf32>
    %560 = arith.select %558, %556, %559 : vector<4x256xi1>, vector<4x256xf32>
    %c38 = arith.constant 38 : index
    %c0_173 = arith.constant 0 : index
    %c0_174 = arith.constant 0 : index
    %561 = vector.load %arg6[%c38, %c0_173, %c0_174] : memref<49x4x1xf32, #tpu.memory_space<vmem>>, vector<1x4x1xf32>
    %562 = vector.shape_cast %561 : vector<1x4x1xf32> to vector<4x1xf32>
    %563 = vector.broadcast %562 : vector<4x1xf32> to vector<4x256xf32>
    %564 = arith.mulf %560, %563 : vector<4x256xf32>
    %565 = arith.addf %555, %564 : vector<4x256xf32>
    %c223_i32 = arith.constant 223 : i32
    %566 = tpu.dynamic_rotate %178 by %c223_i32 dim 1 : vector<4x256xf32>, i32 -> vector<4x256xf32>
    %cst_175 = arith.constant 0.000000e+00 : f32
    %567 = vector.shape_cast %167 : vector<1x256xi1> to vector<1x256xi1>
    %568 = vector.broadcast %567 : vector<1x256xi1> to vector<4x256xi1>
    %569 = vector.broadcast %cst_175 : f32 to vector<4x256xf32>
    %570 = arith.select %568, %566, %569 : vector<4x256xi1>, vector<4x256xf32>
    %c39 = arith.constant 39 : index
    %c0_176 = arith.constant 0 : index
    %c0_177 = arith.constant 0 : index
    %571 = vector.load %arg6[%c39, %c0_176, %c0_177] : memref<49x4x1xf32, #tpu.memory_space<vmem>>, vector<1x4x1xf32>
    %572 = vector.shape_cast %571 : vector<1x4x1xf32> to vector<4x1xf32>
    %573 = vector.broadcast %572 : vector<4x1xf32> to vector<4x256xf32>
    %574 = arith.mulf %570, %573 : vector<4x256xf32>
    %575 = arith.addf %565, %574 : vector<4x256xf32>
    %c222_i32 = arith.constant 222 : i32
    %576 = tpu.dynamic_rotate %178 by %c222_i32 dim 1 : vector<4x256xf32>, i32 -> vector<4x256xf32>
    %cst_178 = arith.constant 0.000000e+00 : f32
    %577 = vector.shape_cast %168 : vector<1x256xi1> to vector<1x256xi1>
    %578 = vector.broadcast %577 : vector<1x256xi1> to vector<4x256xi1>
    %579 = vector.broadcast %cst_178 : f32 to vector<4x256xf32>
    %580 = arith.select %578, %576, %579 : vector<4x256xi1>, vector<4x256xf32>
    %c40 = arith.constant 40 : index
    %c0_179 = arith.constant 0 : index
    %c0_180 = arith.constant 0 : index
    %581 = vector.load %arg6[%c40, %c0_179, %c0_180] : memref<49x4x1xf32, #tpu.memory_space<vmem>>, vector<1x4x1xf32>
    %582 = vector.shape_cast %581 : vector<1x4x1xf32> to vector<4x1xf32>
    %583 = vector.broadcast %582 : vector<4x1xf32> to vector<4x256xf32>
    %584 = arith.mulf %580, %583 : vector<4x256xf32>
    %585 = arith.addf %575, %584 : vector<4x256xf32>
    %c221_i32 = arith.constant 221 : i32
    %586 = tpu.dynamic_rotate %178 by %c221_i32 dim 1 : vector<4x256xf32>, i32 -> vector<4x256xf32>
    %cst_181 = arith.constant 0.000000e+00 : f32
    %587 = vector.shape_cast %169 : vector<1x256xi1> to vector<1x256xi1>
    %588 = vector.broadcast %587 : vector<1x256xi1> to vector<4x256xi1>
    %589 = vector.broadcast %cst_181 : f32 to vector<4x256xf32>
    %590 = arith.select %588, %586, %589 : vector<4x256xi1>, vector<4x256xf32>
    %c41 = arith.constant 41 : index
    %c0_182 = arith.constant 0 : index
    %c0_183 = arith.constant 0 : index
    %591 = vector.load %arg6[%c41, %c0_182, %c0_183] : memref<49x4x1xf32, #tpu.memory_space<vmem>>, vector<1x4x1xf32>
    %592 = vector.shape_cast %591 : vector<1x4x1xf32> to vector<4x1xf32>
    %593 = vector.broadcast %592 : vector<4x1xf32> to vector<4x256xf32>
    %594 = arith.mulf %590, %593 : vector<4x256xf32>
    %595 = arith.addf %585, %594 : vector<4x256xf32>
    %c211_i32 = arith.constant 211 : i32
    %596 = tpu.dynamic_rotate %178 by %c211_i32 dim 1 : vector<4x256xf32>, i32 -> vector<4x256xf32>
    %cst_184 = arith.constant 0.000000e+00 : f32
    %597 = vector.shape_cast %170 : vector<1x256xi1> to vector<1x256xi1>
    %598 = vector.broadcast %597 : vector<1x256xi1> to vector<4x256xi1>
    %599 = vector.broadcast %cst_184 : f32 to vector<4x256xf32>
    %600 = arith.select %598, %596, %599 : vector<4x256xi1>, vector<4x256xf32>
    %c42 = arith.constant 42 : index
    %c0_185 = arith.constant 0 : index
    %c0_186 = arith.constant 0 : index
    %601 = vector.load %arg6[%c42, %c0_185, %c0_186] : memref<49x4x1xf32, #tpu.memory_space<vmem>>, vector<1x4x1xf32>
    %602 = vector.shape_cast %601 : vector<1x4x1xf32> to vector<4x1xf32>
    %603 = vector.broadcast %602 : vector<4x1xf32> to vector<4x256xf32>
    %604 = arith.mulf %600, %603 : vector<4x256xf32>
    %605 = arith.addf %595, %604 : vector<4x256xf32>
    %c210_i32 = arith.constant 210 : i32
    %606 = tpu.dynamic_rotate %178 by %c210_i32 dim 1 : vector<4x256xf32>, i32 -> vector<4x256xf32>
    %cst_187 = arith.constant 0.000000e+00 : f32
    %607 = vector.shape_cast %171 : vector<1x256xi1> to vector<1x256xi1>
    %608 = vector.broadcast %607 : vector<1x256xi1> to vector<4x256xi1>
    %609 = vector.broadcast %cst_187 : f32 to vector<4x256xf32>
    %610 = arith.select %608, %606, %609 : vector<4x256xi1>, vector<4x256xf32>
    %c43 = arith.constant 43 : index
    %c0_188 = arith.constant 0 : index
    %c0_189 = arith.constant 0 : index
    %611 = vector.load %arg6[%c43, %c0_188, %c0_189] : memref<49x4x1xf32, #tpu.memory_space<vmem>>, vector<1x4x1xf32>
    %612 = vector.shape_cast %611 : vector<1x4x1xf32> to vector<4x1xf32>
    %613 = vector.broadcast %612 : vector<4x1xf32> to vector<4x256xf32>
    %614 = arith.mulf %610, %613 : vector<4x256xf32>
    %615 = arith.addf %605, %614 : vector<4x256xf32>
    %c209_i32 = arith.constant 209 : i32
    %616 = tpu.dynamic_rotate %178 by %c209_i32 dim 1 : vector<4x256xf32>, i32 -> vector<4x256xf32>
    %cst_190 = arith.constant 0.000000e+00 : f32
    %617 = vector.shape_cast %172 : vector<1x256xi1> to vector<1x256xi1>
    %618 = vector.broadcast %617 : vector<1x256xi1> to vector<4x256xi1>
    %619 = vector.broadcast %cst_190 : f32 to vector<4x256xf32>
    %620 = arith.select %618, %616, %619 : vector<4x256xi1>, vector<4x256xf32>
    %c44 = arith.constant 44 : index
    %c0_191 = arith.constant 0 : index
    %c0_192 = arith.constant 0 : index
    %621 = vector.load %arg6[%c44, %c0_191, %c0_192] : memref<49x4x1xf32, #tpu.memory_space<vmem>>, vector<1x4x1xf32>
    %622 = vector.shape_cast %621 : vector<1x4x1xf32> to vector<4x1xf32>
    %623 = vector.broadcast %622 : vector<4x1xf32> to vector<4x256xf32>
    %624 = arith.mulf %620, %623 : vector<4x256xf32>
    %625 = arith.addf %615, %624 : vector<4x256xf32>
    %c208_i32 = arith.constant 208 : i32
    %626 = tpu.dynamic_rotate %178 by %c208_i32 dim 1 : vector<4x256xf32>, i32 -> vector<4x256xf32>
    %cst_193 = arith.constant 0.000000e+00 : f32
    %627 = vector.shape_cast %173 : vector<1x256xi1> to vector<1x256xi1>
    %628 = vector.broadcast %627 : vector<1x256xi1> to vector<4x256xi1>
    %629 = vector.broadcast %cst_193 : f32 to vector<4x256xf32>
    %630 = arith.select %628, %626, %629 : vector<4x256xi1>, vector<4x256xf32>
    %c45 = arith.constant 45 : index
    %c0_194 = arith.constant 0 : index
    %c0_195 = arith.constant 0 : index
    %631 = vector.load %arg6[%c45, %c0_194, %c0_195] : memref<49x4x1xf32, #tpu.memory_space<vmem>>, vector<1x4x1xf32>
    %632 = vector.shape_cast %631 : vector<1x4x1xf32> to vector<4x1xf32>
    %633 = vector.broadcast %632 : vector<4x1xf32> to vector<4x256xf32>
    %634 = arith.mulf %630, %633 : vector<4x256xf32>
    %635 = arith.addf %625, %634 : vector<4x256xf32>
    %c207_i32 = arith.constant 207 : i32
    %636 = tpu.dynamic_rotate %178 by %c207_i32 dim 1 : vector<4x256xf32>, i32 -> vector<4x256xf32>
    %cst_196 = arith.constant 0.000000e+00 : f32
    %637 = vector.shape_cast %174 : vector<1x256xi1> to vector<1x256xi1>
    %638 = vector.broadcast %637 : vector<1x256xi1> to vector<4x256xi1>
    %639 = vector.broadcast %cst_196 : f32 to vector<4x256xf32>
    %640 = arith.select %638, %636, %639 : vector<4x256xi1>, vector<4x256xf32>
    %c46 = arith.constant 46 : index
    %c0_197 = arith.constant 0 : index
    %c0_198 = arith.constant 0 : index
    %641 = vector.load %arg6[%c46, %c0_197, %c0_198] : memref<49x4x1xf32, #tpu.memory_space<vmem>>, vector<1x4x1xf32>
    %642 = vector.shape_cast %641 : vector<1x4x1xf32> to vector<4x1xf32>
    %643 = vector.broadcast %642 : vector<4x1xf32> to vector<4x256xf32>
    %644 = arith.mulf %640, %643 : vector<4x256xf32>
    %645 = arith.addf %635, %644 : vector<4x256xf32>
    %c206_i32 = arith.constant 206 : i32
    %646 = tpu.dynamic_rotate %178 by %c206_i32 dim 1 : vector<4x256xf32>, i32 -> vector<4x256xf32>
    %cst_199 = arith.constant 0.000000e+00 : f32
    %647 = vector.shape_cast %175 : vector<1x256xi1> to vector<1x256xi1>
    %648 = vector.broadcast %647 : vector<1x256xi1> to vector<4x256xi1>
    %649 = vector.broadcast %cst_199 : f32 to vector<4x256xf32>
    %650 = arith.select %648, %646, %649 : vector<4x256xi1>, vector<4x256xf32>
    %c47 = arith.constant 47 : index
    %c0_200 = arith.constant 0 : index
    %c0_201 = arith.constant 0 : index
    %651 = vector.load %arg6[%c47, %c0_200, %c0_201] : memref<49x4x1xf32, #tpu.memory_space<vmem>>, vector<1x4x1xf32>
    %652 = vector.shape_cast %651 : vector<1x4x1xf32> to vector<4x1xf32>
    %653 = vector.broadcast %652 : vector<4x1xf32> to vector<4x256xf32>
    %654 = arith.mulf %650, %653 : vector<4x256xf32>
    %655 = arith.addf %645, %654 : vector<4x256xf32>
    %c205_i32 = arith.constant 205 : i32
    %656 = tpu.dynamic_rotate %178 by %c205_i32 dim 1 : vector<4x256xf32>, i32 -> vector<4x256xf32>
    %cst_202 = arith.constant 0.000000e+00 : f32
    %657 = vector.shape_cast %176 : vector<1x256xi1> to vector<1x256xi1>
    %658 = vector.broadcast %657 : vector<1x256xi1> to vector<4x256xi1>
    %659 = vector.broadcast %cst_202 : f32 to vector<4x256xf32>
    %660 = arith.select %658, %656, %659 : vector<4x256xi1>, vector<4x256xf32>
    %c48 = arith.constant 48 : index
    %c0_203 = arith.constant 0 : index
    %c0_204 = arith.constant 0 : index
    %661 = vector.load %arg6[%c48, %c0_203, %c0_204] : memref<49x4x1xf32, #tpu.memory_space<vmem>>, vector<1x4x1xf32>
    %662 = vector.shape_cast %661 : vector<1x4x1xf32> to vector<4x1xf32>
    %663 = vector.broadcast %662 : vector<4x1xf32> to vector<4x256xf32>
    %664 = arith.mulf %660, %663 : vector<4x256xf32>
    %665 = arith.addf %655, %664 : vector<4x256xf32>
    %666 = vector.broadcast %179 : vector<4x1xf32> to vector<4x256xf32>
    %667 = arith.addf %665, %666 : vector<4x256xf32>
    %c0_205 = arith.constant 0 : index
    %c0_206 = arith.constant 0 : index
    %c0_207 = arith.constant 0 : index
    %668 = vector.load %arg1[%c0_205, %c0_206, %c0_207] : memref<1x4x256xf32, #tpu.memory_space<vmem>>, vector<1x4x256xf32>
    %669 = vector.shape_cast %668 : vector<1x4x256xf32> to vector<4x256xf32>
    %c0_208 = arith.constant 0 : index
    %c0_209 = arith.constant 0 : index
    %670 = vector.load %arg5[%c0_208, %c0_209] : memref<4x1xf32, #tpu.memory_space<vmem>>, vector<4x1xf32>
    %cst_210 = arith.constant 0.000000e+00 : f32
    %671 = vector.broadcast %cst_210 : f32 to vector<4x256xf32>
    %c51_i32_211 = arith.constant 51 : i32
    %672 = tpu.dynamic_rotate %669 by %c51_i32_211 dim 1 : vector<4x256xf32>, i32 -> vector<4x256xf32>
    %cst_212 = arith.constant 0.000000e+00 : f32
    %673 = vector.shape_cast %129 : vector<1x256xi1> to vector<1x256xi1>
    %674 = vector.broadcast %673 : vector<1x256xi1> to vector<4x256xi1>
    %675 = vector.broadcast %cst_212 : f32 to vector<4x256xf32>
    %676 = arith.select %674, %672, %675 : vector<4x256xi1>, vector<4x256xf32>
    %c0_213 = arith.constant 0 : index
    %c0_214 = arith.constant 0 : index
    %c0_215 = arith.constant 0 : index
    %677 = vector.load %arg4[%c0_213, %c0_214, %c0_215] : memref<49x4x1xf32, #tpu.memory_space<vmem>>, vector<1x4x1xf32>
    %678 = vector.shape_cast %677 : vector<1x4x1xf32> to vector<4x1xf32>
    %679 = vector.broadcast %678 : vector<4x1xf32> to vector<4x256xf32>
    %680 = arith.mulf %676, %679 : vector<4x256xf32>
    %681 = arith.addf %671, %680 : vector<4x256xf32>
    %c50_i32_216 = arith.constant 50 : i32
    %682 = tpu.dynamic_rotate %669 by %c50_i32_216 dim 1 : vector<4x256xf32>, i32 -> vector<4x256xf32>
    %cst_217 = arith.constant 0.000000e+00 : f32
    %683 = vector.shape_cast %130 : vector<1x256xi1> to vector<1x256xi1>
    %684 = vector.broadcast %683 : vector<1x256xi1> to vector<4x256xi1>
    %685 = vector.broadcast %cst_217 : f32 to vector<4x256xf32>
    %686 = arith.select %684, %682, %685 : vector<4x256xi1>, vector<4x256xf32>
    %c1_218 = arith.constant 1 : index
    %c0_219 = arith.constant 0 : index
    %c0_220 = arith.constant 0 : index
    %687 = vector.load %arg4[%c1_218, %c0_219, %c0_220] : memref<49x4x1xf32, #tpu.memory_space<vmem>>, vector<1x4x1xf32>
    %688 = vector.shape_cast %687 : vector<1x4x1xf32> to vector<4x1xf32>
    %689 = vector.broadcast %688 : vector<4x1xf32> to vector<4x256xf32>
    %690 = arith.mulf %686, %689 : vector<4x256xf32>
    %691 = arith.addf %681, %690 : vector<4x256xf32>
    %c49_i32_221 = arith.constant 49 : i32
    %692 = tpu.dynamic_rotate %669 by %c49_i32_221 dim 1 : vector<4x256xf32>, i32 -> vector<4x256xf32>
    %cst_222 = arith.constant 0.000000e+00 : f32
    %693 = vector.shape_cast %131 : vector<1x256xi1> to vector<1x256xi1>
    %694 = vector.broadcast %693 : vector<1x256xi1> to vector<4x256xi1>
    %695 = vector.broadcast %cst_222 : f32 to vector<4x256xf32>
    %696 = arith.select %694, %692, %695 : vector<4x256xi1>, vector<4x256xf32>
    %c2_223 = arith.constant 2 : index
    %c0_224 = arith.constant 0 : index
    %c0_225 = arith.constant 0 : index
    %697 = vector.load %arg4[%c2_223, %c0_224, %c0_225] : memref<49x4x1xf32, #tpu.memory_space<vmem>>, vector<1x4x1xf32>
    %698 = vector.shape_cast %697 : vector<1x4x1xf32> to vector<4x1xf32>
    %699 = vector.broadcast %698 : vector<4x1xf32> to vector<4x256xf32>
    %700 = arith.mulf %696, %699 : vector<4x256xf32>
    %701 = arith.addf %691, %700 : vector<4x256xf32>
    %c48_i32_226 = arith.constant 48 : i32
    %702 = tpu.dynamic_rotate %669 by %c48_i32_226 dim 1 : vector<4x256xf32>, i32 -> vector<4x256xf32>
    %cst_227 = arith.constant 0.000000e+00 : f32
    %703 = vector.shape_cast %132 : vector<1x256xi1> to vector<1x256xi1>
    %704 = vector.broadcast %703 : vector<1x256xi1> to vector<4x256xi1>
    %705 = vector.broadcast %cst_227 : f32 to vector<4x256xf32>
    %706 = arith.select %704, %702, %705 : vector<4x256xi1>, vector<4x256xf32>
    %c3_228 = arith.constant 3 : index
    %c0_229 = arith.constant 0 : index
    %c0_230 = arith.constant 0 : index
    %707 = vector.load %arg4[%c3_228, %c0_229, %c0_230] : memref<49x4x1xf32, #tpu.memory_space<vmem>>, vector<1x4x1xf32>
    %708 = vector.shape_cast %707 : vector<1x4x1xf32> to vector<4x1xf32>
    %709 = vector.broadcast %708 : vector<4x1xf32> to vector<4x256xf32>
    %710 = arith.mulf %706, %709 : vector<4x256xf32>
    %711 = arith.addf %701, %710 : vector<4x256xf32>
    %c47_i32_231 = arith.constant 47 : i32
    %712 = tpu.dynamic_rotate %669 by %c47_i32_231 dim 1 : vector<4x256xf32>, i32 -> vector<4x256xf32>
    %cst_232 = arith.constant 0.000000e+00 : f32
    %713 = vector.shape_cast %133 : vector<1x256xi1> to vector<1x256xi1>
    %714 = vector.broadcast %713 : vector<1x256xi1> to vector<4x256xi1>
    %715 = vector.broadcast %cst_232 : f32 to vector<4x256xf32>
    %716 = arith.select %714, %712, %715 : vector<4x256xi1>, vector<4x256xf32>
    %c4_233 = arith.constant 4 : index
    %c0_234 = arith.constant 0 : index
    %c0_235 = arith.constant 0 : index
    %717 = vector.load %arg4[%c4_233, %c0_234, %c0_235] : memref<49x4x1xf32, #tpu.memory_space<vmem>>, vector<1x4x1xf32>
    %718 = vector.shape_cast %717 : vector<1x4x1xf32> to vector<4x1xf32>
    %719 = vector.broadcast %718 : vector<4x1xf32> to vector<4x256xf32>
    %720 = arith.mulf %716, %719 : vector<4x256xf32>
    %721 = arith.addf %711, %720 : vector<4x256xf32>
    %c46_i32_236 = arith.constant 46 : i32
    %722 = tpu.dynamic_rotate %669 by %c46_i32_236 dim 1 : vector<4x256xf32>, i32 -> vector<4x256xf32>
    %cst_237 = arith.constant 0.000000e+00 : f32
    %723 = vector.shape_cast %134 : vector<1x256xi1> to vector<1x256xi1>
    %724 = vector.broadcast %723 : vector<1x256xi1> to vector<4x256xi1>
    %725 = vector.broadcast %cst_237 : f32 to vector<4x256xf32>
    %726 = arith.select %724, %722, %725 : vector<4x256xi1>, vector<4x256xf32>
    %c5_238 = arith.constant 5 : index
    %c0_239 = arith.constant 0 : index
    %c0_240 = arith.constant 0 : index
    %727 = vector.load %arg4[%c5_238, %c0_239, %c0_240] : memref<49x4x1xf32, #tpu.memory_space<vmem>>, vector<1x4x1xf32>
    %728 = vector.shape_cast %727 : vector<1x4x1xf32> to vector<4x1xf32>
    %729 = vector.broadcast %728 : vector<4x1xf32> to vector<4x256xf32>
    %730 = arith.mulf %726, %729 : vector<4x256xf32>
    %731 = arith.addf %721, %730 : vector<4x256xf32>
    %c45_i32_241 = arith.constant 45 : i32
    %732 = tpu.dynamic_rotate %669 by %c45_i32_241 dim 1 : vector<4x256xf32>, i32 -> vector<4x256xf32>
    %cst_242 = arith.constant 0.000000e+00 : f32
    %733 = vector.shape_cast %135 : vector<1x256xi1> to vector<1x256xi1>
    %734 = vector.broadcast %733 : vector<1x256xi1> to vector<4x256xi1>
    %735 = vector.broadcast %cst_242 : f32 to vector<4x256xf32>
    %736 = arith.select %734, %732, %735 : vector<4x256xi1>, vector<4x256xf32>
    %c6_243 = arith.constant 6 : index
    %c0_244 = arith.constant 0 : index
    %c0_245 = arith.constant 0 : index
    %737 = vector.load %arg4[%c6_243, %c0_244, %c0_245] : memref<49x4x1xf32, #tpu.memory_space<vmem>>, vector<1x4x1xf32>
    %738 = vector.shape_cast %737 : vector<1x4x1xf32> to vector<4x1xf32>
    %739 = vector.broadcast %738 : vector<4x1xf32> to vector<4x256xf32>
    %740 = arith.mulf %736, %739 : vector<4x256xf32>
    %741 = arith.addf %731, %740 : vector<4x256xf32>
    %c35_i32_246 = arith.constant 35 : i32
    %742 = tpu.dynamic_rotate %669 by %c35_i32_246 dim 1 : vector<4x256xf32>, i32 -> vector<4x256xf32>
    %cst_247 = arith.constant 0.000000e+00 : f32
    %743 = vector.shape_cast %136 : vector<1x256xi1> to vector<1x256xi1>
    %744 = vector.broadcast %743 : vector<1x256xi1> to vector<4x256xi1>
    %745 = vector.broadcast %cst_247 : f32 to vector<4x256xf32>
    %746 = arith.select %744, %742, %745 : vector<4x256xi1>, vector<4x256xf32>
    %c7_248 = arith.constant 7 : index
    %c0_249 = arith.constant 0 : index
    %c0_250 = arith.constant 0 : index
    %747 = vector.load %arg4[%c7_248, %c0_249, %c0_250] : memref<49x4x1xf32, #tpu.memory_space<vmem>>, vector<1x4x1xf32>
    %748 = vector.shape_cast %747 : vector<1x4x1xf32> to vector<4x1xf32>
    %749 = vector.broadcast %748 : vector<4x1xf32> to vector<4x256xf32>
    %750 = arith.mulf %746, %749 : vector<4x256xf32>
    %751 = arith.addf %741, %750 : vector<4x256xf32>
    %c34_i32_251 = arith.constant 34 : i32
    %752 = tpu.dynamic_rotate %669 by %c34_i32_251 dim 1 : vector<4x256xf32>, i32 -> vector<4x256xf32>
    %cst_252 = arith.constant 0.000000e+00 : f32
    %753 = vector.shape_cast %137 : vector<1x256xi1> to vector<1x256xi1>
    %754 = vector.broadcast %753 : vector<1x256xi1> to vector<4x256xi1>
    %755 = vector.broadcast %cst_252 : f32 to vector<4x256xf32>
    %756 = arith.select %754, %752, %755 : vector<4x256xi1>, vector<4x256xf32>
    %c8_253 = arith.constant 8 : index
    %c0_254 = arith.constant 0 : index
    %c0_255 = arith.constant 0 : index
    %757 = vector.load %arg4[%c8_253, %c0_254, %c0_255] : memref<49x4x1xf32, #tpu.memory_space<vmem>>, vector<1x4x1xf32>
    %758 = vector.shape_cast %757 : vector<1x4x1xf32> to vector<4x1xf32>
    %759 = vector.broadcast %758 : vector<4x1xf32> to vector<4x256xf32>
    %760 = arith.mulf %756, %759 : vector<4x256xf32>
    %761 = arith.addf %751, %760 : vector<4x256xf32>
    %c33_i32_256 = arith.constant 33 : i32
    %762 = tpu.dynamic_rotate %669 by %c33_i32_256 dim 1 : vector<4x256xf32>, i32 -> vector<4x256xf32>
    %cst_257 = arith.constant 0.000000e+00 : f32
    %763 = vector.shape_cast %138 : vector<1x256xi1> to vector<1x256xi1>
    %764 = vector.broadcast %763 : vector<1x256xi1> to vector<4x256xi1>
    %765 = vector.broadcast %cst_257 : f32 to vector<4x256xf32>
    %766 = arith.select %764, %762, %765 : vector<4x256xi1>, vector<4x256xf32>
    %c9_258 = arith.constant 9 : index
    %c0_259 = arith.constant 0 : index
    %c0_260 = arith.constant 0 : index
    %767 = vector.load %arg4[%c9_258, %c0_259, %c0_260] : memref<49x4x1xf32, #tpu.memory_space<vmem>>, vector<1x4x1xf32>
    %768 = vector.shape_cast %767 : vector<1x4x1xf32> to vector<4x1xf32>
    %769 = vector.broadcast %768 : vector<4x1xf32> to vector<4x256xf32>
    %770 = arith.mulf %766, %769 : vector<4x256xf32>
    %771 = arith.addf %761, %770 : vector<4x256xf32>
    %c32_i32_261 = arith.constant 32 : i32
    %772 = tpu.dynamic_rotate %669 by %c32_i32_261 dim 1 : vector<4x256xf32>, i32 -> vector<4x256xf32>
    %cst_262 = arith.constant 0.000000e+00 : f32
    %773 = vector.shape_cast %139 : vector<1x256xi1> to vector<1x256xi1>
    %774 = vector.broadcast %773 : vector<1x256xi1> to vector<4x256xi1>
    %775 = vector.broadcast %cst_262 : f32 to vector<4x256xf32>
    %776 = arith.select %774, %772, %775 : vector<4x256xi1>, vector<4x256xf32>
    %c10_263 = arith.constant 10 : index
    %c0_264 = arith.constant 0 : index
    %c0_265 = arith.constant 0 : index
    %777 = vector.load %arg4[%c10_263, %c0_264, %c0_265] : memref<49x4x1xf32, #tpu.memory_space<vmem>>, vector<1x4x1xf32>
    %778 = vector.shape_cast %777 : vector<1x4x1xf32> to vector<4x1xf32>
    %779 = vector.broadcast %778 : vector<4x1xf32> to vector<4x256xf32>
    %780 = arith.mulf %776, %779 : vector<4x256xf32>
    %781 = arith.addf %771, %780 : vector<4x256xf32>
    %c31_i32_266 = arith.constant 31 : i32
    %782 = tpu.dynamic_rotate %669 by %c31_i32_266 dim 1 : vector<4x256xf32>, i32 -> vector<4x256xf32>
    %cst_267 = arith.constant 0.000000e+00 : f32
    %783 = vector.shape_cast %140 : vector<1x256xi1> to vector<1x256xi1>
    %784 = vector.broadcast %783 : vector<1x256xi1> to vector<4x256xi1>
    %785 = vector.broadcast %cst_267 : f32 to vector<4x256xf32>
    %786 = arith.select %784, %782, %785 : vector<4x256xi1>, vector<4x256xf32>
    %c11_268 = arith.constant 11 : index
    %c0_269 = arith.constant 0 : index
    %c0_270 = arith.constant 0 : index
    %787 = vector.load %arg4[%c11_268, %c0_269, %c0_270] : memref<49x4x1xf32, #tpu.memory_space<vmem>>, vector<1x4x1xf32>
    %788 = vector.shape_cast %787 : vector<1x4x1xf32> to vector<4x1xf32>
    %789 = vector.broadcast %788 : vector<4x1xf32> to vector<4x256xf32>
    %790 = arith.mulf %786, %789 : vector<4x256xf32>
    %791 = arith.addf %781, %790 : vector<4x256xf32>
    %c30_i32_271 = arith.constant 30 : i32
    %792 = tpu.dynamic_rotate %669 by %c30_i32_271 dim 1 : vector<4x256xf32>, i32 -> vector<4x256xf32>
    %cst_272 = arith.constant 0.000000e+00 : f32
    %793 = vector.shape_cast %141 : vector<1x256xi1> to vector<1x256xi1>
    %794 = vector.broadcast %793 : vector<1x256xi1> to vector<4x256xi1>
    %795 = vector.broadcast %cst_272 : f32 to vector<4x256xf32>
    %796 = arith.select %794, %792, %795 : vector<4x256xi1>, vector<4x256xf32>
    %c12_273 = arith.constant 12 : index
    %c0_274 = arith.constant 0 : index
    %c0_275 = arith.constant 0 : index
    %797 = vector.load %arg4[%c12_273, %c0_274, %c0_275] : memref<49x4x1xf32, #tpu.memory_space<vmem>>, vector<1x4x1xf32>
    %798 = vector.shape_cast %797 : vector<1x4x1xf32> to vector<4x1xf32>
    %799 = vector.broadcast %798 : vector<4x1xf32> to vector<4x256xf32>
    %800 = arith.mulf %796, %799 : vector<4x256xf32>
    %801 = arith.addf %791, %800 : vector<4x256xf32>
    %c29_i32_276 = arith.constant 29 : i32
    %802 = tpu.dynamic_rotate %669 by %c29_i32_276 dim 1 : vector<4x256xf32>, i32 -> vector<4x256xf32>
    %cst_277 = arith.constant 0.000000e+00 : f32
    %803 = vector.shape_cast %142 : vector<1x256xi1> to vector<1x256xi1>
    %804 = vector.broadcast %803 : vector<1x256xi1> to vector<4x256xi1>
    %805 = vector.broadcast %cst_277 : f32 to vector<4x256xf32>
    %806 = arith.select %804, %802, %805 : vector<4x256xi1>, vector<4x256xf32>
    %c13_278 = arith.constant 13 : index
    %c0_279 = arith.constant 0 : index
    %c0_280 = arith.constant 0 : index
    %807 = vector.load %arg4[%c13_278, %c0_279, %c0_280] : memref<49x4x1xf32, #tpu.memory_space<vmem>>, vector<1x4x1xf32>
    %808 = vector.shape_cast %807 : vector<1x4x1xf32> to vector<4x1xf32>
    %809 = vector.broadcast %808 : vector<4x1xf32> to vector<4x256xf32>
    %810 = arith.mulf %806, %809 : vector<4x256xf32>
    %811 = arith.addf %801, %810 : vector<4x256xf32>
    %c19_i32_281 = arith.constant 19 : i32
    %812 = tpu.dynamic_rotate %669 by %c19_i32_281 dim 1 : vector<4x256xf32>, i32 -> vector<4x256xf32>
    %cst_282 = arith.constant 0.000000e+00 : f32
    %813 = vector.shape_cast %143 : vector<1x256xi1> to vector<1x256xi1>
    %814 = vector.broadcast %813 : vector<1x256xi1> to vector<4x256xi1>
    %815 = vector.broadcast %cst_282 : f32 to vector<4x256xf32>
    %816 = arith.select %814, %812, %815 : vector<4x256xi1>, vector<4x256xf32>
    %c14_283 = arith.constant 14 : index
    %c0_284 = arith.constant 0 : index
    %c0_285 = arith.constant 0 : index
    %817 = vector.load %arg4[%c14_283, %c0_284, %c0_285] : memref<49x4x1xf32, #tpu.memory_space<vmem>>, vector<1x4x1xf32>
    %818 = vector.shape_cast %817 : vector<1x4x1xf32> to vector<4x1xf32>
    %819 = vector.broadcast %818 : vector<4x1xf32> to vector<4x256xf32>
    %820 = arith.mulf %816, %819 : vector<4x256xf32>
    %821 = arith.addf %811, %820 : vector<4x256xf32>
    %c18_i32_286 = arith.constant 18 : i32
    %822 = tpu.dynamic_rotate %669 by %c18_i32_286 dim 1 : vector<4x256xf32>, i32 -> vector<4x256xf32>
    %cst_287 = arith.constant 0.000000e+00 : f32
    %823 = vector.shape_cast %144 : vector<1x256xi1> to vector<1x256xi1>
    %824 = vector.broadcast %823 : vector<1x256xi1> to vector<4x256xi1>
    %825 = vector.broadcast %cst_287 : f32 to vector<4x256xf32>
    %826 = arith.select %824, %822, %825 : vector<4x256xi1>, vector<4x256xf32>
    %c15_288 = arith.constant 15 : index
    %c0_289 = arith.constant 0 : index
    %c0_290 = arith.constant 0 : index
    %827 = vector.load %arg4[%c15_288, %c0_289, %c0_290] : memref<49x4x1xf32, #tpu.memory_space<vmem>>, vector<1x4x1xf32>
    %828 = vector.shape_cast %827 : vector<1x4x1xf32> to vector<4x1xf32>
    %829 = vector.broadcast %828 : vector<4x1xf32> to vector<4x256xf32>
    %830 = arith.mulf %826, %829 : vector<4x256xf32>
    %831 = arith.addf %821, %830 : vector<4x256xf32>
    %c17_i32_291 = arith.constant 17 : i32
    %832 = tpu.dynamic_rotate %669 by %c17_i32_291 dim 1 : vector<4x256xf32>, i32 -> vector<4x256xf32>
    %cst_292 = arith.constant 0.000000e+00 : f32
    %833 = vector.shape_cast %145 : vector<1x256xi1> to vector<1x256xi1>
    %834 = vector.broadcast %833 : vector<1x256xi1> to vector<4x256xi1>
    %835 = vector.broadcast %cst_292 : f32 to vector<4x256xf32>
    %836 = arith.select %834, %832, %835 : vector<4x256xi1>, vector<4x256xf32>
    %c16_293 = arith.constant 16 : index
    %c0_294 = arith.constant 0 : index
    %c0_295 = arith.constant 0 : index
    %837 = vector.load %arg4[%c16_293, %c0_294, %c0_295] : memref<49x4x1xf32, #tpu.memory_space<vmem>>, vector<1x4x1xf32>
    %838 = vector.shape_cast %837 : vector<1x4x1xf32> to vector<4x1xf32>
    %839 = vector.broadcast %838 : vector<4x1xf32> to vector<4x256xf32>
    %840 = arith.mulf %836, %839 : vector<4x256xf32>
    %841 = arith.addf %831, %840 : vector<4x256xf32>
    %c16_i32_296 = arith.constant 16 : i32
    %842 = tpu.dynamic_rotate %669 by %c16_i32_296 dim 1 : vector<4x256xf32>, i32 -> vector<4x256xf32>
    %cst_297 = arith.constant 0.000000e+00 : f32
    %843 = vector.shape_cast %146 : vector<1x256xi1> to vector<1x256xi1>
    %844 = vector.broadcast %843 : vector<1x256xi1> to vector<4x256xi1>
    %845 = vector.broadcast %cst_297 : f32 to vector<4x256xf32>
    %846 = arith.select %844, %842, %845 : vector<4x256xi1>, vector<4x256xf32>
    %c17_298 = arith.constant 17 : index
    %c0_299 = arith.constant 0 : index
    %c0_300 = arith.constant 0 : index
    %847 = vector.load %arg4[%c17_298, %c0_299, %c0_300] : memref<49x4x1xf32, #tpu.memory_space<vmem>>, vector<1x4x1xf32>
    %848 = vector.shape_cast %847 : vector<1x4x1xf32> to vector<4x1xf32>
    %849 = vector.broadcast %848 : vector<4x1xf32> to vector<4x256xf32>
    %850 = arith.mulf %846, %849 : vector<4x256xf32>
    %851 = arith.addf %841, %850 : vector<4x256xf32>
    %c15_i32_301 = arith.constant 15 : i32
    %852 = tpu.dynamic_rotate %669 by %c15_i32_301 dim 1 : vector<4x256xf32>, i32 -> vector<4x256xf32>
    %cst_302 = arith.constant 0.000000e+00 : f32
    %853 = vector.shape_cast %147 : vector<1x256xi1> to vector<1x256xi1>
    %854 = vector.broadcast %853 : vector<1x256xi1> to vector<4x256xi1>
    %855 = vector.broadcast %cst_302 : f32 to vector<4x256xf32>
    %856 = arith.select %854, %852, %855 : vector<4x256xi1>, vector<4x256xf32>
    %c18_303 = arith.constant 18 : index
    %c0_304 = arith.constant 0 : index
    %c0_305 = arith.constant 0 : index
    %857 = vector.load %arg4[%c18_303, %c0_304, %c0_305] : memref<49x4x1xf32, #tpu.memory_space<vmem>>, vector<1x4x1xf32>
    %858 = vector.shape_cast %857 : vector<1x4x1xf32> to vector<4x1xf32>
    %859 = vector.broadcast %858 : vector<4x1xf32> to vector<4x256xf32>
    %860 = arith.mulf %856, %859 : vector<4x256xf32>
    %861 = arith.addf %851, %860 : vector<4x256xf32>
    %c14_i32_306 = arith.constant 14 : i32
    %862 = tpu.dynamic_rotate %669 by %c14_i32_306 dim 1 : vector<4x256xf32>, i32 -> vector<4x256xf32>
    %cst_307 = arith.constant 0.000000e+00 : f32
    %863 = vector.shape_cast %148 : vector<1x256xi1> to vector<1x256xi1>
    %864 = vector.broadcast %863 : vector<1x256xi1> to vector<4x256xi1>
    %865 = vector.broadcast %cst_307 : f32 to vector<4x256xf32>
    %866 = arith.select %864, %862, %865 : vector<4x256xi1>, vector<4x256xf32>
    %c19_308 = arith.constant 19 : index
    %c0_309 = arith.constant 0 : index
    %c0_310 = arith.constant 0 : index
    %867 = vector.load %arg4[%c19_308, %c0_309, %c0_310] : memref<49x4x1xf32, #tpu.memory_space<vmem>>, vector<1x4x1xf32>
    %868 = vector.shape_cast %867 : vector<1x4x1xf32> to vector<4x1xf32>
    %869 = vector.broadcast %868 : vector<4x1xf32> to vector<4x256xf32>
    %870 = arith.mulf %866, %869 : vector<4x256xf32>
    %871 = arith.addf %861, %870 : vector<4x256xf32>
    %c13_i32_311 = arith.constant 13 : i32
    %872 = tpu.dynamic_rotate %669 by %c13_i32_311 dim 1 : vector<4x256xf32>, i32 -> vector<4x256xf32>
    %cst_312 = arith.constant 0.000000e+00 : f32
    %873 = vector.shape_cast %149 : vector<1x256xi1> to vector<1x256xi1>
    %874 = vector.broadcast %873 : vector<1x256xi1> to vector<4x256xi1>
    %875 = vector.broadcast %cst_312 : f32 to vector<4x256xf32>
    %876 = arith.select %874, %872, %875 : vector<4x256xi1>, vector<4x256xf32>
    %c20_313 = arith.constant 20 : index
    %c0_314 = arith.constant 0 : index
    %c0_315 = arith.constant 0 : index
    %877 = vector.load %arg4[%c20_313, %c0_314, %c0_315] : memref<49x4x1xf32, #tpu.memory_space<vmem>>, vector<1x4x1xf32>
    %878 = vector.shape_cast %877 : vector<1x4x1xf32> to vector<4x1xf32>
    %879 = vector.broadcast %878 : vector<4x1xf32> to vector<4x256xf32>
    %880 = arith.mulf %876, %879 : vector<4x256xf32>
    %881 = arith.addf %871, %880 : vector<4x256xf32>
    %c3_i32_316 = arith.constant 3 : i32
    %882 = tpu.dynamic_rotate %669 by %c3_i32_316 dim 1 : vector<4x256xf32>, i32 -> vector<4x256xf32>
    %cst_317 = arith.constant 0.000000e+00 : f32
    %883 = vector.shape_cast %150 : vector<1x256xi1> to vector<1x256xi1>
    %884 = vector.broadcast %883 : vector<1x256xi1> to vector<4x256xi1>
    %885 = vector.broadcast %cst_317 : f32 to vector<4x256xf32>
    %886 = arith.select %884, %882, %885 : vector<4x256xi1>, vector<4x256xf32>
    %c21_318 = arith.constant 21 : index
    %c0_319 = arith.constant 0 : index
    %c0_320 = arith.constant 0 : index
    %887 = vector.load %arg4[%c21_318, %c0_319, %c0_320] : memref<49x4x1xf32, #tpu.memory_space<vmem>>, vector<1x4x1xf32>
    %888 = vector.shape_cast %887 : vector<1x4x1xf32> to vector<4x1xf32>
    %889 = vector.broadcast %888 : vector<4x1xf32> to vector<4x256xf32>
    %890 = arith.mulf %886, %889 : vector<4x256xf32>
    %891 = arith.addf %881, %890 : vector<4x256xf32>
    %c2_i32_321 = arith.constant 2 : i32
    %892 = tpu.dynamic_rotate %669 by %c2_i32_321 dim 1 : vector<4x256xf32>, i32 -> vector<4x256xf32>
    %cst_322 = arith.constant 0.000000e+00 : f32
    %893 = vector.shape_cast %151 : vector<1x256xi1> to vector<1x256xi1>
    %894 = vector.broadcast %893 : vector<1x256xi1> to vector<4x256xi1>
    %895 = vector.broadcast %cst_322 : f32 to vector<4x256xf32>
    %896 = arith.select %894, %892, %895 : vector<4x256xi1>, vector<4x256xf32>
    %c22_323 = arith.constant 22 : index
    %c0_324 = arith.constant 0 : index
    %c0_325 = arith.constant 0 : index
    %897 = vector.load %arg4[%c22_323, %c0_324, %c0_325] : memref<49x4x1xf32, #tpu.memory_space<vmem>>, vector<1x4x1xf32>
    %898 = vector.shape_cast %897 : vector<1x4x1xf32> to vector<4x1xf32>
    %899 = vector.broadcast %898 : vector<4x1xf32> to vector<4x256xf32>
    %900 = arith.mulf %896, %899 : vector<4x256xf32>
    %901 = arith.addf %891, %900 : vector<4x256xf32>
    %c1_i32_326 = arith.constant 1 : i32
    %902 = tpu.dynamic_rotate %669 by %c1_i32_326 dim 1 : vector<4x256xf32>, i32 -> vector<4x256xf32>
    %cst_327 = arith.constant 0.000000e+00 : f32
    %903 = vector.shape_cast %152 : vector<1x256xi1> to vector<1x256xi1>
    %904 = vector.broadcast %903 : vector<1x256xi1> to vector<4x256xi1>
    %905 = vector.broadcast %cst_327 : f32 to vector<4x256xf32>
    %906 = arith.select %904, %902, %905 : vector<4x256xi1>, vector<4x256xf32>
    %c23_328 = arith.constant 23 : index
    %c0_329 = arith.constant 0 : index
    %c0_330 = arith.constant 0 : index
    %907 = vector.load %arg4[%c23_328, %c0_329, %c0_330] : memref<49x4x1xf32, #tpu.memory_space<vmem>>, vector<1x4x1xf32>
    %908 = vector.shape_cast %907 : vector<1x4x1xf32> to vector<4x1xf32>
    %909 = vector.broadcast %908 : vector<4x1xf32> to vector<4x256xf32>
    %910 = arith.mulf %906, %909 : vector<4x256xf32>
    %911 = arith.addf %901, %910 : vector<4x256xf32>
    %c24_331 = arith.constant 24 : index
    %c0_332 = arith.constant 0 : index
    %c0_333 = arith.constant 0 : index
    %912 = vector.load %arg4[%c24_331, %c0_332, %c0_333] : memref<49x4x1xf32, #tpu.memory_space<vmem>>, vector<1x4x1xf32>
    %913 = vector.shape_cast %912 : vector<1x4x1xf32> to vector<4x1xf32>
    %914 = vector.broadcast %913 : vector<4x1xf32> to vector<4x256xf32>
    %915 = arith.mulf %669, %914 : vector<4x256xf32>
    %916 = arith.addf %911, %915 : vector<4x256xf32>
    %c255_i32_334 = arith.constant 255 : i32
    %917 = tpu.dynamic_rotate %669 by %c255_i32_334 dim 1 : vector<4x256xf32>, i32 -> vector<4x256xf32>
    %cst_335 = arith.constant 0.000000e+00 : f32
    %918 = vector.shape_cast %153 : vector<1x256xi1> to vector<1x256xi1>
    %919 = vector.broadcast %918 : vector<1x256xi1> to vector<4x256xi1>
    %920 = vector.broadcast %cst_335 : f32 to vector<4x256xf32>
    %921 = arith.select %919, %917, %920 : vector<4x256xi1>, vector<4x256xf32>
    %c25_336 = arith.constant 25 : index
    %c0_337 = arith.constant 0 : index
    %c0_338 = arith.constant 0 : index
    %922 = vector.load %arg4[%c25_336, %c0_337, %c0_338] : memref<49x4x1xf32, #tpu.memory_space<vmem>>, vector<1x4x1xf32>
    %923 = vector.shape_cast %922 : vector<1x4x1xf32> to vector<4x1xf32>
    %924 = vector.broadcast %923 : vector<4x1xf32> to vector<4x256xf32>
    %925 = arith.mulf %921, %924 : vector<4x256xf32>
    %926 = arith.addf %916, %925 : vector<4x256xf32>
    %c254_i32_339 = arith.constant 254 : i32
    %927 = tpu.dynamic_rotate %669 by %c254_i32_339 dim 1 : vector<4x256xf32>, i32 -> vector<4x256xf32>
    %cst_340 = arith.constant 0.000000e+00 : f32
    %928 = vector.shape_cast %154 : vector<1x256xi1> to vector<1x256xi1>
    %929 = vector.broadcast %928 : vector<1x256xi1> to vector<4x256xi1>
    %930 = vector.broadcast %cst_340 : f32 to vector<4x256xf32>
    %931 = arith.select %929, %927, %930 : vector<4x256xi1>, vector<4x256xf32>
    %c26_341 = arith.constant 26 : index
    %c0_342 = arith.constant 0 : index
    %c0_343 = arith.constant 0 : index
    %932 = vector.load %arg4[%c26_341, %c0_342, %c0_343] : memref<49x4x1xf32, #tpu.memory_space<vmem>>, vector<1x4x1xf32>
    %933 = vector.shape_cast %932 : vector<1x4x1xf32> to vector<4x1xf32>
    %934 = vector.broadcast %933 : vector<4x1xf32> to vector<4x256xf32>
    %935 = arith.mulf %931, %934 : vector<4x256xf32>
    %936 = arith.addf %926, %935 : vector<4x256xf32>
    %c253_i32_344 = arith.constant 253 : i32
    %937 = tpu.dynamic_rotate %669 by %c253_i32_344 dim 1 : vector<4x256xf32>, i32 -> vector<4x256xf32>
    %cst_345 = arith.constant 0.000000e+00 : f32
    %938 = vector.shape_cast %155 : vector<1x256xi1> to vector<1x256xi1>
    %939 = vector.broadcast %938 : vector<1x256xi1> to vector<4x256xi1>
    %940 = vector.broadcast %cst_345 : f32 to vector<4x256xf32>
    %941 = arith.select %939, %937, %940 : vector<4x256xi1>, vector<4x256xf32>
    %c27_346 = arith.constant 27 : index
    %c0_347 = arith.constant 0 : index
    %c0_348 = arith.constant 0 : index
    %942 = vector.load %arg4[%c27_346, %c0_347, %c0_348] : memref<49x4x1xf32, #tpu.memory_space<vmem>>, vector<1x4x1xf32>
    %943 = vector.shape_cast %942 : vector<1x4x1xf32> to vector<4x1xf32>
    %944 = vector.broadcast %943 : vector<4x1xf32> to vector<4x256xf32>
    %945 = arith.mulf %941, %944 : vector<4x256xf32>
    %946 = arith.addf %936, %945 : vector<4x256xf32>
    %c243_i32_349 = arith.constant 243 : i32
    %947 = tpu.dynamic_rotate %669 by %c243_i32_349 dim 1 : vector<4x256xf32>, i32 -> vector<4x256xf32>
    %cst_350 = arith.constant 0.000000e+00 : f32
    %948 = vector.shape_cast %156 : vector<1x256xi1> to vector<1x256xi1>
    %949 = vector.broadcast %948 : vector<1x256xi1> to vector<4x256xi1>
    %950 = vector.broadcast %cst_350 : f32 to vector<4x256xf32>
    %951 = arith.select %949, %947, %950 : vector<4x256xi1>, vector<4x256xf32>
    %c28_351 = arith.constant 28 : index
    %c0_352 = arith.constant 0 : index
    %c0_353 = arith.constant 0 : index
    %952 = vector.load %arg4[%c28_351, %c0_352, %c0_353] : memref<49x4x1xf32, #tpu.memory_space<vmem>>, vector<1x4x1xf32>
    %953 = vector.shape_cast %952 : vector<1x4x1xf32> to vector<4x1xf32>
    %954 = vector.broadcast %953 : vector<4x1xf32> to vector<4x256xf32>
    %955 = arith.mulf %951, %954 : vector<4x256xf32>
    %956 = arith.addf %946, %955 : vector<4x256xf32>
    %c242_i32_354 = arith.constant 242 : i32
    %957 = tpu.dynamic_rotate %669 by %c242_i32_354 dim 1 : vector<4x256xf32>, i32 -> vector<4x256xf32>
    %cst_355 = arith.constant 0.000000e+00 : f32
    %958 = vector.shape_cast %157 : vector<1x256xi1> to vector<1x256xi1>
    %959 = vector.broadcast %958 : vector<1x256xi1> to vector<4x256xi1>
    %960 = vector.broadcast %cst_355 : f32 to vector<4x256xf32>
    %961 = arith.select %959, %957, %960 : vector<4x256xi1>, vector<4x256xf32>
    %c29_356 = arith.constant 29 : index
    %c0_357 = arith.constant 0 : index
    %c0_358 = arith.constant 0 : index
    %962 = vector.load %arg4[%c29_356, %c0_357, %c0_358] : memref<49x4x1xf32, #tpu.memory_space<vmem>>, vector<1x4x1xf32>
    %963 = vector.shape_cast %962 : vector<1x4x1xf32> to vector<4x1xf32>
    %964 = vector.broadcast %963 : vector<4x1xf32> to vector<4x256xf32>
    %965 = arith.mulf %961, %964 : vector<4x256xf32>
    %966 = arith.addf %956, %965 : vector<4x256xf32>
    %c241_i32_359 = arith.constant 241 : i32
    %967 = tpu.dynamic_rotate %669 by %c241_i32_359 dim 1 : vector<4x256xf32>, i32 -> vector<4x256xf32>
    %cst_360 = arith.constant 0.000000e+00 : f32
    %968 = vector.shape_cast %158 : vector<1x256xi1> to vector<1x256xi1>
    %969 = vector.broadcast %968 : vector<1x256xi1> to vector<4x256xi1>
    %970 = vector.broadcast %cst_360 : f32 to vector<4x256xf32>
    %971 = arith.select %969, %967, %970 : vector<4x256xi1>, vector<4x256xf32>
    %c30_361 = arith.constant 30 : index
    %c0_362 = arith.constant 0 : index
    %c0_363 = arith.constant 0 : index
    %972 = vector.load %arg4[%c30_361, %c0_362, %c0_363] : memref<49x4x1xf32, #tpu.memory_space<vmem>>, vector<1x4x1xf32>
    %973 = vector.shape_cast %972 : vector<1x4x1xf32> to vector<4x1xf32>
    %974 = vector.broadcast %973 : vector<4x1xf32> to vector<4x256xf32>
    %975 = arith.mulf %971, %974 : vector<4x256xf32>
    %976 = arith.addf %966, %975 : vector<4x256xf32>
    %c240_i32_364 = arith.constant 240 : i32
    %977 = tpu.dynamic_rotate %669 by %c240_i32_364 dim 1 : vector<4x256xf32>, i32 -> vector<4x256xf32>
    %cst_365 = arith.constant 0.000000e+00 : f32
    %978 = vector.shape_cast %159 : vector<1x256xi1> to vector<1x256xi1>
    %979 = vector.broadcast %978 : vector<1x256xi1> to vector<4x256xi1>
    %980 = vector.broadcast %cst_365 : f32 to vector<4x256xf32>
    %981 = arith.select %979, %977, %980 : vector<4x256xi1>, vector<4x256xf32>
    %c31_366 = arith.constant 31 : index
    %c0_367 = arith.constant 0 : index
    %c0_368 = arith.constant 0 : index
    %982 = vector.load %arg4[%c31_366, %c0_367, %c0_368] : memref<49x4x1xf32, #tpu.memory_space<vmem>>, vector<1x4x1xf32>
    %983 = vector.shape_cast %982 : vector<1x4x1xf32> to vector<4x1xf32>
    %984 = vector.broadcast %983 : vector<4x1xf32> to vector<4x256xf32>
    %985 = arith.mulf %981, %984 : vector<4x256xf32>
    %986 = arith.addf %976, %985 : vector<4x256xf32>
    %c239_i32_369 = arith.constant 239 : i32
    %987 = tpu.dynamic_rotate %669 by %c239_i32_369 dim 1 : vector<4x256xf32>, i32 -> vector<4x256xf32>
    %cst_370 = arith.constant 0.000000e+00 : f32
    %988 = vector.shape_cast %160 : vector<1x256xi1> to vector<1x256xi1>
    %989 = vector.broadcast %988 : vector<1x256xi1> to vector<4x256xi1>
    %990 = vector.broadcast %cst_370 : f32 to vector<4x256xf32>
    %991 = arith.select %989, %987, %990 : vector<4x256xi1>, vector<4x256xf32>
    %c32_371 = arith.constant 32 : index
    %c0_372 = arith.constant 0 : index
    %c0_373 = arith.constant 0 : index
    %992 = vector.load %arg4[%c32_371, %c0_372, %c0_373] : memref<49x4x1xf32, #tpu.memory_space<vmem>>, vector<1x4x1xf32>
    %993 = vector.shape_cast %992 : vector<1x4x1xf32> to vector<4x1xf32>
    %994 = vector.broadcast %993 : vector<4x1xf32> to vector<4x256xf32>
    %995 = arith.mulf %991, %994 : vector<4x256xf32>
    %996 = arith.addf %986, %995 : vector<4x256xf32>
    %c238_i32_374 = arith.constant 238 : i32
    %997 = tpu.dynamic_rotate %669 by %c238_i32_374 dim 1 : vector<4x256xf32>, i32 -> vector<4x256xf32>
    %cst_375 = arith.constant 0.000000e+00 : f32
    %998 = vector.shape_cast %161 : vector<1x256xi1> to vector<1x256xi1>
    %999 = vector.broadcast %998 : vector<1x256xi1> to vector<4x256xi1>
    %1000 = vector.broadcast %cst_375 : f32 to vector<4x256xf32>
    %1001 = arith.select %999, %997, %1000 : vector<4x256xi1>, vector<4x256xf32>
    %c33_376 = arith.constant 33 : index
    %c0_377 = arith.constant 0 : index
    %c0_378 = arith.constant 0 : index
    %1002 = vector.load %arg4[%c33_376, %c0_377, %c0_378] : memref<49x4x1xf32, #tpu.memory_space<vmem>>, vector<1x4x1xf32>
    %1003 = vector.shape_cast %1002 : vector<1x4x1xf32> to vector<4x1xf32>
    %1004 = vector.broadcast %1003 : vector<4x1xf32> to vector<4x256xf32>
    %1005 = arith.mulf %1001, %1004 : vector<4x256xf32>
    %1006 = arith.addf %996, %1005 : vector<4x256xf32>
    %c237_i32_379 = arith.constant 237 : i32
    %1007 = tpu.dynamic_rotate %669 by %c237_i32_379 dim 1 : vector<4x256xf32>, i32 -> vector<4x256xf32>
    %cst_380 = arith.constant 0.000000e+00 : f32
    %1008 = vector.shape_cast %162 : vector<1x256xi1> to vector<1x256xi1>
    %1009 = vector.broadcast %1008 : vector<1x256xi1> to vector<4x256xi1>
    %1010 = vector.broadcast %cst_380 : f32 to vector<4x256xf32>
    %1011 = arith.select %1009, %1007, %1010 : vector<4x256xi1>, vector<4x256xf32>
    %c34_381 = arith.constant 34 : index
    %c0_382 = arith.constant 0 : index
    %c0_383 = arith.constant 0 : index
    %1012 = vector.load %arg4[%c34_381, %c0_382, %c0_383] : memref<49x4x1xf32, #tpu.memory_space<vmem>>, vector<1x4x1xf32>
    %1013 = vector.shape_cast %1012 : vector<1x4x1xf32> to vector<4x1xf32>
    %1014 = vector.broadcast %1013 : vector<4x1xf32> to vector<4x256xf32>
    %1015 = arith.mulf %1011, %1014 : vector<4x256xf32>
    %1016 = arith.addf %1006, %1015 : vector<4x256xf32>
    %c227_i32_384 = arith.constant 227 : i32
    %1017 = tpu.dynamic_rotate %669 by %c227_i32_384 dim 1 : vector<4x256xf32>, i32 -> vector<4x256xf32>
    %cst_385 = arith.constant 0.000000e+00 : f32
    %1018 = vector.shape_cast %163 : vector<1x256xi1> to vector<1x256xi1>
    %1019 = vector.broadcast %1018 : vector<1x256xi1> to vector<4x256xi1>
    %1020 = vector.broadcast %cst_385 : f32 to vector<4x256xf32>
    %1021 = arith.select %1019, %1017, %1020 : vector<4x256xi1>, vector<4x256xf32>
    %c35_386 = arith.constant 35 : index
    %c0_387 = arith.constant 0 : index
    %c0_388 = arith.constant 0 : index
    %1022 = vector.load %arg4[%c35_386, %c0_387, %c0_388] : memref<49x4x1xf32, #tpu.memory_space<vmem>>, vector<1x4x1xf32>
    %1023 = vector.shape_cast %1022 : vector<1x4x1xf32> to vector<4x1xf32>
    %1024 = vector.broadcast %1023 : vector<4x1xf32> to vector<4x256xf32>
    %1025 = arith.mulf %1021, %1024 : vector<4x256xf32>
    %1026 = arith.addf %1016, %1025 : vector<4x256xf32>
    %c226_i32_389 = arith.constant 226 : i32
    %1027 = tpu.dynamic_rotate %669 by %c226_i32_389 dim 1 : vector<4x256xf32>, i32 -> vector<4x256xf32>
    %cst_390 = arith.constant 0.000000e+00 : f32
    %1028 = vector.shape_cast %164 : vector<1x256xi1> to vector<1x256xi1>
    %1029 = vector.broadcast %1028 : vector<1x256xi1> to vector<4x256xi1>
    %1030 = vector.broadcast %cst_390 : f32 to vector<4x256xf32>
    %1031 = arith.select %1029, %1027, %1030 : vector<4x256xi1>, vector<4x256xf32>
    %c36_391 = arith.constant 36 : index
    %c0_392 = arith.constant 0 : index
    %c0_393 = arith.constant 0 : index
    %1032 = vector.load %arg4[%c36_391, %c0_392, %c0_393] : memref<49x4x1xf32, #tpu.memory_space<vmem>>, vector<1x4x1xf32>
    %1033 = vector.shape_cast %1032 : vector<1x4x1xf32> to vector<4x1xf32>
    %1034 = vector.broadcast %1033 : vector<4x1xf32> to vector<4x256xf32>
    %1035 = arith.mulf %1031, %1034 : vector<4x256xf32>
    %1036 = arith.addf %1026, %1035 : vector<4x256xf32>
    %c225_i32_394 = arith.constant 225 : i32
    %1037 = tpu.dynamic_rotate %669 by %c225_i32_394 dim 1 : vector<4x256xf32>, i32 -> vector<4x256xf32>
    %cst_395 = arith.constant 0.000000e+00 : f32
    %1038 = vector.shape_cast %165 : vector<1x256xi1> to vector<1x256xi1>
    %1039 = vector.broadcast %1038 : vector<1x256xi1> to vector<4x256xi1>
    %1040 = vector.broadcast %cst_395 : f32 to vector<4x256xf32>
    %1041 = arith.select %1039, %1037, %1040 : vector<4x256xi1>, vector<4x256xf32>
    %c37_396 = arith.constant 37 : index
    %c0_397 = arith.constant 0 : index
    %c0_398 = arith.constant 0 : index
    %1042 = vector.load %arg4[%c37_396, %c0_397, %c0_398] : memref<49x4x1xf32, #tpu.memory_space<vmem>>, vector<1x4x1xf32>
    %1043 = vector.shape_cast %1042 : vector<1x4x1xf32> to vector<4x1xf32>
    %1044 = vector.broadcast %1043 : vector<4x1xf32> to vector<4x256xf32>
    %1045 = arith.mulf %1041, %1044 : vector<4x256xf32>
    %1046 = arith.addf %1036, %1045 : vector<4x256xf32>
    %c224_i32_399 = arith.constant 224 : i32
    %1047 = tpu.dynamic_rotate %669 by %c224_i32_399 dim 1 : vector<4x256xf32>, i32 -> vector<4x256xf32>
    %cst_400 = arith.constant 0.000000e+00 : f32
    %1048 = vector.shape_cast %166 : vector<1x256xi1> to vector<1x256xi1>
    %1049 = vector.broadcast %1048 : vector<1x256xi1> to vector<4x256xi1>
    %1050 = vector.broadcast %cst_400 : f32 to vector<4x256xf32>
    %1051 = arith.select %1049, %1047, %1050 : vector<4x256xi1>, vector<4x256xf32>
    %c38_401 = arith.constant 38 : index
    %c0_402 = arith.constant 0 : index
    %c0_403 = arith.constant 0 : index
    %1052 = vector.load %arg4[%c38_401, %c0_402, %c0_403] : memref<49x4x1xf32, #tpu.memory_space<vmem>>, vector<1x4x1xf32>
    %1053 = vector.shape_cast %1052 : vector<1x4x1xf32> to vector<4x1xf32>
    %1054 = vector.broadcast %1053 : vector<4x1xf32> to vector<4x256xf32>
    %1055 = arith.mulf %1051, %1054 : vector<4x256xf32>
    %1056 = arith.addf %1046, %1055 : vector<4x256xf32>
    %c223_i32_404 = arith.constant 223 : i32
    %1057 = tpu.dynamic_rotate %669 by %c223_i32_404 dim 1 : vector<4x256xf32>, i32 -> vector<4x256xf32>
    %cst_405 = arith.constant 0.000000e+00 : f32
    %1058 = vector.shape_cast %167 : vector<1x256xi1> to vector<1x256xi1>
    %1059 = vector.broadcast %1058 : vector<1x256xi1> to vector<4x256xi1>
    %1060 = vector.broadcast %cst_405 : f32 to vector<4x256xf32>
    %1061 = arith.select %1059, %1057, %1060 : vector<4x256xi1>, vector<4x256xf32>
    %c39_406 = arith.constant 39 : index
    %c0_407 = arith.constant 0 : index
    %c0_408 = arith.constant 0 : index
    %1062 = vector.load %arg4[%c39_406, %c0_407, %c0_408] : memref<49x4x1xf32, #tpu.memory_space<vmem>>, vector<1x4x1xf32>
    %1063 = vector.shape_cast %1062 : vector<1x4x1xf32> to vector<4x1xf32>
    %1064 = vector.broadcast %1063 : vector<4x1xf32> to vector<4x256xf32>
    %1065 = arith.mulf %1061, %1064 : vector<4x256xf32>
    %1066 = arith.addf %1056, %1065 : vector<4x256xf32>
    %c222_i32_409 = arith.constant 222 : i32
    %1067 = tpu.dynamic_rotate %669 by %c222_i32_409 dim 1 : vector<4x256xf32>, i32 -> vector<4x256xf32>
    %cst_410 = arith.constant 0.000000e+00 : f32
    %1068 = vector.shape_cast %168 : vector<1x256xi1> to vector<1x256xi1>
    %1069 = vector.broadcast %1068 : vector<1x256xi1> to vector<4x256xi1>
    %1070 = vector.broadcast %cst_410 : f32 to vector<4x256xf32>
    %1071 = arith.select %1069, %1067, %1070 : vector<4x256xi1>, vector<4x256xf32>
    %c40_411 = arith.constant 40 : index
    %c0_412 = arith.constant 0 : index
    %c0_413 = arith.constant 0 : index
    %1072 = vector.load %arg4[%c40_411, %c0_412, %c0_413] : memref<49x4x1xf32, #tpu.memory_space<vmem>>, vector<1x4x1xf32>
    %1073 = vector.shape_cast %1072 : vector<1x4x1xf32> to vector<4x1xf32>
    %1074 = vector.broadcast %1073 : vector<4x1xf32> to vector<4x256xf32>
    %1075 = arith.mulf %1071, %1074 : vector<4x256xf32>
    %1076 = arith.addf %1066, %1075 : vector<4x256xf32>
    %c221_i32_414 = arith.constant 221 : i32
    %1077 = tpu.dynamic_rotate %669 by %c221_i32_414 dim 1 : vector<4x256xf32>, i32 -> vector<4x256xf32>
    %cst_415 = arith.constant 0.000000e+00 : f32
    %1078 = vector.shape_cast %169 : vector<1x256xi1> to vector<1x256xi1>
    %1079 = vector.broadcast %1078 : vector<1x256xi1> to vector<4x256xi1>
    %1080 = vector.broadcast %cst_415 : f32 to vector<4x256xf32>
    %1081 = arith.select %1079, %1077, %1080 : vector<4x256xi1>, vector<4x256xf32>
    %c41_416 = arith.constant 41 : index
    %c0_417 = arith.constant 0 : index
    %c0_418 = arith.constant 0 : index
    %1082 = vector.load %arg4[%c41_416, %c0_417, %c0_418] : memref<49x4x1xf32, #tpu.memory_space<vmem>>, vector<1x4x1xf32>
    %1083 = vector.shape_cast %1082 : vector<1x4x1xf32> to vector<4x1xf32>
    %1084 = vector.broadcast %1083 : vector<4x1xf32> to vector<4x256xf32>
    %1085 = arith.mulf %1081, %1084 : vector<4x256xf32>
    %1086 = arith.addf %1076, %1085 : vector<4x256xf32>
    %c211_i32_419 = arith.constant 211 : i32
    %1087 = tpu.dynamic_rotate %669 by %c211_i32_419 dim 1 : vector<4x256xf32>, i32 -> vector<4x256xf32>
    %cst_420 = arith.constant 0.000000e+00 : f32
    %1088 = vector.shape_cast %170 : vector<1x256xi1> to vector<1x256xi1>
    %1089 = vector.broadcast %1088 : vector<1x256xi1> to vector<4x256xi1>
    %1090 = vector.broadcast %cst_420 : f32 to vector<4x256xf32>
    %1091 = arith.select %1089, %1087, %1090 : vector<4x256xi1>, vector<4x256xf32>
    %c42_421 = arith.constant 42 : index
    %c0_422 = arith.constant 0 : index
    %c0_423 = arith.constant 0 : index
    %1092 = vector.load %arg4[%c42_421, %c0_422, %c0_423] : memref<49x4x1xf32, #tpu.memory_space<vmem>>, vector<1x4x1xf32>
    %1093 = vector.shape_cast %1092 : vector<1x4x1xf32> to vector<4x1xf32>
    %1094 = vector.broadcast %1093 : vector<4x1xf32> to vector<4x256xf32>
    %1095 = arith.mulf %1091, %1094 : vector<4x256xf32>
    %1096 = arith.addf %1086, %1095 : vector<4x256xf32>
    %c210_i32_424 = arith.constant 210 : i32
    %1097 = tpu.dynamic_rotate %669 by %c210_i32_424 dim 1 : vector<4x256xf32>, i32 -> vector<4x256xf32>
    %cst_425 = arith.constant 0.000000e+00 : f32
    %1098 = vector.shape_cast %171 : vector<1x256xi1> to vector<1x256xi1>
    %1099 = vector.broadcast %1098 : vector<1x256xi1> to vector<4x256xi1>
    %1100 = vector.broadcast %cst_425 : f32 to vector<4x256xf32>
    %1101 = arith.select %1099, %1097, %1100 : vector<4x256xi1>, vector<4x256xf32>
    %c43_426 = arith.constant 43 : index
    %c0_427 = arith.constant 0 : index
    %c0_428 = arith.constant 0 : index
    %1102 = vector.load %arg4[%c43_426, %c0_427, %c0_428] : memref<49x4x1xf32, #tpu.memory_space<vmem>>, vector<1x4x1xf32>
    %1103 = vector.shape_cast %1102 : vector<1x4x1xf32> to vector<4x1xf32>
    %1104 = vector.broadcast %1103 : vector<4x1xf32> to vector<4x256xf32>
    %1105 = arith.mulf %1101, %1104 : vector<4x256xf32>
    %1106 = arith.addf %1096, %1105 : vector<4x256xf32>
    %c209_i32_429 = arith.constant 209 : i32
    %1107 = tpu.dynamic_rotate %669 by %c209_i32_429 dim 1 : vector<4x256xf32>, i32 -> vector<4x256xf32>
    %cst_430 = arith.constant 0.000000e+00 : f32
    %1108 = vector.shape_cast %172 : vector<1x256xi1> to vector<1x256xi1>
    %1109 = vector.broadcast %1108 : vector<1x256xi1> to vector<4x256xi1>
    %1110 = vector.broadcast %cst_430 : f32 to vector<4x256xf32>
    %1111 = arith.select %1109, %1107, %1110 : vector<4x256xi1>, vector<4x256xf32>
    %c44_431 = arith.constant 44 : index
    %c0_432 = arith.constant 0 : index
    %c0_433 = arith.constant 0 : index
    %1112 = vector.load %arg4[%c44_431, %c0_432, %c0_433] : memref<49x4x1xf32, #tpu.memory_space<vmem>>, vector<1x4x1xf32>
    %1113 = vector.shape_cast %1112 : vector<1x4x1xf32> to vector<4x1xf32>
    %1114 = vector.broadcast %1113 : vector<4x1xf32> to vector<4x256xf32>
    %1115 = arith.mulf %1111, %1114 : vector<4x256xf32>
    %1116 = arith.addf %1106, %1115 : vector<4x256xf32>
    %c208_i32_434 = arith.constant 208 : i32
    %1117 = tpu.dynamic_rotate %669 by %c208_i32_434 dim 1 : vector<4x256xf32>, i32 -> vector<4x256xf32>
    %cst_435 = arith.constant 0.000000e+00 : f32
    %1118 = vector.shape_cast %173 : vector<1x256xi1> to vector<1x256xi1>
    %1119 = vector.broadcast %1118 : vector<1x256xi1> to vector<4x256xi1>
    %1120 = vector.broadcast %cst_435 : f32 to vector<4x256xf32>
    %1121 = arith.select %1119, %1117, %1120 : vector<4x256xi1>, vector<4x256xf32>
    %c45_436 = arith.constant 45 : index
    %c0_437 = arith.constant 0 : index
    %c0_438 = arith.constant 0 : index
    %1122 = vector.load %arg4[%c45_436, %c0_437, %c0_438] : memref<49x4x1xf32, #tpu.memory_space<vmem>>, vector<1x4x1xf32>
    %1123 = vector.shape_cast %1122 : vector<1x4x1xf32> to vector<4x1xf32>
    %1124 = vector.broadcast %1123 : vector<4x1xf32> to vector<4x256xf32>
    %1125 = arith.mulf %1121, %1124 : vector<4x256xf32>
    %1126 = arith.addf %1116, %1125 : vector<4x256xf32>
    %c207_i32_439 = arith.constant 207 : i32
    %1127 = tpu.dynamic_rotate %669 by %c207_i32_439 dim 1 : vector<4x256xf32>, i32 -> vector<4x256xf32>
    %cst_440 = arith.constant 0.000000e+00 : f32
    %1128 = vector.shape_cast %174 : vector<1x256xi1> to vector<1x256xi1>
    %1129 = vector.broadcast %1128 : vector<1x256xi1> to vector<4x256xi1>
    %1130 = vector.broadcast %cst_440 : f32 to vector<4x256xf32>
    %1131 = arith.select %1129, %1127, %1130 : vector<4x256xi1>, vector<4x256xf32>
    %c46_441 = arith.constant 46 : index
    %c0_442 = arith.constant 0 : index
    %c0_443 = arith.constant 0 : index
    %1132 = vector.load %arg4[%c46_441, %c0_442, %c0_443] : memref<49x4x1xf32, #tpu.memory_space<vmem>>, vector<1x4x1xf32>
    %1133 = vector.shape_cast %1132 : vector<1x4x1xf32> to vector<4x1xf32>
    %1134 = vector.broadcast %1133 : vector<4x1xf32> to vector<4x256xf32>
    %1135 = arith.mulf %1131, %1134 : vector<4x256xf32>
    %1136 = arith.addf %1126, %1135 : vector<4x256xf32>
    %c206_i32_444 = arith.constant 206 : i32
    %1137 = tpu.dynamic_rotate %669 by %c206_i32_444 dim 1 : vector<4x256xf32>, i32 -> vector<4x256xf32>
    %cst_445 = arith.constant 0.000000e+00 : f32
    %1138 = vector.shape_cast %175 : vector<1x256xi1> to vector<1x256xi1>
    %1139 = vector.broadcast %1138 : vector<1x256xi1> to vector<4x256xi1>
    %1140 = vector.broadcast %cst_445 : f32 to vector<4x256xf32>
    %1141 = arith.select %1139, %1137, %1140 : vector<4x256xi1>, vector<4x256xf32>
    %c47_446 = arith.constant 47 : index
    %c0_447 = arith.constant 0 : index
    %c0_448 = arith.constant 0 : index
    %1142 = vector.load %arg4[%c47_446, %c0_447, %c0_448] : memref<49x4x1xf32, #tpu.memory_space<vmem>>, vector<1x4x1xf32>
    %1143 = vector.shape_cast %1142 : vector<1x4x1xf32> to vector<4x1xf32>
    %1144 = vector.broadcast %1143 : vector<4x1xf32> to vector<4x256xf32>
    %1145 = arith.mulf %1141, %1144 : vector<4x256xf32>
    %1146 = arith.addf %1136, %1145 : vector<4x256xf32>
    %c205_i32_449 = arith.constant 205 : i32
    %1147 = tpu.dynamic_rotate %669 by %c205_i32_449 dim 1 : vector<4x256xf32>, i32 -> vector<4x256xf32>
    %cst_450 = arith.constant 0.000000e+00 : f32
    %1148 = vector.shape_cast %176 : vector<1x256xi1> to vector<1x256xi1>
    %1149 = vector.broadcast %1148 : vector<1x256xi1> to vector<4x256xi1>
    %1150 = vector.broadcast %cst_450 : f32 to vector<4x256xf32>
    %1151 = arith.select %1149, %1147, %1150 : vector<4x256xi1>, vector<4x256xf32>
    %c48_451 = arith.constant 48 : index
    %c0_452 = arith.constant 0 : index
    %c0_453 = arith.constant 0 : index
    %1152 = vector.load %arg4[%c48_451, %c0_452, %c0_453] : memref<49x4x1xf32, #tpu.memory_space<vmem>>, vector<1x4x1xf32>
    %1153 = vector.shape_cast %1152 : vector<1x4x1xf32> to vector<4x1xf32>
    %1154 = vector.broadcast %1153 : vector<4x1xf32> to vector<4x256xf32>
    %1155 = arith.mulf %1151, %1154 : vector<4x256xf32>
    %1156 = arith.addf %1146, %1155 : vector<4x256xf32>
    %1157 = vector.broadcast %670 : vector<4x1xf32> to vector<4x256xf32>
    %1158 = arith.addf %1156, %1157 : vector<4x256xf32>
    %1159 = arith.addf %1158, %667 : vector<4x256xf32>
    %c0_454 = arith.constant 0 : index
    %c0_455 = arith.constant 0 : index
    %c0_456 = arith.constant 0 : index
    %1160 = vector.load %arg8[%c0_454, %c0_455, %c0_456] : memref<1x4x1xf32, #tpu.memory_space<vmem>>, vector<1x4x1xf32>
    %1161 = vector.shape_cast %1160 : vector<1x4x1xf32> to vector<4x1xf32>
    %1162 = vector.broadcast %1161 : vector<4x1xf32> to vector<4x256xf32>
    %1163 = arith.addf %1159, %1162 : vector<4x256xf32>
    %1164 = arith.truncf %1163 : vector<4x256xf32> to vector<4x256xbf16>
    %c0_457 = arith.constant 0 : index
    %c0_458 = arith.constant 0 : index
    %c0_459 = arith.constant 0 : index
    %c0_460 = arith.constant 0 : index
    %1165 = vector.load %arg9[%c0_457, %c0_458, %c0_459, %c0_460] : memref<2x1x4x256xbf16, #tpu.memory_space<vmem>>, vector<1x1x4x256xbf16>
    %1166 = vector.shape_cast %1165 : vector<1x1x4x256xbf16> to vector<4x256xbf16>
    %1167 = vector.shape_cast %1164 : vector<4x256xbf16> to vector<1x1x4x256xbf16>
    tpu.vector_store %arg9[%c0_457, %c0_458, %c0_459, %c0_460], %1167 {strides = array<i32>} : memref<2x1x4x256xbf16, #tpu.memory_space<vmem>>, vector<1x1x4x256xbf16>,
    %1168 = arith.truncf %667 : vector<4x256xf32> to vector<4x256xbf16>
    %c1_461 = arith.constant 1 : index
    %c0_462 = arith.constant 0 : index
    %c0_463 = arith.constant 0 : index
    %c0_464 = arith.constant 0 : index
    %1169 = vector.load %arg9[%c1_461, %c0_462, %c0_463, %c0_464] : memref<2x1x4x256xbf16, #tpu.memory_space<vmem>>, vector<1x1x4x256xbf16>
    %1170 = vector.shape_cast %1169 : vector<1x1x4x256xbf16> to vector<4x256xbf16>
    %1171 = vector.shape_cast %1168 : vector<4x256xbf16> to vector<1x1x4x256xbf16>
    tpu.vector_store %arg9[%c1_461, %c0_462, %c0_463, %c0_464], %1171 {strides = array<i32>} : memref<2x1x4x256xbf16, #tpu.memory_space<vmem>>, vector<1x1x4x256xbf16>,
    return
  }
  func.func @transform_0(%arg0: i32) -> (i32, i32, i32) {
    %c0_i32 = arith.constant 0 : i32
    %c0_i32_0 = arith.constant 0 : i32
    %c0_i32_1 = arith.constant 0 : i32
    return %arg0, %c0_i32, %c0_i32_0 : i32, i32, i32
  }
  func.func @transform_1(%arg0: i32) -> (i32, i32, i32) {
    %c0_i32 = arith.constant 0 : i32
    %c0_i32_0 = arith.constant 0 : i32
    %c0_i32_1 = arith.constant 0 : i32
    return %arg0, %c0_i32, %c0_i32_0 : i32, i32, i32
  }
  func.func @transform_2(%arg0: i32) -> (i32, i32) {
    %c0_i32 = arith.constant 0 : i32
    %c0_i32_0 = arith.constant 0 : i32
    %c0_i32_1 = arith.constant 0 : i32
    return %c0_i32, %c0_i32_0 : i32, i32
  }
  func.func @transform_3(%arg0: i32) -> (i32, i32, i32) {
    %c0_i32 = arith.constant 0 : i32
    %c0_i32_0 = arith.constant 0 : i32
    %c0_i32_1 = arith.constant 0 : i32
    %c0_i32_2 = arith.constant 0 : i32
    return %c0_i32, %c0_i32_0, %c0_i32_1 : i32, i32, i32
  }
  func.func @transform_4(%arg0: i32) -> (i32, i32) {
    %c0_i32 = arith.constant 0 : i32
    %c0_i32_0 = arith.constant 0 : i32
    %c0_i32_1 = arith.constant 0 : i32
    return %c0_i32, %c0_i32_0 : i32, i32
  }
  func.func @transform_5(%arg0: i32) -> (i32, i32, i32) {
    %c0_i32 = arith.constant 0 : i32
    %c0_i32_0 = arith.constant 0 : i32
    %c0_i32_1 = arith.constant 0 : i32
    %c0_i32_2 = arith.constant 0 : i32
    return %c0_i32, %c0_i32_0, %c0_i32_1 : i32, i32, i32
  }
  func.func @transform_6(%arg0: i32) -> (i32, i32) {
    %c0_i32 = arith.constant 0 : i32
    %c0_i32_0 = arith.constant 0 : i32
    %c0_i32_1 = arith.constant 0 : i32
    return %c0_i32, %c0_i32_0 : i32, i32
  }
  func.func @transform_7(%arg0: i32) -> (i32, i32, i32) {
    %c0_i32 = arith.constant 0 : i32
    %c0_i32_0 = arith.constant 0 : i32
    %c0_i32_1 = arith.constant 0 : i32
    return %arg0, %c0_i32, %c0_i32_0 : i32, i32, i32
  }
  func.func @transform_8(%arg0: i32) -> (i32, i32, i32, i32) {
    %c0_i32 = arith.constant 0 : i32
    %c0_i32_0 = arith.constant 0 : i32
    %c0_i32_1 = arith.constant 0 : i32
    %c0_i32_2 = arith.constant 0 : i32
    return %c0_i32, %arg0, %c0_i32_0, %c0_i32_1 : i32, i32, i32, i32
  }
}

</mosaic_0001>

<bundles_post_ra>
// kernel: tpu_custom_call.1
= control target key start
LH: loop header
LB: loop body
LE: loop exit
PB: predicated region body
PF: predicated region fallthrough
CT: control target
= control target key end

     0   :  { %13 = vsyncpa [#allocation3], 0  ;;  %s7297_s0 = inlined_call_operand.vmem [shape: f32[2,4,256], index: 0, kind: input, shape index: {}]   ;;  %s7298_s1 = inlined_call_operand.vmem [shape: f32[2,4,256], index: 1, kind: input, shape index: {}]   ;;  %s7299_s2 = inlined_call_operand.vmem [shape: s32[2,256], index: 2, kind: input, shape index: {}]   ;;  %s7300_s3 = inlined_call_operand.vmem [shape: f32[49,4,1], index: 3, kind: input, shape index: {}]   ;;  %s7301_s4 = inlined_call_operand.vmem [shape: f32[4,1], index: 4, kind: input, shape index: {}]   ;;  %s7302_s5 = inlined_call_operand.vmem [shape: f32[49,4,1], index: 5, kind: input, shape index: {}]   ;;  %s7303_s6 = inlined_call_operand.vmem [shape: f32[4,1], index: 6, kind: input, shape index: {}]   ;;  %s7304_s7 = inlined_call_operand.vmem [shape: f32[2,4,1], index: 7, kind: input, shape index: {}]   ;;  %s7305_s8 = inlined_call_operand.hbm [shape: bf16[2,2,4,256], index: 8, kind: output, shape index: {}]  }
   0x1   :  { %15 = vsyncpa [#allocation3 + $0x1], 0  ;;  %s3818_s27 = smov 0   ;;  %s3820_s28 = smov 0  }
   0x2   :  { %s3822_s29 = smov 0   ;;  %s3824_s30 = smov 0  }
   0x3 LB: > { %s3839_s9 = sadd.s32 4294967295, %s3717_s30   ;;  %s3432_s10 = sadd.s32 4294967294, %s3717_s30   ;;  %s3717_s30 = sphi %s3824_s30, %s8467_s30   ;;  %s3713_s29 = sphi %s3822_s29, %s8466_s29   ;;  %s3709_s28 = sphi %s3820_s28, %s8465_s28   ;;  %s3705_s27 = sphi %s3818_s27, %s8464_s27  }
   0x4   : > { %s3843_s11 = sadd.s32 1, %s3717_s30   ;;  %s211_s12 = sadd.s32 1, %s3713_s29 }
   0x5   : > { %s208_s13 = ssub.s32 %s3717_s30, %s3843_s11  ;;  %p221_p0 = scmp.ne.s32.totalorder %s3713_s29, %s3709_s28 }
   0x6   : > { %p209_p1 = scmp.eq.s32.totalorder %s208_s13, 0  ;;  %p222_p2 = scmp.eq.s32.totalorder %s3839_s9, 1 }
   0x7   : > { %p227_p3 = scmp.ne.s32.totalorder %s3709_s28, %s3705_s27  ;;  %p228_p4 = scmp.eq.s32.totalorder %s3432_s10, 1 }
   0x8   : > { %s3854_s14 = scalar_select %p209_p1, %s3713_s29, %s211_s12  }
   0x9   : > { %p3856_p5 = por %p222_p2, %p221_p0  ;;  %p3860_p6 = por %p228_p4, %p227_p3 }
   0xa   : > { %p3435_p7 = scmp.ge.s32.totalorder %s3717_s30, 1  ;;  %p284_p8 = scmp.lt.s32.totalorder %s3717_s30, 3 }
   0xc   : > { %p285_p9 = pnand %p3435_p7, %p284_p8 }
   0xe   : > { %288 = sbr.rel (%p285_p9) target bundleno = 796 (0x31c), region = 52 }
  0x13   : > { %v480_v0 = vld [vmem:[%s7302_s5] sm:$0xf]  ;;  %p327_p10 = scmp.lt.s32.totalorder %s3839_s9, 1  ;;  %v7374_v1 = vmov 0   ;;  %s7306_s24 = smov 50  }
  0x14   : > { %3650 = vset.pattern.permute.xlu1 %v7374_v1  ;;  %3651 = vset.pattern.permute.xlu0 %v7374_v1  ;;  %s3721_s25 = smov 51   ;;  %v3449_v4 = vld [vmem:[%s7302_s5 + $0x4] sm:$0xf]  ;;  %s3722_s12 = smov 49   ;;  %v3450_v5 = vld [vmem:[%s7302_s5 + $0x8] sm:$0xf] }
  0x15   : > { %483 = vperm.xlu1 %3650, %v480_v0   ;;  %s3873_s19 = scalar_select %p327_p10, %s3839_s9, 1  ;;  %v3451_v6 = vld [vmem:[%s7302_s5 + $0xc] sm:$0xf]  ;;  %v3452_v7 = vld [vmem:[%s7302_s5 + $0x10] sm:$0xf] }
  0x16   : > { %s7372_s13 = smov 48   ;;  %s7308_s26 = smov 47   ;;  %v3453_v8 = vld [vmem:[%s7302_s5 + $0x14] sm:$0xf]  ;;  %v3454_v9 = vld [vmem:[%s7302_s5 + $0x18] sm:$0xf] }
  0x17   : > { %s3554_s20 = sshll.u32 %s3873_s19, 3  ;;  %s7310_s17 = smov 46   ;;  %v3455_v10 = vld [vmem:[%s7302_s5 + $0x1c] sm:$0xf]  ;;  %v3456_v11 = vld [vmem:[%s7302_s5 + $0x20] sm:$0xf] }
  0x18   : > { %s3881_s23 = scalar_lea.vmem %s7298_s1, %s3554_s20  ;;  %s7312_s22 = smov 45   ;;  %v3457_v12 = vld [vmem:[%s7302_s5 + $0x24] sm:$0xf]  ;;  %v3458_v13 = vld [vmem:[%s7302_s5 + $0x28] sm:$0xf] }
  0x19   : > { %v3884_v2 = vld [vmem:[%s3881_s23] sm:$0xff]  ;;  %v3459_v14 = vld [vmem:[%s7302_s5 + $0x2c] sm:$0xf]  ;;  %v3460_v15 = vld [vmem:[%s7302_s5 + $0x30] sm:$0xf]  ;;  %s7340_s18 = smov 3  }
  0x1a   : > { %490 = vrot.lane.b32.xlu1 %v3884_v2, %s7306_s24  ;;  %450 = vrot.lane.b32.xlu0 %v3884_v2, %s3721_s25  ;;  %v3892_v3 = vcombine.high %v3884_v2, %v3884_v2  ;;  %v3461_v16 = vld [vmem:[%s7302_s5 + $0x34] sm:$0xf]  ;;  %v3462_v17 = vld [vmem:[%s7302_s5 + $0x38] sm:$0xf]  ;;  %s7342_s10 = smov 2   ;;  %s7344_s21 = smov 1  }
  0x1b   : > { %v3463_v18 = vld [vmem:[%s7302_s5 + $0x3c] sm:$0xf]  ;;  %v3464_v19 = vld [vmem:[%s7302_s5 + $0x40] sm:$0xf]  ;;  %v3465_v20 = vld [vmem:[%s7302_s5 + $0x44] sm:$0xf] }
  0x1c   : > { %v3466_v21 = vld [vmem:[%s7302_s5 + $0x48] sm:$0xf]  ;;  %v3467_v22 = vld [vmem:[%s7302_s5 + $0x4c] sm:$0xf]  ;;  %v3468_v24 = vld [vmem:[%s7302_s5 + $0x50] sm:$0xf] }
  0x1d   : > { %v3469_v28 = vld [vmem:[%s7302_s5 + $0x54] sm:$0xf]  ;;  %v3470_v31 = vld [vmem:[%s7302_s5 + $0x58] sm:$0xf]  ;;  %v3472_v35 = vld [vmem:[%s7302_s5 + $0x60] sm:$0xf] }
  0x1e   : > { %522 = vperm.xlu1 %3650, %v3449_v4   ;;  %452 = vrot.lane.b32.xlu0 %v3892_v3, %s3721_s25  ;;  %v3471_v36 = vld [vmem:[%s7302_s5 + $0x5c] sm:$0xf]  ;;  %v3473_v41 = vld [vmem:[%s7302_s5 + $0x64] sm:$0xf]  ;;  %v3474_v44 = vld [vmem:[%s7302_s5 + $0x68] sm:$0xf] }
  0x1f   : > { %v3475_v49 = vld [vmem:[%s7302_s5 + $0x6c] sm:$0xf]  ;;  %v3476_v52 = vld [vmem:[%s7302_s5 + $0x70] sm:$0xf]  ;;  %v3477_v57 = vld [vmem:[%s7302_s5 + $0x74] sm:$0xf] }
  0x20   : > { %v3478_v60 = vld [vmem:[%s7302_s5 + $0x78] sm:$0xf]  ;;  %v3479_v4 = vld [vmem:[%s7302_s5 + $0x7c] sm:$0xf] }
  0x22   : > { %531 = vrot.lane.b32.xlu1 %v3892_v3, %s3722_s12  ;;  %492 = vrot.lane.b32.xlu0 %v3892_v3, %s7306_s24  ;;  %s7352_s24 = smov 125  }
  0x26   : > { %568 = vrot.lane.b32.xlu1 %v3884_v2, %s7372_s13  ;;  %529 = vrot.lane.b32.xlu0 %v3884_v2, %s3722_s12 }
  0x2a   : > { %570 = vrot.lane.b32.xlu1 %v3892_v3, %s7372_s13  ;;  %561 = vperm.xlu0 %3651, %v3450_v5   ;;  %s3758_s13 = smov 95  }
  0x2e   : > { %607 = vrot.lane.b32.xlu1 %v3884_v2, %s7308_s26  ;;  %600 = vperm.xlu0 %3651, %v3451_v6  }
  0x32   : > { %639 = vperm.xlu1 %3650, %v3452_v7   ;;  %609 = vrot.lane.b32.xlu0 %v3892_v3, %s7308_s26  ;;  %s7314_s26 = smov 35   ;;  %v3480_v7 = vld [vmem:[%s7302_s5 + $0x80] sm:$0xf] }
  0x36   : > { %648 = vrot.lane.b32.xlu1 %v3892_v3, %s7310_s17  ;;  %646 = vrot.lane.b32.xlu0 %v3884_v2, %s7310_s17  ;;  %s7316_s17 = smov 34  }
  0x3a   : > { %685 = vrot.lane.b32.xlu1 %v3884_v2, %s7312_s22  ;;  %678 = vperm.xlu0 %3651, %v3453_v8  }
  0x3e   : > { %717 = vperm.xlu1 %3650, %v3454_v9   ;;  %687 = vrot.lane.b32.xlu0 %v3892_v3, %s7312_s22  ;;  %s7318_s22 = smov 33  }
  0x42   : > { %726 = vrot.lane.b32.xlu1 %v3892_v3, %s7314_s26  ;;  %724 = vrot.lane.b32.xlu0 %v3884_v2, %s7314_s26  ;;  %s7320_s26 = smov 32  }
  0x46   : > { %763 = vrot.lane.b32.xlu1 %v3884_v2, %s7316_s17  ;;  %756 = vperm.xlu0 %3651, %v3455_v10  }
  0x4a   : > { %795 = vperm.xlu1 %3650, %v3456_v11   ;;  %765 = vrot.lane.b32.xlu0 %v3892_v3, %s7316_s17  ;;  %s7322_s17 = smov 31  }
  0x4e   : > { %804 = vrot.lane.b32.xlu1 %v3892_v3, %s7318_s22  ;;  %802 = vrot.lane.b32.xlu0 %v3884_v2, %s7318_s22  ;;  %s7324_s22 = smov 30  }
  0x52   : > { %841 = vrot.lane.b32.xlu1 %v3884_v2, %s7320_s26  ;;  %834 = vperm.xlu0 %3651, %v3457_v12   ;;  %v3481_v12 = vld [vmem:[%s7302_s5 + $0x84] sm:$0xf] }
  0x56   : > { %873 = vperm.xlu1 %3650, %v3458_v13   ;;  %843 = vrot.lane.b32.xlu0 %v3892_v3, %s7320_s26  ;;  %s7326_s26 = smov 29  }
  0x5a   : > { %882 = vrot.lane.b32.xlu1 %v3892_v3, %s7322_s17  ;;  %880 = vrot.lane.b32.xlu0 %v3884_v2, %s7322_s17  ;;  %s7328_s17 = smov 19  }
  0x5e   : > { %919 = vrot.lane.b32.xlu1 %v3884_v2, %s7324_s22  ;;  %912 = vperm.xlu0 %3651, %v3459_v14  }
  0x62   : > { %951 = vperm.xlu1 %3650, %v3460_v15   ;;  %921 = vrot.lane.b32.xlu0 %v3892_v3, %s7324_s22  ;;  %s7330_s22 = smov 18   ;;  %v3482_v15 = vld [vmem:[%s7302_s5 + $0x88] sm:$0xf] }
  0x66   : > { %960 = vrot.lane.b32.xlu1 %v3892_v3, %s7326_s26  ;;  %958 = vrot.lane.b32.xlu0 %v3884_v2, %s7326_s26  ;;  %s7332_s26 = smov 17  }
  0x6a   : > { %997 = vrot.lane.b32.xlu1 %v3884_v2, %s7328_s17  ;;  %990 = vperm.xlu0 %3651, %v3461_v16  }
  0x6e   : > { %1029 = vperm.xlu1 %3650, %v3462_v17   ;;  %999 = vrot.lane.b32.xlu0 %v3892_v3, %s7328_s17  ;;  %s7334_s17 = smov 16  }
  0x72   : > { %1038 = vrot.lane.b32.xlu1 %v3892_v3, %s7330_s22  ;;  %1036 = vrot.lane.b32.xlu0 %v3884_v2, %s7330_s22  ;;  %s7370_s22 = smov 15  }
  0x76   : > { %1075 = vrot.lane.b32.xlu1 %v3884_v2, %s7332_s26  ;;  %1068 = vperm.xlu0 %3651, %v3463_v18  }
  0x7a   : > { %1107 = vperm.xlu1 %3650, %v3464_v19   ;;  %1077 = vrot.lane.b32.xlu0 %v3892_v3, %s7332_s26  ;;  %s7338_s26 = smov 14  }
  0x7e   : > { %1116 = vrot.lane.b32.xlu1 %v3892_v3, %s7334_s17  ;;  %1114 = vrot.lane.b32.xlu0 %v3884_v2, %s7334_s17  ;;  %s7336_s17 = smov 13  }
  0x82   : > { %1153 = vrot.lane.b32.xlu1 %v3884_v2, %s7370_s22  ;;  %1146 = vperm.xlu0 %3651, %v3465_v20   ;;  %v3483_v20 = vld [vmem:[%s7302_s5 + $0x8c] sm:$0xf] }
  0x86   : > { %1185 = vperm.xlu1 %3650, %v3466_v21   ;;  %1155 = vrot.lane.b32.xlu0 %v3892_v3, %s7370_s22  ;;  %s7639_s22 = smov 93  }
  0x8a   : > { %1194 = vrot.lane.b32.xlu1 %v3892_v3, %s7338_s26  ;;  %1192 = vrot.lane.b32.xlu0 %v3884_v2, %s7338_s26  ;;  %s7346_s26 = smov 126  }
  0x8c   : > { %v4029_v23 = vpop.permute.xlu0 %450 }
  0x8e   : > { %1231 = vrot.lane.b32.xlu1 %v3884_v2, %s7336_s17  ;;  %1224 = vperm.xlu0 %3651, %v3467_v22  }
  0x90   : > { %v4034_v25 = vpop.permute.xlu1 %483  ;;  %v4040_v27 = vpop.permute.xlu0 %452 }
  0x92   : > { %1263 = vperm.xlu1 %3650, %v3468_v24   ;;  %1233 = vrot.lane.b32.xlu0 %v3892_v3, %s7336_s17  ;;  %s7350_s17 = smov 115   ;;  %v3484_v24 = vld [vmem:[%s7302_s5 + $0x90] sm:$0xf] }
  0x94   : > { %v4038_v26 = vpop.permute.xlu1 %490  ;;  %v4053_v30 = vpop.permute.xlu0 %492 }
  0x96   : > { %1272 = vrot.lane.b32.xlu1 %v3892_v3, %s7340_s18  ;;  %1270 = vrot.lane.b32.xlu0 %v3884_v2, %s7340_s18  ;;  %s7354_s18 = smov 113  }
  0x98   : > { %v4062_v33 = vpop.permute.xlu0 %529 }
  0x99   : > { %v4049_v29 = vpop.permute.xlu1 %522 }
  0x9a   : > { %1309 = vrot.lane.b32.xlu1 %v3884_v2, %s7342_s10  ;;  %1302 = vperm.xlu0 %3651, %v3469_v28  }
  0x9d   : > { %v4058_v32 = vpop.permute.xlu1 %531 }
  0x9e   : > { %1341 = vperm.xlu1 %3650, %v3470_v31   ;;  %1311 = vrot.lane.b32.xlu0 %v3892_v3, %s7342_s10  ;;  %s7348_s10 = smov 127  }
  0xa1   : > { %v4064_v34 = vpop.permute.xlu1 %568 }
  0xa2   : > { %1350 = vrot.lane.b32.xlu1 %v3892_v3, %s7344_s21  ;;  %1348 = vrot.lane.b32.xlu0 %v3884_v2, %s7344_s21  ;;  %s7356_s21 = smov 114  }
  0xa5   : > { %v4076_v37 = vpop.permute.xlu1 %570  ;;  %v4078_v38 = vpop.permute.xlu0 %561 }
  0xa6   : > { %1391 = vperm.xlu1 %3650, %v3472_v35   ;;  %1380 = vperm.xlu0 %3651, %v3471_v36  }
  0xa9   : > { %v4080_v39 = vpop.permute.xlu1 %607  ;;  %v4082_v40 = vpop.permute.xlu0 %600 }
  0xaa   : > { %1409 = vrot.lane.b32.xlu1 %v3892_v3, %s7348_s10  ;;  %1407 = vrot.lane.b32.xlu0 %v3884_v2, %s7348_s10  ;;  %s7360_s10 = smov 112  }
  0xad   : > { %v4091_v42 = vpop.permute.xlu1 %639  ;;  %v4093_v43 = vpop.permute.xlu0 %609 }
  0xae   : > { %7664 = vst [vmem:[#allocation5_spill] sm:$0xff] %v4091_v42  ;;  %1446 = vrot.lane.b32.xlu1 %v3884_v2, %s7346_s26  ;;  %1439 = vperm.xlu0 %3651, %v3473_v41   ;;  %v3485_v41 = vld [vmem:[%s7302_s5 + $0x94] sm:$0xf] }
  0xb1   : > { %v4100_v45 = vpop.permute.xlu1 %648  ;;  %v4102_v46 = vpop.permute.xlu0 %646 }
  0xb2   : > { %7665 = vst [vmem:[#allocation6_spill] sm:$0xff] %v4100_v45  ;;  %7666 = vst [vmem:[#allocation7_spill] sm:$0xff] %v4102_v46  ;;  %1478 = vperm.xlu1 %3650, %v3474_v44   ;;  %1448 = vrot.lane.b32.xlu0 %v3892_v3, %s7346_s26  ;;  %s7358_s26 = smov 111  }
  0xb5   : > { %v4106_v47 = vpop.permute.xlu1 %685  ;;  %v4108_v48 = vpop.permute.xlu0 %678 }
  0xb6   : > { %7667 = vst [vmem:[#allocation8_spill] sm:$0xff] %v4106_v47  ;;  %7668 = vst [vmem:[#allocation9_spill] sm:$0xff] %v4108_v48  ;;  %1487 = vrot.lane.b32.xlu1 %v3892_v3, %s7352_s24  ;;  %1485 = vrot.lane.b32.xlu0 %v3884_v2, %s7352_s24  ;;  %s7364_s24 = smov 110  }
  0xb9   : > { %v4117_v50 = vpop.permute.xlu1 %717  ;;  %v4119_v51 = vpop.permute.xlu0 %687 }
  0xba   : > { %7669 = vst [vmem:[#allocation10_spill] sm:$0xff] %v4117_v50  ;;  %7670 = vst [vmem:[#allocation11_spill] sm:$0xff] %v4119_v51  ;;  %1524 = vrot.lane.b32.xlu1 %v3884_v2, %s7350_s17  ;;  %1517 = vperm.xlu0 %3651, %v3475_v49  }
  0xbd   : > { %v4126_v53 = vpop.permute.xlu1 %726  ;;  %v4128_v54 = vpop.permute.xlu0 %724 }
  0xbe   : > { %7671 = vst [vmem:[#allocation12_spill] sm:$0xff] %v4126_v53  ;;  %7672 = vst [vmem:[#allocation13_spill] sm:$0xff] %v4128_v54  ;;  %1556 = vperm.xlu1 %3650, %v3476_v52   ;;  %1526 = vrot.lane.b32.xlu0 %v3892_v3, %s7350_s17  ;;  %s7362_s17 = smov 109   ;;  %v341_v52 = vld [vmem:[%s7299_s2] sm:$0xf] }
  0xbf   : > { %vm354_vm7 = vcmp.ge.s32.totalorder %v341_v52, 0  ;;  %vm355_vm8 = vcmp.lt.s32.totalorder %v341_v52, 16 }
  0xc0   : > { %vm4297_vm11 = vmand %vm354_vm7, %vm355_vm8 }
  0xc1   : > { %v4132_v55 = vpop.permute.xlu1 %763  ;;  %v4134_v56 = vpop.permute.xlu0 %756 }
  0xc2   : > { %7673 = vst [vmem:[#allocation14_spill] sm:$0xff] %v4132_v55  ;;  %7674 = vst [vmem:[#allocation15_spill] sm:$0xff] %v4134_v56  ;;  %1565 = vrot.lane.b32.xlu1 %v3892_v3, %s7356_s21  ;;  %1563 = vrot.lane.b32.xlu0 %v3884_v2, %s7356_s21  ;;  %s7368_s21 = smov 99  }
  0xc5   : > { %v4143_v58 = vpop.permute.xlu1 %795  ;;  %v4145_v59 = vpop.permute.xlu0 %765 }
  0xc6   : > { %7675 = vst [vmem:[#allocation16_spill] sm:$0xff] %v4143_v58  ;;  %7676 = vst [vmem:[#allocation17_spill] sm:$0xff] %v4145_v59  ;;  %1602 = vrot.lane.b32.xlu1 %v3884_v2, %s7354_s18  ;;  %1595 = vperm.xlu0 %3651, %v3477_v57   ;;  %v3486_v57 = vld [vmem:[%s7302_s5 + $0x98] sm:$0xf]  ;;  %v3492_v58 = vld [vmem:[%s7302_s5 + $0xb0] sm:$0xf] }
  0xc9   : > { %v4152_v61 = vpop.permute.xlu1 %804  ;;  %v4154_v62 = vpop.permute.xlu0 %802 }
  0xca   : > { %7677 = vst [vmem:[#allocation18_spill] sm:$0xff] %v4152_v61  ;;  %7678 = vst [vmem:[#allocation19_spill] sm:$0xff] %v4154_v62  ;;  %1634 = vperm.xlu1 %3650, %v3478_v60   ;;  %1604 = vrot.lane.b32.xlu0 %v3892_v3, %s7354_s18  ;;  %s7366_s18 = smov 98   ;;  %v342_v60 = vadd.s32 4294967293, %v341_v52 }
  0xcc   : > { %vm343_vm0 = vcmp.ge.s32.totalorder %v342_v60, 0  ;;  %vm344_vm1 = vcmp.lt.s32.totalorder %v342_v60, 16  ;;  %v361_v60 = vadd.s32 2, %v341_v52 }
  0xcd   : > { %v4158_v63 = vpop.permute.xlu1 %841  ;;  %v4160_v0 = vpop.permute.xlu0 %834  ;;  %vm4273_vm6 = vmand %vm343_vm0, %vm344_vm1 }
  0xce   : > { %7679 = vst [vmem:[#allocation20_spill] sm:$0xff] %v4158_v63  ;;  %7680 = vst [vmem:[#allocation21_spill] sm:$0xff] %v4160_v0  ;;  %1643 = vrot.lane.b32.xlu1 %v3892_v3, %s7360_s10  ;;  %1641 = vrot.lane.b32.xlu0 %v3884_v2, %s7360_s10  ;;  %s3756_s10 = smov 97   ;;  %vm362_vm14 = vcmp.ge.s32.totalorder %v361_v60, 0  ;;  %vm363_vm15 = vcmp.lt.s32.totalorder %v361_v60, 16  ;;  %v454_v60 = vlaneseq }
  0xd1   : > { %v4169_v5 = vpop.permute.xlu1 %873  ;;  %v4171_v6 = vpop.permute.xlu0 %843 }
  0xd2   : > { %7681 = vst [vmem:[#allocation22_spill] sm:$0xff] %v4169_v5  ;;  %7682 = vst [vmem:[#allocation23_spill] sm:$0xff] %v4171_v6  ;;  %1680 = vrot.lane.b32.xlu1 %v3884_v2, %s7358_s26  ;;  %1673 = vperm.xlu0 %3651, %v3479_v4  }
  0xd5   : > { %v4178_v8 = vpop.permute.xlu1 %882  ;;  %v4180_v9 = vpop.permute.xlu0 %880 }
  0xd6   : > { %7683 = vst [vmem:[#allocation24_spill] sm:$0xff] %v4178_v8  ;;  %7684 = vst [vmem:[#allocation25_spill] sm:$0xff] %v4180_v9  ;;  %1712 = vperm.xlu1 %3650, %v3480_v7   ;;  %1682 = vrot.lane.b32.xlu0 %v3892_v3, %s7358_s26  ;;  %s7426_s26 = smov 83  }
  0xd9   : > { %v4184_v10 = vpop.permute.xlu1 %919  ;;  %v4186_v11 = vpop.permute.xlu0 %912 }
  0xda   : > { %7685 = vst [vmem:[#allocation26_spill] sm:$0xff] %v4184_v10  ;;  %7686 = vst [vmem:[#allocation27_spill] sm:$0xff] %v4186_v11  ;;  %1721 = vrot.lane.b32.xlu1 %v3892_v3, %s7364_s24  ;;  %1719 = vrot.lane.b32.xlu0 %v3884_v2, %s7364_s24  ;;  %s7641_s24 = smov 94  }
  0xdd   : > { %v4195_v13 = vpop.permute.xlu1 %951  ;;  %v4197_v14 = vpop.permute.xlu0 %921 }
  0xde   : > { %7687 = vst [vmem:[#allocation28_spill] sm:$0xff] %v4195_v13  ;;  %7688 = vst [vmem:[#allocation29_spill] sm:$0xff] %v4197_v14  ;;  %1758 = vrot.lane.b32.xlu1 %v3884_v2, %s7362_s17  ;;  %1751 = vperm.xlu0 %3651, %v3481_v12   ;;  %v346_v12 = vadd.s32 4294967294, %v341_v52 }
  0xe0   : > { %vm347_vm2 = vcmp.ge.s32.totalorder %v346_v12, 0  ;;  %vm348_vm3 = vcmp.lt.s32.totalorder %v346_v12, 16  ;;  %v3487_v12 = vld [vmem:[%s7302_s5 + $0x9c] sm:$0xf] }
  0xe1   : > { %v4204_v16 = vpop.permute.xlu1 %960  ;;  %v4206_v17 = vpop.permute.xlu0 %958  ;;  %vm4280_vm9 = vmand %vm347_vm2, %vm348_vm3 }
  0xe2   : > { %7689 = vst [vmem:[#allocation30_spill] sm:$0xff] %v4204_v16  ;;  %7690 = vst [vmem:[#allocation31_spill] sm:$0xff] %v4206_v17  ;;  %1790 = vperm.xlu1 %3650, %v3482_v15   ;;  %1760 = vrot.lane.b32.xlu0 %v3892_v3, %s7362_s17  ;;  %v350_v15 = vadd.s32 4294967295, %v341_v52  ;;  %s8007_s17 = smov 35  }
  0xe3   : > { %vm4321_vm3 = vmand %vm362_vm14, %vm363_vm15 }
  0xe4   : > { %vm351_vm4 = vcmp.ge.s32.totalorder %v350_v15, 0  ;;  %vm352_vm5 = vcmp.lt.s32.totalorder %v350_v15, 16 }
  0xe5   : > { %v4210_v18 = vpop.permute.xlu1 %997  ;;  %v4212_v19 = vpop.permute.xlu0 %990  ;;  %vm4288_vm10 = vmand %vm351_vm4, %vm352_vm5 }
  0xe6   : > { %7691 = vst [vmem:[#allocation32_spill] sm:$0xff] %v4210_v18  ;;  %7692 = vst [vmem:[#allocation33_spill] sm:$0xff] %v4212_v19  ;;  %1799 = vrot.lane.b32.xlu1 %v3892_v3, %s7368_s21  ;;  %1797 = vrot.lane.b32.xlu0 %v3884_v2, %s7368_s21  ;;  %s3757_s21 = smov 96   ;;  %v7724_v19 = vmov 0 }
  0xe9   : > { %v4221_v21 = vpop.permute.xlu1 %1029  ;;  %v4223_v22 = vpop.permute.xlu0 %999 }
  0xea   : > { %7693 = vst [vmem:[#allocation34_spill] sm:$0xff] %v4221_v21  ;;  %7694 = vst [vmem:[#allocation35_spill] sm:$0xff] %v4223_v22  ;;  %1836 = vrot.lane.b32.xlu1 %v3884_v2, %s7366_s18  ;;  %1829 = vperm.xlu0 %3651, %v3483_v20   ;;  %v3489_v22 = vld [vmem:[%s7302_s5 + $0xa4] sm:$0xf] }
  0xed   : > { %v4230_v28 = vpop.permute.xlu1 %1038  ;;  %v4232_v31 = vpop.permute.xlu0 %1036 }
  0xee   : > { %7695 = vst [vmem:[#allocation36_spill] sm:$0xff] %v4230_v28  ;;  %7696 = vst [vmem:[#allocation37_spill] sm:$0xff] %v4232_v31  ;;  %1868 = vperm.xlu1 %3650, %v3484_v24   ;;  %1838 = vrot.lane.b32.xlu0 %v3892_v3, %s7366_s18  ;;  %v7721_v31 = vmov 0  ;;  %s7417_s18 = smov 82  }
  0xef   : > { %v7722_v31 = vsel %vm4321_vm3, 4294967295, %v7721_v31 }
  0xf0   : > { %7723 = vst [vmem:[#allocation51_spill] sm:$0xff] %v7722_v31 }
  0xf1   : > { %v4236_v35 = vpop.permute.xlu1 %1075  ;;  %v4238_v36 = vpop.permute.xlu0 %1068 }
  0xf2   : > { %7697 = vst [vmem:[#allocation38_spill] sm:$0xff] %v4236_v35  ;;  %7698 = vst [vmem:[#allocation39_spill] sm:$0xff] %v4238_v36  ;;  %1877 = vrot.lane.b32.xlu1 %v3892_v3, %s3756_s10  ;;  %1875 = vrot.lane.b32.xlu0 %v3884_v2, %s3756_s10  ;;  %v7718_v35 = vmov 0 }
  0xf5   : > { %v4247_v44 = vpop.permute.xlu1 %1107  ;;  %v4249_v49 = vpop.permute.xlu0 %1077 }
  0xf6   : > { %7699 = vst [vmem:[#allocation40_spill] sm:$0xff] %v4247_v44  ;;  %7700 = vst [vmem:[#allocation41_spill] sm:$0xff] %v4249_v49  ;;  %1914 = vrot.lane.b32.xlu1 %v3884_v2, %s3757_s21  ;;  %1907 = vperm.xlu0 %3651, %v3485_v41   ;;  %v357_v41 = vadd.s32 1, %v341_v52 }
  0xf8   : > { %vm358_vm12 = vcmp.ge.s32.totalorder %v357_v41, 0  ;;  %vm359_vm13 = vcmp.lt.s32.totalorder %v357_v41, 16 }
  0xf9   : > { %v4259_v4 = vpop.permute.xlu1 %1116  ;;  %v4261_v7 = vpop.permute.xlu0 %1114  ;;  %vm4317_vm0 = vmand %vm358_vm12, %vm359_vm13 }
  0xfa   : > { %7701 = vst [vmem:[#allocation42_spill] sm:$0xff] %v4259_v4  ;;  %7702 = vst [vmem:[#allocation43_spill] sm:$0xff] %v4261_v7  ;;  %1946 = vperm.xlu1 %3650, %v3486_v57   ;;  %1916 = vrot.lane.b32.xlu0 %v3892_v3, %s3757_s21  ;;  %v7713_v4 = vmov 0   ;;  %v7719_v35 = vsel %vm4317_vm0, 4294967295, %v7718_v35 }
  0xfb   : > { %v369_v7 = vsel %vm4273_vm6, 1, %v7713_v4  ;;  %7720 = vst [vmem:[#allocation50_spill] sm:$0xff] %v7719_v35 }
  0xfc   : > { %v3442_v41 = vrot.slane %v369_v7, 9 }
  0xfd   : > { %v4265_v20 = vpop.permute.xlu1 %1153  ;;  %v4267_v24 = vpop.permute.xlu0 %1146 }
  0xfe   : > { %7703 = vst [vmem:[#allocation44_spill] sm:$0xff] %v4265_v20  ;;  %7704 = vst [vmem:[#allocation45_spill] sm:$0xff] %v4267_v24  ;;  %1955 = vrot.lane.b32.xlu1 %v3892_v3, %s3758_s13  ;;  %1953 = vrot.lane.b32.xlu0 %v3884_v2, %s3758_s13  ;;  %v365_v20 = vadd.s32 3, %v341_v52  ;;  %v374_v52 = vsel %vm4280_vm9, 1, %v7713_v4  ;;  %vm4338_vm5 = vcmp.ne.s32.totalorder %v3442_v41, 0 }
  0xff   : > { %v3443_v28 = vrot.slane %v374_v52, 9  ;;  %v7729_v52 = vmov 0  ;;  %vm373_vm12 = vmand %vm4273_vm6, %vm4338_vm5 }
 0x100   : > { %vm366_vm1 = vcmp.ge.s32.totalorder %v365_v20, 0  ;;  %vm367_vm2 = vcmp.lt.s32.totalorder %v365_v20, 16  ;;  %v7730_v52 = vsel %vm4338_vm5, 4294967295, %v7729_v52 }
 0x101   : > { %v4284_v15 = vpop.permute.xlu1 %1185  ;;  %v4286_v24 = vpop.permute.xlu0 %1155  ;;  %vm4330_vm4 = vmand %vm366_vm1, %vm367_vm2  ;;  %7731 = vst [vmem:[#allocation55_spill] sm:$0xff] %v7730_v52  ;;  %vm4349_vm7 = vcmp.ne.s32.totalorder %v3443_v28, 0  ;;  %v7736_v28 = vmov 0 }
 0x102   : > { %7709 = vst [vmem:[#allocation46_spill] sm:$0xff] %v4284_v15  ;;  %7710 = vst [vmem:[#allocation47_spill] sm:$0xff] %v4286_v24  ;;  %1992 = vrot.lane.b32.xlu1 %v3884_v2, %s7641_s24  ;;  %1985 = vperm.xlu0 %3651, %v3487_v12   ;;  %v3488_v15 = vld [vmem:[%s7302_s5 + $0xa0] sm:$0xf]  ;;  %v379_v24 = vsel %vm4288_vm10, 1, %v7713_v4  ;;  %v384_v12 = vsel %vm4297_vm11, 1, %v7713_v4 }
 0x103   : > { %v3444_v7 = vrot.slane %v379_v24, 9  ;;  %v7725_v19 = vsel %vm4330_vm4, 4294967295, %v7724_v19  ;;  %v394_v24 = vsel %vm4321_vm3, 1, %v7713_v4  ;;  %vm378_vm14 = vmand %vm4273_vm6, %vm4349_vm7 }
 0x104   : > { %7726 = vst [vmem:[#allocation52_spill] sm:$0xff] %v7725_v19 }
 0x105   : > { %v4310_v21 = vpop.permute.xlu1 %1194  ;;  %v4312_v49 = vpop.permute.xlu0 %1192  ;;  %vm4355_vm8 = vcmp.ne.s32.totalorder %v3444_v7, 0  ;;  %v3447_v7 = vrot.slane %v394_v24, 9  ;;  %v3490_v24 = vld [vmem:[%s7302_s5 + $0xa8] sm:$0xf] }
 0x106   : > { %7716 = vst [vmem:[#allocation48_spill] sm:$0xff] %v4310_v21  ;;  %7717 = vst [vmem:[#allocation49_spill] sm:$0xff] %v4312_v49  ;;  %2024 = vperm.xlu1 %3650, %v3488_v15   ;;  %1994 = vrot.lane.b32.xlu0 %v3892_v3, %s7641_s24  ;;  %v3445_v21 = vrot.slane %v384_v12, 9  ;;  %v389_v49 = vsel %vm4317_vm0, 1, %v7713_v4  ;;  %v4347_v12 = vshrl.u32 %v454_v60, 7  ;;  %s8190_s24 = smov 112  }
 0x107   : > { %vm383_vm15 = vmand %vm4273_vm6, %vm4355_vm8 }
 0x108   : > { %vm4369_vm13 = vcmp.ne.s32.totalorder %v3445_v21, 0  ;;  %v4384_v19 = vsub.s32 0, %v4347_v12  ;;  %v536_v11 = vsel %vm383_vm15, 1, %v7713_v4 }
 0x109   : > { %v4334_v20 = vpop.permute.xlu1 %1231  ;;  %v4336_v15 = vpop.permute.xlu0 %1224  ;;  %v7737_v28 = vsel %vm4369_vm13, 4294967295, %v7736_v28  ;;  %vm388_vm1 = vmand %vm4273_vm6, %vm4369_vm13 }
 0x10a   : > { %7727 = vst [vmem:[#allocation53_spill] sm:$0xff] %v4334_v20  ;;  %7728 = vst [vmem:[#allocation54_spill] sm:$0xff] %v4336_v15  ;;  %2033 = vrot.lane.b32.xlu1 %v3892_v3, %s7639_s22  ;;  %2031 = vrot.lane.b32.xlu0 %v3884_v2, %s7639_s22  ;;  %v3446_v15 = vrot.slane %v389_v49, 9  ;;  %v399_v20 = vsel %vm4330_vm4, 1, %v7713_v4  ;;  %vm4406_vm4 = vcmp.ne.s32.totalorder %v3447_v7, 0  ;;  %v7748_v7 = vmov 0 }
 0x10b   : > { %7738 = vst [vmem:[#allocation56_spill] sm:$0xff] %v7737_v28  ;;  %v3448_v21 = vrot.slane %v399_v20, 9  ;;  %v7743_v20 = vmov 0  ;;  %v540_v10 = vrot.slane %v536_v11, %v4384_v19  ;;  %s8184_s22 = smov 114  }
 0x10c   : > { %vm4401_vm2 = vcmp.ne.s32.totalorder %v3446_v15, 0  ;;  %v7744_v20 = vsel %vm4406_vm4, 4294967295, %v7743_v20  ;;  %v575_v15 = vsel %vm388_vm1, 1, %v7713_v4  ;;  %vm407_vm1 = vmand %vm4280_vm9, %vm4369_vm13 }
 0x10d   : > { %v4373_v18 = vpop.permute.xlu1 %1263  ;;  %v4375_v49 = vpop.permute.xlu0 %1233  ;;  %7745 = vst [vmem:[#allocation59_spill] sm:$0xff] %v7744_v20 }
 0x10e   : > { %7739 = vst [vmem:[#allocation57_spill] sm:$0xff] %v4373_v18  ;;  %7740 = vst [vmem:[#allocation58_spill] sm:$0xff] %v4375_v49  ;;  %2070 = vrot.lane.b32.xlu1 %v3884_v2, %s7426_s26  ;;  %2063 = vperm.xlu0 %3651, %v3489_v22   ;;  %v459_v18 = vsel %vm373_vm12, 1, %v7713_v4  ;;  %v4395_v49 = vsub.s32 2, %v4347_v12  ;;  %v497_v22 = vsel %vm378_vm14, 1, %v7713_v4  ;;  %vm4421_vm14 = vcmp.ne.s32.totalorder %v3448_v21, 0 }
 0x10f   : > { %v463_v14 = vrot.slane %v459_v18, %v4384_v19  ;;  %vm393_vm12 = vmand %vm4273_vm6, %vm4401_vm2  ;;  %v7749_v7 = vsel %vm4421_vm14, 4294967295, %v7748_v7 }
 0x110   : > { %7750 = vst [vmem:[#allocation62_spill] sm:$0xff] %v7749_v7  ;;  %v544_v21 = vrot.slane %v536_v11, %v4395_v49  ;;  %vm403_vm15 = vmand %vm4273_vm6, %vm4421_vm14  ;;  %v4451_v11 = vand.u32 127, %v454_v60 }
 0x111   : > { %v4410_v16 = vpop.permute.xlu1 %1272  ;;  %v4412_v17 = vpop.permute.xlu0 %1270  ;;  %v4454_v8 = vrot.slane %v463_v14, %v4384_v19  ;;  %v692_v0 = vsel %vm403_vm15, 1, %v7713_v4  ;;  %vm408_vm15 = vmand %vm4280_vm9, %vm4401_vm2 }
 0x112   : > { %7746 = vst [vmem:[#allocation60_spill] sm:$0xff] %v4410_v16  ;;  %7747 = vst [vmem:[#allocation61_spill] sm:$0xff] %v4412_v17  ;;  %2102 = vperm.xlu1 %3650, %v3490_v24   ;;  %2072 = vrot.lane.b32.xlu0 %v3892_v3, %s7426_s26  ;;  %v467_v17 = vrot.slane %v459_v18, %v4395_v49  ;;  %v501_v24 = vrot.slane %v497_v22, %v4384_v19  ;;  %s7456_s26 = smov 80  }
 0x113   : > { %v505_v16 = vrot.slane %v497_v22, %v4395_v49  ;;  %v579_v22 = vrot.slane %v575_v15, %v4384_v19  ;;  %7753 = vst [vmem:[#allocation65_spill] sm:$0xff] %v4454_v8  ;;  %v696_v56 = vrot.slane %v692_v0, %v4384_v19 }
 0x114   : > { %v4470_v14 = vrot.slane %v467_v17, %v4384_v19  ;;  %v4473_v60 = vrot.slane %v501_v24, %v4384_v19  ;;  %v3491_v17 = vld [vmem:[%s7302_s5 + $0xac] sm:$0xf]  ;;  %v4492_v24 = vrot.slane %v540_v10, %v4384_v19 }
 0x115   : > { %v4440_v5 = vpop.permute.xlu1 %1309  ;;  %v4442_v18 = vpop.permute.xlu0 %1302  ;;  %v4518_v57 = vrot.slane %v579_v22, %v4384_v19 }
 0x116   : > { %7751 = vst [vmem:[#allocation63_spill] sm:$0xff] %v4440_v5  ;;  %7752 = vst [vmem:[#allocation64_spill] sm:$0xff] %v4442_v18  ;;  %2111 = vrot.lane.b32.xlu1 %v3892_v3, %s7417_s18  ;;  %v583_v5 = vrot.slane %v575_v15, %v4395_v49  ;;  %v614_v18 = vsel %vm393_vm12, 1, %v7713_v4  ;;  %2109 = vrot.lane.b32.xlu0 %v3884_v2, %s7417_s18  ;;  %v4476_v15 = vrot.slane %v505_v16, %v4384_v19  ;;  %s7442_s18 = smov 81  }
 0x117   : > { %7754 = vst [vmem:[#allocation66_spill] sm:$0xff] %v4470_v14  ;;  %7755 = vst [vmem:[#allocation67_spill] sm:$0xff] %v4473_v60  ;;  %v4495_v16 = vrot.slane %v544_v21, %v4384_v19  ;;  %v618_v63 = vrot.slane %v614_v18, %v4384_v19  ;;  %v622_v62 = vrot.slane %v614_v18, %v4395_v49 }
 0x118   : > { %7756 = vst [vmem:[#allocation68_spill] sm:$0xff] %v4476_v15  ;;  %vm7757_vm12 = vmand %vm4273_vm6, %vm4406_vm4  ;;  %v4535_v22 = vrot.slane %v583_v5, %v4384_v19 }
 0x119   : > { %v653_v9 = vsel %vm7757_vm12, 1, %v7713_v4  ;;  %7758 = vst [vmem:[#allocation69_spill] sm:$0xff] %v4492_v24  ;;  %7759 = vst [vmem:[#allocation70_spill] sm:$0xff] %v4495_v16  ;;  %v4513_v10 = vpop.permute.xlu1 %1341  ;;  %v4515_v21 = vpop.permute.xlu0 %1311  ;;  %v4581_v53 = vrot.slane %v618_v63, %v4384_v19 }
 0x11a   : > { %vm7760_vm12 = vmand %vm4280_vm9, %vm4338_vm5  ;;  %7761 = vst [vmem:[#allocation71_spill] sm:$0xff] %v4513_v10  ;;  %2148 = vrot.lane.b32.xlu1 %v3884_v2, %s7442_s18  ;;  %v657_v18 = vrot.slane %v653_v9, %v4384_v19  ;;  %v661_v10 = vrot.slane %v653_v9, %v4395_v49  ;;  %2141 = vperm.xlu0 %3651, %v3491_v17   ;;  %v848_v9 = vsel %vm407_vm1, 1, %v7713_v4 }
 0x11b   : > { %v731_v6 = vsel %vm7760_vm12, 1, %v7713_v4  ;;  %7762 = vst [vmem:[#allocation72_spill] sm:$0xff] %v4515_v21  ;;  %7763 = vst [vmem:[#allocation73_spill] sm:$0xff] %v4518_v57  ;;  %v700_v17 = vrot.slane %v692_v0, %v4395_v49  ;;  %v852_v63 = vrot.slane %v848_v9, %v4384_v19 }
 0x11c   : > { %vm7764_vm6 = vmand %vm4280_vm9, %vm4349_vm7  ;;  %7765 = vst [vmem:[#allocation74_spill] sm:$0xff] %v4535_v22  ;;  %v735_v5 = vrot.slane %v731_v6, %v4384_v19  ;;  %v739_v50 = vrot.slane %v731_v6, %v4395_v49  ;;  %v4570_v6 = vsel %vm408_vm15, 1, %v7713_v4 }
 0x11d   : > { %v770_v61 = vsel %vm7764_vm6, 1, %v7713_v4  ;;  %vm7766_vm12 = vmand %vm4280_vm9, %vm4355_vm8  ;;  %v4576_v54 = vpop.permute.xlu1 %1350  ;;  %v4578_v0 = vpop.permute.xlu0 %1348  ;;  %7769 = vst [vmem:[#allocation77_spill] sm:$0xff] %v4581_v53  ;;  %v4671_v1 = vrot.slane %v852_v63, %v4384_v19 }
 0x11e   : > { %v809_v21 = vsel %vm7766_vm12, 1, %v7713_v4  ;;  %vm409_vm6 = vmand %vm4280_vm9, %vm4406_vm4  ;;  %v774_v59 = vrot.slane %v770_v61, %v4384_v19  ;;  %v778_v55 = vrot.slane %v770_v61, %v4395_v49  ;;  %7767 = vst [vmem:[#allocation75_spill] sm:$0xff] %v4576_v54  ;;  %v4584_v61 = vrot.slane %v622_v62, %v4384_v19  ;;  %2180 = vperm.xlu1 %3650, %v3492_v58  }
 0x11f   : > { %vm410_vm1 = vmand %vm4280_vm9, %vm4421_vm14  ;;  %7768 = vst [vmem:[#allocation76_spill] sm:$0xff] %v4578_v0  ;;  %v813_v48 = vrot.slane %v809_v21, %v4384_v19  ;;  %v817_v47 = vrot.slane %v809_v21, %v4395_v49  ;;  %v4593_v54 = vrot.slane %v657_v18, %v4384_v19  ;;  %v4596_v0 = vrot.slane %v661_v10, %v4384_v19 }
 0x120   : > { %7770 = vst [vmem:[#allocation78_spill] sm:$0xff] %v4584_v61  ;;  %v856_v62 = vrot.slane %v848_v9, %v4395_v49  ;;  %2150 = vrot.lane.b32.xlu0 %v3892_v3, %s7442_s18  ;;  %v4607_v58 = vrot.slane %v696_v56, %v4384_v19  ;;  %v4610_v21 = vrot.slane %v735_v5, %v4384_v19  ;;  %vm414_vm12 = vmand %vm4288_vm10, %vm4369_vm13  ;;  %s7480_s18 = smov 79  }
 0x121   : > { %7771 = vst [vmem:[#allocation79_spill] sm:$0xff] %v4593_v54  ;;  %7772 = vst [vmem:[#allocation80_spill] sm:$0xff] %v4596_v0  ;;  %v4613_v10 = vrot.slane %v739_v50, %v4384_v19  ;;  %v891_v18 = vrot.slane %v4570_v6, %v4384_v19  ;;  %v4622_v9 = vrot.slane %v700_v17, %v4384_v19  ;;  %v926_v50 = vsel %vm409_vm6, 1, %v7713_v4  ;;  %v4640_v17 = vpop.permute.xlu1 %1391  ;;  %v4661_v51 = vpop.permute.xlu0 %1380 }
 0x122   : > { %7773 = vst [vmem:[#allocation81_spill] sm:$0xff] %v4607_v58  ;;  %7774 = vst [vmem:[#allocation82_spill] sm:$0xff] %v4610_v21  ;;  %v4625_v56 = vrot.slane %v774_v59, %v4384_v19  ;;  %v4628_v5 = vrot.slane %v778_v55, %v4384_v19  ;;  %v4644_v59 = vrot.slane %v813_v48, %v4384_v19  ;;  %2189 = vrot.lane.b32.xlu1 %v3892_v3, %s7456_s26 }
 0x123   : > { %7775 = vst [vmem:[#allocation83_spill] sm:$0xff] %v4613_v10  ;;  %7776 = vst [vmem:[#allocation84_spill] sm:$0xff] %v4622_v9  ;;  %v4647_v55 = vrot.slane %v817_v47, %v4384_v19  ;;  %v4674_v47 = vrot.slane %v856_v62, %v4384_v19  ;;  %v895_v48 = vrot.slane %v4570_v6, %v4395_v49 }
 0x124   : > { %7777 = vst [vmem:[#allocation85_spill] sm:$0xff] %v4625_v56  ;;  %7778 = vst [vmem:[#allocation86_spill] sm:$0xff] %v4628_v5  ;;  %v965_v5 = vsel %vm410_vm1, 1, %v7713_v4  ;;  %2187 = vrot.lane.b32.xlu0 %v3884_v2, %s7456_s26  ;;  %v4691_v63 = vrot.slane %v891_v18, %v4384_v19  ;;  %v930_v6 = vrot.slane %v926_v50, %v4384_v19  ;;  %s7472_s26 = smov 78  }
 0x125   : > { %7779 = vst [vmem:[#allocation87_spill] sm:$0xff] %v4640_v17  ;;  %7780 = vst [vmem:[#allocation88_spill] sm:$0xff] %v4644_v59  ;;  %v934_v62 = vrot.slane %v926_v50, %v4395_v49  ;;  %v969_v18 = vrot.slane %v965_v5, %v4384_v19  ;;  %v1121_v50 = vsel %vm414_vm12, 1, %v7713_v4  ;;  %v4714_v59 = vpop.permute.xlu1 %1409  ;;  %v4728_v28 = vpop.permute.xlu0 %1407 }
 0x126   : > { %7781 = vst [vmem:[#allocation89_spill] sm:$0xff] %v4647_v55  ;;  %vm7782_vm6 = vmand %vm4288_vm10, %vm4338_vm5  ;;  %2226 = vrot.lane.b32.xlu1 %v3884_v2, %s7480_s18  ;;  %v4749_v10 = vrot.slane %v930_v6, %v4384_v19 }
 0x127   : > { %v1004_v17 = vsel %vm7782_vm6, 1, %v7713_v4  ;;  %7783 = vst [vmem:[#allocation90_spill] sm:$0xff] %v4661_v51  ;;  %7784 = vst [vmem:[#allocation91_spill] sm:$0xff] %v4671_v1  ;;  %v4752_v21 = vrot.slane %v934_v62, %v4384_v19 }
 0x128   : > { %7785 = vst [vmem:[#allocation92_spill] sm:$0xff] %v4674_v47  ;;  %vm7786_vm1 = vmand %vm4288_vm10, %vm4349_vm7  ;;  %v3493_v47 = vld [vmem:[%s7302_s5 + $0xb4] sm:$0xf]  ;;  %v1008_v55 = vrot.slane %v1004_v17, %v4384_v19  ;;  %v1012_v35 = vrot.slane %v1004_v17, %v4395_v49 }
 0x129   : > { %v1043_v51 = vsel %vm7786_vm1, 1, %v7713_v4  ;;  %vm416_vm6 = vmand %vm4288_vm10, %vm4406_vm4  ;;  %7787 = vst [vmem:[#allocation93_spill] sm:$0xff] %v4691_v63  ;;  %v973_v63 = vrot.slane %v965_v5, %v4395_v49  ;;  %2219 = vperm.xlu0 %3651, %v3493_v47   ;;  %v4770_v47 = vpop.permute.xlu1 %1446 }
 0x12a   : > { %vm7788_vm1 = vmand %vm4288_vm10, %vm4355_vm8  ;;  %7789 = vst [vmem:[#allocation94_spill] sm:$0xff] %v4714_v59  ;;  %v1047_v42 = vrot.slane %v1043_v51, %v4384_v19  ;;  %v4726_v5 = vsel %vm416_vm6, 1, %v7713_v4  ;;  %v4740_v59 = vrot.slane %v895_v48, %v4384_v19  ;;  %v1051_v56 = vrot.slane %v1043_v51, %v4395_v49 }
 0x12b   : > { %v1082_v1 = vsel %vm7788_vm1, 1, %v7713_v4  ;;  %7790 = vst [vmem:[#allocation95_spill] sm:$0xff] %v4728_v28  ;;  %vm7791_vm12 = vmand %vm4288_vm10, %vm4401_vm2  ;;  %v3494_v28 = vld [vmem:[%s7302_s5 + $0xb8] sm:$0xf]  ;;  %v1125_v48 = vrot.slane %v1121_v50, %v4384_v19  ;;  %v4762_v51 = vrot.slane %v969_v18, %v4384_v19  ;;  %v4778_v18 = vrot.slane %v1008_v55, %v4384_v19 }
 0x12c   : > { %v1160_v17 = vsel %vm7791_vm12, 1, %v7713_v4  ;;  %7792 = vst [vmem:[#allocation96_spill] sm:$0xff] %v4740_v59  ;;  %v1086_v46 = vrot.slane %v1082_v1, %v4384_v19  ;;  %v1090_v45 = vrot.slane %v1082_v1, %v4395_v49  ;;  %7793 = vst [vmem:[#allocation97_spill] sm:$0xff] %v4749_v10  ;;  %v1129_v59 = vrot.slane %v1121_v50, %v4395_v49  ;;  %v4786_v10 = vpop.permute.xlu0 %1439 }
 0x12d   : > { %7794 = vst [vmem:[#allocation98_spill] sm:$0xff] %v4752_v21  ;;  %vm417_vm6 = vmand %vm4288_vm10, %vm4421_vm14  ;;  %v1203_v1 = vrot.slane %v4726_v5, %v4384_v19  ;;  %v1164_v6 = vrot.slane %v1160_v17, %v4384_v19  ;;  %v1168_v62 = vrot.slane %v1160_v17, %v4395_v49  ;;  %v4775_v50 = vrot.slane %v973_v63, %v4384_v19  ;;  %v4838_v63 = vpop.permute.xlu1 %1478 }
 0x12e   : > { %7795 = vst [vmem:[#allocation99_spill] sm:$0xff] %v4762_v51  ;;  %vm418_vm1 = vmand %vm4297_vm11, %vm4338_vm5  ;;  %v4781_v51 = vrot.slane %v1012_v35, %v4384_v19  ;;  %v4784_v21 = vrot.slane %v1047_v42, %v4384_v19  ;;  %2258 = vperm.xlu1 %3650, %v3494_v28   ;;  %2228 = vrot.lane.b32.xlu0 %v3892_v3, %s7480_s18  ;;  %v1238_v28 = vsel %vm417_vm6, 1, %v7713_v4  ;;  %vm7807_vm10 = vcmp.lt.s32.totalorder %v4451_v11, 51  ;;  %s4946_s18 = scalar_lea.vmem %s7297_s0, %s3554_s20  ;;  %s7939_s20 = smov 47  }
 0x12f   : > { %7796 = vst [vmem:[#allocation100_spill] sm:$0xff] %v4770_v47  ;;  %7797 = vst [vmem:[#allocation101_spill] sm:$0xff] %v4775_v50  ;;  %v4790_v47 = vrot.slane %v1051_v56, %v4384_v19  ;;  %v4799_v35 = vrot.slane %v1086_v46, %v4384_v19  ;;  %v4802_v42 = vrot.slane %v1090_v45, %v4384_v19  ;;  %v1277_v44 = vsel %vm418_vm1, 1, %v7713_v4 }
 0x130   : > { %7798 = vst [vmem:[#allocation102_spill] sm:$0xff] %v4778_v18  ;;  %7799 = vst [vmem:[#allocation103_spill] sm:$0xff] %v4781_v51  ;;  %v4813_v56 = vrot.slane %v1125_v48, %v4384_v19  ;;  %v4816_v46 = vrot.slane %v1129_v59, %v4384_v19  ;;  %v1207_v45 = vrot.slane %v4726_v5, %v4395_v49  ;;  %vm7816_vm6 = vcmp.eq.s32.totalorder %v4454_v8, 1 }
 0x131   : > { %7800 = vst [vmem:[#allocation104_spill] sm:$0xff] %v4784_v21  ;;  %7801 = vst [vmem:[#allocation105_spill] sm:$0xff] %v4786_v10  ;;  %v458_v55 = vsel %vm7807_vm10, %v4040_v27, %v4029_v23  ;;  %v4832_v59 = vrot.slane %v1203_v1, %v4384_v19  ;;  %v4841_v5 = vrot.slane %v1164_v6, %v4384_v19  ;;  %v4855_v10 = vpop.permute.xlu0 %1448 }
 0x132   : > { %7802 = vst [vmem:[#allocation106_spill] sm:$0xff] %v4790_v47  ;;  %vm419_vm15 = vmand %vm4297_vm11, %vm4349_vm7  ;;  %v4844_v17 = vrot.slane %v1168_v62, %v4384_v19  ;;  %2267 = vrot.lane.b32.xlu1 %v3892_v3, %s7472_s26  ;;  %v1242_v6 = vrot.slane %v1238_v28, %v4384_v19  ;;  %v1281_v62 = vrot.slane %v1277_v44, %v4384_v19 }
 0x133   : > { %7803 = vst [vmem:[#allocation107_spill] sm:$0xff] %v4799_v35  ;;  %7804 = vst [vmem:[#allocation108_spill] sm:$0xff] %v4802_v42  ;;  %2265 = vrot.lane.b32.xlu0 %v3884_v2, %s7472_s26  ;;  %s7637_s26 = smov 77  }
 0x134   : > { %7805 = vst [vmem:[#allocation109_spill] sm:$0xff] %v4813_v56  ;;  %7806 = vst [vmem:[#allocation110_spill] sm:$0xff] %v4816_v46  ;;  %v3767_v46 = vmov 839922192  }
 0x135   : > { %7808 = vst [vmem:[#allocation111_spill] sm:$0xff] %v4832_v59  ;;  %vm420_vm9 = vmand %vm4297_vm11, %vm4355_vm8  ;;  %v4880_v59 = vrot.slane %v1207_v45, %v4384_v19 }
 0x136   : > { %7809 = vst [vmem:[#allocation112_spill] sm:$0xff] %v4838_v63  ;;  %7810 = vst [vmem:[#allocation113_spill] sm:$0xff] %v4841_v5  ;;  %v1246_v63 = vrot.slane %v1238_v28, %v4395_v49  ;;  %v1355_v2 = vsel %vm420_vm9, 1, %v7713_v4  ;;  %vm7821_vm9 = vcmp.eq.s32.totalorder %v4476_v15, 1  ;;  %v1394_v5 = vunpack.c.l.s4 %v3767_v46  ;;  %v3496_v46 = vld [vmem:[%s7302_s5 + $0xc0] sm:$0xf] }
 0x137   : > { %7811 = vst [vmem:[#allocation114_spill] sm:$0xff] %v4844_v17  ;;  %vm7812_vm1 = vmmov %vm7807_vm10  ;;  %vm7813_vm10 = vcmp.lt.s32.totalorder %v4451_v11, 50 }
 0x138   : > { %v457_v48 = vsel %vm7812_vm1, %v4029_v23, %v4040_v27  ;;  %v496_v1 = vsel %vm7813_vm10, %v4053_v30, %v4038_v26  ;;  %7814 = vst [vmem:[#allocation115_spill] sm:$0xff] %v4855_v10  ;;  %v1316_v23 = vsel %vm419_vm15, 1, %v7713_v4  ;;  %vm7815_vm1 = vmmov %vm7813_vm10  ;;  %v478_v10 = vsel %vm7816_vm6, %v458_v55, 0.0  ;;  %v8062_v20 = vld [vmem:[#allocation105_spill] sm:$0xff] }
 0x139   : > { %v495_v27 = vsel %vm7815_vm1, %v4038_v26, %v4053_v30  ;;  %7817 = vst [vmem:[#allocation116_spill] sm:$0xff] %v4880_v59  ;;  %v1285_v26 = vrot.slane %v1277_v44, %v4395_v49  ;;  %v3495_v30 = vld [vmem:[%s7302_s5 + $0xbc] sm:$0xf]  ;;  %vm7818_vm6 = vcmp.eq.s32.totalorder %v4470_v14, 1  ;;  %vm7819_vm1 = vcmp.eq.s32.totalorder %v4473_v60, 1  ;;  %v4897_v44 = vpop.permute.xlu1 %1487  ;;  %v4904_v14 = vpop.permute.xlu0 %1485  ;;  %vm427_vm12 = vmand %vm4317_vm0, %vm4369_vm13 }
 0x13a   : > { %v479_v28 = vsel %vm7818_vm6, %v457_v48, 0.0  ;;  %v516_v45 = vsel %vm7819_vm1, %v496_v1, 0.0  ;;  %7820 = vst [vmem:[#allocation117_spill] sm:$0xff] %v4897_v44  ;;  %v1320_v55 = vrot.slane %v1316_v23, %v4384_v19  ;;  %v1324_v8 = vrot.slane %v1316_v23, %v4395_v49  ;;  %7822 = vst [vmem:[#allocation118_spill] sm:$0xff] %v4904_v14  ;;  %v4907_v48 = vld [vmem:[%s3881_s23] sm:$0xff]  ;;  %2297 = vperm.xlu0 %3651, %v3495_v30   ;;  %s7967_s23 = smov 46  }
 0x13b   : > { %v517_v59 = vsel %vm7821_vm9, %v495_v27, 0.0  ;;  %v525_v17 = vmul.f32 %v4049_v29, %v516_v45  ;;  %7823 = vst [vmem:[#allocation119_spill] sm:$0xff] %v4907_v48  ;;  %2304 = vrot.lane.b32.xlu1 %v4907_v48, %s7637_s26  ;;  %v4912_v1 = vrot.slane %v1242_v6, %v4384_v19  ;;  %v4916_v27 = vrot.slane %v1281_v62, %v4384_v19  ;;  %vm421_vm6 = vmand %vm4297_vm11, %vm4401_vm2 }
 0x13c   : > { %v526_v23 = vmul.f32 %v4049_v29, %v517_v59  ;;  %v1359_v45 = vrot.slane %v1355_v2, %v4384_v19  ;;  %v4927_v6 = vrot.slane %v1246_v63, %v4384_v19  ;;  %v486_v29 = vmul.f32 %v4034_v25, %v478_v10  ;;  %vm423_vm9 = vmand %vm4297_vm11, %vm4421_vm14 }
 0x13d   : > { %7824 = vst [vmem:[#allocation120_spill] sm:$0xff] %v4912_v1  ;;  %7825 = vst [vmem:[#allocation121_spill] sm:$0xff] %v4916_v27  ;;  %v487_v59 = vmul.f32 %v4034_v25, %v479_v28  ;;  %vm7827_vm1 = vcmp.lt.s32.totalorder %v4451_v11, 49  ;;  %v4939_v30 = vrot.slane %v1285_v26, %v4384_v19  ;;  %v1363_v10 = vrot.slane %v1355_v2, %v4395_v49  ;;  %v4953_v63 = vpop.permute.xlu1 %1524 }
 0x13e   : > { %7826 = vst [vmem:[#allocation122_spill] sm:$0xff] %v4927_v6  ;;  %v535_v62 = vsel %vm7827_vm1, %v4058_v32, %v4062_v33  ;;  %vm7829_vm10 = vmmov %vm7827_vm1  ;;  %v4956_v28 = vrot.slane %v1320_v55, %v4384_v19  ;;  %v4959_v26 = vrot.slane %v1324_v8, %v4384_v19  ;;  %v527_v15 = vadd.f32 %v525_v17, %v486_v29  ;;  %v4989_v55 = vld [vmem:[%s4946_s18] sm:$0xff] }
 0x13f   : > { %7828 = vst [vmem:[#allocation123_spill] sm:$0xff] %v4939_v30  ;;  %v534_v25 = vsel %vm7829_vm10, %v4062_v33, %v4058_v32  ;;  %7830 = vst [vmem:[#allocation124_spill] sm:$0xff] %v4953_v63  ;;  %vm7833_vm1 = vcmp.lt.s32.totalorder %v4451_v11, 48  ;;  %v1395_v14 = vunpack.c.0.s8 %v1394_v5  ;;  %v4971_v32 = vsel %vm421_vm6, 1, %v7713_v4  ;;  %v4973_v33 = vpop.permute.xlu0 %1517  ;;  %2336 = vperm.xlu1 %3650, %v3496_v46   ;;  %2306 = vrot.lane.b32.xlu0 %v3892_v3, %s7637_s26  ;;  %v446_v29 = vld [vmem:[%s7303_s6] sm:$0xf] }
 0x140   : > { %7831 = vst [vmem:[#allocation125_spill] sm:$0xff] %v4956_v28  ;;  %7832 = vst [vmem:[#allocation126_spill] sm:$0xff] %v4959_v26  ;;  %v574_v60 = vsel %vm7833_vm1, %v4076_v37, %v4064_v34  ;;  %v528_v8 = vadd.f32 %v526_v23, %v487_v59  ;;  %vm7835_vm10 = vcmp.eq.s32.totalorder %v4492_v24, 1  ;;  %vm7836_vm1 = vcmp.lt.s32.totalorder %v4451_v11, 47  ;;  %v7856_v24 = vld [vmem:[#allocation5_spill] sm:$0xff]  ;;  %s8178_s26 = smov 2  }
 0x141   : > { %7834 = vst [vmem:[#allocation127_spill] sm:$0xff] %v4973_v33  ;;  %v555_v17 = vsel %vm7835_vm10, %v535_v62, 0.0  ;;  %v613_v5 = vsel %vm7836_vm1, %v4093_v43, %v4080_v39  ;;  %v4984_v2 = vrot.slane %v1359_v45, %v4384_v19  ;;  %vm422_vm6 = vmand %vm4297_vm11, %vm4406_vm4  ;;  %vm7838_vm10 = vcmp.lt.s32.totalorder %v4451_v11, 48 }
 0x142   : > { %v573_v23 = vsel %vm7838_vm10, %v4064_v34, %v4076_v37  ;;  %vm7839_vm1 = vcmp.eq.s32.totalorder %v4495_v16, 1  ;;  %v564_v45 = vmul.f32 %v4078_v38, %v555_v17  ;;  %vm7840_vm15 = vcmp.lt.s32.totalorder %v4451_v11, 47 }
 0x143   : > { %7837 = vst [vmem:[#allocation128_spill] sm:$0xff] %v4984_v2  ;;  %v556_v46 = vsel %vm7839_vm1, %v534_v25, 0.0  ;;  %v612_v3 = vsel %vm7840_vm15, %v4080_v39, %v4093_v43  ;;  %vm7841_vm10 = vcmp.eq.s32.totalorder %v4518_v57, 1  ;;  %v5015_v37 = vrot.slane %v1363_v10, %v4384_v19  ;;  %v5019_v39 = vpop.permute.xlu1 %1556  ;;  %v5027_v17 = vpop.permute.xlu0 %1526  ;;  %2355 = vrot.lane.b32.xlu1 %v4989_v55, %s3721_s25  ;;  %2345 = vperm.xlu0 %3651, %v446_v29   ;;  %v7855_v57 = vld [vmem:[#allocation85_spill] sm:$0xff] }
 0x144   : > { %v565_v59 = vmul.f32 %v4078_v38, %v556_v46  ;;  %v594_v34 = vsel %vm7841_vm10, %v574_v60, 0.0  ;;  %v1418_v62 = vrot.slane %v4971_v32, %v4384_v19  ;;  %7843 = vst [vmem:[#allocation130_spill] sm:$0xff] %v5019_v39  ;;  %vm7844_vm15 = vcmp.eq.s32.totalorder %v4581_v53, 1  ;;  %7846 = vst [vmem:[#allocation132_spill] sm:$0xff] %v5027_v17  ;;  %v7851_v53 = vld [vmem:[#allocation6_spill] sm:$0xff] }
 0x145   : > { %7842 = vst [vmem:[#allocation129_spill] sm:$0xff] %v5015_v37  ;;  %v603_v43 = vmul.f32 %v4082_v40, %v594_v34  ;;  %v633_v25 = vsel %vm7844_vm15, %v613_v5, 0.0  ;;  %v5025_v38 = vsub.s32 %v1395_v14, %v4347_v12  ;;  %v1453_v60 = vsel %vm422_vm6, 1, %v7713_v4  ;;  %v7849_v12 = vld [vmem:[#allocation82_spill] sm:$0xff]  ;;  %v7850_v14 = vld [vmem:[#allocation83_spill] sm:$0xff] }
 0x146   : > { %vm7847_vm10 = vcmp.eq.s32.totalorder %v4535_v22, 1  ;;  %vm7848_vm15 = vcmp.eq.s32.totalorder %v4584_v61, 1  ;;  %vm7508_vm1 = vcmp.eq.s32.totalorder %v7849_v12, 1  ;;  %v1422_v46 = vrot.slane %v4971_v32, %v4395_v49  ;;  %v7852_v22 = vld [vmem:[#allocation7_spill] sm:$0xff] }
 0x147   : > { %7845 = vst [vmem:[#allocation131_spill] sm:$0xff] %v5025_v38  ;;  %v595_v10 = vsel %vm7847_vm10, %v573_v23, 0.0  ;;  %v634_v5 = vsel %vm7848_vm15, %v612_v3, 0.0  ;;  %v2363_v23 = vld [vmem:[%s7300_s3] sm:$0xf]  ;;  %v5054_v3 = vcombine.high %v4989_v55, %v4989_v55  ;;  %v566_v34 = vadd.f32 %v564_v45, %v527_v15  ;;  %v5070_v15 = vpop.permute.xlu1 %1565 }
 0x148   : > { %v604_v61 = vmul.f32 %v4082_v40, %v595_v10  ;;  %vm7853_vm6 = vcmp.lt.s32.totalorder %v4451_v11, 46  ;;  %v567_v16 = vadd.f32 %v565_v59, %v528_v8  ;;  %v642_v39 = vmul.f32 %v7856_v24, %v633_v25  ;;  %7858 = vst [vmem:[#allocation7_spill] sm:$0xff] %v5070_v15  ;;  %2366 = vperm.xlu1 %3650, %v2363_v23   ;;  %v7867_v23 = vld [vmem:[#allocation86_spill] sm:$0xff]  ;;  %v3497_v15 = vld [vmem:[%s7300_s3 + $0x4] sm:$0xf] }
 0x149   : > { %v651_v32 = vsel %vm7853_vm6, %v7852_v22, %v7851_v53  ;;  %vm7854_vm10 = vmmov %vm7853_vm6  ;;  %v5068_v33 = vrot.slane %v1418_v62, %v4384_v19  ;;  %v1457_v40 = vrot.slane %v1453_v60, %v4384_v19  ;;  %v605_v45 = vadd.f32 %v603_v43, %v566_v34  ;;  %v7863_v62 = vld [vmem:[#allocation11_spill] sm:$0xff]  ;;  %v7864_v43 = vld [vmem:[#allocation8_spill] sm:$0xff]  ;;  %2357 = vrot.lane.b32.xlu0 %v5054_v3, %s3721_s25  ;;  %s7875_s25 = smov 50  }
 0x14a   : > { %v652_v29 = vsel %vm7854_vm10, %v7851_v53, %v7852_v22  ;;  %v643_v10 = vmul.f32 %v7856_v24, %v634_v5  ;;  %v5080_v53 = vsel %vm423_vm9, 1, %v7713_v4  ;;  %v5082_v22 = vpop.permute.xlu0 %1563  ;;  %vm424_vm6 = vmand %vm4317_vm0, %vm4338_vm5  ;;  %v1461_v59 = vrot.slane %v1453_v60, %v4395_v49  ;;  %v7868_v34 = vld [vmem:[#allocation9_spill] sm:$0xff] }
 0x14b   : > { %7857 = vst [vmem:[#allocation6_spill] sm:$0xff] %v5068_v33  ;;  %7859 = vst [vmem:[#allocation5_spill] sm:$0xff] %v5082_v22  ;;  %vm7861_vm10 = vcmp.eq.s32.totalorder %v4593_v54, 1  ;;  %vm7862_vm15 = vcmp.eq.s32.totalorder %v4596_v0, 1  ;;  %vm7865_vm11 = vcmp.lt.s32.totalorder %v4451_v11, 45  ;;  %v606_v60 = vadd.f32 %v604_v61, %v567_v16 }
 0x14c   : > { %v672_v24 = vsel %vm7861_vm10, %v652_v29, 0.0  ;;  %v673_v36 = vsel %vm7862_vm15, %v651_v32, 0.0  ;;  %v690_v25 = vsel %vm7865_vm11, %v7864_v43, %v7863_v62  ;;  %vm7866_vm9 = vmmov %vm7865_vm11  ;;  %v5111_v0 = vrot.slane %v1422_v46, %v4384_v19  ;;  %2375 = vrot.lane.b32.xlu1 %v5054_v3, %s7875_s25 }
 0x14d   : > { %v691_v5 = vsel %vm7866_vm9, %v7863_v62, %v7864_v43  ;;  %vm425_vm15 = vmand %vm4317_vm0, %vm4349_vm7  ;;  %v681_v32 = vmul.f32 %v7868_v34, %v672_v24  ;;  %v682_v29 = vmul.f32 %v7868_v34, %v673_v36  ;;  %v644_v54 = vadd.f32 %v642_v39, %v605_v45  ;;  %v5117_v43 = vpop.permute.xlu1 %1602  ;;  %v7877_v36 = vld [vmem:[#allocation13_spill] sm:$0xff]  ;;  %2373 = vrot.lane.b32.xlu0 %v4989_v55, %s7875_s25  ;;  %s7985_s25 = smov 45  }
 0x14e   : > { %7869 = vst [vmem:[#allocation50_spill] sm:$0xff] %v5111_v0  ;;  %v1496_v62 = vrot.slane %v5080_v53, %v4384_v19  ;;  %7870 = vst [vmem:[#allocation11_spill] sm:$0xff] %v5117_v43  ;;  %v5120_v22 = vrot.slane %v1457_v40, %v4384_v19  ;;  %v5128_v16 = vsel %vm424_vm6, 1, %v7713_v4  ;;  %v645_v61 = vadd.f32 %v643_v10, %v606_v60  ;;  %v5135_v24 = vpop.permute.xlu0 %1595  ;;  %v7876_v40 = vld [vmem:[#allocation12_spill] sm:$0xff]  ;;  %v7886_v43 = vld [vmem:[#allocation91_spill] sm:$0xff] }
 0x14f   : > { %vm7872_vm9 = vcmp.eq.s32.totalorder %v4607_v58, 1  ;;  %vm7873_vm11 = vcmp.eq.s32.totalorder %v4622_v9, 1  ;;  %v1570_v45 = vsel %vm425_vm15, 1, %v7713_v4  ;;  %7874 = vst [vmem:[#allocation9_spill] sm:$0xff] %v5135_v24  ;;  %vm7878_vm10 = vcmp.lt.s32.totalorder %v4451_v11, 35  ;;  %vm426_vm15 = vmand %vm4317_vm0, %vm4355_vm8  ;;  %v7881_v58 = vld [vmem:[#allocation14_spill] sm:$0xff] }
 0x150   : > { %7871 = vst [vmem:[#allocation8_spill] sm:$0xff] %v5120_v22  ;;  %v711_v39 = vsel %vm7872_vm9, %v691_v5, 0.0  ;;  %v712_v46 = vsel %vm7873_vm11, %v690_v25, 0.0  ;;  %v729_v34 = vsel %vm7878_vm10, %v7877_v36, %v7876_v40  ;;  %vm7879_vm6 = vmmov %vm7878_vm10  ;;  %v1500_v25 = vrot.slane %v5080_v53, %v4395_v49  ;;  %v7882_v24 = vld [vmem:[#allocation17_spill] sm:$0xff]  ;;  %2392 = vrot.lane.b32.xlu1 %v4989_v55, %s3722_s12 }
 0x151   : > { %v730_v10 = vsel %vm7879_vm6, %v7876_v40, %v7877_v36  ;;  %v5156_v5 = vrot.slane %v1461_v59, %v4384_v19  ;;  %v683_v60 = vadd.f32 %v681_v32, %v644_v54  ;;  %v684_v9 = vadd.f32 %v682_v29, %v645_v61  ;;  %v7884_v36 = vld [vmem:[#allocation88_spill] sm:$0xff]  ;;  %v7885_v53 = vld [vmem:[#allocation89_spill] sm:$0xff]  ;;  %v7888_v59 = vld [vmem:[#allocation10_spill] sm:$0xff]  ;;  %v5179_v44 = vpop.permute.xlu1 %1634  ;;  %2385 = vperm.xlu0 %3651, %v3497_v15  }
 0x152   : > { %vm7883_vm10 = vcmp.lt.s32.totalorder %v4451_v11, 34  ;;  %vm7522_vm11 = vcmp.eq.s32.totalorder %v7884_v36, 1  ;;  %v1535_v54 = vrot.slane %v5128_v16, %v4384_v19  ;;  %v720_v32 = vmul.f32 %v7888_v59, %v711_v39  ;;  %v7889_v61 = vld [vmem:[#allocation92_spill] sm:$0xff]  ;;  %7890 = vst [vmem:[#allocation13_spill] sm:$0xff] %v5179_v44  ;;  %v7934_v36 = vld [vmem:[#allocation22_spill] sm:$0xff] }
 0x153   : > { %7880 = vst [vmem:[#allocation12_spill] sm:$0xff] %v5156_v5  ;;  %v769_v40 = vsel %vm7883_vm10, %v7882_v24, %v7881_v58  ;;  %v721_v29 = vmul.f32 %v7888_v59, %v712_v46  ;;  %v1574_v17 = vrot.slane %v1570_v45, %v4384_v19  ;;  %v1539_v48 = vrot.slane %v5128_v16, %v4395_v49  ;;  %v5188_v46 = vpop.permute.xlu0 %1604  ;;  %v7893_v59 = vld [vmem:[#allocation15_spill] sm:$0xff] }
 0x154   : > { %v750_v38 = vsel %vm7508_vm1, %v730_v10, 0.0  ;;  %vm7891_vm9 = vcmp.eq.s32.totalorder %v7850_v14, 1  ;;  %v1578_v39 = vrot.slane %v1570_v45, %v4395_v49  ;;  %7892 = vst [vmem:[#allocation14_spill] sm:$0xff] %v5188_v46  ;;  %v1609_v16 = vsel %vm426_vm15, 1, %v7713_v4  ;;  %v3498_v10 = vld [vmem:[%s7300_s3 + $0x8] sm:$0xf] }
 0x155   : > { %v751_v5 = vsel %vm7891_vm9, %v729_v34, 0.0  ;;  %v759_v12 = vmul.f32 %v7893_v59, %v750_v38  ;;  %vm7894_vm9 = vmmov %vm7883_vm10  ;;  %vm7895_vm1 = vcmp.eq.s32.totalorder %v7855_v57, 1  ;;  %v1648_v38 = vsel %vm427_vm12, 1, %v7713_v4  ;;  %v7900_v46 = vld [vmem:[#allocation96_spill] sm:$0xff]  ;;  %v5227_v22 = vpop.permute.xlu1 %1643  ;;  %2404 = vperm.xlu1 %3650, %v3498_v10   ;;  %2394 = vrot.lane.b32.xlu0 %v5054_v3, %s3722_s12  ;;  %s7925_s12 = smov 48  }
 0x156   : > { %v768_v34 = vsel %vm7894_vm9, %v7881_v58, %v7882_v24  ;;  %v789_v45 = vsel %vm7895_vm1, %v769_v40, 0.0  ;;  %v760_v14 = vmul.f32 %v7893_v59, %v751_v5  ;;  %v7896_v58 = vld [vmem:[#allocation93_spill] sm:$0xff]  ;;  %v5218_v24 = vrot.slane %v1496_v62, %v4384_v19  ;;  %7901 = vst [vmem:[#allocation15_spill] sm:$0xff] %v5227_v22  ;;  %v7903_v59 = vld [vmem:[#allocation16_spill] sm:$0xff]  ;;  %vm429_vm10 = vmand %vm4317_vm0, %vm4406_vm4 }
 0x157   : > { %v5221_v15 = vrot.slane %v1500_v25, %v4384_v19  ;;  %v5224_v40 = vrot.slane %v1535_v54, %v4384_v19  ;;  %v722_v57 = vadd.f32 %v720_v32, %v683_v60  ;;  %v723_v44 = vadd.f32 %v721_v29, %v684_v9  ;;  %v7904_v25 = vld [vmem:[#allocation97_spill] sm:$0xff]  ;;  %v7906_v32 = vld [vmem:[#allocation98_spill] sm:$0xff]  ;;  %v7914_v10 = vld [vmem:[#allocation20_spill] sm:$0xff] }
 0x158   : > { %7897 = vst [vmem:[#allocation17_spill] sm:$0xff] %v5218_v24  ;;  %v1613_v0 = vrot.slane %v1609_v16, %v4384_v19  ;;  %v1617_v5 = vrot.slane %v1609_v16, %v4395_v49  ;;  %vm7902_vm12 = vcmp.eq.s32.totalorder %v7867_v23, 1  ;;  %v798_v24 = vmul.f32 %v7903_v59, %v789_v45  ;;  %v7911_v45 = vld [vmem:[#allocation19_spill] sm:$0xff] }
 0x159   : > { %7898 = vst [vmem:[#allocation56_spill] sm:$0xff] %v5221_v15  ;;  %7899 = vst [vmem:[#allocation10_spill] sm:$0xff] %v5224_v40  ;;  %v790_v62 = vsel %vm7902_vm12, %v768_v34, 0.0  ;;  %v5235_v15 = vpop.permute.xlu0 %1641  ;;  %v1652_v9 = vrot.slane %v1648_v38, %v4384_v19  ;;  %v1656_v60 = vrot.slane %v1648_v38, %v4395_v49  ;;  %v761_v54 = vadd.f32 %v759_v12, %v722_v57  ;;  %v7910_v34 = vld [vmem:[#allocation18_spill] sm:$0xff]  ;;  %v7915_v38 = vld [vmem:[#allocation23_spill] sm:$0xff] }
 0x15a   : > { %7905 = vst [vmem:[#allocation16_spill] sm:$0xff] %v5235_v15  ;;  %v5242_v29 = vrot.slane %v1574_v17, %v4384_v19  ;;  %v5245_v16 = vrot.slane %v1578_v39, %v4384_v19  ;;  %vm428_vm12 = vmand %vm4317_vm0, %vm4401_vm2  ;;  %v5254_v57 = vrot.slane %v1539_v48, %v4384_v19  ;;  %v762_v12 = vadd.f32 %v760_v14, %v723_v44  ;;  %v5278_v14 = vpop.permute.xlu1 %1680  ;;  %v7921_v22 = vld [vmem:[#allocation99_spill] sm:$0xff] }
 0x15b   : > { %vm7912_vm15 = vcmp.lt.s32.totalorder %v4451_v11, 33  ;;  %vm7916_vm9 = vcmp.lt.s32.totalorder %v4451_v11, 32  ;;  %vm7539_vm6 = vcmp.lt.s32.totalorder %v4451_v11, 19  ;;  %v799_v44 = vmul.f32 %v7903_v59, %v790_v62  ;;  %7918 = vst [vmem:[#allocation18_spill] sm:$0xff] %v5278_v14  ;;  %2413 = vrot.lane.b32.xlu1 %v5054_v3, %s7925_s12  ;;  %2411 = vrot.lane.b32.xlu0 %v4989_v55, %s7925_s12  ;;  %v7935_v14 = vld [vmem:[#allocation26_spill] sm:$0xff]  ;;  %s8019_s12 = smov 34  }
 0x15c   : > { %7907 = vst [vmem:[#allocation133_spill] sm:$0xff] %v5242_v29  ;;  %7908 = vst [vmem:[#allocation134_spill] sm:$0xff] %v5245_v16  ;;  %v807_v17 = vsel %vm7912_vm15, %v7911_v45, %v7910_v34  ;;  %v847_v23 = vsel %vm7916_vm9, %v7915_v38, %v7914_v10  ;;  %v800_v15 = vadd.f32 %v798_v24, %v761_v54  ;;  %v7928_v54 = vld [vmem:[#allocation21_spill] sm:$0xff] }
 0x15d   : > { %7909 = vst [vmem:[#allocation135_spill] sm:$0xff] %v5254_v57  ;;  %vm7913_vm1 = vmmov %vm7912_vm15  ;;  %v5288_v16 = vrot.slane %v1652_v9, %v4384_v19  ;;  %v5291_v62 = vrot.slane %v1656_v60, %v4384_v19  ;;  %v5293_v59 = vpop.permute.xlu0 %1673  ;;  %v1726_v60 = vsel %vm429_vm10, 1, %v7713_v4  ;;  %vm7937_vm10 = vcmp.lt.s32.totalorder %v4451_v11, 30 }
 0x15e   : > { %v808_v39 = vsel %vm7913_vm1, %v7910_v34, %v7911_v45  ;;  %vm7917_vm15 = vmmov %vm7916_vm9  ;;  %v5281_v34 = vrot.slane %v1613_v0, %v4384_v19  ;;  %v5284_v45 = vrot.slane %v1617_v5, %v4384_v19  ;;  %7924 = vst [vmem:[#allocation137_spill] sm:$0xff] %v5293_v59  ;;  %v1687_v0 = vsel %vm428_vm12, 1, %v7713_v4 }
 0x15f   : > { %v846_v48 = vsel %vm7917_vm15, %v7914_v10, %v7915_v38  ;;  %7922 = vst [vmem:[#allocation23_spill] sm:$0xff] %v5288_v16  ;;  %7923 = vst [vmem:[#allocation136_spill] sm:$0xff] %v5291_v62  ;;  %v828_v24 = vsel %vm7522_vm11, %v808_v39, 0.0  ;;  %vm7926_vm9 = vcmp.eq.s32.totalorder %v7885_v53, 1  ;;  %vm7927_vm15 = vcmp.eq.s32.totalorder %v7886_v43, 1  ;;  %v7931_v38 = vld [vmem:[#allocation24_spill] sm:$0xff]  ;;  %2430 = vrot.lane.b32.xlu1 %v4989_v55, %s7939_s20 }
 0x160   : > { %7919 = vst [vmem:[#allocation19_spill] sm:$0xff] %v5281_v34  ;;  %7920 = vst [vmem:[#allocation20_spill] sm:$0xff] %v5284_v45  ;;  %v829_v5 = vsel %vm7926_vm9, %v807_v17, 0.0  ;;  %v867_v9 = vsel %vm7927_vm15, %v847_v23, 0.0  ;;  %v837_v39 = vmul.f32 %v7928_v54, %v828_v24  ;;  %vm7929_vm12 = vcmp.eq.s32.totalorder %v7889_v61, 1  ;;  %v7930_v23 = vld [vmem:[#allocation25_spill] sm:$0xff] }
 0x161   : > { %v838_v10 = vmul.f32 %v7928_v54, %v829_v5  ;;  %v868_v17 = vsel %vm7929_vm12, %v846_v48, 0.0  ;;  %vm7932_vm9 = vcmp.lt.s32.totalorder %v4451_v11, 31  ;;  %v3499_v24 = vld [vmem:[%s7300_s3 + $0xc] sm:$0xf]  ;;  %vm430_vm12 = vmand %vm4317_vm0, %vm4421_vm14  ;;  %v801_v48 = vadd.f32 %v799_v44, %v762_v12  ;;  %v5341_v54 = vpop.permute.xlu1 %1712  ;;  %v7936_v62 = vld [vmem:[#allocation29_spill] sm:$0xff]  ;;  %v5350_v45 = vpop.permute.xlu0 %1682 }
 0x162   : > { %v886_v43 = vsel %vm7932_vm9, %v7931_v38, %v7930_v23  ;;  %v885_v5 = vsel %vm7932_vm9, %v7930_v23, %v7931_v38  ;;  %7933 = vst [vmem:[#allocation21_spill] sm:$0xff] %v5341_v54  ;;  %v1691_v61 = vrot.slane %v1687_v0, %v4384_v19  ;;  %v1695_v53 = vrot.slane %v1687_v0, %v4395_v49  ;;  %vm7941_vm1 = vmmov %vm7937_vm10  ;;  %v3500_v38 = vld [vmem:[%s7300_s3 + $0x10] sm:$0xf] }
 0x163   : > { %v876_v59 = vmul.f32 %v7934_v36, %v867_v9  ;;  %v925_v16 = vsel %vm7937_vm10, %v7936_v62, %v7935_v14  ;;  %7938 = vst [vmem:[#allocation25_spill] sm:$0xff] %v5350_v45  ;;  %v1730_v12 = vrot.slane %v1726_v60, %v4384_v19  ;;  %v1734_v44 = vrot.slane %v1726_v60, %v4395_v49  ;;  %v7962_v45 = vld [vmem:[#allocation110_spill] sm:$0xff] }
 0x164   : > { %v877_v23 = vmul.f32 %v7934_v36, %v868_v17  ;;  %vm7940_vm9 = vcmp.eq.s32.totalorder %v7896_v58, 1  ;;  %v924_v9 = vsel %vm7941_vm1, %v7935_v14, %v7936_v62  ;;  %2423 = vperm.xlu0 %3651, %v3499_v24   ;;  %v839_v36 = vadd.f32 %v837_v39, %v800_v15  ;;  %v7943_v62 = vld [vmem:[#allocation27_spill] sm:$0xff]  ;;  %2442 = vperm.xlu1 %3650, %v3500_v38  }
 0x165   : > { %v906_v0 = vsel %vm7940_vm9, %v886_v43, 0.0  ;;  %v5374_v43 = vsel %vm430_vm12, 1, %v7713_v4  ;;  %v840_v60 = vadd.f32 %v838_v10, %v801_v48  ;;  %vm7942_vm1 = vcmp.eq.s32.totalorder %v7900_v46, 1  ;;  %v5385_v58 = vpop.permute.xlu1 %1721 }
 0x166   : > { %v907_v14 = vsel %vm7942_vm1, %v885_v5, 0.0  ;;  %v915_v17 = vmul.f32 %v7943_v62, %v906_v0  ;;  %vm7549_vm9 = vcmp.eq.s32.totalorder %v4790_v47, 1  ;;  %vm7557_vm10 = vcmp.lt.s32.totalorder %v4451_v11, 16  ;;  %7945 = vst [vmem:[#allocation24_spill] sm:$0xff] %v5385_v58  ;;  %v7949_v5 = vld [vmem:[#allocation31_spill] sm:$0xff]  ;;  %v7950_v0 = vld [vmem:[#allocation30_spill] sm:$0xff] }
 0x167   : > { %v916_v8 = vmul.f32 %v7943_v62, %v907_v14  ;;  %vm7944_vm15 = vcmp.eq.s32.totalorder %v7904_v25, 1  ;;  %v5389_v15 = vrot.slane %v1691_v61, %v4384_v19  ;;  %v5392_v39 = vrot.slane %v1695_v53, %v4384_v19  ;;  %v7958_v25 = vld [vmem:[#allocation113_spill] sm:$0xff]  ;;  %v8076_v62 = vld [vmem:[#allocation127_spill] sm:$0xff] }
 0x168   : > { %v945_v24 = vsel %vm7944_vm15, %v925_v16, 0.0  ;;  %v878_v10 = vadd.f32 %v876_v59, %v839_v36  ;;  %vm7948_vm12 = vcmp.eq.s32.totalorder %v7906_v32, 1  ;;  %vm7951_vm1 = vcmp.lt.s32.totalorder %v4451_v11, 29  ;;  %v5400_v16 = vpop.permute.xlu0 %1719  ;;  %vm431_vm15 = vmand %vm4321_vm3, %vm4338_vm5  ;;  %v7954_v59 = vld [vmem:[#allocation32_spill] sm:$0xff]  ;;  %v7955_v36 = vld [vmem:[#allocation35_spill] sm:$0xff]  ;;  %2432 = vrot.lane.b32.xlu0 %v5054_v3, %s7939_s20  ;;  %2451 = vrot.lane.b32.xlu1 %v5054_v3, %s7967_s23  ;;  %s8045_s20 = smov 33  }
 0x169   : > { %7946 = vst [vmem:[#allocation22_spill] sm:$0xff] %v5389_v15  ;;  %7947 = vst [vmem:[#allocation26_spill] sm:$0xff] %v5392_v39  ;;  %v946_v48 = vsel %vm7948_vm12, %v924_v9, 0.0  ;;  %v964_v14 = vsel %vm7951_vm1, %v7950_v0, %v7949_v5  ;;  %v1769_v53 = vrot.slane %v5374_v43, %v4384_v19  ;;  %v879_v61 = vadd.f32 %v877_v23, %v840_v60  ;;  %v7959_v23 = vld [vmem:[#allocation28_spill] sm:$0xff] }
 0x16a   : > { %7952 = vst [vmem:[#allocation29_spill] sm:$0xff] %v5400_v16  ;;  %v1003_v9 = vsel %vm7539_vm6, %v7955_v36, %v7954_v59  ;;  %v5416_v38 = vrot.slane %v1730_v12, %v4384_v19  ;;  %v5419_v32 = vrot.slane %v1734_v44, %v4384_v19  ;;  %v917_v46 = vadd.f32 %v915_v17, %v878_v10  ;;  %vm7960_vm0 = vmmov %vm7951_vm1  ;;  %v5436_v17 = vpop.permute.xlu1 %1758 }
 0x16b   : > { %v954_v60 = vmul.f32 %v7959_v23, %v945_v24  ;;  %v963_v54 = vsel %vm7960_vm0, %v7949_v5, %v7950_v0  ;;  %v1002_v16 = vsel %vm7539_vm6, %v7954_v59, %v7955_v36  ;;  %v918_v12 = vadd.f32 %v916_v8, %v879_v61  ;;  %7963 = vst [vmem:[#allocation30_spill] sm:$0xff] %v5436_v17  ;;  %v7964_v8 = vld [vmem:[#allocation33_spill] sm:$0xff]  ;;  %v7968_v0 = vld [vmem:[#allocation114_spill] sm:$0xff] }
 0x16c   : > { %7956 = vst [vmem:[#allocation27_spill] sm:$0xff] %v5416_v38  ;;  %7957 = vst [vmem:[#allocation31_spill] sm:$0xff] %v5419_v32  ;;  %v955_v58 = vmul.f32 %v7959_v23, %v946_v48  ;;  %vm7961_vm12 = vcmp.eq.s32.totalorder %v7921_v22, 1  ;;  %vm7558_vm1 = vcmp.eq.s32.totalorder %v7962_v45, 1  ;;  %v5444_v24 = vsel %vm431_vm15, 1, %v7713_v4  ;;  %v5449_v5 = vpop.permute.xlu0 %1751  ;;  %v7973_v23 = vld [vmem:[#allocation36_spill] sm:$0xff]  ;;  %2449 = vrot.lane.b32.xlu0 %v4989_v55, %s7967_s23  ;;  %2468 = vrot.lane.b32.xlu1 %v4989_v55, %s7985_s25 }
 0x16d   : > { %v984_v44 = vsel %vm7961_vm12, %v964_v14, 0.0  ;;  %vm7965_vm0 = vcmp.eq.s32.totalorder %v4778_v18, 1  ;;  %7966 = vst [vmem:[#allocation51_spill] sm:$0xff] %v5449_v5  ;;  %v1773_v14 = vrot.slane %v5374_v43, %v4395_v49  ;;  %v5457_v61 = vrot.slane %v1769_v53, %v4384_v19  ;;  %v7975_v18 = vld [vmem:[#allocation38_spill] sm:$0xff]  ;;  %v7976_v22 = vld [vmem:[#allocation41_spill] sm:$0xff]  ;;  %v7979_v53 = vld [vmem:[#allocation111_spill] sm:$0xff] }
 0x16e   : > { %v993_v10 = vmul.f32 %v7964_v8, %v984_v44  ;;  %v1023_v48 = vsel %vm7965_vm0, %v1003_v9, 0.0  ;;  %vm7970_vm15 = vcmp.eq.s32.totalorder %v4775_v50, 1  ;;  %vm7971_vm6 = vcmp.eq.s32.totalorder %v4781_v51, 1  ;;  %v7972_v9 = vld [vmem:[#allocation37_spill] sm:$0xff]  ;;  %v7983_v38 = vld [vmem:[#allocation116_spill] sm:$0xff]  ;;  %s8057_s23 = smov 32  }
 0x16f   : > { %7969 = vst [vmem:[#allocation32_spill] sm:$0xff] %v5457_v61  ;;  %v985_v59 = vsel %vm7970_vm15, %v963_v54, 0.0  ;;  %v1024_v36 = vsel %vm7971_vm6, %v1002_v16, 0.0  ;;  %vm7974_vm0 = vcmp.lt.s32.totalorder %v4451_v11, 18  ;;  %vm7977_vm12 = vcmp.lt.s32.totalorder %v4451_v11, 17  ;;  %v7980_v61 = vld [vmem:[#allocation34_spill] sm:$0xff] }
 0x170   : > { %v1042_v44 = vsel %vm7974_vm0, %v7973_v23, %v7972_v9  ;;  %v1081_v5 = vsel %vm7977_vm12, %v7976_v22, %v7975_v18  ;;  %v956_v43 = vadd.f32 %v954_v60, %v917_v46  ;;  %v994_v54 = vmul.f32 %v7964_v8, %v985_v59  ;;  %vm7978_vm6 = vmmov %vm7974_vm0  ;;  %v3501_v51 = vld [vmem:[%s7300_s3 + $0x14] sm:$0xf]  ;;  %v5490_v60 = vpop.permute.xlu1 %1790  ;;  %v8028_v45 = vld [vmem:[#allocation76_spill] sm:$0xff] }
 0x171   : > { %v1041_v16 = vsel %vm7978_vm6, %v7972_v9, %v7973_v23  ;;  %v1808_v50 = vrot.slane %v5444_v24, %v4384_v19  ;;  %v957_v17 = vadd.f32 %v955_v58, %v918_v12  ;;  %v1032_v32 = vmul.f32 %v7980_v61, %v1023_v48  ;;  %7981 = vst [vmem:[#allocation35_spill] sm:$0xff] %v5490_v60  ;;  %v5498_v58 = vpop.permute.xlu0 %1760  ;;  %v7987_v12 = vld [vmem:[#allocation39_spill] sm:$0xff]  ;;  %v7989_v48 = vld [vmem:[#allocation42_spill] sm:$0xff] }
 0x172   : > { %v1080_v46 = vsel %vm7977_vm12, %v7975_v18, %v7976_v22  ;;  %v1812_v8 = vrot.slane %v5444_v24, %v4395_v49  ;;  %v995_v59 = vadd.f32 %v993_v10, %v956_v43  ;;  %v1033_v9 = vmul.f32 %v7980_v61, %v1024_v36  ;;  %7984 = vst [vmem:[#allocation28_spill] sm:$0xff] %v5498_v58  ;;  %vm432_vm12 = vmand %vm4321_vm3, %vm4349_vm7  ;;  %v7988_v10 = vld [vmem:[#allocation43_spill] sm:$0xff]  ;;  %v7990_v36 = vld [vmem:[#allocation44_spill] sm:$0xff] }
 0x173   : > { %vm7982_vm0 = vcmp.eq.s32.totalorder %v4784_v21, 1  ;;  %vm7986_vm15 = vcmp.eq.s32.totalorder %v4799_v35, 1  ;;  %v1063_v22 = vsel %vm7549_vm9, %v1041_v16, 0.0  ;;  %v1120_v61 = vsel %vm7557_vm10, %v7989_v48, %v7988_v10  ;;  %2461 = vperm.xlu0 %3651, %v3501_v51   ;;  %v7994_v58 = vld [vmem:[#allocation40_spill] sm:$0xff] }
 0x174   : > { %v1062_v23 = vsel %vm7982_vm0, %v1042_v44, 0.0  ;;  %v1101_v18 = vsel %vm7986_vm15, %v1081_v5, 0.0  ;;  %v7991_v44 = vld [vmem:[#allocation47_spill] sm:$0xff]  ;;  %vm7992_vm0 = vcmp.lt.s32.totalorder %v4451_v11, 15  ;;  %vm7562_vm6 = vcmp.lt.s32.totalorder %v4451_v11, 3  ;;  %v5536_v60 = vpop.permute.xlu1 %1799 }
 0x175   : > { %v1071_v24 = vmul.f32 %v7987_v12, %v1062_v23  ;;  %v1159_v43 = vsel %vm7992_vm0, %v7991_v44, %v7990_v36  ;;  %v3502_v5 = vld [vmem:[%s7300_s3 + $0x18] sm:$0xf]  ;;  %v996_v16 = vadd.f32 %v994_v54, %v957_v17  ;;  %v1072_v23 = vmul.f32 %v7987_v12, %v1063_v22 }
 0x176   : > { %vm7993_vm11 = vcmp.eq.s32.totalorder %v4802_v42, 1  ;;  %v5530_v47 = vrot.slane %v1773_v14, %v4384_v19  ;;  %v1034_v21 = vadd.f32 %v1032_v32, %v995_v59  ;;  %v1119_v51 = vsel %vm7557_vm10, %v7988_v10, %v7989_v48  ;;  %2480 = vperm.xlu1 %3650, %v3502_v5   ;;  %v8002_v5 = vld [vmem:[#allocation46_spill] sm:$0xff] }
 0x177   : > { %v1102_v35 = vsel %vm7993_vm11, %v1080_v46, 0.0  ;;  %v1110_v52 = vmul.f32 %v7994_v58, %v1101_v18  ;;  %v5545_v17 = vsel %vm432_vm12, 1, %v7713_v4  ;;  %v1035_v14 = vadd.f32 %v1033_v9, %v996_v16  ;;  %v5555_v46 = vpop.permute.xlu0 %1797  ;;  %v7997_v18 = vld [vmem:[#allocation45_spill] sm:$0xff]  ;;  %2470 = vrot.lane.b32.xlu0 %v5054_v3, %s7985_s25  ;;  %s8088_s25 = smov 31  }
 0x178   : > { %vm7995_vm11 = vcmp.eq.s32.totalorder %v4813_v56, 1  ;;  %v1158_v54 = vsel %vm7992_vm0, %v7990_v36, %v7991_v44  ;;  %vm7571_vm10 = vcmp.eq.s32.totalorder %v4916_v27, 1  ;;  %vm7570_vm9 = vcmp.eq.s32.totalorder %v4939_v30, 1  ;;  %v7998_v36 = vld [vmem:[#allocation49_spill] sm:$0xff]  ;;  %vm433_vm0 = vmand %vm4321_vm3, %vm4355_vm8  ;;  %v8029_v56 = vld [vmem:[#allocation75_spill] sm:$0xff] }
 0x179   : > { %v1140_v32 = vsel %vm7995_vm11, %v1120_v61, 0.0  ;;  %vm7996_vm15 = vcmp.eq.s32.totalorder %v7958_v25, 1  ;;  %v1073_v9 = vadd.f32 %v1071_v24, %v1034_v21  ;;  %v5565_v12 = vrot.slane %v1808_v50, %v4384_v19  ;;  %v7999_v21 = vld [vmem:[#allocation48_spill] sm:$0xff]  ;;  %v5578_v50 = vpop.permute.xlu1 %1836  ;;  %v8031_v30 = vld [vmem:[#allocation131_spill] sm:$0xff] }
 0x17a   : > { %v1179_v59 = vsel %vm7996_vm15, %v1159_v43, 0.0  ;;  %v1149_v22 = vmul.f32 %v7997_v18, %v1140_v32  ;;  %v1111_v10 = vmul.f32 %v7994_v58, %v1102_v35  ;;  %v1074_v48 = vadd.f32 %v1072_v23, %v1035_v14  ;;  %v8004_v14 = vld [vmem:[#allocation58_spill] sm:$0xff]  ;;  %2489 = vrot.lane.b32.xlu1 %v5054_v3, %s8007_s17 }
 0x17b   : > { %v1141_v61 = vsel %vm7558_vm1, %v1119_v51, 0.0  ;;  %vm8000_vm15 = vcmp.lt.s32.totalorder %v4451_v11, 14  ;;  %v1847_v44 = vrot.slane %v5545_v17, %v4384_v19  ;;  %v1112_v35 = vadd.f32 %v1110_v52, %v1073_v9  ;;  %v8003_v51 = vld [vmem:[#allocation53_spill] sm:$0xff]  ;;  %v5599_v52 = vpop.permute.xlu0 %1829  ;;  %2487 = vrot.lane.b32.xlu0 %v4989_v55, %s8007_s17  ;;  %s8100_s17 = smov 30  }
 0x17c   : > { %v1198_v24 = vsel %vm8000_vm15, %v7999_v21, %v7998_v36  ;;  %v1150_v43 = vmul.f32 %v7997_v18, %v1141_v61  ;;  %vm8001_vm1 = vcmp.eq.s32.totalorder %v7968_v0, 1  ;;  %v1188_v16 = vmul.f32 %v8002_v5, %v1179_v59 }
 0x17d   : > { %v1180_v58 = vsel %vm8001_vm1, %v1158_v54, 0.0  ;;  %v1197_v23 = vsel %vm8000_vm15, %v7998_v36, %v7999_v21  ;;  %vm8005_vm11 = vcmp.lt.s32.totalorder %v4451_v11, 13  ;;  %vm7574_vm12 = vcmp.eq.s32.totalorder %v4984_v2, 1  ;;  %v8009_v36 = vld [vmem:[#allocation54_spill] sm:$0xff]  ;;  %vm434_vm15 = vmand %vm4321_vm3, %vm4369_vm13 }
 0x17e   : > { %v1237_v32 = vsel %vm8005_vm11, %v8004_v14, %v8003_v51  ;;  %v5597_v18 = vrot.slane %v1812_v8, %v4384_v19  ;;  %v1851_v54 = vrot.slane %v5545_v17, %v4395_v49  ;;  %vm8008_vm1 = vcmp.eq.s32.totalorder %v7979_v53, 1  ;;  %v3503_v17 = vld [vmem:[%s7300_s3 + $0x1c] sm:$0xf]  ;;  %v8017_v53 = vld [vmem:[#allocation72_spill] sm:$0xff]  ;;  %2506 = vrot.lane.b32.xlu1 %v4989_v55, %s8019_s12 }
 0x17f   : > { %v1218_v59 = vsel %vm8008_vm1, %v1198_v24, 0.0  ;;  %v1236_v9 = vsel %vm8005_vm11, %v8003_v51, %v8004_v14  ;;  %v1113_v8 = vadd.f32 %v1111_v10, %v1074_v48  ;;  %v1151_v61 = vadd.f32 %v1149_v22, %v1112_v35  ;;  %v5633_v10 = vpop.permute.xlu1 %1868  ;;  %2499 = vperm.xlu0 %3651, %v3503_v17  }
 0x180   : > { %8006 = vst [vmem:[#allocation33_spill] sm:$0xff] %v5597_v18  ;;  %v1227_v21 = vmul.f32 %v8009_v36, %v1218_v59  ;;  %v5624_v24 = vsel %vm433_vm0, 1, %v7713_v4  ;;  %v1189_v51 = vmul.f32 %v8002_v5, %v1180_v58  ;;  %v5628_v14 = vrot.slane %v1847_v44, %v4384_v19  ;;  %8012 = vst [vmem:[#allocation36_spill] sm:$0xff] %v5633_v10  ;;  %v8014_v5 = vld [vmem:[#allocation60_spill] sm:$0xff]  ;;  %v8015_v44 = vld [vmem:[#allocation61_spill] sm:$0xff] }
 0x181   : > { %vm8011_vm1 = vcmp.eq.s32.totalorder %v7983_v38, 1  ;;  %v1152_v48 = vadd.f32 %v1150_v43, %v1113_v8  ;;  %v1190_v35 = vadd.f32 %v1188_v16, %v1151_v61  ;;  %vm8013_vm0 = vcmp.eq.s32.totalorder %v4912_v1, 1  ;;  %v8016_v38 = vld [vmem:[#allocation63_spill] sm:$0xff]  ;;  %v5654_v43 = vpop.permute.xlu0 %1838  ;;  %v8098_v10 = vld [vmem:[#allocation32_spill] sm:$0xff] }
 0x182   : > { %8010 = vst [vmem:[#allocation37_spill] sm:$0xff] %v5628_v14  ;;  %v1219_v22 = vsel %vm8011_vm1, %v1197_v23, 0.0  ;;  %v1257_v58 = vsel %vm8013_vm0, %v1237_v32, 0.0  ;;  %v1275_v59 = vsel %vm7562_vm6, %v8015_v44, %v8014_v5  ;;  %v1276_v23 = vsel %vm7562_vm6, %v8014_v5, %v8015_v44  ;;  %v3504_v61 = vld [vmem:[%s7300_s3 + $0x20] sm:$0xf] }
 0x183   : > { %vm8018_vm1 = vcmp.lt.s32.totalorder %v4451_v11, 2  ;;  %vm7579_vm11 = vcmp.lt.s32.totalorder %v4451_v11, 126  ;;  %vm8020_vm0 = vcmp.eq.s32.totalorder %v4927_v6, 1  ;;  %v1228_v32 = vmul.f32 %v8009_v36, %v1219_v22  ;;  %v8023_v6 = vld [vmem:[#allocation57_spill] sm:$0xff]  ;;  %2518 = vperm.xlu1 %3650, %v3504_v61   ;;  %2508 = vrot.lane.b32.xlu0 %v5054_v3, %s8019_s12  ;;  %s8120_s12 = smov 29  }
 0x184   : > { %v1315_v0 = vsel %vm8018_vm1, %v8017_v53, %v8016_v38  ;;  %v1258_v16 = vsel %vm8020_vm0, %v1236_v9, 0.0  ;;  %vm8021_vm6 = vmmov %vm8018_vm1  ;;  %v1886_v5 = vrot.slane %v5624_v24, %v4384_v19  ;;  %v1890_v44 = vrot.slane %v5624_v24, %v4395_v49  ;;  %v8022_v9 = vld [vmem:[#allocation50_spill] sm:$0xff]  ;;  %v5687_v24 = vpop.permute.xlu1 %1877 }
 0x185   : > { %v1314_v8 = vsel %vm8021_vm6, %v8016_v38, %v8017_v53  ;;  %v1191_v36 = vadd.f32 %v1189_v51, %v1152_v48  ;;  %v1229_v22 = vadd.f32 %v1227_v21, %v1190_v35  ;;  %v1266_v1 = vmul.f32 %v8023_v6, %v1257_v58  ;;  %v8025_v48 = vld [vmem:[#allocation8_spill] sm:$0xff] }
 0x186   : > { %v5681_v38 = vsel %vm434_vm15, 1, %v7713_v4  ;;  %v1296_v53 = vsel %vm7571_vm10, %v1276_v23, 0.0  ;;  %v1297_v17 = vsel %vm7570_vm9, %v1275_v59, 0.0  ;;  %v1267_v21 = vmul.f32 %v8023_v6, %v1258_v16  ;;  %v8026_v35 = vld [vmem:[#allocation12_spill] sm:$0xff]  ;;  %v8032_v59 = vld [vmem:[#allocation87_spill] sm:$0xff]  ;;  %v5702_v6 = vpop.permute.xlu0 %1875 }
 0x187   : > { %vm8024_vm6 = vcmp.eq.s32.totalorder %v4956_v28, 1  ;;  %vm7592_vm0 = vcmp.eq.s32.totalorder %v8025_v48, 1  ;;  %vm7591_vm1 = vcmp.eq.s32.totalorder %v8026_v35, 1  ;;  %v8027_v58 = vld [vmem:[#allocation64_spill] sm:$0xff]  ;;  %vm8030_vm15 = vcmp.lt.s32.totalorder %v4451_v11, 1  ;;  %8033 = vst [vmem:[#allocation38_spill] sm:$0xff] %v5702_v6  ;;  %2527 = vrot.lane.b32.xlu1 %v5054_v3, %s8045_s20  ;;  %2525 = vrot.lane.b32.xlu0 %v4989_v55, %s8045_s20 }
 0x188   : > { %v1335_v51 = vsel %vm8024_vm6, %v1315_v0, 0.0  ;;  %v1305_v25 = vmul.f32 %v8027_v58, %v1296_v53  ;;  %v1354_v23 = vsel %vm8030_vm15, %v8029_v56, %v8028_v45  ;;  %v1399_v27 = vrot.slane %v8032_v59, %v8031_v30  ;;  %vm435_vm6 = vmand %vm4321_vm3, %vm4401_vm2  ;;  %v8039_v28 = vld [vmem:[#allocation56_spill] sm:$0xff]  ;;  %s8129_s20 = smov 19  }
 0x189   : > { %vm8034_vm10 = vcmp.eq.s32.totalorder %v4959_v26, 1  ;;  %v1306_v16 = vmul.f32 %v8027_v58, %v1297_v17  ;;  %v1353_v53 = vsel %vm8030_vm15, %v8028_v45, %v8029_v56  ;;  %vm7590_vm9 = vcmp.lt.s32.totalorder %v4451_v11, 115  ;;  %v8037_v26 = vld [vmem:[#allocation71_spill] sm:$0xff]  ;;  %v8038_v45 = vld [vmem:[#allocation17_spill] sm:$0xff]  ;;  %v8069_v35 = vld [vmem:[#allocation124_spill] sm:$0xff] }
 0x18a   : > { %v1336_v0 = vsel %vm8034_vm10, %v1314_v8, 0.0  ;;  %v1230_v61 = vadd.f32 %v1228_v32, %v1191_v36  ;;  %v5719_v59 = vrot.slane %v1851_v54, %v4384_v19  ;;  %v5722_v30 = vrot.slane %v1886_v5, %v4384_v19  ;;  %v5731_v32 = vpop.permute.xlu1 %1914  ;;  %v8041_v36 = vld [vmem:[#allocation119_spill] sm:$0xff]  ;;  %v5746_v42 = vpop.permute.xlu0 %1907 }
 0x18b   : > { %v1268_v8 = vadd.f32 %v1266_v1, %v1229_v22  ;;  %v1344_v17 = vmul.f32 %v8037_v26, %v1335_v51  ;;  %v1925_v58 = vrot.slane %v5681_v38, %v4384_v19  ;;  %v1374_v56 = vsel %vm7574_vm12, %v1354_v23, 0.0  ;;  %8040 = vst [vmem:[#allocation39_spill] sm:$0xff] %v5731_v32  ;;  %v8043_v23 = vld [vmem:[#allocation90_spill] sm:$0xff]  ;;  %8044 = vst [vmem:[#allocation43_spill] sm:$0xff] %v5746_v42 }
 0x18c   : > { %8035 = vst [vmem:[#allocation41_spill] sm:$0xff] %v5719_v59  ;;  %8036 = vst [vmem:[#allocation34_spill] sm:$0xff] %v5722_v30  ;;  %v5739_v1 = vsel %vm435_vm6, 1, %v7713_v4  ;;  %v1269_v54 = vadd.f32 %v1267_v21, %v1230_v61  ;;  %v1345_v5 = vmul.f32 %v8037_v26, %v1336_v0  ;;  %v1401_v22 = vmul.f32 %v8041_v36, %v1399_v27  ;;  %v8047_v0 = vld [vmem:[#allocation94_spill] sm:$0xff] }
 0x18d   : > { %vm8042_vm12 = vcmp.eq.s32.totalorder %v5015_v37, 1  ;;  %v1383_v2 = vmul.f32 %v8043_v23, %v1374_v56  ;;  %v1307_v32 = vadd.f32 %v1305_v25, %v1268_v8  ;;  %v5755_v27 = vrot.slane %v1890_v44, %v4384_v19  ;;  %v3505_v8 = vld [vmem:[%s7300_s3 + $0x24] sm:$0xf]  ;;  %2544 = vrot.lane.b32.xlu1 %v4989_v55, %s8057_s23 }
 0x18e   : > { %v1375_v51 = vsel %vm8042_vm12, %v1353_v53, 0.0  ;;  %vm436_vm12 = vmand %vm4321_vm3, %vm4406_vm4  ;;  %v1308_v26 = vadd.f32 %v1306_v16, %v1269_v54  ;;  %v1929_v25 = vrot.slane %v5681_v38, %v4395_v49  ;;  %v8048_v53 = vld [vmem:[#allocation95_spill] sm:$0xff]  ;;  %vm8049_vm6 = vcmp.lt.s32.totalorder %v4451_v11, 127  ;;  %v8053_v54 = vld [vmem:[#allocation100_spill] sm:$0xff]  ;;  %2537 = vperm.xlu0 %3651, %v3505_v8  }
 0x18f   : > { %v1384_v21 = vmul.f32 %v8043_v23, %v1375_v51  ;;  %8046 = vst [vmem:[#allocation42_spill] sm:$0xff] %v5755_v27  ;;  %v1412_v61 = vsel %vm8049_vm6, %v8048_v53, %v8047_v0  ;;  %vm8050_vm10 = vmmov %vm8049_vm6  ;;  %v1346_v16 = vadd.f32 %v1344_v17, %v1307_v32  ;;  %v5778_v56 = vrot.slane %v1925_v58, %v4384_v19  ;;  %v8052_v38 = vld [vmem:[#allocation115_spill] sm:$0xff]  ;;  %v5788_v23 = vpop.permute.xlu1 %1946  ;;  %v8055_v58 = vld [vmem:[#allocation134_spill] sm:$0xff]  ;;  %v5794_v32 = vpop.permute.xlu0 %1916 }
 0x190   : > { %v1413_v44 = vsel %vm8050_vm10, %v8047_v0, %v8048_v53  ;;  %v1451_v36 = vsel %vm7579_vm11, %v8053_v54, %v8052_v38  ;;  %v1452_v51 = vsel %vm7579_vm11, %v8052_v38, %v8053_v54  ;;  %8054 = vst [vmem:[#allocation47_spill] sm:$0xff] %v5788_v23  ;;  %v1964_v0 = vrot.slane %v5739_v1, %v4384_v19  ;;  %v8063_v8 = vld [vmem:[#allocation117_spill] sm:$0xff] }
 0x191   : > { %8051 = vst [vmem:[#allocation44_spill] sm:$0xff] %v5778_v56  ;;  %v1347_v53 = vadd.f32 %v1345_v5, %v1308_v26  ;;  %v1403_v17 = vcombine.high %v1401_v22, %v1401_v22  ;;  %8056 = vst [vmem:[#allocation40_spill] sm:$0xff] %v5794_v32  ;;  %v1968_v37 = vrot.slane %v5739_v1, %v4395_v49  ;;  %v5806_v5 = vsel %vm436_vm12, 1, %v7713_v4  ;;  %v3506_v1 = vld [vmem:[%s7300_s3 + $0x28] sm:$0xf] }
 0x192   : > { %v1385_v38 = vadd.f32 %v1383_v2, %v1346_v16  ;;  %vm8058_vm11 = vcmp.eq.s32.totalorder %v5068_v33, 1  ;;  %vm8059_vm6 = vcmp.eq.s32.totalorder %v8022_v9, 1  ;;  %vm7609_vm10 = vcmp.eq.s32.totalorder %v5281_v34, 1  ;;  %v8060_v16 = vld [vmem:[#allocation20_spill] sm:$0xff]  ;;  %vm437_vm12 = vmand %vm4321_vm3, %vm4421_vm14  ;;  %2556 = vperm.xlu1 %3650, %v3506_v1   ;;  %2546 = vrot.lane.b32.xlu0 %v5054_v3, %s8057_s23  ;;  %s8143_s23 = smov 18  }
 0x193   : > { %v1433_v26 = vsel %vm8058_vm11, %v1412_v61, 0.0  ;;  %v1434_v54 = vsel %vm8059_vm6, %v1413_v44, 0.0  ;;  %v1386_v2 = vadd.f32 %v1384_v21, %v1347_v53  ;;  %v5818_v23 = vrot.slane %v1929_v25, %v4384_v19  ;;  %v8064_v25 = vld [vmem:[#allocation118_spill] sm:$0xff] }
 0x194   : > { %v1442_v42 = vmul.f32 %v8062_v20, %v1433_v26  ;;  %v1443_v61 = vmul.f32 %v8062_v20, %v1434_v54  ;;  %v1472_v21 = vsel %vm7592_vm0, %v1451_v36, 0.0  ;;  %v1473_v44 = vsel %vm7591_vm1, %v1452_v51, 0.0  ;;  %v5840_v26 = vpop.permute.xlu1 %1955  ;;  %v8068_v51 = vld [vmem:[#allocation132_spill] sm:$0xff] }
 0x195   : > { %8061 = vst [vmem:[#allocation45_spill] sm:$0xff] %v5818_v23  ;;  %vm8065_vm6 = vcmp.lt.s32.totalorder %v4451_v11, 125  ;;  %vm7608_vm15 = vcmp.lt.s32.totalorder %v4451_v11, 111  ;;  %8067 = vst [vmem:[#allocation49_spill] sm:$0xff] %v5840_v26  ;;  %v5843_v54 = vrot.slane %v1964_v0, %v4384_v19  ;;  %v2003_v36 = vrot.slane %v5806_v5, %v4384_v19  ;;  %v8071_v0 = vld [vmem:[#allocation23_spill] sm:$0xff]  ;;  %v8072_v26 = vld [vmem:[#allocation136_spill] sm:$0xff] }
 0x196   : > { %v1490_v53 = vsel %vm8065_vm6, %v8064_v25, %v8063_v8  ;;  %vm8066_vm11 = vmmov %vm8065_vm6  ;;  %v1529_v48 = vsel %vm7590_vm9, %v8069_v35, %v8068_v51  ;;  %v1405_v9 = vadd.f32 %v1401_v22, %v1385_v38  ;;  %v1406_v33 = vadd.f32 %v1403_v17, %v1386_v2  ;;  %v8073_v22 = vld [vmem:[#allocation112_spill] sm:$0xff]  ;;  %2565 = vrot.lane.b32.xlu1 %v5054_v3, %s8088_s25 }
 0x197   : > { %v1491_v20 = vsel %vm8066_vm11, %v8063_v8, %v8064_v25  ;;  %v1530_v8 = vsel %vm7590_vm9, %v8068_v51, %v8069_v35  ;;  %v5855_v25 = vpop.permute.xlu0 %1953  ;;  %v5862_v32 = vrot.slane %v1968_v37, %v4384_v19  ;;  %v5870_v35 = vsel %vm437_vm12, 1, %v7713_v4  ;;  %2563 = vrot.lane.b32.xlu0 %v4989_v55, %s8088_s25  ;;  %s8154_s25 = smov 17  }
 0x198   : > { %8070 = vst [vmem:[#allocation48_spill] sm:$0xff] %v5855_v25  ;;  %v1481_v17 = vmul.f32 %v8073_v22, %v1472_v21  ;;  %v1482_v38 = vmul.f32 %v8073_v22, %v1473_v44  ;;  %vm8074_vm9 = vcmp.eq.s32.totalorder %v8038_v45, 1  ;;  %vm8075_vm1 = vcmp.eq.s32.totalorder %v8039_v28, 1  ;;  %v5883_v21 = vpop.permute.xlu1 %1992  ;;  %v8093_v28 = vld [vmem:[#allocation27_spill] sm:$0xff]  ;;  %v8139_v31 = vld [vmem:[#allocation40_spill] sm:$0xff] }
 0x199   : > { %v1511_v1 = vsel %vm8074_vm9, %v1490_v53, 0.0  ;;  %v1512_v2 = vsel %vm8075_vm1, %v1491_v20, 0.0  ;;  %v1444_v37 = vadd.f32 %v1442_v42, %v1405_v9  ;;  %v1445_v51 = vadd.f32 %v1443_v61, %v1406_v33  ;;  %8077 = vst [vmem:[#allocation46_spill] sm:$0xff] %v5883_v21  ;;  %v8079_v53 = vld [vmem:[#allocation52_spill] sm:$0xff]  ;;  %v8083_v9 = vld [vmem:[#allocation7_spill] sm:$0xff]  ;;  %v8084_v61 = vld [vmem:[#allocation5_spill] sm:$0xff] }
 0x19a   : > { %v1520_v7 = vmul.f32 %v8076_v62, %v1511_v1  ;;  %v1521_v25 = vmul.f32 %v8076_v62, %v1512_v2  ;;  %vm8080_vm9 = vnez %v8079_v53  ;;  %vm8081_vm1 = vcmp.eq.s32.totalorder %v5224_v40, 1  ;;  %v8089_v2 = vld [vmem:[#allocation14_spill] sm:$0xff]  ;;  %v8090_v62 = vld [vmem:[#allocation11_spill] sm:$0xff]  ;;  %2582 = vrot.lane.b32.xlu1 %v4989_v55, %s8100_s17  ;;  %v3508_v55 = vld [vmem:[%s7300_s3 + $0x30] sm:$0xf] }
 0x19b   : > { %vm438_vm12 = vmand %vm8080_vm9, %vm4338_vm5  ;;  %v1550_v42 = vsel %vm8081_vm1, %v1529_v48, 0.0  ;;  %vm8082_vm0 = vcmp.eq.s32.totalorder %v5254_v57, 1  ;;  %vm8085_vm6 = vcmp.lt.s32.totalorder %v4451_v11, 114  ;;  %vm7612_vm11 = vcmp.lt.s32.totalorder %v4451_v11, 109  ;;  %v5902_v1 = vpop.permute.xlu0 %1985 }
 0x19c   : > { %v1551_v33 = vsel %vm8082_vm0, %v1530_v8, 0.0  ;;  %v1568_v20 = vsel %vm8085_vm6, %v8084_v61, %v8083_v9  ;;  %vm8086_vm3 = vmmov %vm8085_vm6  ;;  %8087 = vst [vmem:[#allocation53_spill] sm:$0xff] %v5902_v1  ;;  %v2007_v48 = vrot.slane %v5806_v5, %v4395_v49  ;;  %v5909_v8 = vrot.slane %v2003_v36, %v4384_v19  ;;  %v8094_v5 = vld [vmem:[#allocation31_spill] sm:$0xff]  ;;  %v3507_v36 = vld [vmem:[%s7300_s3 + $0x2c] sm:$0xf] }
 0x19d   : > { %v1569_v22 = vsel %vm8086_vm3, %v8083_v9, %v8084_v61  ;;  %vm8091_vm0 = vcmp.lt.s32.totalorder %v4451_v11, 113  ;;  %v1483_v61 = vadd.f32 %v1481_v17, %v1444_v37  ;;  %v1484_v40 = vadd.f32 %v1482_v38, %v1445_v51  ;;  %v8095_v1 = vld [vmem:[#allocation130_spill] sm:$0xff]  ;;  %v5942_v51 = vpop.permute.xlu1 %2024  ;;  %2575 = vperm.xlu0 %3651, %v3507_v36  }
 0x19e   : > { %v1607_v57 = vsel %vm8091_vm0, %v8090_v62, %v8089_v2  ;;  %vm8092_vm6 = vmmov %vm8091_vm0  ;;  %v2042_v45 = vrot.slane %v5870_v35, %v4384_v19  ;;  %v1559_v21 = vmul.f32 %v8095_v1, %v1550_v42  ;;  %v5936_v17 = vsel %vm438_vm12, 1, %v7713_v4  ;;  %2594 = vperm.xlu1 %3650, %v3508_v55  }
 0x19f   : > { %v1608_v9 = vsel %vm8092_vm6, %v8089_v2, %v8090_v62  ;;  %v1560_v2 = vmul.f32 %v8095_v1, %v1551_v33  ;;  %vm8096_vm0 = vcmp.eq.s32.totalorder %v5242_v29, 1  ;;  %vm8097_vm6 = vcmp.eq.s32.totalorder %v8055_v58, 1  ;;  %v8099_v33 = vld [vmem:[#allocation9_spill] sm:$0xff]  ;;  %v5949_v6 = vpop.permute.xlu0 %1994 }
 0x1a0   : > { %v1589_v38 = vsel %vm8096_vm0, %v1568_v20, 0.0  ;;  %v1590_v37 = vsel %vm8097_vm6, %v1569_v22, 0.0  ;;  %v1522_v62 = vadd.f32 %v1520_v7, %v1483_v61  ;;  %v1523_v42 = vadd.f32 %v1521_v25, %v1484_v40  ;;  %v8102_v40 = vld [vmem:[#allocation15_spill] sm:$0xff]  ;;  %v8103_v25 = vld [vmem:[#allocation16_spill] sm:$0xff] }
 0x1a1   : > { %vm7614_vm1 = vcmp.eq.s32.totalorder %v8098_v10, 1  ;;  %vm7613_vm3 = vcmp.eq.s32.totalorder %v5530_v47, 1  ;;  %v1598_v1 = vmul.f32 %v8099_v33, %v1589_v38  ;;  %v1599_v44 = vmul.f32 %v8099_v33, %v1590_v37  ;;  %v8106_v38 = vld [vmem:[#allocation25_spill] sm:$0xff]  ;;  %v8107_v37 = vld [vmem:[#allocation18_spill] sm:$0xff]  ;;  %2584 = vrot.lane.b32.xlu0 %v5054_v3, %s8100_s17  ;;  %s8165_s17 = smov 16  }
 0x1a2   : > { %v1628_v20 = vsel %vm7609_vm10, %v1607_v57, 0.0  ;;  %vm8101_vm12 = vcmp.eq.s32.totalorder %v8060_v16, 1  ;;  %vm8104_vm0 = vcmp.lt.s32.totalorder %v4451_v11, 112  ;;  %v2046_v57 = vrot.slane %v5870_v35, %v4395_v49  ;;  %v5984_v35 = vpop.permute.xlu1 %2033  ;;  %v8108_v16 = vld [vmem:[#allocation13_spill] sm:$0xff]  ;;  %2603 = vrot.lane.b32.xlu1 %v5054_v3, %s8120_s12 }
 0x1a3   : > { %v1629_v7 = vsel %vm8101_vm12, %v1608_v9, 0.0  ;;  %v1646_v22 = vsel %vm8104_vm0, %v8103_v25, %v8102_v40  ;;  %vm8105_vm6 = vmmov %vm8104_vm0  ;;  %v5972_v9 = vrot.slane %v2007_v48, %v4384_v19  ;;  %v1685_v33 = vsel %vm7608_vm15, %v8107_v37, %v8106_v38 }
 0x1a4   : > { %v1647_v61 = vsel %vm8105_vm6, %v8102_v40, %v8103_v25  ;;  %v1686_v36 = vsel %vm7608_vm15, %v8106_v38, %v8107_v37  ;;  %v1561_v40 = vadd.f32 %v1559_v21, %v1522_v62  ;;  %v1562_v25 = vadd.f32 %v1560_v2, %v1523_v42  ;;  %v5997_v62 = vpop.permute.xlu0 %2031 }
 0x1a5   : > { %v5987_v48 = vrot.slane %v2042_v45, %v4384_v19  ;;  %v1637_v34 = vmul.f32 %v8108_v16, %v1628_v20  ;;  %v1638_v58 = vmul.f32 %v8108_v16, %v1629_v7  ;;  %v2081_v29 = vrot.slane %v5936_v17, %v4384_v19  ;;  %v8111_v45 = vld [vmem:[#allocation137_spill] sm:$0xff]  ;;  %v8114_v7 = vld [vmem:[#allocation24_spill] sm:$0xff] }
 0x1a6   : > { %vm8109_vm6 = vcmp.eq.s32.totalorder %v8071_v0, 1  ;;  %vm8110_vm15 = vcmp.eq.s32.totalorder %v8072_v26, 1  ;;  %v1600_v42 = vadd.f32 %v1598_v1, %v1561_v40  ;;  %v1601_v38 = vadd.f32 %v1599_v44, %v1562_v25 }
 0x1a7   : > { %v1667_v21 = vsel %vm8109_vm6, %v1646_v22, 0.0  ;;  %v1668_v2 = vsel %vm8110_vm15, %v1647_v61, 0.0  ;;  %vm439_vm15 = vmand %vm8080_vm9, %vm4349_vm7  ;;  %vm8112_vm6 = vcmp.eq.s32.totalorder %v5389_v15, 1  ;;  %vm8113_vm12 = vcmp.eq.s32.totalorder %v5392_v39, 1  ;;  %v8115_v22 = vld [vmem:[#allocation29_spill] sm:$0xff] }
 0x1a8   : > { %v1676_v16 = vmul.f32 %v8111_v45, %v1667_v21  ;;  %v1677_v20 = vmul.f32 %v8111_v45, %v1668_v2  ;;  %v1706_v1 = vsel %vm8112_vm6, %v1685_v33, 0.0  ;;  %v1707_v44 = vsel %vm8113_vm12, %v1686_v36, 0.0  ;;  %v8118_v33 = vld [vmem:[#allocation28_spill] sm:$0xff]  ;;  %v8119_v36 = vld [vmem:[#allocation30_spill] sm:$0xff]  ;;  %v6035_v21 = vpop.permute.xlu1 %2070  ;;  %vm440_vm6 = vmand %vm8080_vm9, %vm4355_vm8 }
 0x1a9   : > { %vm8116_vm0 = vcmp.lt.s32.totalorder %v4451_v11, 110  ;;  %vm7615_vm5 = vcmp.lt.s32.totalorder %v4451_v11, 97  ;;  %v6023_v13 = vrot.slane %v2046_v57, %v4384_v19  ;;  %v1763_v40 = vsel %vm7612_vm11, %v8119_v36, %v8118_v33  ;;  %v6037_v57 = vpop.permute.xlu0 %2063  ;;  %vm442_vm8 = vmand %vm8080_vm9, %vm4401_vm2 }
 0x1aa   : > { %v1724_v61 = vsel %vm8116_vm0, %v8115_v22, %v8114_v7  ;;  %vm8117_vm10 = vmmov %vm8116_vm0  ;;  %v1764_v25 = vsel %vm7612_vm11, %v8118_v33, %v8119_v36  ;;  %v1639_v2 = vadd.f32 %v1637_v34, %v1600_v42  ;;  %v1640_v45 = vadd.f32 %v1638_v58, %v1601_v38  ;;  %v6057_v58 = vld [vmem:[%s4946_s18] sm:$0xff] }
 0x1ab   : > { %v1725_v55 = vsel %vm8117_vm10, %v8114_v7, %v8115_v22  ;;  %v6042_v7 = vsel %vm439_vm15, 1, %v7713_v4  ;;  %v8121_v22 = vld [vmem:[#allocation21_spill] sm:$0xff]  ;;  %v6047_v15 = vrot.slane %v2081_v29, %v4384_v19  ;;  %vm8122_vm7 = vcmp.eq.s32.totalorder %v8093_v28, 1  ;;  %2601 = vrot.lane.b32.xlu0 %v6057_v58, %s8120_s12  ;;  %v8124_v38 = vld [vmem:[#allocation51_spill] sm:$0xff]  ;;  %2620 = vrot.lane.b32.xlu1 %v6057_v58, %s8129_s20  ;;  %s8170_s12 = smov 15  }
 0x1ac   : > { %v1715_v37 = vmul.f32 %v8121_v22, %v1706_v1  ;;  %v1716_v39 = vmul.f32 %v8121_v22, %v1707_v44  ;;  %v1745_v33 = vsel %vm8122_vm7, %v1724_v61, 0.0  ;;  %vm8123_vm10 = vcmp.eq.s32.totalorder %v8094_v5, 1  ;;  %v3509_v61 = vld [vmem:[%s7300_s3 + $0x34] sm:$0xf]  ;;  %vm441_vm7 = vmand %vm8080_vm9, %vm4369_vm13 }
 0x1ad   : > { %v1746_v34 = vsel %vm8123_vm10, %v1725_v55, 0.0  ;;  %vm7617_vm12 = vcmp.eq.s32.totalorder %v5722_v30, 1  ;;  %vm7616_vm0 = vcmp.eq.s32.totalorder %v5755_v27, 1  ;;  %v1678_v29 = vadd.f32 %v1676_v16, %v1639_v2  ;;  %v6086_v2 = vpop.permute.xlu1 %2102  ;;  %v8150_v27 = vld [vmem:[#allocation48_spill] sm:$0xff] }
 0x1ae   : > { %v1679_v42 = vadd.f32 %v1677_v20, %v1640_v45  ;;  %v1754_v1 = vmul.f32 %v8124_v38, %v1745_v33  ;;  %v1755_v44 = vmul.f32 %v8124_v38, %v1746_v34  ;;  %v1784_v55 = vsel %vm7614_vm1, %v1763_v40, 0.0 }
 0x1af   : > { %v1785_v16 = vsel %vm7613_vm3, %v1764_v25, 0.0  ;;  %vm8125_vm10 = vcmp.lt.s32.totalorder %v4451_v11, 99  ;;  %v2120_v45 = vrot.slane %v6042_v7, %v4384_v19  ;;  %v2124_v40 = vrot.slane %v6042_v7, %v4395_v49  ;;  %2613 = vperm.xlu0 %3651, %v3509_v61  }
 0x1b0   : > { %v1802_v20 = vsel %vm8125_vm10, %v5555_v46, %v5536_v60  ;;  %vm8126_vm11 = vmmov %vm8125_vm10  ;;  %vm8127_vm3 = vcmp.lt.s32.totalorder %v4451_v11, 98  ;;  %v1718_v33 = vadd.f32 %v1716_v39, %v1679_v42  ;;  %vm7625_vm1 = vcmp.eq.s32.totalorder %v5778_v56, 1  ;;  %v8130_v39 = vld [vmem:[#allocation35_spill] sm:$0xff] }
 0x1b1   : > { %v1803_v36 = vsel %vm8126_vm11, %v5536_v60, %v5555_v46  ;;  %v1841_v25 = vsel %vm8127_vm3, %v5578_v50, %v5654_v43  ;;  %vm8128_vm10 = vmmov %vm8127_vm3  ;;  %vm7622_vm11 = vcmp.lt.s32.totalorder %v4451_v11, 95  ;;  %v6101_v60 = vpop.permute.xlu0 %2072  ;;  %v1717_v46 = vadd.f32 %v1715_v37, %v1678_v29  ;;  %v8159_v56 = vld [vmem:[#allocation47_spill] sm:$0xff] }
 0x1b2   : > { %v1842_v22 = vsel %vm8128_vm10, %v5654_v43, %v5578_v50  ;;  %vm7623_vm15 = vcmp.eq.s32.totalorder %v5818_v23, 1  ;;  %v3510_v50 = vld [vmem:[%s7300_s3 + $0x38] sm:$0xf]  ;;  %v6117_v43 = vsel %vm441_vm7, 1, %v7713_v4  ;;  %v1793_v37 = vmul.f32 %v8130_v39, %v1784_v55 }
 0x1b3   : > { %v1794_v7 = vmul.f32 %v8130_v39, %v1785_v16  ;;  %v2155_v34 = vsel %vm440_vm6, 1, %v7713_v4  ;;  %vm8131_vm10 = vcmp.eq.s32.totalorder %v5565_v12, 1  ;;  %vm8132_vm3 = vcmp.eq.s32.totalorder %v5597_v18, 1  ;;  %v6135_v16 = vpop.permute.xlu1 %2111  ;;  %2632 = vperm.xlu1 %3650, %v3510_v50   ;;  %2622 = vrot.lane.b32.xlu0 %v5054_v3, %s8129_s20  ;;  %s8173_s20 = smov 14  }
 0x1b4   : > { %v1823_v29 = vsel %vm8131_vm10, %v1802_v20, 0.0  ;;  %v1824_v63 = vsel %vm8132_vm3, %v1803_v36, 0.0  ;;  %v1756_v42 = vadd.f32 %v1754_v1, %v1717_v46  ;;  %v1757_v38 = vadd.f32 %v1755_v44, %v1718_v33  ;;  %v8136_v46 = vld [vmem:[#allocation38_spill] sm:$0xff] }
 0x1b5   : > { %v1832_v61 = vmul.f32 %v5599_v52, %v1823_v29  ;;  %v1833_v55 = vmul.f32 %v5599_v52, %v1824_v63  ;;  %vm7630_vm13 = vcmp.eq.s32.totalorder %v5843_v54, 1  ;;  %vm8133_vm6 = vcmp.eq.s32.totalorder %v5628_v14, 1  ;;  %v6145_v44 = vpop.permute.xlu0 %2109 }
 0x1b6   : > { %v1862_v41 = vsel %vm8133_vm6, %v1841_v25, 0.0  ;;  %vm8134_vm3 = vcmp.eq.s32.totalorder %v5719_v59, 1  ;;  %v6148_v52 = vrot.slane %v2120_v45, %v4384_v19  ;;  %vm7629_vm10 = vcmp.eq.s32.totalorder %v5909_v8, 1 }
 0x1b7   : > { %v1863_v1 = vsel %vm8134_vm3, %v1842_v22, 0.0  ;;  %vm7628_vm7 = vcmp.eq.s32.totalorder %v5972_v9, 1  ;;  %v8135_v20 = vrot.slane %v5936_v17, %v4395_v49  ;;  %v2159_v25 = vrot.slane %v2155_v34, %v4384_v19  ;;  %2641 = vrot.lane.b32.xlu1 %v5054_v3, %s8143_s23  ;;  %2639 = vrot.lane.b32.xlu0 %v6057_v58, %s8143_s23  ;;  %s8174_s23 = smov 13  }
 0x1b8   : > { %v2163_v22 = vrot.slane %v2155_v34, %v4395_v49  ;;  %v1880_v45 = vsel %vm7615_vm5, %v8136_v46, %v5687_v24  ;;  %v1881_v33 = vsel %vm7615_vm5, %v5687_v24, %v8136_v46  ;;  %vm2035_vm6 = vcmp.lt.s32.totalorder %v4451_v11, 93  ;;  %v8137_v34 = vld [vmem:[#allocation36_spill] sm:$0xff]  ;;  %v8140_v46 = vld [vmem:[#allocation39_spill] sm:$0xff] }
 0x1b9   : > { %v6156_v36 = vrot.slane %v8135_v20, %v4384_v19  ;;  %v1795_v17 = vadd.f32 %v1793_v37, %v1756_v42  ;;  %v1796_v50 = vadd.f32 %v1794_v7, %v1757_v38  ;;  %v2198_v39 = vrot.slane %v6117_v43, %v4384_v19  ;;  %v6184_v20 = vpop.permute.xlu1 %2148 }
 0x1ba   : > { %v1871_v29 = vmul.f32 %v8137_v34, %v1862_v41  ;;  %v1872_v63 = vmul.f32 %v8137_v34, %v1863_v1  ;;  %v6182_v24 = vsel %vm442_vm8, 1, %v7713_v4  ;;  %v6187_v37 = vrot.slane %v2124_v40, %v4384_v19 }
 0x1bb   : > { %v2202_v7 = vrot.slane %v6117_v43, %v4395_v49  ;;  %v1834_v42 = vadd.f32 %v1832_v61, %v1795_v17  ;;  %v1835_v38 = vadd.f32 %v1833_v55, %v1796_v50  ;;  %v1901_v41 = vsel %vm7617_vm12, %v1880_v45, 0.0  ;;  %v6205_v43 = vpop.permute.xlu0 %2141  ;;  %v8144_v61 = vld [vmem:[#allocation43_spill] sm:$0xff]  ;;  %v3511_v50 = vld [vmem:[%s7300_s3 + $0x3c] sm:$0xf]  ;;  %2658 = vrot.lane.b32.xlu1 %v6057_v58, %s8154_s25 }
 0x1bc   : > { %8138 = vst [vmem:[#allocation58_spill] sm:$0xff] %v6187_v37  ;;  %v1902_v1 = vsel %vm7616_vm0, %v1881_v33, 0.0  ;;  %vm8141_vm2 = vcmp.lt.s32.totalorder %v4451_v11, 96  ;;  %vm2055_vm5 = vcmp.eq.s32.totalorder %v5987_v48, 1  ;;  %vm2056_vm3 = vcmp.eq.s32.totalorder %v6023_v13, 1  ;;  %2651 = vperm.xlu0 %3651, %v3511_v50  }
 0x1bd   : > { %v1919_v34 = vsel %vm8141_vm2, %v8140_v46, %v8139_v31  ;;  %vm8142_vm8 = vmmov %vm8141_vm2  ;;  %vm2094_vm0 = vcmp.eq.s32.totalorder %v6047_v15, 1  ;;  %v1910_v55 = vmul.f32 %v8144_v61, %v1901_v41  ;;  %v1911_v45 = vmul.f32 %v8144_v61, %v1902_v1  ;;  %v8149_v61 = vld [vmem:[#allocation49_spill] sm:$0xff]  ;;  %v6242_v59 = vpop.permute.xlu1 %2180 }
 0x1be   : > { %v1920_v40 = vsel %vm8142_vm8, %v8139_v31, %v8140_v46  ;;  %v6216_v33 = vrot.slane %v2159_v25, %v4384_v19  ;;  %v2237_v17 = vrot.slane %v6182_v24, %v4384_v19  ;;  %v6225_v31 = vrot.slane %v2198_v39, %v4384_v19  ;;  %vm443_vm8 = vmand %vm8080_vm9, %vm4406_vm4 }
 0x1bf   : > { %v1873_v1 = vadd.f32 %v1871_v29, %v1834_v42  ;;  %v1874_v25 = vadd.f32 %v1872_v63, %v1835_v38  ;;  %v6232_v46 = vrot.slane %v2163_v22, %v4384_v19  ;;  %v1958_v30 = vsel %vm7622_vm11, %v8150_v27, %v8149_v61  ;;  %v8151_v22 = vld [vmem:[#allocation46_spill] sm:$0xff] }
 0x1c0   : > { %8145 = vst [vmem:[#allocation54_spill] sm:$0xff] %v6216_v33  ;;  %8146 = vst [vmem:[#allocation60_spill] sm:$0xff] %v6225_v31  ;;  %v1959_v39 = vsel %vm7622_vm11, %v8149_v61, %v8150_v27  ;;  %v1940_v14 = vsel %vm7625_vm1, %v1919_v34, 0.0  ;;  %v1941_v29 = vsel %vm7623_vm15, %v1920_v40, 0.0  ;;  %vm8152_vm2 = vcmp.lt.s32.totalorder %v4451_v11, 94  ;;  %v6257_v27 = vpop.permute.xlu0 %2150  ;;  %2660 = vrot.lane.b32.xlu0 %v5054_v3, %s8154_s25  ;;  %s7636_s25 = sand.u32 1, %s3709_s28  }
 0x1c1   : > { %8148 = vst [vmem:[#allocation61_spill] sm:$0xff] %v6232_v46  ;;  %v1997_v63 = vsel %vm8152_vm2, %v8151_v22, %v5949_v6  ;;  %vm8153_vm12 = vmmov %vm8152_vm2  ;;  %vm2152_vm11 = vcmp.lt.s32.totalorder %v4451_v11, 81  ;;  %v6262_v38 = vrot.slane %v2202_v7, %v4384_v19  ;;  %v2241_v34 = vrot.slane %v6182_v24, %v4395_v49 }
 0x1c2   : > { %v1998_v42 = vsel %vm8153_vm12, %v5949_v6, %v8151_v22  ;;  %vm2133_vm2 = vcmp.eq.s32.totalorder %v6148_v52, 1  ;;  %vm2134_vm15 = vcmp.eq.s32.totalorder %v6187_v37, 1  ;;  %v3512_v6 = vld [vmem:[%s7300_s3 + $0x40] sm:$0xf]  ;;  %v2272_v7 = vsel %vm443_vm8, 1, %v7713_v4  ;;  %vm444_vm1 = vmand %vm8080_vm9, %vm4421_vm14 }
 0x1c3   : > { %8155 = vst [vmem:[#allocation63_spill] sm:$0xff] %v6262_v38  ;;  %v1912_v40 = vadd.f32 %v1910_v55, %v1873_v1  ;;  %v1913_v61 = vadd.f32 %v1911_v45, %v1874_v25  ;;  %v6278_v24 = vrot.slane %v2237_v17, %v4384_v19  ;;  %v1979_v22 = vsel %vm7630_vm13, %v1958_v30, 0.0  ;;  %v8160_v55 = vld [vmem:[#allocation53_spill] sm:$0xff]  ;;  %v6292_v1 = vpop.permute.xlu1 %2189  ;;  %2670 = vperm.xlu1 %3650, %v3512_v6  }
 0x1c4   : > { %vm8157_vm12 = vcmp.eq.s32.totalorder %v5862_v32, 1  ;;  %v1949_v41 = vmul.f32 %v8159_v56, %v1940_v14  ;;  %v1950_v18 = vmul.f32 %v8159_v56, %v1941_v29  ;;  %v1988_v45 = vmul.f32 %v8160_v55, %v1979_v22  ;;  %2677 = vrot.lane.b32.xlu0 %v6057_v58, %s8165_s17 }
 0x1c5   : > { %8156 = vst [vmem:[#allocation72_spill] sm:$0xff] %v6278_v24  ;;  %v1980_v50 = vsel %vm8157_vm12, %v1959_v39, 0.0  ;;  %v2018_v30 = vsel %vm7629_vm10, %v1997_v63, 0.0  ;;  %v2019_v25 = vsel %vm7628_vm7, %v1998_v42, 0.0  ;;  %vm7631_vm4 = vcmp.eq.s32.totalorder %v6216_v33, 1  ;;  %v2188_v63 = vpop.permute.xlu0 %2187  ;;  %v8201_v33 = vld [vmem:[#allocation69_spill] sm:$0xff] }
 0x1c6   : > { %v1989_v17 = vmul.f32 %v8160_v55, %v1980_v50  ;;  %vm7632_vm8 = vcmp.eq.s32.totalorder %v6232_v46, 1  ;;  %v2036_v14 = vsel %vm2035_vm6, %v5997_v62, %v5984_v35  ;;  %v2037_v56 = vsel %vm2035_vm6, %v5984_v35, %v5997_v62 }
 0x1c7   : > { %vm8161_vm12 = vcmp.lt.s32.totalorder %v4451_v11, 83  ;;  %vm2191_vm10 = vcmp.lt.s32.totalorder %v4451_v11, 80  ;;  %vm7633_vm13 = vcmp.lt.s32.totalorder %v4451_v11, 79  ;;  %v2276_v35 = vrot.slane %v2272_v7, %v4384_v19  ;;  %2679 = vrot.lane.b32.xlu1 %v5054_v3, %s8165_s17  ;;  %s8177_s17 = smov 3  }
 0x1c8   : > { %v2075_v39 = vsel %vm8161_vm12, %v6035_v21, %v6101_v60  ;;  %vm8162_vm7 = vmmov %vm8161_vm12  ;;  %v2280_v62 = vrot.slane %v2272_v7, %v4395_v49  ;;  %v6323_v42 = vrot.slane %v2241_v34, %v4384_v19  ;;  %v1952_v6 = vadd.f32 %v1950_v18, %v1913_v61  ;;  %v2227_v7 = vpop.permute.xlu1 %2226 }
 0x1c9   : > { %v2076_v29 = vsel %vm8162_vm7, %v6101_v60, %v6035_v21  ;;  %v2311_v21 = vsel %vm444_vm1, 1, %v7713_v4  ;;  %v1951_v60 = vadd.f32 %v1949_v41, %v1912_v40  ;;  %v2027_v22 = vmul.f32 %v5942_v51, %v2018_v30 }
 0x1ca   : > { %8163 = vst [vmem:[#allocation57_spill] sm:$0xff] %v6323_v42  ;;  %v2028_v50 = vmul.f32 %v5942_v51, %v2019_v25  ;;  %v2057_v55 = vsel %vm2055_vm5, %v2036_v14, 0.0  ;;  %v2058_v34 = vsel %vm2056_vm3, %v2037_v56, 0.0  ;;  %vm2211_vm7 = vcmp.eq.s32.totalorder %v6225_v31, 1  ;;  %v2220_v51 = vpop.permute.xlu0 %2219 }
 0x1cb   : > { %vm2212_vm12 = vcmp.eq.s32.totalorder %v6262_v38, 1  ;;  %v2096_v4 = vsel %vm2094_vm0, %v2075_v39, 0.0  ;;  %vm8164_vm14 = vcmp.eq.s32.totalorder %v6156_v36, 1  ;;  %v2066_v23 = vmul.f32 %v6037_v57, %v2057_v55  ;;  %2696 = vrot.lane.b32.xlu1 %v6057_v58, %s8170_s12  ;;  %v8199_v38 = vld [vmem:[#allocation68_spill] sm:$0xff] }
 0x1cc   : > { %v2097_v18 = vsel %vm8164_vm14, %v2076_v29, 0.0  ;;  %v2067_v53 = vmul.f32 %v6037_v57, %v2058_v34  ;;  %vm7634_vm9 = vcmp.lt.s32.totalorder %v4451_v11, 78  ;;  %v1990_v40 = vadd.f32 %v1988_v45, %v1951_v60  ;;  %v3513_v45 = vld [vmem:[%s7300_s3 + $0x44] sm:$0xf]  ;;  %v2259_v29 = vpop.permute.xlu1 %2258 }
 0x1cd   : > { %v1991_v61 = vadd.f32 %v1989_v17, %v1952_v6  ;;  %vm8166_vm1 = vcmp.lt.s32.totalorder %v4451_v11, 82  ;;  %v6359_v57 = vrot.slane %v2276_v35, %v4384_v19  ;;  %v6362_v25 = vrot.slane %v2280_v62, %v4384_v19  ;;  %2689 = vperm.xlu0 %3651, %v3513_v45  }
 0x1ce   : > { %v2114_v41 = vsel %vm8166_vm1, %v6145_v44, %v6135_v16  ;;  %vm8167_vm14 = vmmov %vm8166_vm1  ;;  %v2029_v17 = vadd.f32 %v2027_v22, %v1990_v40  ;;  %v2105_v56 = vmul.f32 %v6086_v2, %v2096_v4  ;;  %v2106_v39 = vmul.f32 %v6086_v2, %v2097_v18  ;;  %v2229_v6 = vpop.permute.xlu0 %2228 }
 0x1cf   : > { %v2115_v30 = vsel %vm8167_vm14, %v6135_v16, %v6145_v44  ;;  %8168 = vst [vmem:[#allocation64_spill] sm:$0xff] %v6359_v57  ;;  %8169 = vst [vmem:[#allocation76_spill] sm:$0xff] %v6362_v25  ;;  %v2030_v14 = vadd.f32 %v2028_v50, %v1991_v61  ;;  %v2153_v16 = vsel %vm2152_vm11, %v6184_v20, %v6257_v27  ;;  %v2135_v60 = vsel %vm2133_vm2, %v2114_v41, 0.0 }
 0x1d0   : > { %v2154_v44 = vsel %vm2152_vm11, %v6257_v27, %v6184_v20  ;;  %v2315_v35 = vrot.slane %v2311_v21, %v4384_v19  ;;  %v2319_v62 = vrot.slane %v2311_v21, %v4395_v49  ;;  %v2136_v2 = vsel %vm2134_vm15, %v2115_v30, 0.0  ;;  %v3514_v49 = vld [vmem:[%s7300_s3 + $0x48] sm:$0xf]  ;;  %v2268_v40 = vpop.permute.xlu1 %2267 }
 0x1d1   : > { %v2068_v22 = vadd.f32 %v2066_v23, %v2029_v17  ;;  %v2069_v50 = vadd.f32 %v2067_v53, %v2030_v14  ;;  %v2144_v55 = vmul.f32 %v6205_v43, %v2135_v60  ;;  %v2145_v20 = vmul.f32 %v6205_v43, %v2136_v2  ;;  %2708 = vperm.xlu1 %3650, %v3514_v49  }
 0x1d2   : > { %vm7661_vm1 = vcmp.eq.s32.totalorder %v6278_v24, 1  ;;  %vm7635_vm14 = vcmp.eq.s32.totalorder %v6323_v42, 1  ;;  %v2174_v34 = vsel %vm7631_vm4, %v2153_v16, 0.0  ;;  %v2175_v4 = vsel %vm7632_vm8, %v2154_v44, 0.0  ;;  %v2266_v61 = vpop.permute.xlu0 %2265  ;;  %2698 = vrot.lane.b32.xlu0 %v5054_v3, %s8170_s12  ;;  %s3436_s12 = sshll.u32 %s7636_s25, 3  ;;  %s8179_s25 = smov 1  }
 0x1d3   : > { %v2107_v27 = vadd.f32 %v2105_v56, %v2068_v22  ;;  %v2108_v21 = vadd.f32 %v2106_v39, %v2069_v50  ;;  %v2192_v43 = vsel %vm2191_vm10, %v2188_v63, %v6292_v1  ;;  %v2193_v18 = vsel %vm2191_vm10, %v6292_v1, %v2188_v63  ;;  %v8197_v42 = vld [vmem:[#allocation67_spill] sm:$0xff] }
 0x1d4   : > { %v2231_v23 = vsel %vm7633_vm13, %v2227_v7, %v2229_v6  ;;  %v2232_v53 = vsel %vm7633_vm13, %v2229_v6, %v2227_v7  ;;  %vm7654_vm4 = vcmp.eq.s32.totalorder %v6359_v57, 1  ;;  %vm7647_vm8 = vcmp.eq.s32.totalorder %v6362_v25, 1  ;;  %v8195_v25 = vld [vmem:[#allocation66_spill] sm:$0xff] }
 0x1d5   : > { %v6409_v41 = vrot.slane %v2315_v35, %v4384_v19  ;;  %v6412_v30 = vrot.slane %v2319_v62, %v4384_v19  ;;  %v2146_v1 = vadd.f32 %v2144_v55, %v2107_v27  ;;  %v2147_v63 = vadd.f32 %v2145_v20, %v2108_v21  ;;  %v2305_v35 = vpop.permute.xlu1 %2304  ;;  %2717 = vrot.lane.b32.xlu1 %v5054_v3, %s8173_s20  ;;  %v3515_v55 = vld [vmem:[%s7300_s3 + $0x4c] sm:$0xf] }
 0x1d6   : > { %v2183_v7 = vmul.f32 %v6242_v59, %v2174_v34  ;;  %v2184_v45 = vmul.f32 %v6242_v59, %v2175_v4  ;;  %v2213_v17 = vsel %vm2211_vm7, %v2192_v43, 0.0  ;;  %v2214_v14 = vsel %vm2212_vm12, %v2193_v18, 0.0  ;;  %v2298_v62 = vpop.permute.xlu0 %2297  ;;  %2715 = vrot.lane.b32.xlu0 %v6057_v58, %s8173_s20  ;;  %s8185_s20 = smov 113  }
 0x1d7   : > { %8171 = vst [vmem:[#allocation75_spill] sm:$0xff] %v6409_v41  ;;  %8172 = vst [vmem:[#allocation87_spill] sm:$0xff] %v6412_v30  ;;  %v2252_v56 = vsel %vm7661_vm1, %v2231_v23, 0.0  ;;  %v2253_v19 = vsel %vm7635_vm14, %v2232_v53, 0.0  ;;  %v2222_v39 = vmul.f32 %v2220_v51, %v2213_v17  ;;  %v2223_v16 = vmul.f32 %v2220_v51, %v2214_v14  ;;  %v3516_v53 = vld [vmem:[%s7300_s3 + $0x50] sm:$0xf] }
 0x1d8   : > { %v2270_v44 = vsel %vm7634_vm9, %v2266_v61, %v2268_v40  ;;  %v2271_v59 = vsel %vm7634_vm9, %v2268_v40, %v2266_v61  ;;  %vm7646_vm13 = vcmp.lt.s32.totalorder %v4451_v11, 77  ;;  %v2185_v60 = vadd.f32 %v2183_v7, %v2146_v1 }
 0x1d9   : > { %v2186_v2 = vadd.f32 %v2184_v45, %v2147_v63  ;;  %v2261_v6 = vmul.f32 %v2259_v29, %v2252_v56  ;;  %v2262_v51 = vmul.f32 %v2259_v29, %v2253_v19  ;;  %v2291_v22 = vsel %vm7654_vm4, %v2270_v44, 0.0  ;;  %v2337_v27 = vpop.permute.xlu1 %2336  ;;  %2734 = vrot.lane.b32.xlu1 %v6057_v58, %s8174_s23 }
 0x1da   : > { %v2292_v50 = vsel %vm7647_vm8, %v2271_v59, 0.0  ;;  %vm7645_vm9 = vcmp.eq.s32.totalorder %v6409_v41, 1  ;;  %vm7643_vm14 = vcmp.eq.s32.totalorder %v6412_v30, 1  ;;  %v2300_v20 = vmul.f32 %v2298_v62, %v2291_v22  ;;  %v2307_v34 = vpop.permute.xlu0 %2306  ;;  %2727 = vperm.xlu0 %3651, %v3515_v55  }
 0x1db   : > { %v2301_v49 = vmul.f32 %v2298_v62, %v2292_v50  ;;  %v2224_v21 = vadd.f32 %v2222_v39, %v2185_v60  ;;  %v2225_v29 = vadd.f32 %v2223_v16, %v2186_v2  ;;  %v2309_v4 = vsel %vm7646_vm13, %v2305_v35, %v2307_v34  ;;  %v3517_v62 = vld [vmem:[%s7300_s3 + $0x54] sm:$0xf] }
 0x1dc   : > { %v2310_v43 = vsel %vm7646_vm13, %v2307_v34, %v2305_v35  ;;  %v2330_v40 = vsel %vm7645_vm9, %v2309_v4, 0.0  ;;  %v3521_v4 = vld [vmem:[%s7300_s3 + $0x64] sm:$0xf]  ;;  %vm8188_vm13 = vcmp.lt.s32.totalorder %v4451_v11, 50  ;;  %vm8198_vm4 = vcmp.eq.s32.totalorder %v8197_v42, 1 }
 0x1dd   : > { %v2263_v18 = vadd.f32 %v2261_v6, %v2224_v21  ;;  %v2264_v23 = vadd.f32 %v2262_v51, %v2225_v29  ;;  %v2331_v61 = vsel %vm7643_vm14, %v2310_v43, 0.0  ;;  %v2339_v7 = vmul.f32 %v2337_v27, %v2330_v40  ;;  %v6458_v17 = vpop.permute.xlu1 %2355  ;;  %2746 = vperm.xlu1 %3650, %v3516_v53   ;;  %v3518_v6 = vld [vmem:[%s7300_s3 + $0x58] sm:$0xf]  ;;  %vm8189_vm8 = vmmov %vm8188_vm13 }
 0x1de   : > { %v2340_v45 = vmul.f32 %v2337_v27, %v2331_v61  ;;  %v2346_v14 = vpop.permute.xlu0 %2345  ;;  %2736 = vrot.lane.b32.xlu0 %v5054_v3, %s8174_s23  ;;  %s6481_s23 = scalar_lea.vmem [#allocation2], %s3436_s12  ;;  %s8181_s12 = smov 126   ;;  %vm8186_vm14 = vcmp.lt.s32.totalorder %v4451_v11, 51 }
 0x1df   : > { %v2302_v1 = vadd.f32 %v2300_v20, %v2263_v18  ;;  %v2303_v63 = vadd.f32 %v2301_v49, %v2264_v23  ;;  %v3520_v20 = vld [vmem:[%s7300_s3 + $0x60] sm:$0xf]  ;;  %v3519_v49 = vld [vmem:[%s7300_s3 + $0x5c] sm:$0xf]  ;;  %v3522_v23 = vld [vmem:[%s7300_s3 + $0x68] sm:$0xf] }
 0x1e0   : > { %vm8187_vm9 = vmmov %vm8186_vm14 }
 0x1e1   : > { %v2341_v56 = vadd.f32 %v2339_v7, %v2302_v1  ;;  %v2342_v19 = vadd.f32 %v2340_v45, %v2303_v63  ;;  %v6468_v44 = vpop.permute.xlu1 %2366  ;;  %2755 = vrot.lane.b32.xlu1 %v5054_v3, %s8177_s17  ;;  %v3523_v63 = vld [vmem:[%s7300_s3 + $0x6c] sm:$0xf] }
 0x1e2   : > { %v6470_v59 = vpop.permute.xlu0 %2357  ;;  %2753 = vrot.lane.b32.xlu0 %v6057_v58, %s8177_s17  ;;  %s8182_s17 = smov 125  }
 0x1e3   : > { %v6464_v39 = vadd.f32 %v2346_v14, %v2341_v56  ;;  %v6466_v16 = vadd.f32 %v2346_v14, %v2342_v19  ;;  %v3524_v14 = vld [vmem:[%s7300_s3 + $0x70] sm:$0xf] }
 0x1e5   : > { %8175 = vst [vmem:[#allocation71_spill] sm:$0xff] %v6464_v39  ;;  %8176 = vst [vmem:[#allocation119_spill] sm:$0xff] %v6466_v16  ;;  %v3547_v35 = vpack.c.bf16 %v6466_v16, %v6464_v39  ;;  %v6484_v60 = vpop.permute.xlu1 %2375  ;;  %2772 = vrot.lane.b32.xlu1 %v6057_v58, %s8178_s26  ;;  %v2359_v16 = vsel %vm8186_vm14, %v6458_v17, %v6470_v59  ;;  %vm8191_vm14 = vcmp.lt.s32.totalorder %v4451_v11, 49 }
 0x1e6   : > { %v6486_v2 = vpop.permute.xlu0 %2373  ;;  %2765 = vperm.xlu0 %3651, %v3517_v62  }
 0x1e7   : > { %3556 = vst.sshfl [vmem:[%s6481_s23 + $0x4] sm:$0x33 pattern:$0x76325410] %v3547_v35  ;;  %v2378_v39 = vsel %vm8189_vm8, %v6484_v60, %v6486_v2  ;;  %vm8196_vm8 = vcmp.eq.s32.totalorder %v8195_v25, 1 }
 0x1e8   : > { %v2362_v57 = vsel %vm8196_vm8, %v2359_v16, 0.0  ;;  %v2379_v24 = vsel %vm8198_vm4, %v2378_v39, 0.0  ;;  %vm8206_vm4 = vcmp.lt.s32.totalorder %v4451_v11, 48 }
 0x1e9   : > { %v6493_v51 = vpop.permute.xlu1 %2392  ;;  %2784 = vperm.xlu1 %3650, %v3518_v6   ;;  %v3525_v6 = vld [vmem:[%s7300_s3 + $0x74] sm:$0xf]  ;;  %vm8207_vm8 = vmmov %vm8206_vm4 }
 0x1ea   : > { %v6495_v22 = vpop.permute.xlu0 %2385  ;;  %2774 = vrot.lane.b32.xlu0 %v5054_v3, %s8178_s26  ;;  %s8180_s26 = smov 127  }
 0x1ed   : > { %v6499_v50 = vpop.permute.xlu1 %2404  ;;  %2793 = vrot.lane.b32.xlu1 %v5054_v3, %s8179_s25 }
 0x1ee   : > { %v2395_v55 = vpop.permute.xlu0 %2394  ;;  %2791 = vrot.lane.b32.xlu0 %v6057_v58, %s8179_s25  ;;  %s8183_s25 = smov 115  }
 0x1ef   : > { %v2396_v41 = vsel %vm8191_vm14, %v6493_v51, %v2395_v55 }
 0x1f1   : > { %v6511_v27 = vpop.permute.xlu1 %2413  ;;  %2814 = vperm.xlu1 %3650, %v3520_v20  }
 0x1f2   : > { %v6513_v21 = vpop.permute.xlu0 %2411  ;;  %2803 = vperm.xlu0 %3651, %v3519_v49  }
 0x1f3   : > { %v2416_v42 = vsel %vm8207_vm8, %v6511_v27, %v6513_v21 }
 0x1f5   : > { %v6515_v29 = vpop.permute.xlu1 %2430  ;;  %2832 = vrot.lane.b32.xlu1 %v5054_v3, %s8180_s26 }
 0x1f6   : > { %v6517_v34 = vpop.permute.xlu0 %2423  ;;  %2830 = vrot.lane.b32.xlu0 %v6057_v58, %s8180_s26  ;;  %s8205_s26 = smov 111  }
 0x1f9   : > { %v6526_v43 = vpop.permute.xlu1 %2442  ;;  %2849 = vrot.lane.b32.xlu1 %v6057_v58, %s8181_s12 }
 0x1fa   : > { %v6528_v18 = vpop.permute.xlu0 %2432  ;;  %2842 = vperm.xlu0 %3651, %v3521_v4   ;;  %v3526_v4 = vld [vmem:[%s7300_s3 + $0x78] sm:$0xf] }
 0x1fd   : > { %v6535_v53 = vpop.permute.xlu1 %2451  ;;  %2861 = vperm.xlu1 %3650, %v3522_v23  }
 0x1fe   : > { %v6537_v40 = vpop.permute.xlu0 %2449  ;;  %2851 = vrot.lane.b32.xlu0 %v5054_v3, %s8181_s12  ;;  %s8220_s12 = smov 110  }
 0x201   : > { %v6541_v61 = vpop.permute.xlu1 %2468  ;;  %2870 = vrot.lane.b32.xlu1 %v5054_v3, %s8182_s17 }
 0x202   : > { %v6543_v1 = vpop.permute.xlu0 %2461  ;;  %2868 = vrot.lane.b32.xlu0 %v6057_v58, %s8182_s17  ;;  %s8231_s17 = smov 109  }
 0x205   : > { %v6552_v7 = vpop.permute.xlu1 %2480  ;;  %2887 = vrot.lane.b32.xlu1 %v6057_v58, %s8183_s25 }
 0x206   : > { %v6554_v45 = vpop.permute.xlu0 %2470  ;;  %2880 = vperm.xlu0 %3651, %v3523_v63  }
 0x209   : > { %v6561_v56 = vpop.permute.xlu1 %2489  ;;  %2899 = vperm.xlu1 %3650, %v3524_v14  }
 0x20a   : > { %v6563_v19 = vpop.permute.xlu0 %2487  ;;  %2889 = vrot.lane.b32.xlu0 %v5054_v3, %s8183_s25  ;;  %s8248_s25 = smov 99  }
 0x20d   : > { %v6567_v35 = vpop.permute.xlu1 %2506  ;;  %2908 = vrot.lane.b32.xlu1 %v5054_v3, %s8184_s22 }
 0x20e   : > { %v6569_v62 = vpop.permute.xlu0 %2499  ;;  %2906 = vrot.lane.b32.xlu0 %v6057_v58, %s8184_s22  ;;  %s8261_s22 = smov 98  }
 0x211   : > { %v6578_v20 = vpop.permute.xlu1 %2518  ;;  %2925 = vrot.lane.b32.xlu1 %v6057_v58, %s8185_s20 }
 0x212   : > { %v6580_v49 = vpop.permute.xlu0 %2508  ;;  %2918 = vperm.xlu0 %3651, %v3525_v6   ;;  %v2360_v6 = vsel %vm8187_vm9, %v6470_v59, %v6458_v17  ;;  %vm8192_vm9 = vmmov %vm8191_vm14  ;;  %v3527_v59 = vld [vmem:[%s7300_s3 + $0x7c] sm:$0xf]  ;;  %vm8200_vm14 = vcmp.eq.s32.totalorder %v8199_v38, 1  ;;  %v3528_v38 = vld [vmem:[%s7300_s3 + $0x80] sm:$0xf] }
 0x213   : > { %v2397_v17 = vsel %vm8192_vm9, %v2395_v55, %v6493_v51  ;;  %v2388_v55 = vmul.f32 %v6495_v22, %v2379_v24  ;;  %vm8202_vm9 = vcmp.eq.s32.totalorder %v8201_v33, 1  ;;  %v2415_v33 = vsel %vm8206_vm4, %v6513_v21, %v6511_v27 }
 0x214   : > { %v2398_v37 = vsel %vm8202_vm9, %v2397_v17, 0.0 }
 0x215   : > { %v6587_v23 = vpop.permute.xlu1 %2527  ;;  %2937 = vperm.xlu1 %3650, %v3526_v4   ;;  %v2377_v4 = vsel %vm8188_vm13, %v6486_v2, %v6484_v60  ;;  %v8193_v60 = vld [vmem:[#allocation65_spill] sm:$0xff] }
 0x216   : > { %v6589_v63 = vpop.permute.xlu0 %2525  ;;  %2927 = vrot.lane.b32.xlu0 %v5054_v3, %s8185_s20  ;;  %vm8194_vm13 = vcmp.eq.s32.totalorder %v8193_v60, 1  ;;  %v2380_v31 = vsel %vm8200_vm14, %v2377_v4, 0.0  ;;  %v8203_v60 = vld [vmem:[#allocation70_spill] sm:$0xff]  ;;  %s3441_s20 = sshll.u32 %s3873_s19, 2  ;;  %s8363_s19 = smov 77  }
 0x217   : > { %v2361_v2 = vsel %vm8194_vm13, %v2360_v6, 0.0  ;;  %v2389_v46 = vmul.f32 %v6495_v22, %v2380_v31  ;;  %vm8204_vm13 = vcmp.eq.s32.totalorder %v8203_v60, 1  ;;  %v2370_v31 = vmul.f32 %v6468_v44, %v2362_v57  ;;  %v8208_v57 = vld [vmem:[#allocation73_spill] sm:$0xff] }
 0x218   : > { %v2399_v6 = vsel %vm8204_vm13, %v2396_v41, 0.0  ;;  %v2369_v24 = vmul.f32 %v6468_v44, %v2361_v2  ;;  %v2407_v41 = vmul.f32 %v6499_v50, %v2398_v37  ;;  %vm8209_vm14 = vcmp.eq.s32.totalorder %v8208_v57, 1 }
 0x219   : > { %v6593_v14 = vpop.permute.xlu1 %2544  ;;  %2946 = vrot.lane.b32.xlu1 %v5054_v3, %s8190_s24  ;;  %v2408_v39 = vmul.f32 %v6499_v50, %v2399_v6  ;;  %v2391_v4 = vadd.f32 %v2389_v46, %v2370_v31  ;;  %v2417_v44 = vsel %vm8209_vm14, %v2416_v42, 0.0  ;;  %vm8212_vm13 = vcmp.lt.s32.totalorder %v4451_v11, 47  ;;  %v8214_v6 = vld [vmem:[#allocation77_spill] sm:$0xff] }
 0x21a   : > { %v6611_v30 = vpop.permute.xlu0 %2537  ;;  %2944 = vrot.lane.b32.xlu0 %v6057_v58, %s8190_s24  ;;  %v2390_v22 = vadd.f32 %v2388_v55, %v2369_v24  ;;  %v2434_v37 = vsel %vm8212_vm13, %v6515_v29, %v6528_v18  ;;  %vm8213_vm4 = vmmov %vm8212_vm13  ;;  %v2426_v46 = vmul.f32 %v6517_v34, %v2417_v44  ;;  %vm8215_vm8 = vcmp.eq.s32.totalorder %v8214_v6, 1  ;;  %v8216_v24 = vld [vmem:[#allocation78_spill] sm:$0xff]  ;;  %v8225_v44 = vld [vmem:[#allocation80_spill] sm:$0xff]  ;;  %s8342_s24 = smov 80  }
 0x21b   : > { %v2435_v50 = vsel %vm8213_vm4, %v6528_v18, %v6515_v29  ;;  %v2410_v55 = vadd.f32 %v2408_v39, %v2391_v4  ;;  %vm8217_vm14 = vcmp.eq.s32.totalorder %v8216_v24, 1  ;;  %vm8221_vm4 = vcmp.lt.s32.totalorder %v4451_v11, 45  ;;  %v8223_v4 = vld [vmem:[#allocation79_spill] sm:$0xff] }
 0x21c   : > { %v2409_v21 = vadd.f32 %v2407_v41, %v2390_v22  ;;  %v2437_v31 = vsel %vm8217_vm14, %v2434_v37, 0.0  ;;  %vm8224_vm14 = vcmp.eq.s32.totalorder %v8223_v4, 1  ;;  %v8227_v37 = vld [vmem:[#allocation81_spill] sm:$0xff] }
 0x21d   : > { %v6634_v51 = vpop.permute.xlu1 %2556  ;;  %2963 = vrot.lane.b32.xlu1 %v6057_v58, %s8205_s26  ;;  %v2446_v22 = vmul.f32 %v6526_v43, %v2437_v31 }
 0x21e   : > { %v6642_v25 = vpop.permute.xlu0 %2546  ;;  %2956 = vperm.xlu0 %3651, %v3527_v59   ;;  %v8210_v59 = vld [vmem:[#allocation74_spill] sm:$0xff]  ;;  %v2428_v41 = vadd.f32 %v2426_v46, %v2409_v21  ;;  %v8229_v46 = vld [vmem:[#allocation84_spill] sm:$0xff] }
 0x21f   : > { %vm8211_vm9 = vcmp.eq.s32.totalorder %v8210_v59, 1 }
 0x220   : > { %v2418_v2 = vsel %vm8211_vm9, %v2415_v33, 0.0  ;;  %vm8218_vm9 = vcmp.lt.s32.totalorder %v4451_v11, 46  ;;  %v2472_v33 = vsel %vm8221_vm4, %v6541_v61, %v6554_v45 }
 0x221   : > { %v6661_v16 = vpop.permute.xlu1 %2565  ;;  %2975 = vperm.xlu1 %3650, %v3528_v38   ;;  %v2427_v27 = vmul.f32 %v6517_v34, %v2418_v2  ;;  %v2436_v38 = vsel %vm8215_vm8, %v2435_v50, 0.0  ;;  %v2453_v29 = vsel %vm8218_vm9, %v6537_v40, %v6535_v53  ;;  %vm8219_vm13 = vmmov %vm8218_vm9  ;;  %vm8226_vm9 = vcmp.eq.s32.totalorder %v8225_v44, 1 }
 0x222   : > { %v6663_v17 = vpop.permute.xlu0 %2563  ;;  %2965 = vrot.lane.b32.xlu0 %v5054_v3, %s8205_s26  ;;  %v2454_v34 = vsel %vm8219_vm13, %v6535_v53, %v6537_v40  ;;  %vm8222_vm8 = vmmov %vm8221_vm4  ;;  %v3529_v40 = vld [vmem:[%s7300_s3 + $0x84] sm:$0xf]  ;;  %v2445_v39 = vmul.f32 %v6526_v43, %v2436_v38  ;;  %v2456_v59 = vsel %vm8226_vm9, %v2453_v29, 0.0  ;;  %vm8228_vm13 = vcmp.eq.s32.totalorder %v8227_v37, 1  ;;  %v3530_v38 = vld [vmem:[%s7300_s3 + $0x88] sm:$0xf] }
 0x223   : > { %v2473_v42 = vsel %vm8222_vm8, %v6554_v45, %v6541_v61  ;;  %v2429_v53 = vadd.f32 %v2427_v27, %v2410_v55  ;;  %v2455_v57 = vsel %vm8224_vm14, %v2454_v34, 0.0  ;;  %v2465_v2 = vmul.f32 %v6543_v1, %v2456_v59  ;;  %v8236_v34 = vld [vmem:[#allocation82_spill] sm:$0xff] }
 0x224   : > { %v2464_v45 = vmul.f32 %v6543_v1, %v2455_v57  ;;  %v2474_v50 = vsel %vm8228_vm13, %v2473_v42, 0.0  ;;  %vm8230_vm4 = vcmp.eq.s32.totalorder %v8229_v46, 1  ;;  %vm8232_vm8 = vcmp.lt.s32.totalorder %v4451_v11, 35  ;;  %v8238_v42 = vld [vmem:[#allocation83_spill] sm:$0xff]  ;;  %v8240_v57 = vld [vmem:[#allocation85_spill] sm:$0xff] }
 0x225   : > { %v6681_v60 = vpop.permute.xlu1 %2582  ;;  %2984 = vrot.lane.b32.xlu1 %v5054_v3, %s8220_s12  ;;  %v2475_v27 = vsel %vm8230_vm4, %v2472_v33, 0.0  ;;  %v2491_v43 = vsel %vm8232_vm8, %v6563_v19, %v6561_v56  ;;  %vm8233_vm14 = vmmov %vm8232_vm8  ;;  %vm8234_vm9 = vcmp.lt.s32.totalorder %v4451_v11, 34  ;;  %v2447_v24 = vadd.f32 %v2445_v39, %v2428_v41 }
 0x226   : > { %v6695_v18 = vpop.permute.xlu0 %2575  ;;  %2982 = vrot.lane.b32.xlu0 %v6057_v58, %s8220_s12  ;;  %v2492_v1 = vsel %vm8233_vm14, %v6561_v56, %v6563_v19  ;;  %v2510_v55 = vsel %vm8234_vm9, %v6567_v35, %v6580_v49  ;;  %vm8235_vm13 = vmmov %vm8234_vm9  ;;  %v2448_v31 = vadd.f32 %v2446_v22, %v2429_v53  ;;  %v2483_v29 = vmul.f32 %v6552_v7, %v2474_v50  ;;  %s8313_s12 = smov 93  }
 0x227   : > { %v2511_v6 = vsel %vm8235_vm13, %v6580_v49, %v6567_v35  ;;  %v2484_v56 = vmul.f32 %v6552_v7, %v2475_v27  ;;  %vm8237_vm4 = vcmp.eq.s32.totalorder %v8236_v34, 1  ;;  %vm8239_vm8 = vcmp.eq.s32.totalorder %v8238_v42, 1  ;;  %v8242_v49 = vld [vmem:[#allocation86_spill] sm:$0xff]  ;;  %v8255_v34 = vld [vmem:[#allocation92_spill] sm:$0xff] }
 0x228   : > { %v2493_v33 = vsel %vm8237_vm4, %v2492_v1, 0.0  ;;  %v2494_v4 = vsel %vm8239_vm8, %v2491_v43, 0.0  ;;  %vm8241_vm14 = vcmp.eq.s32.totalorder %v8240_v57, 1  ;;  %vm8243_vm9 = vcmp.eq.s32.totalorder %v8242_v49, 1  ;;  %v8249_v1 = vld [vmem:[#allocation88_spill] sm:$0xff] }
 0x229   : > { %v6718_v61 = vpop.permute.xlu1 %2594  ;;  %3001 = vrot.lane.b32.xlu1 %v6057_v58, %s8231_s17  ;;  %v2512_v35 = vsel %vm8241_vm14, %v2511_v6, 0.0  ;;  %v2466_v41 = vadd.f32 %v2464_v45, %v2447_v24  ;;  %v2467_v53 = vadd.f32 %v2465_v2, %v2448_v31  ;;  %v2502_v39 = vmul.f32 %v6569_v62, %v2493_v33 }
 0x22a   : > { %v2585_v21 = vpop.permute.xlu0 %2584  ;;  %2994 = vperm.xlu0 %3651, %v3529_v40   ;;  %v2513_v40 = vsel %vm8243_vm9, %v2510_v55, 0.0  ;;  %v2503_v7 = vmul.f32 %v6569_v62, %v2494_v4  ;;  %vm8244_vm13 = vcmp.lt.s32.totalorder %v4451_v11, 33  ;;  %v2521_v2 = vmul.f32 %v6578_v20, %v2512_v35  ;;  %v8251_v55 = vld [vmem:[#allocation89_spill] sm:$0xff] }
 0x22b   : > { %v2529_v22 = vsel %vm8244_vm13, %v6589_v63, %v6587_v23  ;;  %vm8245_vm4 = vmmov %vm8244_vm13  ;;  %v2485_v37 = vadd.f32 %v2483_v29, %v2466_v41  ;;  %v2486_v45 = vadd.f32 %v2484_v56, %v2467_v53  ;;  %v2522_v50 = vmul.f32 %v6578_v20, %v2513_v40  ;;  %v8253_v29 = vld [vmem:[#allocation91_spill] sm:$0xff]  ;;  %v3532_v40 = vld [vmem:[%s7300_s3 + $0x90] sm:$0xf] }
 0x22c   : > { %v2530_v59 = vsel %vm8245_vm4, %v6587_v23, %v6589_v63  ;;  %vm8246_vm8 = vcmp.lt.s32.totalorder %v4451_v11, 32  ;;  %vm8250_vm9 = vcmp.eq.s32.totalorder %v8249_v1, 1  ;;  %vm8252_vm13 = vcmp.eq.s32.totalorder %v8251_v55, 1 }
 0x22d   : > { %v2604_v19 = vpop.permute.xlu1 %2603  ;;  %3013 = vperm.xlu1 %3650, %v3530_v38   ;;  %v2548_v46 = vsel %vm8246_vm8, %v6593_v14, %v6642_v25  ;;  %vm8247_vm14 = vmmov %vm8246_vm8  ;;  %v2504_v23 = vadd.f32 %v2502_v39, %v2485_v37  ;;  %v2505_v63 = vadd.f32 %v2503_v7, %v2486_v45  ;;  %v2531_v20 = vsel %vm8250_vm9, %v2530_v59, 0.0  ;;  %v8262_v39 = vld [vmem:[#allocation93_spill] sm:$0xff]  ;;  %v8268_v37 = vld [vmem:[#allocation98_spill] sm:$0xff] }
 0x22e   : > { %v2602_v44 = vpop.permute.xlu0 %2601  ;;  %3003 = vrot.lane.b32.xlu0 %v5054_v3, %s8231_s17  ;;  %v2549_v27 = vsel %vm8247_vm14, %v6642_v25, %v6593_v14  ;;  %v2532_v6 = vsel %vm8252_vm13, %v2529_v22, 0.0  ;;  %v2540_v38 = vmul.f32 %v6611_v30, %v2531_v20  ;;  %v3531_v14 = vld [vmem:[%s7300_s3 + $0x8c] sm:$0xf]  ;;  %vm8254_vm4 = vcmp.eq.s32.totalorder %v8253_v29, 1  ;;  %s8349_s17 = smov 79  }
 0x22f   : > { %v2541_v24 = vmul.f32 %v6611_v30, %v2532_v6  ;;  %v2523_v25 = vadd.f32 %v2521_v2, %v2504_v23  ;;  %v2524_v31 = vadd.f32 %v2522_v50, %v2505_v63  ;;  %v2550_v56 = vsel %vm8254_vm4, %v2549_v27, 0.0  ;;  %v8264_v22 = vld [vmem:[#allocation96_spill] sm:$0xff]  ;;  %v8272_v6 = vld [vmem:[#allocation99_spill] sm:$0xff] }
 0x230   : > { %vm8256_vm8 = vcmp.eq.s32.totalorder %v8255_v34, 1  ;;  %vm8257_vm14 = vcmp.lt.s32.totalorder %v4451_v11, 31  ;;  %vm8259_vm13 = vcmp.lt.s32.totalorder %v4451_v11, 30 }
 0x231   : > { %v2621_v62 = vpop.permute.xlu1 %2620  ;;  %3022 = vrot.lane.b32.xlu1 %v5054_v3, %s8248_s25  ;;  %v2551_v33 = vsel %vm8256_vm8, %v2548_v46, 0.0  ;;  %v2567_v4 = vsel %vm8257_vm14, %v6663_v17, %v6661_v16  ;;  %vm8258_vm9 = vmmov %vm8257_vm14  ;;  %v2586_v57 = vsel %vm8259_vm13, %v6681_v60, %v2585_v21  ;;  %v2542_v41 = vadd.f32 %v2540_v38, %v2523_v25  ;;  %v8274_v38 = vld [vmem:[#allocation101_spill] sm:$0xff] }
 0x232   : > { %v2614_v43 = vpop.permute.xlu0 %2613  ;;  %3020 = vrot.lane.b32.xlu0 %v6057_v58, %s8248_s25  ;;  %v2568_v30 = vsel %vm8258_vm9, %v6661_v16, %v6663_v17  ;;  %vm8260_vm4 = vmmov %vm8259_vm13  ;;  %v2543_v53 = vadd.f32 %v2541_v24, %v2524_v31  ;;  %v2559_v16 = vmul.f32 %v6634_v51, %v2550_v56  ;;  %v2560_v17 = vmul.f32 %v6634_v51, %v2551_v33  ;;  %s8306_s25 = smov 94  }
 0x233   : > { %v2587_v35 = vsel %vm8260_vm4, %v2585_v21, %v6681_v60  ;;  %vm8263_vm8 = vcmp.eq.s32.totalorder %v8262_v39, 1  ;;  %vm8265_vm14 = vcmp.eq.s32.totalorder %v8264_v22, 1  ;;  %v8266_v21 = vld [vmem:[#allocation97_spill] sm:$0xff]  ;;  %vm8269_vm13 = vcmp.eq.s32.totalorder %v8268_v37, 1  ;;  %v8288_v37 = vld [vmem:[#allocation106_spill] sm:$0xff] }
 0x234   : > { %v2569_v7 = vsel %vm8263_vm8, %v2568_v30, 0.0  ;;  %v2570_v60 = vsel %vm8265_vm14, %v2567_v4, 0.0  ;;  %vm8267_vm9 = vcmp.eq.s32.totalorder %v8266_v21, 1  ;;  %v2589_v45 = vsel %vm8269_vm13, %v2586_v57, 0.0  ;;  %v8278_v30 = vld [vmem:[#allocation102_spill] sm:$0xff]  ;;  %v8280_v57 = vld [vmem:[#allocation103_spill] sm:$0xff] }
 0x235   : > { %v2633_v42 = vpop.permute.xlu1 %2632  ;;  %3039 = vrot.lane.b32.xlu1 %v6057_v58, %s8261_s22  ;;  %v2588_v59 = vsel %vm8267_vm9, %v2587_v35, 0.0  ;;  %v2578_v50 = vmul.f32 %v6695_v18, %v2569_v7  ;;  %v2579_v46 = vmul.f32 %v6695_v18, %v2570_v60  ;;  %vm8270_vm4 = vcmp.lt.s32.totalorder %v4451_v11, 29  ;;  %v8286_v21 = vld [vmem:[#allocation104_spill] sm:$0xff] }
 0x236   : > { %v2623_v49 = vpop.permute.xlu0 %2622  ;;  %3032 = vperm.xlu0 %3651, %v3531_v14   ;;  %v2605_v51 = vsel %vm8270_vm4, %v2602_v44, %v2604_v19  ;;  %vm8271_vm1 = vmmov %vm8270_vm4  ;;  %v2561_v63 = vadd.f32 %v2559_v16, %v2542_v41  ;;  %v2562_v1 = vadd.f32 %v2560_v17, %v2543_v53  ;;  %v2597_v20 = vmul.f32 %v6718_v61, %v2588_v59 }
 0x237   : > { %v2606_v27 = vsel %vm8271_vm1, %v2604_v19, %v2602_v44  ;;  %v2598_v55 = vmul.f32 %v6718_v61, %v2589_v45  ;;  %vm8273_vm8 = vcmp.eq.s32.totalorder %v8272_v6, 1  ;;  %vm8275_vm14 = vcmp.eq.s32.totalorder %v8274_v38, 1  ;;  %v3534_v61 = vld [vmem:[%s7300_s3 + $0x98] sm:$0xf] }
 0x238   : > { %v2607_v18 = vsel %vm8273_vm8, %v2606_v27, 0.0  ;;  %v2608_v24 = vsel %vm8275_vm14, %v2605_v51, 0.0  ;;  %vm8276_vm9 = vcmp.lt.s32.totalorder %v4451_v11, 19  ;;  %v2580_v25 = vadd.f32 %v2578_v50, %v2561_v63 }
 0x239   : > { %v2642_v2 = vpop.permute.xlu1 %2641  ;;  %3051 = vperm.xlu1 %3650, %v3532_v40   ;;  %v2624_v19 = vsel %vm8276_vm9, %v2621_v62, %v2623_v49  ;;  %vm8277_vm1 = vmmov %vm8276_vm9  ;;  %v2581_v31 = vadd.f32 %v2579_v46, %v2562_v1  ;;  %v2616_v29 = vmul.f32 %v2614_v43, %v2607_v18  ;;  %v2617_v56 = vmul.f32 %v2614_v43, %v2608_v24  ;;  %v3533_v43 = vld [vmem:[%s7300_s3 + $0x94] sm:$0xf]  ;;  %v8292_v46 = vld [vmem:[#allocation108_spill] sm:$0xff] }
 0x23a   : > { %v2640_v23 = vpop.permute.xlu0 %2639  ;;  %3041 = vrot.lane.b32.xlu0 %v5054_v3, %s8261_s22  ;;  %v2625_v44 = vsel %vm8277_vm1, %v2623_v49, %v2621_v62  ;;  %v2599_v33 = vadd.f32 %v2597_v20, %v2580_v25  ;;  %vm8279_vm13 = vcmp.eq.s32.totalorder %v8278_v30, 1  ;;  %vm8281_vm4 = vcmp.eq.s32.totalorder %v8280_v57, 1  ;;  %s8320_s22 = smov 83  }
 0x23b   : > { %v2600_v4 = vadd.f32 %v2598_v55, %v2581_v31  ;;  %v2626_v62 = vsel %vm8279_vm13, %v2625_v44, 0.0  ;;  %v2627_v35 = vsel %vm8281_vm4, %v2624_v19, 0.0  ;;  %vm8282_vm8 = vcmp.lt.s32.totalorder %v4451_v11, 18  ;;  %v3536_v19 = vld [vmem:[%s7300_s3 + $0xa0] sm:$0xf]  ;;  %v8296_v31 = vld [vmem:[#allocation109_spill] sm:$0xff] }
 0x23c   : > { %v2643_v49 = vsel %vm8282_vm8, %v2640_v23, %v2642_v2  ;;  %vm8283_vm14 = vmmov %vm8282_vm8  ;;  %v2618_v53 = vadd.f32 %v2616_v29, %v2599_v33  ;;  %v2635_v39 = vmul.f32 %v2633_v42, %v2626_v62  ;;  %v2636_v7 = vmul.f32 %v2633_v42, %v2627_v35  ;;  %v3535_v42 = vld [vmem:[%s7300_s3 + $0x9c] sm:$0xf] }
 0x23d   : > { %v2659_v14 = vpop.permute.xlu1 %2658  ;;  %3060 = vrot.lane.b32.xlu1 %v5054_v3, %s3756_s10  ;;  %v2644_v40 = vsel %vm8283_vm14, %v2642_v2, %v2640_v23  ;;  %v2619_v16 = vadd.f32 %v2617_v56, %v2600_v4  ;;  %vm8284_vm9 = vcmp.lt.s32.totalorder %v4451_v11, 17  ;;  %vm8287_vm13 = vcmp.eq.s32.totalorder %v8286_v21, 1  ;;  %v8290_v2 = vld [vmem:[#allocation107_spill] sm:$0xff] }
 0x23e   : > { %v2652_v34 = vpop.permute.xlu0 %2651  ;;  %3058 = vrot.lane.b32.xlu0 %v6057_v58, %s3756_s10  ;;  %vm8285_vm1 = vmmov %vm8284_vm9  ;;  %v2645_v59 = vsel %vm8287_vm13, %v2644_v40, 0.0  ;;  %vm8289_vm4 = vcmp.eq.s32.totalorder %v8288_v37, 1  ;;  %vm8291_vm8 = vcmp.eq.s32.totalorder %v8290_v2, 1  ;;  %vm8293_vm14 = vcmp.eq.s32.totalorder %v8292_v46, 1  ;;  %v3538_v46 = vld [vmem:[%s7300_s3 + $0xa8] sm:$0xf] }
 0x23f   : > { %v2646_v45 = vsel %vm8289_vm4, %v2643_v49, 0.0  ;;  %v2654_v27 = vmul.f32 %v2652_v34, %v2645_v59  ;;  %v2637_v6 = vadd.f32 %v2635_v39, %v2618_v53  ;;  %v2638_v18 = vadd.f32 %v2636_v7, %v2619_v16  ;;  %v8302_v53 = vld [vmem:[#allocation113_spill] sm:$0xff]  ;;  %v3537_v7 = vld [vmem:[%s7300_s3 + $0xa4] sm:$0xf] }
 0x240   : > { %v2655_v23 = vmul.f32 %v2652_v34, %v2646_v45  ;;  %vm8297_vm13 = vcmp.eq.s32.totalorder %v8296_v31, 1  ;;  %v8318_v31 = vld [vmem:[#allocation122_spill] sm:$0xff] }
 0x241   : > { %v2671_v41 = vpop.permute.xlu1 %2670  ;;  %3089 = vperm.xlu1 %3650, %v3534_v61   ;;  %v2656_v44 = vadd.f32 %v2654_v27, %v2637_v6 }
 0x242   : > { %v2661_v17 = vpop.permute.xlu0 %2660  ;;  %3070 = vperm.xlu0 %3651, %v3533_v43  }
 0x243   : > { %v2662_v22 = vsel %vm8284_vm9, %v2659_v14, %v2661_v17  ;;  %v2663_v60 = vsel %vm8285_vm1, %v2661_v17, %v2659_v14  ;;  %vm8294_vm9 = vcmp.lt.s32.totalorder %v4451_v11, 16  ;;  %v2657_v14 = vadd.f32 %v2655_v23, %v2638_v18  ;;  %v8304_v17 = vld [vmem:[#allocation114_spill] sm:$0xff]  ;;  %v8311_v23 = vld [vmem:[#allocation116_spill] sm:$0xff] }
 0x244   : > { %v2664_v50 = vsel %vm8291_vm8, %v2663_v60, 0.0  ;;  %v2665_v51 = vsel %vm8293_vm14, %v2662_v22, 0.0  ;;  %vm8295_vm1 = vmmov %vm8294_vm9  ;;  %vm8300_vm8 = vcmp.lt.s32.totalorder %v4451_v11, 15 }
 0x245   : > { %v2673_v63 = vmul.f32 %v2671_v41, %v2664_v50  ;;  %v2674_v1 = vmul.f32 %v2671_v41, %v2665_v51  ;;  %v2680_v20 = vpop.permute.xlu1 %2679  ;;  %3077 = vrot.lane.b32.xlu1 %v6057_v58, %s3757_s21  ;;  %v8298_v58 = vld [vmem:[#allocation110_spill] sm:$0xff]  ;;  %vm8301_vm14 = vmmov %vm8300_vm8  ;;  %v6898_v41 = vld [vmem:[%s4946_s18] sm:$0xff] }
 0x246   : > { %v2678_v55 = vpop.permute.xlu0 %2677  ;;  %3108 = vperm.xlu0 %3651, %v3535_v42   ;;  %vm8299_vm4 = vcmp.eq.s32.totalorder %v8298_v58, 1  ;;  %v8309_v42 = vld [vmem:[#allocation111_spill] sm:$0xff]  ;;  %v3539_v58 = vld [vmem:[%s7300_s3 + $0xac] sm:$0xf] }
 0x247   : > { %v2681_v38 = vsel %vm8294_vm9, %v2678_v55, %v2680_v20  ;;  %v2682_v24 = vsel %vm8295_vm1, %v2680_v20, %v2678_v55  ;;  %v2675_v61 = vadd.f32 %v2673_v63, %v2656_v44  ;;  %v2676_v33 = vadd.f32 %v2674_v1, %v2657_v14  ;;  %v8316_v14 = vld [vmem:[#allocation120_spill] sm:$0xff] }
 0x248   : > { %v2683_v29 = vsel %vm8297_vm13, %v2682_v24, 0.0  ;;  %v2684_v56 = vsel %vm8299_vm4, %v2681_v38, 0.0  ;;  %vm8303_vm9 = vcmp.eq.s32.totalorder %v8302_v53, 1  ;;  %vm8305_vm1 = vcmp.eq.s32.totalorder %v8304_v17, 1  ;;  %v8325_v53 = vld [vmem:[#allocation123_spill] sm:$0xff] }
 0x249   : > { %v2697_v25 = vpop.permute.xlu1 %2696  ;;  %3127 = vperm.xlu1 %3650, %v3536_v19   ;;  %vm8307_vm13 = vcmp.lt.s32.totalorder %v4451_v11, 14 }
 0x24a   : > { %v2690_v34 = vpop.permute.xlu0 %2689  ;;  %3079 = vrot.lane.b32.xlu0 %v5054_v3, %s3757_s21  ;;  %vm8308_vm4 = vmmov %vm8307_vm13  ;;  %s8327_s21 = smov 82  }
 0x24b   : > { %v2692_v4 = vmul.f32 %v2690_v34, %v2683_v29  ;;  %v2693_v30 = vmul.f32 %v2690_v34, %v2684_v56 }
 0x24d   : > { %v2694_v62 = vadd.f32 %v2692_v4, %v2675_v61  ;;  %v2695_v57 = vadd.f32 %v2693_v30, %v2676_v33  ;;  %v2709_v35 = vpop.permute.xlu1 %2708  ;;  %3098 = vrot.lane.b32.xlu1 %v5054_v3, %s3758_s13 }
 0x24e   : > { %v2699_v43 = vpop.permute.xlu0 %2698  ;;  %3096 = vrot.lane.b32.xlu0 %v6898_v41, %s3758_s13  ;;  %s8334_s13 = smov 81  }
 0x24f   : > { %v2700_v49 = vsel %vm8300_vm8, %v2697_v25, %v2699_v43  ;;  %v2701_v40 = vsel %vm8301_vm14, %v2699_v43, %v2697_v25  ;;  %vm8310_vm8 = vcmp.eq.s32.totalorder %v8309_v42, 1  ;;  %vm8312_vm14 = vcmp.eq.s32.totalorder %v8311_v23, 1  ;;  %v3541_v42 = vld [vmem:[%s7300_s3 + $0xb4] sm:$0xf] }
 0x250   : > { %v2702_v16 = vsel %vm8303_vm9, %v2701_v40, 0.0  ;;  %v2703_v39 = vsel %vm8305_vm1, %v2700_v49, 0.0  ;;  %vm8314_vm9 = vcmp.lt.s32.totalorder %v4451_v11, 13  ;;  %v8323_v49 = vld [vmem:[#allocation121_spill] sm:$0xff] }
 0x251   : > { %v2711_v22 = vmul.f32 %v2709_v35, %v2702_v16  ;;  %v2712_v60 = vmul.f32 %v2709_v35, %v2703_v39  ;;  %v2718_v21 = vpop.permute.xlu1 %2717  ;;  %3115 = vrot.lane.b32.xlu1 %v6898_v41, %s8306_s25  ;;  %vm8315_vm1 = vmmov %vm8314_vm9  ;;  %v3540_v35 = vld [vmem:[%s7300_s3 + $0xb0] sm:$0xf] }
 0x252   : > { %v2716_v59 = vpop.permute.xlu0 %2715  ;;  %3146 = vperm.xlu0 %3651, %v3537_v7  }
 0x253   : > { %v2719_v37 = vsel %vm8307_vm13, %v2716_v59, %v2718_v21  ;;  %v2720_v45 = vsel %vm8308_vm4, %v2718_v21, %v2716_v59  ;;  %v2713_v2 = vadd.f32 %v2711_v22, %v2694_v62  ;;  %v2714_v50 = vadd.f32 %v2712_v60, %v2695_v57 }
 0x254   : > { %v2721_v27 = vsel %vm8310_vm8, %v2720_v45, 0.0  ;;  %v2722_v63 = vsel %vm8312_vm14, %v2719_v37, 0.0  ;;  %vm8317_vm13 = vcmp.eq.s32.totalorder %v8316_v14, 1  ;;  %vm8319_vm4 = vcmp.eq.s32.totalorder %v8318_v31, 1  ;;  %v8338_v14 = vld [vmem:[#allocation128_spill] sm:$0xff]  ;;  %v8340_v31 = vld [vmem:[#allocation129_spill] sm:$0xff] }
 0x255   : > { %v2735_v51 = vpop.permute.xlu1 %2734  ;;  %3165 = vperm.xlu1 %3650, %v3538_v46   ;;  %vm8321_vm8 = vcmp.lt.s32.totalorder %v4451_v11, 3  ;;  %v8332_v46 = vld [vmem:[#allocation126_spill] sm:$0xff] }
 0x256   : > { %v2728_v1 = vpop.permute.xlu0 %2727  ;;  %3117 = vrot.lane.b32.xlu0 %v5054_v3, %s8306_s25  ;;  %vm8322_vm14 = vmmov %vm8321_vm8  ;;  %s8356_s25 = smov 78  }
 0x257   : > { %v2730_v20 = vmul.f32 %v2728_v1, %v2721_v27  ;;  %v2731_v55 = vmul.f32 %v2728_v1, %v2722_v63 }
 0x259   : > { %v2732_v6 = vadd.f32 %v2730_v20, %v2713_v2  ;;  %v2733_v18 = vadd.f32 %v2731_v55, %v2714_v50  ;;  %v2747_v38 = vpop.permute.xlu1 %2746  ;;  %3136 = vrot.lane.b32.xlu1 %v5054_v3, %s8313_s12  ;;  %v8330_v2 = vld [vmem:[#allocation125_spill] sm:$0xff] }
 0x25a   : > { %v2737_v24 = vpop.permute.xlu0 %2736  ;;  %3134 = vrot.lane.b32.xlu0 %v6898_v41, %s8313_s12  ;;  %s340_s12 = scalar_lea.vmem %s7304_s7, %s3441_s20 }
 0x25b   : > { %v2738_v19 = vsel %vm8314_vm9, %v2735_v51, %v2737_v24  ;;  %v2739_v44 = vsel %vm8315_vm1, %v2737_v24, %v2735_v51  ;;  %vm8324_vm9 = vcmp.eq.s32.totalorder %v8323_v49, 1  ;;  %vm8326_vm1 = vcmp.eq.s32.totalorder %v8325_v53, 1  ;;  %v3543_v53 = vld [vmem:[%s7300_s3 + $0xbc] sm:$0xf] }
 0x25c   : > { %v2740_v25 = vsel %vm8317_vm13, %v2739_v44, 0.0  ;;  %v2741_v29 = vsel %vm8319_vm4, %v2738_v19, 0.0  ;;  %vm8328_vm13 = vcmp.lt.s32.totalorder %v4451_v11, 2  ;;  %v8337_v19 = vld [vmem:[#allocation131_spill] sm:$0xff] }
 0x25d   : > { %v2749_v56 = vmul.f32 %v2747_v38, %v2740_v25  ;;  %v2750_v34 = vmul.f32 %v2747_v38, %v2741_v29  ;;  %v2756_v61 = vpop.permute.xlu1 %2755  ;;  %3153 = vrot.lane.b32.xlu1 %v6898_v41, %s8320_s22  ;;  %vm8329_vm4 = vmmov %vm8328_vm13  ;;  %v3542_v38 = vld [vmem:[%s7300_s3 + $0xb8] sm:$0xf] }
 0x25e   : > { %v2754_v33 = vpop.permute.xlu0 %2753  ;;  %3184 = vperm.xlu0 %3651, %v3539_v58  }
 0x25f   : > { %v2757_v4 = vsel %vm8321_vm8, %v2754_v33, %v2756_v61  ;;  %v2758_v30 = vsel %vm8322_vm14, %v2756_v61, %v2754_v33  ;;  %v2751_v62 = vadd.f32 %v2749_v56, %v2732_v6  ;;  %v2752_v57 = vadd.f32 %v2750_v34, %v2733_v18 }
 0x260   : > { %v2759_v40 = vsel %vm8324_vm9, %v2758_v30, 0.0  ;;  %v2760_v16 = vsel %vm8326_vm1, %v2757_v4, 0.0  ;;  %vm8331_vm8 = vcmp.eq.s32.totalorder %v8330_v2, 1  ;;  %vm8333_vm14 = vcmp.eq.s32.totalorder %v8332_v46, 1 }
 0x261   : > { %v2773_v43 = vpop.permute.xlu1 %2772  ;;  %3203 = vperm.xlu1 %3650, %v3540_v35   ;;  %vm8335_vm9 = vcmp.lt.s32.totalorder %v4451_v11, 1 }
 0x262   : > { %v2766_v17 = vpop.permute.xlu0 %2765  ;;  %3155 = vrot.lane.b32.xlu0 %v5054_v3, %s8320_s22  ;;  %vm8336_vm1 = vmmov %vm8335_vm9  ;;  %s3346_s22 = sshll.u32 %s6481_s23, 4  ;;  %s7247_s22 = int_to_ptr.vmem [resolvable:$true] %s3346_s22 }
 0x263   : > { %v2768_v39 = vmul.f32 %v2766_v17, %v2759_v40  ;;  %v2769_v7 = vmul.f32 %v2766_v17, %v2760_v16  ;;  %v8345_v17 = vld [vmem:[#allocation6_spill] sm:$0xff]  ;;  %s3657_s18 = scalar_lea.vmem %s7247_s22, 128 }
 0x264   : > { %p3658_p11 = scmp.ne.s32.totalorder %s7247_s22, %s3657_s18 }
 0x265   : > { %v2770_v22 = vadd.f32 %v2768_v39, %v2751_v62  ;;  %v2771_v60 = vadd.f32 %v2769_v7, %v2752_v57  ;;  %v2785_v21 = vpop.permute.xlu1 %2784  ;;  %3174 = vrot.lane.b32.xlu1 %v5054_v3, %s8327_s21  ;;  %v8347_v7 = vld [vmem:[#allocation50_spill] sm:$0xff] }
 0x266   : > { %v2775_v59 = vpop.permute.xlu0 %2774  ;;  %3172 = vrot.lane.b32.xlu0 %v6898_v41, %s8327_s21  ;;  %p3659_p12 = pnand %p3658_p11, %p3856_p5 }
 0x267   : > { %v2776_v37 = vsel %vm8328_vm13, %v2773_v43, %v2775_v59  ;;  %v2777_v45 = vsel %vm8329_vm4, %v2775_v59, %v2773_v43  ;;  %vm8339_vm13 = vcmp.eq.s32.totalorder %v8338_v14, 1  ;;  %vm8341_vm4 = vcmp.eq.s32.totalorder %v8340_v31, 1 }
 0x268   : > { %v2778_v50 = vsel %vm8331_vm8, %v2777_v45, 0.0  ;;  %v2779_v51 = vsel %vm8333_vm14, %v2776_v37, 0.0  ;;  %vm8343_vm8 = vcmp.lt.s32.totalorder %v4451_v11, 127  ;;  %v3544_v37 = vld [vmem:[%s7300_s3 + $0xc0] sm:$0xf]  ;;  %p3660_p13 = pneg %p3659_p12 }
 0x269   : > { %v2787_v27 = vmul.f32 %v2785_v21, %v2778_v50  ;;  %v2788_v23 = vmul.f32 %v2785_v21, %v2779_v51  ;;  %v2794_v63 = vpop.permute.xlu1 %2793  ;;  %3191 = vrot.lane.b32.xlu1 %v6898_v41, %s8334_s13  ;;  %vm8344_vm14 = vmmov %vm8343_vm8 }
 0x26a   : > { %v2792_v1 = vpop.permute.xlu0 %2791  ;;  %3222 = vperm.xlu0 %3651, %v3541_v42  }
 0x26b   : > { %v2795_v20 = vsel %vm8335_vm9, %v2792_v1, %v2794_v63  ;;  %v2796_v55 = vsel %vm8336_vm1, %v2794_v63, %v2792_v1  ;;  %v2789_v6 = vadd.f32 %v2787_v27, %v2770_v22  ;;  %v2790_v18 = vadd.f32 %v2788_v23, %v2771_v60  ;;  %v8352_v27 = vld [vmem:[#allocation8_spill] sm:$0xff] }
 0x26c   : > { %v2797_v25 = vsel %vm8339_vm13, %v2796_v55, 0.0  ;;  %v2798_v29 = vsel %vm8341_vm4, %v2795_v20, 0.0  ;;  %vm8346_vm9 = vcmp.eq.s32.totalorder %v8345_v17, 1  ;;  %vm8348_vm1 = vcmp.eq.s32.totalorder %v8347_v7, 1  ;;  %v8354_v63 = vld [vmem:[#allocation12_spill] sm:$0xff] }
 0x26d   : > { %v2815_v24 = vpop.permute.xlu1 %2814  ;;  %3241 = vperm.xlu1 %3650, %v3542_v38   ;;  %vm8350_vm13 = vcmp.lt.s32.totalorder %v4451_v11, 126 }
 0x26e   : > { %v2822_v44 = vrot.slane %v2815_v24, %v8337_v19  ;;  %v2804_v58 = vpop.permute.xlu0 %2803  ;;  %3193 = vrot.lane.b32.xlu0 %v5054_v3, %s8334_s13  ;;  %vm8351_vm4 = vmmov %vm8350_vm13 }
 0x26f   : > { %v2806_v56 = vmul.f32 %v2804_v58, %v2797_v25  ;;  %v2807_v34 = vmul.f32 %v2804_v58, %v2798_v29  ;;  %v8359_v25 = vld [vmem:[#allocation17_spill] sm:$0xff]  ;;  %v8361_v29 = vld [vmem:[#allocation56_spill] sm:$0xff] }
 0x270   : > { %v2824_v61 = vmul.f32 %v6898_v41, %v2822_v44 }
 0x271   : > { %v2808_v33 = vadd.f32 %v2806_v56, %v2789_v6  ;;  %v2809_v4 = vadd.f32 %v2807_v34, %v2790_v18  ;;  %v2833_v30 = vpop.permute.xlu1 %2832  ;;  %3212 = vrot.lane.b32.xlu1 %v5054_v3, %s8342_s24 }
 0x272   : > { %v2826_v62 = vcombine.high %v2824_v61, %v2824_v61  ;;  %v2831_v57 = vpop.permute.xlu0 %2830  ;;  %3210 = vrot.lane.b32.xlu0 %v6898_v41, %s8342_s24 }
 0x273   : > { %v2834_v35 = vsel %vm8343_vm8, %v2831_v57, %v2833_v30  ;;  %v2835_v43 = vsel %vm8344_vm14, %v2833_v30, %v2831_v57  ;;  %v2828_v49 = vadd.f32 %v2824_v61, %v2808_v33  ;;  %vm8353_vm8 = vcmp.eq.s32.totalorder %v8352_v27, 1  ;;  %v3295_v33 = vld [vmem:[%s340_s12] sm:$0xf] }
 0x274   : > { %v2829_v40 = vadd.f32 %v2826_v62, %v2809_v4  ;;  %v2836_v39 = vsel %vm8346_vm9, %v2834_v35, 0.0  ;;  %v2837_v22 = vsel %vm8348_vm1, %v2835_v43, 0.0  ;;  %vm8355_vm14 = vcmp.eq.s32.totalorder %v8354_v63, 1  ;;  %v2351_v4 = vld [vmem:[%s7301_s4] sm:$0xf] }
 0x275   : > { %v2850_v16 = vpop.permute.xlu1 %2849  ;;  %3229 = vrot.lane.b32.xlu1 %v6898_v41, %s8349_s17  ;;  %vm8357_vm9 = vcmp.lt.s32.totalorder %v4451_v11, 125 }
 0x276   : > { %v2843_v60 = vpop.permute.xlu0 %2842  ;;  %3260 = vperm.xlu0 %3651, %v3543_v53   ;;  %vm8358_vm1 = vmmov %vm8357_vm9 }
 0x277   : > { %v2845_v21 = vmul.f32 %v2843_v60, %v2836_v39  ;;  %v2846_v59 = vmul.f32 %v2843_v60, %v2837_v22 }
 0x279   : > { %v2847_v45 = vadd.f32 %v2845_v21, %v2828_v49  ;;  %v2848_v2 = vadd.f32 %v2846_v59, %v2829_v40  ;;  %v2862_v50 = vpop.permute.xlu1 %2861  ;;  %3279 = vperm.xlu1 %3650, %v3544_v37   ;;  %v8366_v49 = vld [vmem:[#allocation10_spill] sm:$0xff]  ;;  %v8368_v40 = vld [vmem:[#allocation135_spill] sm:$0xff] }
 0x27a   : > { %v2852_v46 = vpop.permute.xlu0 %2851  ;;  %3231 = vrot.lane.b32.xlu0 %v5054_v3, %s8349_s17  ;;  %s3557_s17 = sshll.u32 %s3839_s9, 6  ;;  %s3769_s9 = smov [#allocation2]  }
 0x27b   : > { %v2853_v51 = vsel %vm8350_vm13, %v2850_v16, %v2852_v46  ;;  %v2854_v42 = vsel %vm8351_vm4, %v2852_v46, %v2850_v16  ;;  %vm8360_vm13 = vcmp.eq.s32.totalorder %v8359_v25, 1  ;;  %vm8362_vm4 = vcmp.eq.s32.totalorder %v8361_v29, 1  ;;  %s7252_s20 = scalar_lea.hbm %s7305_s8, %s3557_s17  ;;  %s3661_s12 = sshll.u32 %s3769_s9, 4  ;;  %s3662_s12 = int_to_ptr.vmem [resolvable:$false] %s3661_s12 }
 0x27c   : > { %v2855_v23 = vsel %vm8353_vm8, %v2853_v51, 0.0  ;;  %v2856_v1 = vsel %vm8355_vm14, %v2854_v42, 0.0  ;;  %vm8364_vm8 = vcmp.lt.s32.totalorder %v4451_v11, 115  ;;  %p3664_p0 = scmp.lt.s32.totalorder %s7247_s22, %s3662_s12 }
 0x27d   : > { %v2864_v20 = vmul.f32 %v2862_v50, %v2855_v23  ;;  %v2865_v55 = vmul.f32 %v2862_v50, %v2856_v1  ;;  %v2871_v6 = vpop.permute.xlu1 %2870  ;;  %3250 = vrot.lane.b32.xlu1 %v5054_v3, %s8356_s25  ;;  %vm8365_vm14 = vmmov %vm8364_vm8  ;;  %v8374_v50 = vld [vmem:[#allocation134_spill] sm:$0xff] }
 0x27e   : > { %v2869_v18 = vpop.permute.xlu0 %2868  ;;  %3248 = vrot.lane.b32.xlu0 %v6898_v41, %s8356_s25  ;;  %s8463_s25 = sand.u32 1, %s3709_s28  }
 0x27f   : > { %v2872_v38 = vsel %vm8357_vm9, %v2869_v18, %v2871_v6  ;;  %v2873_v24 = vsel %vm8358_vm1, %v2871_v6, %v2869_v18  ;;  %v2866_v19 = vadd.f32 %v2864_v20, %v2847_v45  ;;  %v2867_v44 = vadd.f32 %v2865_v55, %v2848_v2  ;;  %v8372_v45 = vld [vmem:[#allocation133_spill] sm:$0xff]  ;;  %v8378_v18 = vld [vmem:[#allocation19_spill] sm:$0xff]  ;;  %s7257_s13 = scalar_lea.sflag [#allocation3], %s8463_s25 }
 0x280   : > { %v2874_v31 = vsel %vm8360_vm13, %v2872_v38, 0.0  ;;  %v2875_v58 = vsel %vm8362_vm4, %v2873_v24, 0.0  ;;  %vm8367_vm9 = vcmp.eq.s32.totalorder %v8366_v49, 1  ;;  %vm8369_vm1 = vcmp.eq.s32.totalorder %v8368_v40, 1  ;;  %v8380_v24 = vld [vmem:[#allocation20_spill] sm:$0xff] }
 0x281   : > { %v2888_v14 = vpop.permute.xlu1 %2887  ;;  %3269 = vrot.lane.b32.xlu1 %v5054_v3, %s8363_s19  ;;  %vm8370_vm13 = vcmp.lt.s32.totalorder %v4451_v11, 114 }
 0x282   : > { %v2881_v56 = vpop.permute.xlu0 %2880  ;;  %3267 = vrot.lane.b32.xlu0 %v6898_v41, %s8363_s19  ;;  %vm8371_vm4 = vmmov %vm8370_vm13  ;;  %s3663_s19 = scalar_lea.vmem %s3662_s12, 256 }
 0x283   : > { %v2883_v34 = vmul.f32 %v2881_v56, %v2874_v31  ;;  %v2884_v61 = vmul.f32 %v2881_v56, %v2875_v58  ;;  %p3665_p1 = scmp.lt.s32.totalorder %s3663_s19, %s3657_s18 }
 0x285   : > { %v2885_v30 = vadd.f32 %v2883_v34, %v2866_v19  ;;  %v2886_v62 = vadd.f32 %v2884_v61, %v2867_v44  ;;  %v2900_v57 = vpop.permute.xlu1 %2899  ;;  %3298 = vperm.xlu1 %3650, %v3295_v33   ;;  %p3666_p2 = por %p3665_p1, %p3664_p0 }
 0x286   : > { %v2890_v35 = vpop.permute.xlu0 %2889  ;;  %3288 = vperm.xlu0 %3651, %v2351_v4  }
 0x287   : > { %v2891_v43 = vsel %vm8364_vm8, %v2888_v14, %v2890_v35  ;;  %v2892_v3 = vsel %vm8365_vm14, %v2890_v35, %v2888_v14  ;;  %vm8373_vm8 = vcmp.eq.s32.totalorder %v8372_v45, 1  ;;  %vm8375_vm14 = vcmp.eq.s32.totalorder %v8374_v50, 1  ;;  %p3667_p3 = pnand %p3666_p2, %p3660_p13 }
 0x288   : > { %v2893_v41 = vsel %vm8367_vm9, %v2891_v43, 0.0  ;;  %v2894_v53 = vsel %vm8369_vm1, %v2892_v3, 0.0  ;;  %vm8376_vm9 = vcmp.lt.s32.totalorder %v4451_v11, 113 }
 0x289   : > { %v2902_v16 = vmul.f32 %v2900_v57, %v2893_v41  ;;  %v2903_v17 = vmul.f32 %v2900_v57, %v2894_v53  ;;  %v2909_v39 = vpop.permute.xlu1 %2908  ;;  %vm8377_vm1 = vmmov %vm8376_vm9  ;;  %v8388_v53 = vld [vmem:[#allocation22_spill] sm:$0xff] }
 0x28a   : > { %v2907_v7 = vpop.permute.xlu0 %2906 }
 0x28b   : > { %v2910_v22 = vsel %vm8370_vm13, %v2907_v7, %v2909_v39  ;;  %v2911_v60 = vsel %vm8371_vm4, %v2909_v39, %v2907_v7  ;;  %v2904_v21 = vadd.f32 %v2902_v16, %v2885_v30  ;;  %v2905_v59 = vadd.f32 %v2903_v17, %v2886_v62  ;;  %v8390_v16 = vld [vmem:[#allocation26_spill] sm:$0xff] }
 0x28c   : > { %v2912_v2 = vsel %vm8373_vm8, %v2910_v22, 0.0  ;;  %v2913_v46 = vsel %vm8375_vm14, %v2911_v60, 0.0  ;;  %vm8379_vm13 = vcmp.eq.s32.totalorder %v8378_v18, 1  ;;  %vm8381_vm4 = vcmp.eq.s32.totalorder %v8380_v24, 1 }
 0x28d   : > { %v2926_v37 = vpop.permute.xlu1 %2925  ;;  %vm8382_vm8 = vcmp.lt.s32.totalorder %v4451_v11, 112 }
 0x28e   : > { %v2919_v51 = vpop.permute.xlu0 %2918  ;;  %vm8383_vm14 = vmmov %vm8382_vm8 }
 0x28f   : > { %v2921_v42 = vmul.f32 %v2919_v51, %v2912_v2  ;;  %v2922_v27 = vmul.f32 %v2919_v51, %v2913_v46 }
 0x291   : > { %v2923_v23 = vadd.f32 %v2921_v42, %v2904_v21  ;;  %v2924_v63 = vadd.f32 %v2922_v27, %v2905_v59  ;;  %v2938_v1 = vpop.permute.xlu1 %2937 }
 0x292   : > { %v2928_v20 = vpop.permute.xlu0 %2927 }
 0x293   : > { %v2929_v55 = vsel %vm8376_vm9, %v2926_v37, %v2928_v20  ;;  %v2930_v6 = vsel %vm8377_vm1, %v2928_v20, %v2926_v37  ;;  %vm8384_vm9 = vcmp.eq.s32.totalorder %v8071_v0, 1  ;;  %vm8385_vm1 = vcmp.eq.s32.totalorder %v8072_v26, 1 }
 0x294   : > { %v2931_v38 = vsel %vm8379_vm13, %v2929_v55, 0.0  ;;  %v2932_v19 = vsel %vm8381_vm4, %v2930_v6, 0.0  ;;  %vm8386_vm13 = vcmp.lt.s32.totalorder %v4451_v11, 111 }
 0x295   : > { %v2940_v44 = vmul.f32 %v2938_v1, %v2931_v38  ;;  %v2941_v14 = vmul.f32 %v2938_v1, %v2932_v19  ;;  %v2947_v25 = vpop.permute.xlu1 %2946  ;;  %vm8387_vm4 = vmmov %vm8386_vm13 }
 0x296   : > { %v2945_v31 = vpop.permute.xlu0 %2944 }
 0x297   : > { %v2948_v29 = vsel %vm8382_vm8, %v2945_v31, %v2947_v25  ;;  %v2949_v58 = vsel %vm8383_vm14, %v2947_v25, %v2945_v31  ;;  %v2942_v56 = vadd.f32 %v2940_v44, %v2923_v23  ;;  %v2943_v34 = vadd.f32 %v2941_v14, %v2924_v63 }
 0x298   : > { %v2950_v33 = vsel %vm8384_vm9, %v2948_v29, 0.0  ;;  %v2951_v4 = vsel %vm8385_vm1, %v2949_v58, 0.0  ;;  %vm8389_vm8 = vcmp.eq.s32.totalorder %v8388_v53, 1  ;;  %vm8391_vm14 = vcmp.eq.s32.totalorder %v8390_v16, 1 }
 0x299   : > { %v2964_v61 = vpop.permute.xlu1 %2963  ;;  %vm8392_vm9 = vcmp.lt.s32.totalorder %v4451_v11, 110 }
 0x29a   : > { %v2957_v30 = vpop.permute.xlu0 %2956  ;;  %vm8393_vm1 = vmmov %vm8392_vm9 }
 0x29b   : > { %v2959_v62 = vmul.f32 %v2957_v30, %v2950_v33  ;;  %v2960_v57 = vmul.f32 %v2957_v30, %v2951_v4 }
 0x29d   : > { %v2961_v35 = vadd.f32 %v2959_v62, %v2942_v56  ;;  %v2962_v43 = vadd.f32 %v2960_v57, %v2943_v34  ;;  %v2976_v3 = vpop.permute.xlu1 %2975 }
 0x29e   : > { %v2966_v49 = vpop.permute.xlu0 %2965 }
 0x29f   : > { %v2967_v41 = vsel %vm8386_vm13, %v2964_v61, %v2966_v49  ;;  %v2968_v40 = vsel %vm8387_vm4, %v2966_v49, %v2964_v61  ;;  %vm8394_vm13 = vcmp.lt.s32.totalorder %v4451_v11, 109 }
 0x2a0   : > { %v2969_v0 = vsel %vm8389_vm8, %v2967_v41, 0.0  ;;  %v2970_v26 = vsel %vm8391_vm14, %v2968_v40, 0.0  ;;  %vm8395_vm4 = vmmov %vm8394_vm13  ;;  %vm8396_vm8 = vcmp.eq.s32.totalorder %v8093_v28, 1  ;;  %vm8397_vm14 = vcmp.eq.s32.totalorder %v8094_v5, 1 }
 0x2a1   : > { %v2978_v17 = vmul.f32 %v2976_v3, %v2969_v0  ;;  %v2979_v39 = vmul.f32 %v2976_v3, %v2970_v26  ;;  %v2985_v7 = vpop.permute.xlu1 %2984 }
 0x2a2   : > { %v2983_v22 = vpop.permute.xlu0 %2982 }
 0x2a3   : > { %v2980_v60 = vadd.f32 %v2978_v17, %v2961_v35  ;;  %v2981_v21 = vadd.f32 %v2979_v39, %v2962_v43  ;;  %v2986_v58 = vsel %vm8392_vm9, %v2983_v22, %v2985_v7  ;;  %v2987_v56 = vsel %vm8393_vm1, %v2985_v7, %v2983_v22  ;;  %v8405_v17 = vld [vmem:[#allocation33_spill] sm:$0xff] }
 0x2a4   : > { %v2988_v30 = vsel %vm8396_vm8, %v2986_v58, 0.0  ;;  %v2989_v62 = vsel %vm8397_vm14, %v2987_v56, 0.0  ;;  %vm8398_vm9 = vcmp.eq.s32.totalorder %v8098_v10, 1  ;;  %vm8399_vm1 = vcmp.eq.s32.totalorder %v5530_v47, 1 }
 0x2a5   : > { %v3002_v59 = vpop.permute.xlu1 %3001  ;;  %vm8402_vm8 = vcmp.lt.s32.totalorder %v4451_v11, 98 }
 0x2a6   : > { %v2995_v37 = vpop.permute.xlu0 %2994  ;;  %vm8403_vm14 = vmmov %vm8402_vm8 }
 0x2a7   : > { %v2997_v57 = vmul.f32 %v2995_v37, %v2988_v30  ;;  %v2998_v35 = vmul.f32 %v2995_v37, %v2989_v62  ;;  %v8407_v37 = vld [vmem:[#allocation37_spill] sm:$0xff] }
 0x2a9   : > { %v3014_v45 = vpop.permute.xlu1 %3013  ;;  %v2999_v47 = vadd.f32 %v2997_v57, %v2980_v60  ;;  %v3000_v16 = vadd.f32 %v2998_v35, %v2981_v21  ;;  %v8415_v57 = vld [vmem:[#allocation34_spill] sm:$0xff] }
 0x2aa   : > { %v3004_v2 = vpop.permute.xlu0 %3003 }
 0x2ab   : > { %v3005_v61 = vsel %vm8394_vm13, %v3002_v59, %v3004_v2  ;;  %v3006_v33 = vsel %vm8395_vm4, %v3004_v2, %v3002_v59  ;;  %vm8400_vm13 = vcmp.lt.s32.totalorder %v4451_v11, 99 }
 0x2ac   : > { %v3007_v43 = vsel %vm8398_vm9, %v3005_v61, 0.0  ;;  %v3008_v3 = vsel %vm8399_vm1, %v3006_v33, 0.0  ;;  %vm8401_vm4 = vmmov %vm8400_vm13  ;;  %vm8404_vm9 = vcmp.eq.s32.totalorder %v5565_v12, 1  ;;  %vm8406_vm1 = vcmp.eq.s32.totalorder %v8405_v17, 1 }
 0x2ad   : > { %v3023_v50 = vpop.permute.xlu1 %3022  ;;  %v3016_v53 = vmul.f32 %v3014_v45, %v3007_v43  ;;  %v3017_v0 = vmul.f32 %v3014_v45, %v3008_v3  ;;  %v8417_v43 = vld [vmem:[#allocation42_spill] sm:$0xff] }
 0x2ae   : > { %v3021_v46 = vpop.permute.xlu0 %3020 }
 0x2af   : > { %v3024_v41 = vsel %vm8400_vm13, %v3021_v46, %v3023_v50  ;;  %v3025_v28 = vsel %vm8401_vm4, %v3023_v50, %v3021_v46  ;;  %vm8408_vm13 = vcmp.eq.s32.totalorder %v8407_v37, 1  ;;  %v8409_v50 = vld [vmem:[#allocation41_spill] sm:$0xff]  ;;  %v3018_v45 = vadd.f32 %v3016_v53, %v2999_v47 }
 0x2b0   : > { %v3026_v26 = vsel %vm8404_vm9, %v3024_v41, 0.0  ;;  %v3027_v39 = vsel %vm8406_vm1, %v3025_v28, 0.0  ;;  %vm8410_vm4 = vcmp.eq.s32.totalorder %v8409_v50, 1  ;;  %v3019_v60 = vadd.f32 %v3017_v0, %v3000_v16  ;;  %v8421_v28 = vld [vmem:[#allocation44_spill] sm:$0xff] }
 0x2b1   : > { %v3040_v51 = vpop.permute.xlu1 %3039  ;;  %vm8413_vm9 = vcmp.lt.s32.totalorder %v4451_v11, 96 }
 0x2b2   : > { %v3033_v42 = vpop.permute.xlu0 %3032  ;;  %vm8414_vm1 = vmmov %vm8413_vm9 }
 0x2b3   : > { %v3035_v22 = vmul.f32 %v3033_v42, %v3026_v26  ;;  %v3036_v59 = vmul.f32 %v3033_v42, %v3027_v39 }
 0x2b5   : > { %v3052_v27 = vpop.permute.xlu1 %3051  ;;  %v3037_v33 = vadd.f32 %v3035_v22, %v3018_v45  ;;  %v3038_v30 = vadd.f32 %v3036_v59, %v3019_v60 }
 0x2b6   : > { %v3042_v23 = vpop.permute.xlu0 %3041 }
 0x2b7   : > { %v3043_v5 = vsel %vm8402_vm8, %v3040_v51, %v3042_v23  ;;  %v3044_v10 = vsel %vm8403_vm14, %v3042_v23, %v3040_v51  ;;  %vm8411_vm8 = vcmp.lt.s32.totalorder %v4451_v11, 97 }
 0x2b8   : > { %v3045_v2 = vsel %vm8408_vm13, %v3043_v5, 0.0  ;;  %v3046_v46 = vsel %vm8410_vm4, %v3044_v10, 0.0  ;;  %vm8412_vm14 = vmmov %vm8411_vm8  ;;  %vm8416_vm13 = vcmp.eq.s32.totalorder %v8415_v57, 1  ;;  %vm8418_vm4 = vcmp.eq.s32.totalorder %v8417_v43, 1 }
 0x2b9   : > { %v3061_v63 = vpop.permute.xlu1 %3060  ;;  %v3054_v23 = vmul.f32 %v3052_v27, %v3045_v2  ;;  %v3055_v58 = vmul.f32 %v3052_v27, %v3046_v46 }
 0x2ba   : > { %v3059_v1 = vpop.permute.xlu0 %3058 }
 0x2bb   : > { %v3062_v12 = vsel %vm8411_vm8, %v3059_v1, %v3061_v63  ;;  %v3063_v21 = vsel %vm8412_vm14, %v3061_v63, %v3059_v1  ;;  %vm8419_vm8 = vcmp.lt.s32.totalorder %v4451_v11, 95  ;;  %v3056_v10 = vadd.f32 %v3054_v23, %v3037_v33 }
 0x2bc   : > { %v3064_v35 = vsel %vm8416_vm13, %v3062_v12, 0.0  ;;  %v3065_v3 = vsel %vm8418_vm4, %v3063_v21, 0.0  ;;  %vm8420_vm14 = vmmov %vm8419_vm8  ;;  %v3057_v53 = vadd.f32 %v3055_v58, %v3038_v30  ;;  %vm8425_vm13 = vcmp.eq.s32.totalorder %v5843_v54, 1 }
 0x2bd   : > { %v7079_v20 = vpop.permute.xlu1 %3089  ;;  %vm8426_vm4 = vcmp.eq.s32.totalorder %v5862_v32, 1 }
 0x2be   : > { %v3071_v55 = vpop.permute.xlu0 %3070 }
 0x2bf   : > { %v3073_v1 = vmul.f32 %v3071_v55, %v3064_v35  ;;  %v3074_v41 = vmul.f32 %v3071_v55, %v3065_v3 }
 0x2c1   : > { %v3078_v6 = vpop.permute.xlu1 %3077  ;;  %v3075_v32 = vadd.f32 %v3073_v1, %v3056_v10  ;;  %v3076_v22 = vadd.f32 %v3074_v41, %v3057_v53  ;;  %v8439_v1 = vld [vmem:[#allocation61_spill] sm:$0xff] }
 0x2c2   : > { %v7081_v18 = vpop.permute.xlu0 %3108 }
 0x2c5   : > { %v7083_v38 = vpop.permute.xlu1 %3127 }
 0x2c6   : > { %v3080_v24 = vpop.permute.xlu0 %3079 }
 0x2c7   : > { %v3081_v42 = vsel %vm8413_vm9, %v3078_v6, %v3080_v24  ;;  %v3082_v56 = vsel %vm8414_vm1, %v3080_v24, %v3078_v6  ;;  %vm8422_vm9 = vcmp.eq.s32.totalorder %v8421_v28, 1  ;;  %v8423_v24 = vld [vmem:[#allocation45_spill] sm:$0xff] }
 0x2c8   : > { %v3083_v6 = vsel %vm8422_vm9, %v3081_v42, 0.0  ;;  %vm8424_vm1 = vcmp.eq.s32.totalorder %v8423_v24, 1  ;;  %vm8429_vm9 = vcmp.eq.s32.totalorder %v5909_v8, 1 }
 0x2c9   : > { %v3099_v19 = vpop.permute.xlu1 %3098  ;;  %v3084_v5 = vsel %vm8424_vm1, %v3082_v56, 0.0  ;;  %v3092_v26 = vmul.f32 %v7079_v20, %v3083_v6  ;;  %vm8430_vm1 = vcmp.eq.s32.totalorder %v5972_v9, 1 }
 0x2ca   : > { %v3097_v44 = vpop.permute.xlu0 %3096  ;;  %v3093_v17 = vmul.f32 %v7079_v20, %v3084_v5 }
 0x2cb   : > { %v3100_v63 = vsel %vm8419_vm8, %v3097_v44, %v3099_v19  ;;  %v3101_v27 = vsel %vm8420_vm14, %v3099_v19, %v3097_v44  ;;  %vm8427_vm8 = vcmp.lt.s32.totalorder %v4451_v11, 94 }
 0x2cc   : > { %v3102_v47 = vsel %vm8425_vm13, %v3100_v63, 0.0  ;;  %v3103_v16 = vsel %vm8426_vm4, %v3101_v27, 0.0  ;;  %vm8428_vm14 = vmmov %vm8427_vm8  ;;  %v3095_v46 = vadd.f32 %v3093_v17, %v3076_v22  ;;  %v8437_v63 = vld [vmem:[#allocation54_spill] sm:$0xff] }
 0x2cd   : > { %v3116_v14 = vpop.permute.xlu1 %3115  ;;  %v3111_v59 = vmul.f32 %v7081_v18, %v3102_v47  ;;  %v3112_v37 = vmul.f32 %v7081_v18, %v3103_v16 }
 0x2ce   : > { %v7085_v25 = vpop.permute.xlu0 %3146 }
 0x2cf   : > { %v3114_v60 = vadd.f32 %v3112_v37, %v3095_v46 }
 0x2d1   : > { %v7087_v31 = vpop.permute.xlu1 %3165 }
 0x2d2   : > { %v3118_v29 = vpop.permute.xlu0 %3117 }
 0x2d3   : > { %v3119_v19 = vsel %vm8427_vm8, %v3116_v14, %v3118_v29  ;;  %v3120_v55 = vsel %vm8428_vm14, %v3118_v29, %v3116_v14  ;;  %vm8440_vm8 = vcmp.eq.s32.totalorder %v8439_v1, 1 }
 0x2d4   : > { %v3121_v14 = vsel %vm8429_vm9, %v3119_v19, 0.0  ;;  %v3122_v29 = vsel %vm8430_vm1, %v3120_v55, 0.0  ;;  %vm8455_vm1 = vcmp.lt.s32.totalorder %v4451_v11, 77 }
 0x2d5   : > { %v3137_v34 = vpop.permute.xlu1 %3136  ;;  %v3130_v9 = vmul.f32 %v7083_v38, %v3121_v14  ;;  %v3131_v45 = vmul.f32 %v7083_v38, %v3122_v29 }
 0x2d6   : > { %v3135_v4 = vpop.permute.xlu0 %3134 }
 0x2d7   : > { %v3138_v39 = vsel %vm2035_vm6, %v3135_v4, %v3137_v34  ;;  %v3139_v54 = vsel %vm2035_vm6, %v3137_v34, %v3135_v4  ;;  %v3094_v4 = vadd.f32 %v3092_v26, %v3075_v32  ;;  %vm8431_vm6 = vcmp.lt.s32.totalorder %v4451_v11, 83  ;;  %v8445_v32 = vld [vmem:[#allocation72_spill] sm:$0xff] }
 0x2d8   : > { %v3140_v20 = vsel %vm2055_vm5, %v3138_v39, 0.0  ;;  %v3141_v50 = vsel %vm2056_vm3, %v3139_v54, 0.0  ;;  %vm8432_vm13 = vmmov %vm8431_vm6  ;;  %vm8433_vm5 = vcmp.eq.s32.totalorder %v6156_v36, 1  ;;  %vm8434_vm3 = vcmp.lt.s32.totalorder %v4451_v11, 82 }
 0x2d9   : > { %v7105_v49 = vpop.permute.xlu1 %3153  ;;  %v3113_v48 = vadd.f32 %v3111_v59, %v3094_v4  ;;  %v3149_v13 = vmul.f32 %v7085_v25, %v3140_v20  ;;  %v3150_v12 = vmul.f32 %v7085_v25, %v3141_v50  ;;  %vm8435_vm4 = vmmov %vm8434_vm3  ;;  %v3133_v56 = vadd.f32 %v3131_v45, %v3114_v60  ;;  %v8447_v59 = vld [vmem:[#allocation57_spill] sm:$0xff] }
 0x2da   : > { %v7111_v40 = vpop.permute.xlu0 %3184 }
 0x2db   : > { %v3132_v42 = vadd.f32 %v3130_v9, %v3113_v48  ;;  %v3152_v43 = vadd.f32 %v3150_v12, %v3133_v56  ;;  %v8451_v9 = vld [vmem:[#allocation64_spill] sm:$0xff] }
 0x2dc   : > { %vm8452_vm14 = vcmp.eq.s32.totalorder %v8451_v9, 1  ;;  %v8453_v48 = vld [vmem:[#allocation76_spill] sm:$0xff] }
 0x2dd   : > { %v7121_v7 = vpop.permute.xlu1 %3203  ;;  %vm8454_vm9 = vcmp.eq.s32.totalorder %v8453_v48, 1 }
 0x2de   : > { %v3156_v51 = vpop.permute.xlu0 %3155 }
 0x2df   : > { %v3157_v18 = vsel %vm8431_vm6, %v7105_v49, %v3156_v51  ;;  %v3158_v8 = vsel %vm8432_vm13, %v3156_v51, %v7105_v49  ;;  %vm8456_vm6 = vmmov %vm8455_vm1 }
 0x2e0   : > { %v3159_v23 = vsel %vm2094_vm0, %v3157_v18, 0.0  ;;  %v3160_v58 = vsel %vm8433_vm5, %v3158_v8, 0.0  ;;  %vm8438_vm0 = vcmp.eq.s32.totalorder %v8437_v63, 1 }
 0x2e1   : > { %v3175_v61 = vpop.permute.xlu1 %3174  ;;  %v3168_v15 = vmul.f32 %v7087_v31, %v3159_v23  ;;  %v3169_v36 = vmul.f32 %v7087_v31, %v3160_v58 }
 0x2e2   : > { %v3173_v62 = vpop.permute.xlu0 %3172 }
 0x2e3   : > { %v3176_v49 = vsel %vm8434_vm3, %v3173_v62, %v3175_v61  ;;  %v3177_v51 = vsel %vm8435_vm4, %v3175_v61, %v3173_v62  ;;  %v3151_v62 = vadd.f32 %v3149_v13, %v3132_v42  ;;  %v3171_v5 = vadd.f32 %v3169_v36, %v3152_v43  ;;  %v8457_v42 = vld [vmem:[#allocation75_spill] sm:$0xff] }
 0x2e4   : > { %v3178_v30 = vsel %vm2133_vm2, %v3176_v49, 0.0  ;;  %v3179_v35 = vsel %vm2134_vm15, %v3177_v51, 0.0  ;;  %vm8443_vm15 = vcmp.lt.s32.totalorder %v4451_v11, 79  ;;  %vm8448_vm2 = vcmp.eq.s32.totalorder %v8447_v59, 1 }
 0x2e5   : > { %v3192_v0 = vpop.permute.xlu1 %3191  ;;  %v3187_v31 = vmul.f32 %v7111_v40, %v3178_v30  ;;  %v3188_v6 = vmul.f32 %v7111_v40, %v3179_v35  ;;  %v3170_v24 = vadd.f32 %v3168_v15, %v3151_v62  ;;  %vm8458_vm13 = vcmp.eq.s32.totalorder %v8457_v42, 1 }
 0x2e6   : > { %v7155_v44 = vpop.permute.xlu0 %3222 }
 0x2e7   : > { %v3189_v39 = vadd.f32 %v3187_v31, %v3170_v24  ;;  %v3190_v54 = vadd.f32 %v3188_v6, %v3171_v5 }
 0x2e9   : > { %v3242_v2 = vpop.permute.xlu1 %3241 }
 0x2ea   : > { %v3194_v34 = vpop.permute.xlu0 %3193 }
 0x2eb   : > { %v3195_v33 = vsel %vm2152_vm11, %v3192_v0, %v3194_v34  ;;  %v3196_v25 = vsel %vm2152_vm11, %v3194_v34, %v3192_v0  ;;  %vm8444_vm11 = vmmov %vm8443_vm15 }
 0x2ec   : > { %v3197_v27 = vsel %vm8438_vm0, %v3195_v33, 0.0  ;;  %v3198_v41 = vsel %vm8440_vm8, %v3196_v25, 0.0  ;;  %v8459_v33 = vld [vmem:[#allocation87_spill] sm:$0xff] }
 0x2ed   : > { %v3213_v21 = vpop.permute.xlu1 %3212  ;;  %v3206_v53 = vmul.f32 %v7121_v7, %v3197_v27  ;;  %v3207_v0 = vmul.f32 %v7121_v7, %v3198_v41  ;;  %vm8460_vm5 = vcmp.eq.s32.totalorder %v8459_v33, 1  ;;  %v8462_v27 = vld [vmem:[#allocation119_spill] sm:$0xff] }
 0x2ee   : > { %v3211_v38 = vpop.permute.xlu0 %3210 }
 0x2ef   : > { %v3214_v28 = vsel %vm2191_vm10, %v3211_v38, %v3213_v21  ;;  %v3215_v52 = vsel %vm2191_vm10, %v3213_v21, %v3211_v38  ;;  %vm8446_vm10 = vcmp.eq.s32.totalorder %v8445_v32, 1  ;;  %v3208_v20 = vadd.f32 %v3206_v53, %v3189_v39 }
 0x2f0   : > { %v3216_v16 = vsel %vm2211_vm7, %v3214_v28, 0.0  ;;  %v3217_v55 = vsel %vm2212_vm12, %v3215_v52, 0.0  ;;  %v3209_v50 = vadd.f32 %v3207_v0, %v3190_v54  ;;  %vm8449_vm7 = vcmp.lt.s32.totalorder %v4451_v11, 78 }
 0x2f1   : > { %v3230_v61 = vpop.permute.xlu1 %3229  ;;  %v3225_v37 = vmul.f32 %v7155_v44, %v3216_v16  ;;  %v3226_v14 = vmul.f32 %v7155_v44, %v3217_v55  ;;  %vm8450_vm12 = vmmov %vm8449_vm7 }
 0x2f2   : > { %v3261_v3 = vpop.permute.xlu0 %3260 }
 0x2f3   : > { %v3227_v13 = vadd.f32 %v3225_v37, %v3208_v20  ;;  %v3228_v44 = vadd.f32 %v3226_v14, %v3209_v50 }
 0x2f5   : > { %v3280_v10 = vpop.permute.xlu1 %3279 }
 0x2f6   : > { %v3232_v26 = vpop.permute.xlu0 %3231 }
 0x2f7   : > { %v3233_v17 = vsel %vm8443_vm15, %v3230_v61, %v3232_v26  ;;  %v3234_v40 = vsel %vm8444_vm11, %v3232_v26, %v3230_v61 }
 0x2f8   : > { %v3235_v22 = vsel %vm8446_vm10, %v3233_v17, 0.0  ;;  %v3236_v7 = vsel %vm8448_vm2, %v3234_v40, 0.0 }
 0x2f9   : > { %v3251_v29 = vpop.permute.xlu1 %3250  ;;  %v3244_v4 = vmul.f32 %v3242_v2, %v3235_v22  ;;  %v3245_v46 = vmul.f32 %v3242_v2, %v3236_v7 }
 0x2fa   : > { %v3249_v34 = vpop.permute.xlu0 %3248 }
 0x2fb   : > { %v3252_v18 = vsel %vm8449_vm7, %v3249_v34, %v3251_v29  ;;  %v3253_v8 = vsel %vm8450_vm12, %v3251_v29, %v3249_v34  ;;  %v3246_v2 = vadd.f32 %v3244_v4, %v3227_v13  ;;  %v3247_v49 = vadd.f32 %v3245_v46, %v3228_v44 }
 0x2fc   : > { %v3254_v45 = vsel %vm8452_vm14, %v3252_v18, 0.0  ;;  %v3255_v60 = vsel %vm8454_vm9, %v3253_v8, 0.0 }
 0x2fd   : > { %v3263_v12 = vmul.f32 %v3261_v3, %v3254_v45  ;;  %v3264_v21 = vmul.f32 %v3261_v3, %v3255_v60  ;;  %v3270_v23 = vpop.permute.xlu1 %3269  ;;  %v8461_v3 = vld [vmem:[#allocation71_spill] sm:$0xff] }
 0x2fe   : > { %v3268_v58 = vpop.permute.xlu0 %3267 }
 0x2ff   : > { %v3271_v51 = vsel %vm8455_vm1, %v3268_v58, %v3270_v23  ;;  %v3272_v38 = vsel %vm8456_vm6, %v3270_v23, %v3268_v58  ;;  %v3265_v30 = vadd.f32 %v3263_v12, %v3246_v2  ;;  %v3266_v57 = vadd.f32 %v3264_v21, %v3247_v49 }
 0x300   : > { %v3273_v56 = vsel %vm8458_vm13, %v3271_v51, 0.0  ;;  %v3274_v25 = vsel %vm8460_vm5, %v3272_v38, 0.0 }
 0x301   : > { %v3282_v15 = vmul.f32 %v3280_v10, %v3273_v56  ;;  %v3283_v36 = vmul.f32 %v3280_v10, %v3274_v25  ;;  %v3299_v41 = vpop.permute.xlu1 %3298 }
 0x302   : > { %v3289_v62 = vpop.permute.xlu0 %3288 }
 0x303   : > { %v3284_v35 = vadd.f32 %v3282_v15, %v3265_v30  ;;  %v3285_v61 = vadd.f32 %v3283_v36, %v3266_v57 }
 0x305   : > { %v3291_v43 = vadd.f32 %v3289_v62, %v3284_v35  ;;  %v3292_v11 = vadd.f32 %v3289_v62, %v3285_v61 }
 0x307   : > { %v3293_v63 = vadd.f32 %v3291_v43, %v8461_v3  ;;  %v3294_v1 = vadd.f32 %v3292_v11, %v8462_v27 }
 0x309   : > { %v3301_v28 = vadd.f32 %v3299_v41, %v3293_v63  ;;  %v3302_v52 = vadd.f32 %v3299_v41, %v3294_v1 }
 0x30b   : > { %v3545_v31 = vpack.c.bf16 %v3302_v52, %v3301_v28 }
 0x30d   : > { %3546 = vst.sshfl [vmem:[%s6481_s23] sm:$0x33 pattern:$0x76325410] %v3545_v31 }
 0x30e   : > { %3670 = shalt.err (!%p3667_p3)
}
 0x30f   : > { %s3671_s23 = scalar_lea.hbm %s7252_s20, 128  ;;  %s3675_s17 = scalar_lea.hbm %s7305_s8, 256 }
 0x310   : > { %p3672_p4 = scmp.ne.s32.totalorder %s7252_s20, %s3671_s23  ;;  %p3676_p9 = scmp.lt.s32.totalorder %s7252_s20, %s7305_s8 }
 0x311   : > { %p3677_p10 = scmp.lt.s32.totalorder %s3675_s17, %s3671_s23 }
 0x312   : > { %p3673_p7 = pnand %p3672_p4, %p3856_p5 }
 0x313   : > { %p3678_p11 = por %p3677_p10, %p3676_p9 }
 0x314   : > { %p3674_p8 = pneg %p3673_p7 }
 0x316   : > { %p3679_p12 = pnand %p3678_p11, %p3674_p8 }
 0x318   : > { %3682 = shalt.err (!%p3679_p12)
}
 0x319   : > { %s3770_s25 = smov 64   ;;  %s3771_s18 = smov 128  }
 0x31a   : > { %s3772_s9 = smov 4  }
 0x31b   : > { %3558 = dma.vmem_to_hbm [thread:$0]  (%p3856_p5), %s7247_s22, 128, %s7252_s20, %s7257_s13, %s3770_s25, %s3771_s18, %s3772_s9  }
 0x31c PF: > { %p3564_p13 = scmp.ge.s32.totalorder %s3717_s30, 2  ;;  %s3361_s12 = sand.u32 1, %s3705_s27  }
 0x31d   : > { %s3362_s19 = scalar_lea.sflag [#allocation3], %s3361_s12 }
 0x31e   : > { %p3561_p0 = pnand %p3564_p13, %p3860_p6 }
 0x320   : > { %p3562_p1 = pneg %p3561_p0 }
 0x322   : > { %3700 = dma.done.wait (%p3562_p1), %s3362_s19, 128  }
 0x323   : > { %3702 = vsyncadd (%p3562_p1), %s3362_s19, 4294967168  ;;  %p18_p2 = scmp.ge.s32.totalorder %s3843_s11, 4   ;;  %s8464_s27 = smov %s3709_s28 }
 0x324   : > { %s8465_s28 = smov %s3713_s29  ;;  %s8466_s29 = smov %s3854_s14 }
 0x325   : > { %s8467_s30 = smov %s3843_s11  ;;  %20 = sbr.rel (!%p18_p2) target bundleno = 3 (0x3), region = 190 }
 0x32a   :  { %3367 = vsyncpa [#allocation3], 1 }
 0x32b   :  { %3369 = vsyncpa [#allocation3 + $0x1], 1 }

</bundles_post_ra>
